<compile_context>
chip_gen: v7x
topology: tpu7x:2x2x1
jax: 0.10.0
libtpu: 0.0.40
codegen_flags: <defaults>
</compile_context>

<pallas_src>
import functools

import jax
import jax.numpy as jnp
from jax import lax
from jax.experimental import pallas as pl
from jax.experimental.pallas import tpu as pltpu


# ----------------------------- Pallas kernel ------------------------------ #

def _bottleneck_kernel(x_ref, w1_ref, b1_ref, w2_ref, b2_ref, w3_ref, b3_ref,
                       o_ref, *, H, W):
    HW = H * W
    C2 = w1_ref.shape[1]
    cdt = w1_ref.dtype                      # compute (matmul) dtype, e.g. bf16

    x = x_ref[0]                            # (HW, Cin) f32 (kept f32 for residual)

    # --- conv1 (1x1, BN folded) + bias + relu -----------------------------
    h1 = jnp.dot(x.astype(cdt), w1_ref[...], preferred_element_type=jnp.float32)
    h1 = jnp.maximum(h1 + b1_ref[...], 0.0)                       # (HW, C2) f32

    # --- conv2 (3x3, stride 1, pad 1, BN folded) --------------------------
    # Border masks for the implicit zero padding, in flattened-HW coordinates.
    row = lax.broadcasted_iota(jnp.int32, (HW, 1), 0)             # flat index
    col = row % W                                                 # x within row

    def row_shift(a, d):
        # s[y, x] = a[y + d, x], zero outside [0, H).
        if d == 0:
            return a
        s = pltpu.roll(a, (-d * W) % HW, 0)
        edge = (row < W) if d < 0 else (row >= (H - 1) * W)
        return jnp.where(edge, 0.0, s)

    def col_shift(a, d):
        # t[y, x] = a[y, x + d], zero outside [0, W).  Row-wrap garbage from
        # the flattened roll lands exactly on the masked border columns.
        s = pltpu.roll(a, (-d) % HW, 0)
        edge = (col == 0) if d < 0 else (col == W - 1)
        return jnp.where(edge, 0.0, s)

    # One wide-K matmul per kernel row r: K = 3*C2 fuses the 3 column taps.
    acc = jnp.zeros((HW, C2), jnp.float32)
    for r in range(3):
        s_r = row_shift(h1, r - 1)
        slab = jnp.concatenate(
            [col_shift(s_r, -1), s_r, col_shift(s_r, 1)], axis=-1)  # (HW, 3*C2)
        acc = acc + jnp.dot(slab.astype(cdt), w2_ref[r],
                            preferred_element_type=jnp.float32)
    h2 = jnp.maximum(acc + b2_ref[...], 0.0)                      # (HW, C2) f32

    # --- conv3 (1x1, BN folded) + bias + identity residual + relu ---------
    h3 = jnp.dot(h2.astype(cdt), w3_ref[...], preferred_element_type=jnp.float32)
    o_ref[0] = jnp.maximum(h3 + b3_ref[...] + x, 0.0)


# ------------------------------- wrapper ----------------------------------- #

def _build_pallas_call(N, H, W, Cin, C2, C4, single_buffer_weights):
    HW = H * W
    wkw = {"pipeline_mode": pl.Buffered(1)} if single_buffer_weights else {}

    def cspec(shape):
        # Grid-invariant (weight / bias) block.
        return pl.BlockSpec(shape, lambda n: (0,) * len(shape), **wkw)

    return pl.pallas_call(
        functools.partial(_bottleneck_kernel, H=H, W=W),
        out_shape=jax.ShapeDtypeStruct((N, HW, C4), jnp.float32),
        grid_spec=pltpu.PrefetchScalarGridSpec(
            num_scalar_prefetch=0,
            grid=(N,),
            in_specs=[
                pl.BlockSpec((1, HW, Cin), lambda n: (n, 0, 0)),
                cspec((Cin, C2)),
                cspec((1, C2)),
                cspec((3, 3 * C2, C2)),
                cspec((1, C2)),
                cspec((C2, C4)),
                cspec((1, C4)),
            ],
            out_specs=pl.BlockSpec((1, HW, C4), lambda n: (n, 0, 0)),
        ),
        compiler_params=pltpu.CompilerParams(
            dimension_semantics=("parallel",),       # per-image work independent
            vmem_limit_bytes=64 * 1024 * 1024,
        ),
    )


def bottleneck_forward_nhwc(x_nhwc, params):
    """x_nhwc: (N, H, W, Cin) float32.  Returns (N, H, W, Cin)."""
    N, H, W, Cin = x_nhwc.shape
    C2 = params["w1"].shape[1]
    C4 = params["w3"].shape[1]
    assert C4 == Cin, "identity residual requires inplanes == planes * 4"

    xf = x_nhwc.reshape(N, H * W, Cin).astype(jnp.float32)
    args = (xf, params["w1"], params["b1"], params["w2"], params["b2"],
            params["w3"], params["b3"])

    out = None
    for single in (True, False):
        try:
            out = _build_pallas_call(N, H, W, Cin, C2, C4, single)(*args)
            break
        except Exception:
            # pl.Buffered(1) not supported on this jax version -> default buffering.
            if not single:
                raise
    return out.reshape(N, H, W, C4)


def bottleneck_forward(x_nchw, params):
    """NCHW (PyTorch) boundary.  In an NHWC end-to-end model, skip the transposes."""
    x = jnp.transpose(x_nchw, (0, 2, 3, 1))
    y = bottleneck_forward_nhwc(x, params)
    return jnp.transpose(y, (0, 3, 1, 2))


# --------------------------- pure-JAX reference ----------------------------- #

def bottleneck_reference(x_nchw, params):
    """Bottleneck forward (inference BN, BN folded into weights) at the same
    matmul precision as the kernel (weights stored in the compute dtype)."""
    x = jnp.transpose(x_nchw, (0, 2, 3, 1)).astype(jnp.float32)
    cdt = params["w1"].dtype
    Cin = x.shape[-1]
    C2 = params["w1"].shape[1]
    C4 = params["w3"].shape[1]

    def conv(inp, w_hwio, pad):
        return lax.conv_general_dilated(
            inp.astype(cdt), w_hwio, (1, 1), [(pad, pad), (pad, pad)],
            dimension_numbers=("NHWC", "HWIO", "NHWC"),
            preferred_element_type=jnp.float32)

    w1 = params["w1"].reshape(1, 1, Cin, C2)
    w2 = params["w2"].reshape(3, 3, C2, C2)
    w3 = params["w3"].reshape(1, 1, C2, C4)

    h = jnp.maximum(conv(x, w1, 0) + params["b1"][0], 0.0)
    h = jnp.maximum(conv(h, w2, 1) + params["b2"][0], 0.0)
    h = conv(h, w3, 0) + params["b3"][0] + x
    return jnp.transpose(jnp.maximum(h, 0.0), (0, 3, 1, 2))


# ----------------------------- param builder -------------------------------- #

def make_params(key, inplanes, planes, eps=1e-5, compute_dtype=jnp.bfloat16):
    """Random conv/BN params; BN scale is folded into conv weights (inference)."""
    C2, C4 = planes * 2, planes * 4
    ks = jax.random.split(key, 15)

    def bn(kg, kb, km, kv, c):
        gamma = 1.0 + 0.1 * jax.random.normal(kg, (c,), jnp.float32)
        beta = 0.1 * jax.random.normal(kb, (c,), jnp.float32)
        mean = 0.1 * jax.random.normal(km, (c,), jnp.float32)
        var = 1.0 + 0.1 * jax.random.uniform(kv, (c,), jnp.float32)
        scale = gamma / jnp.sqrt(var + eps)
        bias = beta - mean * scale
        return scale, bias

    w1 = 0.1 * jax.random.normal(ks[0], (inplanes, C2), jnp.float32)       # 1x1, (Cin, C2)
    w2 = 0.1 * jax.random.normal(ks[1], (3, 3, C2, C2), jnp.float32)       # 3x3, HWIO
    w3 = 0.1 * jax.random.normal(ks[2], (C2, C4), jnp.float32)             # 1x1, (C2, C4)
    s1, b1 = bn(ks[3], ks[4], ks[5], ks[6], C2)
    s2, b2 = bn(ks[7], ks[8], ks[9], ks[10], C2)
    s3, b3 = bn(ks[11], ks[12], ks[13], ks[14], C4)

    # Fold BN scale into conv output channels; store weights in compute dtype.
    w1f = (w1 * s1[None, :]).astype(compute_dtype)
    w2f = (w2 * s2[None, None, None, :]).reshape(3, 3 * C2, C2).astype(compute_dtype)
    w3f = (w3 * s3[None, :]).astype(compute_dtype)

    return {
        "w1": w1f, "b1": b1.reshape(1, C2),
        "w2": w2f, "b2": b2.reshape(1, C2),   # (row, 3*C2, C2): col taps on K axis
        "w3": w3f, "b3": b3.reshape(1, C4),
    }


# --------------------------------- main ------------------------------------- #

if __name__ == "__main__":
    inplanes, planes = 16, 4          # Bottleneck(16, 4): inplanes == planes*4
    N, H, W = 2, 16, 16

    key = jax.random.PRNGKey(0)
    kx, kp = jax.random.split(key)
    x = jax.random.normal(kx, (N, inplanes, H, W), jnp.float32)   # NCHW (PyTorch)
    params = make_params(kp, inplanes, planes)

    out = jax.block_until_ready(bottleneck_forward(x, params))
    ref = jax.block_until_ready(bottleneck_reference(x, params))

    assert out.shape == (N, inplanes, H, W)
    err = float(jnp.max(jnp.abs(out - ref)))
    assert jnp.allclose(out, ref, atol=2e-3, rtol=2e-3), f"max abs err {err}"

    print("KERNEL_OK")
</pallas_src>

<mosaic_0001>
module attributes {stable_mosaic.version = 11 : i64} {
  func.func @_bottleneck_kernel(%arg0: i32, %arg1: memref<1x256x16xf32, #tpu.memory_space<vmem>>, %arg2: memref<16x8xbf16, #tpu.memory_space<vmem>>, %arg3: memref<1x8xf32, #tpu.memory_space<vmem>>, %arg4: memref<3x24x8xbf16, #tpu.memory_space<vmem>>, %arg5: memref<1x8xf32, #tpu.memory_space<vmem>>, %arg6: memref<8x16xbf16, #tpu.memory_space<vmem>>, %arg7: memref<1x16xf32, #tpu.memory_space<vmem>>, %arg8: memref<1x256x16xf32, #tpu.memory_space<vmem>>) attributes {dimension_semantics = [#tpu.dimension_semantics<parallel>], iteration_bounds = array<i64: 2>, scalar_prefetch = 0 : i64, scratch_operands = 0 : i64, tpu.core_type = #tpu.core_type<tc>, window_params = [{transform_indices = @transform_0, window_bounds = array<i64: 1, 256, 16>}, {pipeline_mode = #tpu.pipeline_mode<synchronous>, transform_indices = @transform_1, window_bounds = array<i64: 16, 8>}, {pipeline_mode = #tpu.pipeline_mode<synchronous>, transform_indices = @transform_2, window_bounds = array<i64: 1, 8>}, {pipeline_mode = #tpu.pipeline_mode<synchronous>, transform_indices = @transform_3, window_bounds = array<i64: 3, 24, 8>}, {pipeline_mode = #tpu.pipeline_mode<synchronous>, transform_indices = @transform_4, window_bounds = array<i64: 1, 8>}, {pipeline_mode = #tpu.pipeline_mode<synchronous>, transform_indices = @transform_5, window_bounds = array<i64: 8, 16>}, {pipeline_mode = #tpu.pipeline_mode<synchronous>, transform_indices = @transform_6, window_bounds = array<i64: 1, 16>}, {transform_indices = @transform_7, window_bounds = array<i64: 1, 256, 16>}]} {
    %c0 = arith.constant 0 : index
    %c0_0 = arith.constant 0 : index
    %c0_1 = arith.constant 0 : index
    %0 = vector.load %arg1[%c0, %c0_0, %c0_1] : memref<1x256x16xf32, #tpu.memory_space<vmem>>, vector<1x256x16xf32>
    %1 = vector.shape_cast %0 : vector<1x256x16xf32> to vector<256x16xf32>
    %2 = arith.truncf %1 : vector<256x16xf32> to vector<256x16xbf16>
    %c0_2 = arith.constant 0 : index
    %c0_3 = arith.constant 0 : index
    %3 = vector.load %arg2[%c0_2, %c0_3] : memref<16x8xbf16, #tpu.memory_space<vmem>>, vector<16x8xbf16>
    %cst = arith.constant dense<0.000000e+00> : vector<256x8xf32>
    %4 = tpu.matmul %2, %3, %cst {dimension_numbers = #tpu.dot_dimension_numbers<[1], [0], [0], [1], [0, 0, 1, 1], [], []>} : vector<256x16xbf16>, vector<16x8xbf16>, vector<256x8xf32> -> vector<256x8xf32>
    %c0_4 = arith.constant 0 : index
    %c0_5 = arith.constant 0 : index
    %5 = vector.load %arg3[%c0_4, %c0_5] : memref<1x8xf32, #tpu.memory_space<vmem>>, vector<1x8xf32>
    %6 = vector.broadcast %5 : vector<1x8xf32> to vector<256x8xf32>
    %7 = arith.addf %4, %6 : vector<256x8xf32>
    %cst_6 = arith.constant 0.000000e+00 : f32
    %8 = vector.broadcast %cst_6 : f32 to vector<256x8xf32>
    %9 = arith.maximumf %7, %8 : vector<256x8xf32>
    %10 = tpu.iota {dimensions = array<i32: 0>} : vector<256x1xi32>
    %c16_i32 = arith.constant 16 : i32
    %c0_i32 = arith.constant 0 : i32
    %11 = arith.cmpi eq, %c16_i32, %c0_i32 : i32
    %c1_i32 = arith.constant 1 : i32
    %12 = arith.select %11, %c1_i32, %c16_i32 : i32
    %13 = vector.broadcast %12 : i32 to vector<256x1xi32>
    %14 = arith.remsi %10, %13 : vector<256x1xi32>
    %c0_i32_7 = arith.constant 0 : i32
    %15 = vector.broadcast %c0_i32_7 : i32 to vector<256x1xi32>
    %16 = arith.cmpi ne, %14, %15 : vector<256x1xi32>
    %c0_i32_8 = arith.constant 0 : i32
    %17 = vector.broadcast %c0_i32_8 : i32 to vector<256x1xi32>
    %18 = arith.cmpi slt, %14, %17 : vector<256x1xi32>
    %c0_i32_9 = arith.constant 0 : i32
    %19 = arith.cmpi slt, %12, %c0_i32_9 : i32
    %20 = vector.broadcast %19 : i1 to vector<256x1xi1>
    %21 = vector.broadcast %20 : vector<256x1xi1> to vector<256x1xi1>
    %22 = arith.xori %18, %21 : vector<256x1xi1>
    %23 = arith.andi %22, %16 : vector<256x1xi1>
    %24 = vector.broadcast %12 : i32 to vector<256x1xi32>
    %25 = arith.addi %14, %24 : vector<256x1xi32>
    %26 = arith.select %23, %25, %14 : vector<256x1xi1>, vector<256x1xi32>
    %cst_10 = arith.constant 0.000000e+00 : f32
    %27 = vector.broadcast %cst_10 : f32 to vector<256x8xf32>
    %c16_i32_11 = arith.constant 16 : i32
    %28 = tpu.dynamic_rotate %9 by %c16_i32_11 dim 0 : vector<256x8xf32>, i32 -> vector<256x8xf32>
    %c16_i32_12 = arith.constant 16 : i32
    %29 = vector.broadcast %c16_i32_12 : i32 to vector<256x1xi32>
    %30 = arith.cmpi slt, %10, %29 : vector<256x1xi32>
    %cst_13 = arith.constant 0.000000e+00 : f32
    %31 = vector.shape_cast %30 : vector<256x1xi1> to vector<256x1xi1>
    %32 = vector.broadcast %31 : vector<256x1xi1> to vector<256x8xi1>
    %33 = vector.broadcast %cst_13 : f32 to vector<256x8xf32>
    %34 = arith.select %32, %33, %28 : vector<256x8xi1>, vector<256x8xf32>
    %c1_i32_14 = arith.constant 1 : i32
    %35 = tpu.dynamic_rotate %34 by %c1_i32_14 dim 0 : vector<256x8xf32>, i32 -> vector<256x8xf32>
    %c0_i32_15 = arith.constant 0 : i32
    %36 = vector.broadcast %c0_i32_15 : i32 to vector<256x1xi32>
    %37 = arith.cmpi eq, %26, %36 : vector<256x1xi32>
    %cst_16 = arith.constant 0.000000e+00 : f32
    %38 = vector.shape_cast %37 : vector<256x1xi1> to vector<256x1xi1>
    %39 = vector.broadcast %38 : vector<256x1xi1> to vector<256x8xi1>
    %40 = vector.broadcast %cst_16 : f32 to vector<256x8xf32>
    %41 = arith.select %39, %40, %35 : vector<256x8xi1>, vector<256x8xf32>
    %c255_i32 = arith.constant 255 : i32
    %42 = tpu.dynamic_rotate %34 by %c255_i32 dim 0 : vector<256x8xf32>, i32 -> vector<256x8xf32>
    %c15_i32 = arith.constant 15 : i32
    %43 = vector.broadcast %c15_i32 : i32 to vector<256x1xi32>
    %44 = arith.cmpi eq, %26, %43 : vector<256x1xi32>
    %cst_17 = arith.constant 0.000000e+00 : f32
    %45 = vector.shape_cast %44 : vector<256x1xi1> to vector<256x1xi1>
    %46 = vector.broadcast %45 : vector<256x1xi1> to vector<256x8xi1>
    %47 = vector.broadcast %cst_17 : f32 to vector<256x8xf32>
    %48 = arith.select %46, %47, %42 : vector<256x8xi1>, vector<256x8xf32>
    %49 = tpu.concatenate %41, %34, %48 in 1 : vector<256x8xf32>, vector<256x8xf32>, vector<256x8xf32> -> vector<256x24xf32>
    %50 = arith.truncf %49 : vector<256x24xf32> to vector<256x24xbf16>
    %c0_18 = arith.constant 0 : index
    %c0_19 = arith.constant 0 : index
    %c0_20 = arith.constant 0 : index
    %51 = vector.load %arg4[%c0_18, %c0_19, %c0_20] : memref<3x24x8xbf16, #tpu.memory_space<vmem>>, vector<1x24x8xbf16>
    %52 = vector.shape_cast %51 : vector<1x24x8xbf16> to vector<24x8xbf16>
    %cst_21 = arith.constant dense<0.000000e+00> : vector<256x8xf32>
    %53 = tpu.matmul %50, %52, %cst_21 {dimension_numbers = #tpu.dot_dimension_numbers<[1], [0], [0], [1], [0, 0, 1, 1], [], []>} : vector<256x24xbf16>, vector<24x8xbf16>, vector<256x8xf32> -> vector<256x8xf32>
    %54 = arith.addf %27, %53 : vector<256x8xf32>
    %c1_i32_22 = arith.constant 1 : i32
    %55 = tpu.dynamic_rotate %9 by %c1_i32_22 dim 0 : vector<256x8xf32>, i32 -> vector<256x8xf32>
    %c0_i32_23 = arith.constant 0 : i32
    %56 = vector.broadcast %c0_i32_23 : i32 to vector<256x1xi32>
    %57 = arith.cmpi eq, %26, %56 : vector<256x1xi32>
    %cst_24 = arith.constant 0.000000e+00 : f32
    %58 = vector.shape_cast %57 : vector<256x1xi1> to vector<256x1xi1>
    %59 = vector.broadcast %58 : vector<256x1xi1> to vector<256x8xi1>
    %60 = vector.broadcast %cst_24 : f32 to vector<256x8xf32>
    %61 = arith.select %59, %60, %55 : vector<256x8xi1>, vector<256x8xf32>
    %c255_i32_25 = arith.constant 255 : i32
    %62 = tpu.dynamic_rotate %9 by %c255_i32_25 dim 0 : vector<256x8xf32>, i32 -> vector<256x8xf32>
    %c15_i32_26 = arith.constant 15 : i32
    %63 = vector.broadcast %c15_i32_26 : i32 to vector<256x1xi32>
    %64 = arith.cmpi eq, %26, %63 : vector<256x1xi32>
    %cst_27 = arith.constant 0.000000e+00 : f32
    %65 = vector.shape_cast %64 : vector<256x1xi1> to vector<256x1xi1>
    %66 = vector.broadcast %65 : vector<256x1xi1> to vector<256x8xi1>
    %67 = vector.broadcast %cst_27 : f32 to vector<256x8xf32>
    %68 = arith.select %66, %67, %62 : vector<256x8xi1>, vector<256x8xf32>
    %69 = tpu.concatenate %61, %9, %68 in 1 : vector<256x8xf32>, vector<256x8xf32>, vector<256x8xf32> -> vector<256x24xf32>
    %70 = arith.truncf %69 : vector<256x24xf32> to vector<256x24xbf16>
    %c1 = arith.constant 1 : index
    %c0_28 = arith.constant 0 : index
    %c0_29 = arith.constant 0 : index
    %71 = vector.load %arg4[%c1, %c0_28, %c0_29] : memref<3x24x8xbf16, #tpu.memory_space<vmem>>, vector<1x24x8xbf16>
    %72 = vector.shape_cast %71 : vector<1x24x8xbf16> to vector<24x8xbf16>
    %cst_30 = arith.constant dense<0.000000e+00> : vector<256x8xf32>
    %73 = tpu.matmul %70, %72, %cst_30 {dimension_numbers = #tpu.dot_dimension_numbers<[1], [0], [0], [1], [0, 0, 1, 1], [], []>} : vector<256x24xbf16>, vector<24x8xbf16>, vector<256x8xf32> -> vector<256x8xf32>
    %74 = arith.addf %54, %73 : vector<256x8xf32>
    %c240_i32 = arith.constant 240 : i32
    %75 = tpu.dynamic_rotate %9 by %c240_i32 dim 0 : vector<256x8xf32>, i32 -> vector<256x8xf32>
    %c240_i32_31 = arith.constant 240 : i32
    %76 = vector.broadcast %c240_i32_31 : i32 to vector<256x1xi32>
    %77 = arith.cmpi sge, %10, %76 : vector<256x1xi32>
    %cst_32 = arith.constant 0.000000e+00 : f32
    %78 = vector.shape_cast %77 : vector<256x1xi1> to vector<256x1xi1>
    %79 = vector.broadcast %78 : vector<256x1xi1> to vector<256x8xi1>
    %80 = vector.broadcast %cst_32 : f32 to vector<256x8xf32>
    %81 = arith.select %79, %80, %75 : vector<256x8xi1>, vector<256x8xf32>
    %c1_i32_33 = arith.constant 1 : i32
    %82 = tpu.dynamic_rotate %81 by %c1_i32_33 dim 0 : vector<256x8xf32>, i32 -> vector<256x8xf32>
    %c0_i32_34 = arith.constant 0 : i32
    %83 = vector.broadcast %c0_i32_34 : i32 to vector<256x1xi32>
    %84 = arith.cmpi eq, %26, %83 : vector<256x1xi32>
    %cst_35 = arith.constant 0.000000e+00 : f32
    %85 = vector.shape_cast %84 : vector<256x1xi1> to vector<256x1xi1>
    %86 = vector.broadcast %85 : vector<256x1xi1> to vector<256x8xi1>
    %87 = vector.broadcast %cst_35 : f32 to vector<256x8xf32>
    %88 = arith.select %86, %87, %82 : vector<256x8xi1>, vector<256x8xf32>
    %c255_i32_36 = arith.constant 255 : i32
    %89 = tpu.dynamic_rotate %81 by %c255_i32_36 dim 0 : vector<256x8xf32>, i32 -> vector<256x8xf32>
    %c15_i32_37 = arith.constant 15 : i32
    %90 = vector.broadcast %c15_i32_37 : i32 to vector<256x1xi32>
    %91 = arith.cmpi eq, %26, %90 : vector<256x1xi32>
    %cst_38 = arith.constant 0.000000e+00 : f32
    %92 = vector.shape_cast %91 : vector<256x1xi1> to vector<256x1xi1>
    %93 = vector.broadcast %92 : vector<256x1xi1> to vector<256x8xi1>
    %94 = vector.broadcast %cst_38 : f32 to vector<256x8xf32>
    %95 = arith.select %93, %94, %89 : vector<256x8xi1>, vector<256x8xf32>
    %96 = tpu.concatenate %88, %81, %95 in 1 : vector<256x8xf32>, vector<256x8xf32>, vector<256x8xf32> -> vector<256x24xf32>
    %97 = arith.truncf %96 : vector<256x24xf32> to vector<256x24xbf16>
    %c2 = arith.constant 2 : index
    %c0_39 = arith.constant 0 : index
    %c0_40 = arith.constant 0 : index
    %98 = vector.load %arg4[%c2, %c0_39, %c0_40] : memref<3x24x8xbf16, #tpu.memory_space<vmem>>, vector<1x24x8xbf16>
    %99 = vector.shape_cast %98 : vector<1x24x8xbf16> to vector<24x8xbf16>
    %cst_41 = arith.constant dense<0.000000e+00> : vector<256x8xf32>
    %100 = tpu.matmul %97, %99, %cst_41 {dimension_numbers = #tpu.dot_dimension_numbers<[1], [0], [0], [1], [0, 0, 1, 1], [], []>} : vector<256x24xbf16>, vector<24x8xbf16>, vector<256x8xf32> -> vector<256x8xf32>
    %101 = arith.addf %74, %100 : vector<256x8xf32>
    %c0_42 = arith.constant 0 : index
    %c0_43 = arith.constant 0 : index
    %102 = vector.load %arg5[%c0_42, %c0_43] : memref<1x8xf32, #tpu.memory_space<vmem>>, vector<1x8xf32>
    %103 = vector.broadcast %102 : vector<1x8xf32> to vector<256x8xf32>
    %104 = arith.addf %101, %103 : vector<256x8xf32>
    %cst_44 = arith.constant 0.000000e+00 : f32
    %105 = vector.broadcast %cst_44 : f32 to vector<256x8xf32>
    %106 = arith.maximumf %104, %105 : vector<256x8xf32>
    %107 = arith.truncf %106 : vector<256x8xf32> to vector<256x8xbf16>
    %c0_45 = arith.constant 0 : index
    %c0_46 = arith.constant 0 : index
    %108 = vector.load %arg6[%c0_45, %c0_46] : memref<8x16xbf16, #tpu.memory_space<vmem>>, vector<8x16xbf16>
    %cst_47 = arith.constant dense<0.000000e+00> : vector<256x16xf32>
    %109 = tpu.matmul %107, %108, %cst_47 {dimension_numbers = #tpu.dot_dimension_numbers<[1], [0], [0], [1], [0, 0, 1, 1], [], []>} : vector<256x8xbf16>, vector<8x16xbf16>, vector<256x16xf32> -> vector<256x16xf32>
    %c0_48 = arith.constant 0 : index
    %c0_49 = arith.constant 0 : index
    %110 = vector.load %arg7[%c0_48, %c0_49] : memref<1x16xf32, #tpu.memory_space<vmem>>, vector<1x16xf32>
    %111 = vector.broadcast %110 : vector<1x16xf32> to vector<256x16xf32>
    %112 = arith.addf %109, %111 : vector<256x16xf32>
    %113 = arith.addf %112, %1 : vector<256x16xf32>
    %cst_50 = arith.constant 0.000000e+00 : f32
    %114 = vector.broadcast %cst_50 : f32 to vector<256x16xf32>
    %115 = arith.maximumf %113, %114 : vector<256x16xf32>
    %c0_51 = arith.constant 0 : index
    %c0_52 = arith.constant 0 : index
    %c0_53 = arith.constant 0 : index
    %116 = vector.load %arg8[%c0_51, %c0_52, %c0_53] : memref<1x256x16xf32, #tpu.memory_space<vmem>>, vector<1x256x16xf32>
    %117 = vector.shape_cast %116 : vector<1x256x16xf32> to vector<256x16xf32>
    %118 = vector.shape_cast %115 : vector<256x16xf32> to vector<1x256x16xf32>
    tpu.vector_store %arg8[%c0_51, %c0_52, %c0_53], %118 {strides = array<i32>} : memref<1x256x16xf32, #tpu.memory_space<vmem>>, vector<1x256x16xf32>,
    return
  }
  func.func @transform_0(%arg0: i32) -> (i32, i32, i32) {
    %c0_i32 = arith.constant 0 : i32
    %c0_i32_0 = arith.constant 0 : i32
    %c0_i32_1 = arith.constant 0 : i32
    return %arg0, %c0_i32, %c0_i32_0 : i32, i32, i32
  }
  func.func @transform_1(%arg0: i32) -> (i32, i32) {
    %c0_i32 = arith.constant 0 : i32
    %c0_i32_0 = arith.constant 0 : i32
    %c0_i32_1 = arith.constant 0 : i32
    return %c0_i32, %c0_i32_0 : i32, i32
  }
  func.func @transform_2(%arg0: i32) -> (i32, i32) {
    %c0_i32 = arith.constant 0 : i32
    %c0_i32_0 = arith.constant 0 : i32
    %c0_i32_1 = arith.constant 0 : i32
    return %c0_i32, %c0_i32_0 : i32, i32
  }
  func.func @transform_3(%arg0: i32) -> (i32, i32, i32) {
    %c0_i32 = arith.constant 0 : i32
    %c0_i32_0 = arith.constant 0 : i32
    %c0_i32_1 = arith.constant 0 : i32
    %c0_i32_2 = arith.constant 0 : i32
    return %c0_i32, %c0_i32_0, %c0_i32_1 : i32, i32, i32
  }
  func.func @transform_4(%arg0: i32) -> (i32, i32) {
    %c0_i32 = arith.constant 0 : i32
    %c0_i32_0 = arith.constant 0 : i32
    %c0_i32_1 = arith.constant 0 : i32
    return %c0_i32, %c0_i32_0 : i32, i32
  }
  func.func @transform_5(%arg0: i32) -> (i32, i32) {
    %c0_i32 = arith.constant 0 : i32
    %c0_i32_0 = arith.constant 0 : i32
    %c0_i32_1 = arith.constant 0 : i32
    return %c0_i32, %c0_i32_0 : i32, i32
  }
  func.func @transform_6(%arg0: i32) -> (i32, i32) {
    %c0_i32 = arith.constant 0 : i32
    %c0_i32_0 = arith.constant 0 : i32
    %c0_i32_1 = arith.constant 0 : i32
    return %c0_i32, %c0_i32_0 : i32, i32
  }
  func.func @transform_7(%arg0: i32) -> (i32, i32, i32) {
    %c0_i32 = arith.constant 0 : i32
    %c0_i32_0 = arith.constant 0 : i32
    %c0_i32_1 = arith.constant 0 : i32
    return %arg0, %c0_i32, %c0_i32_0 : i32, i32, i32
  }
}

module attributes {stable_mosaic.version = 11 : i64} {
  func.func @_bottleneck_kernel(%arg0: i32, %arg1: memref<1x256x16xf32, #tpu.memory_space<vmem>>, %arg2: memref<16x8xbf16, #tpu.memory_space<vmem>>, %arg3: memref<1x8xf32, #tpu.memory_space<vmem>>, %arg4: memref<3x24x8xbf16, #tpu.memory_space<vmem>>, %arg5: memref<1x8xf32, #tpu.memory_space<vmem>>, %arg6: memref<8x16xbf16, #tpu.memory_space<vmem>>, %arg7: memref<1x16xf32, #tpu.memory_space<vmem>>, %arg8: memref<1x256x16xf32, #tpu.memory_space<vmem>>) attributes {dimension_semantics = [#tpu.dimension_semantics<parallel>], iteration_bounds = array<i64: 2>, scalar_prefetch = 0 : i64, scratch_operands = 0 : i64, tpu.core_type = #tpu.core_type<tc>, window_params = [{transform_indices = @transform_0, window_bounds = array<i64: 1, 256, 16>}, {pipeline_mode = #tpu.pipeline_mode<synchronous>, transform_indices = @transform_1, window_bounds = array<i64: 16, 8>}, {pipeline_mode = #tpu.pipeline_mode<synchronous>, transform_indices = @transform_2, window_bounds = array<i64: 1, 8>}, {pipeline_mode = #tpu.pipeline_mode<synchronous>, transform_indices = @transform_3, window_bounds = array<i64: 3, 24, 8>}, {pipeline_mode = #tpu.pipeline_mode<synchronous>, transform_indices = @transform_4, window_bounds = array<i64: 1, 8>}, {pipeline_mode = #tpu.pipeline_mode<synchronous>, transform_indices = @transform_5, window_bounds = array<i64: 8, 16>}, {pipeline_mode = #tpu.pipeline_mode<synchronous>, transform_indices = @transform_6, window_bounds = array<i64: 1, 16>}, {transform_indices = @transform_7, window_bounds = array<i64: 1, 256, 16>}]} {
    %c0 = arith.constant 0 : index
    %c0_0 = arith.constant 0 : index
    %c0_1 = arith.constant 0 : index
    %0 = vector.load %arg1[%c0, %c0_0, %c0_1] : memref<1x256x16xf32, #tpu.memory_space<vmem>>, vector<1x256x16xf32>
    %1 = vector.shape_cast %0 : vector<1x256x16xf32> to vector<256x16xf32>
    %2 = arith.truncf %1 : vector<256x16xf32> to vector<256x16xbf16>
    %c0_2 = arith.constant 0 : index
    %c0_3 = arith.constant 0 : index
    %3 = vector.load %arg2[%c0_2, %c0_3] : memref<16x8xbf16, #tpu.memory_space<vmem>>, vector<16x8xbf16>
    %cst = arith.constant dense<0.000000e+00> : vector<256x8xf32>
    %4 = tpu.matmul %2, %3, %cst {dimension_numbers = #tpu.dot_dimension_numbers<[1], [0], [0], [1], [0, 0, 1, 1], [], []>} : vector<256x16xbf16>, vector<16x8xbf16>, vector<256x8xf32> -> vector<256x8xf32>
    %c0_4 = arith.constant 0 : index
    %c0_5 = arith.constant 0 : index
    %5 = vector.load %arg3[%c0_4, %c0_5] : memref<1x8xf32, #tpu.memory_space<vmem>>, vector<1x8xf32>
    %6 = vector.broadcast %5 : vector<1x8xf32> to vector<256x8xf32>
    %7 = arith.addf %4, %6 : vector<256x8xf32>
    %cst_6 = arith.constant 0.000000e+00 : f32
    %8 = vector.broadcast %cst_6 : f32 to vector<256x8xf32>
    %9 = arith.maximumf %7, %8 : vector<256x8xf32>
    %10 = tpu.iota {dimensions = array<i32: 0>} : vector<256x1xi32>
    %c16_i32 = arith.constant 16 : i32
    %c0_i32 = arith.constant 0 : i32
    %11 = arith.cmpi eq, %c16_i32, %c0_i32 : i32
    %c1_i32 = arith.constant 1 : i32
    %12 = arith.select %11, %c1_i32, %c16_i32 : i32
    %13 = vector.broadcast %12 : i32 to vector<256x1xi32>
    %14 = arith.remsi %10, %13 : vector<256x1xi32>
    %c0_i32_7 = arith.constant 0 : i32
    %15 = vector.broadcast %c0_i32_7 : i32 to vector<256x1xi32>
    %16 = arith.cmpi ne, %14, %15 : vector<256x1xi32>
    %c0_i32_8 = arith.constant 0 : i32
    %17 = vector.broadcast %c0_i32_8 : i32 to vector<256x1xi32>
    %18 = arith.cmpi slt, %14, %17 : vector<256x1xi32>
    %c0_i32_9 = arith.constant 0 : i32
    %19 = arith.cmpi slt, %12, %c0_i32_9 : i32
    %20 = vector.broadcast %19 : i1 to vector<256x1xi1>
    %21 = vector.broadcast %20 : vector<256x1xi1> to vector<256x1xi1>
    %22 = arith.xori %18, %21 : vector<256x1xi1>
    %23 = arith.andi %22, %16 : vector<256x1xi1>
    %24 = vector.broadcast %12 : i32 to vector<256x1xi32>
    %25 = arith.addi %14, %24 : vector<256x1xi32>
    %26 = arith.select %23, %25, %14 : vector<256x1xi1>, vector<256x1xi32>
    %cst_10 = arith.constant 0.000000e+00 : f32
    %27 = vector.broadcast %cst_10 : f32 to vector<256x8xf32>
    %c16_i32_11 = arith.constant 16 : i32
    %28 = tpu.dynamic_rotate %9 by %c16_i32_11 dim 0 : vector<256x8xf32>, i32 -> vector<256x8xf32>
    %c16_i32_12 = arith.constant 16 : i32
    %29 = vector.broadcast %c16_i32_12 : i32 to vector<256x1xi32>
    %30 = arith.cmpi slt, %10, %29 : vector<256x1xi32>
    %cst_13 = arith.constant 0.000000e+00 : f32
    %31 = vector.shape_cast %30 : vector<256x1xi1> to vector<256x1xi1>
    %32 = vector.broadcast %31 : vector<256x1xi1> to vector<256x8xi1>
    %33 = vector.broadcast %cst_13 : f32 to vector<256x8xf32>
    %34 = arith.select %32, %33, %28 : vector<256x8xi1>, vector<256x8xf32>
    %c1_i32_14 = arith.constant 1 : i32
    %35 = tpu.dynamic_rotate %34 by %c1_i32_14 dim 0 : vector<256x8xf32>, i32 -> vector<256x8xf32>
    %c0_i32_15 = arith.constant 0 : i32
    %36 = vector.broadcast %c0_i32_15 : i32 to vector<256x1xi32>
    %37 = arith.cmpi eq, %26, %36 : vector<256x1xi32>
    %cst_16 = arith.constant 0.000000e+00 : f32
    %38 = vector.shape_cast %37 : vector<256x1xi1> to vector<256x1xi1>
    %39 = vector.broadcast %38 : vector<256x1xi1> to vector<256x8xi1>
    %40 = vector.broadcast %cst_16 : f32 to vector<256x8xf32>
    %41 = arith.select %39, %40, %35 : vector<256x8xi1>, vector<256x8xf32>
    %c255_i32 = arith.constant 255 : i32
    %42 = tpu.dynamic_rotate %34 by %c255_i32 dim 0 : vector<256x8xf32>, i32 -> vector<256x8xf32>
    %c15_i32 = arith.constant 15 : i32
    %43 = vector.broadcast %c15_i32 : i32 to vector<256x1xi32>
    %44 = arith.cmpi eq, %26, %43 : vector<256x1xi32>
    %cst_17 = arith.constant 0.000000e+00 : f32
    %45 = vector.shape_cast %44 : vector<256x1xi1> to vector<256x1xi1>
    %46 = vector.broadcast %45 : vector<256x1xi1> to vector<256x8xi1>
    %47 = vector.broadcast %cst_17 : f32 to vector<256x8xf32>
    %48 = arith.select %46, %47, %42 : vector<256x8xi1>, vector<256x8xf32>
    %49 = tpu.concatenate %41, %34, %48 in 1 : vector<256x8xf32>, vector<256x8xf32>, vector<256x8xf32> -> vector<256x24xf32>
    %50 = arith.truncf %49 : vector<256x24xf32> to vector<256x24xbf16>
    %c0_18 = arith.constant 0 : index
    %c0_19 = arith.constant 0 : index
    %c0_20 = arith.constant 0 : index
    %51 = vector.load %arg4[%c0_18, %c0_19, %c0_20] : memref<3x24x8xbf16, #tpu.memory_space<vmem>>, vector<1x24x8xbf16>
    %52 = vector.shape_cast %51 : vector<1x24x8xbf16> to vector<24x8xbf16>
    %cst_21 = arith.constant dense<0.000000e+00> : vector<256x8xf32>
    %53 = tpu.matmul %50, %52, %cst_21 {dimension_numbers = #tpu.dot_dimension_numbers<[1], [0], [0], [1], [0, 0, 1, 1], [], []>} : vector<256x24xbf16>, vector<24x8xbf16>, vector<256x8xf32> -> vector<256x8xf32>
    %54 = arith.addf %27, %53 : vector<256x8xf32>
    %c1_i32_22 = arith.constant 1 : i32
    %55 = tpu.dynamic_rotate %9 by %c1_i32_22 dim 0 : vector<256x8xf32>, i32 -> vector<256x8xf32>
    %c0_i32_23 = arith.constant 0 : i32
    %56 = vector.broadcast %c0_i32_23 : i32 to vector<256x1xi32>
    %57 = arith.cmpi eq, %26, %56 : vector<256x1xi32>
    %cst_24 = arith.constant 0.000000e+00 : f32
    %58 = vector.shape_cast %57 : vector<256x1xi1> to vector<256x1xi1>
    %59 = vector.broadcast %58 : vector<256x1xi1> to vector<256x8xi1>
    %60 = vector.broadcast %cst_24 : f32 to vector<256x8xf32>
    %61 = arith.select %59, %60, %55 : vector<256x8xi1>, vector<256x8xf32>
    %c255_i32_25 = arith.constant 255 : i32
    %62 = tpu.dynamic_rotate %9 by %c255_i32_25 dim 0 : vector<256x8xf32>, i32 -> vector<256x8xf32>
    %c15_i32_26 = arith.constant 15 : i32
    %63 = vector.broadcast %c15_i32_26 : i32 to vector<256x1xi32>
    %64 = arith.cmpi eq, %26, %63 : vector<256x1xi32>
    %cst_27 = arith.constant 0.000000e+00 : f32
    %65 = vector.shape_cast %64 : vector<256x1xi1> to vector<256x1xi1>
    %66 = vector.broadcast %65 : vector<256x1xi1> to vector<256x8xi1>
    %67 = vector.broadcast %cst_27 : f32 to vector<256x8xf32>
    %68 = arith.select %66, %67, %62 : vector<256x8xi1>, vector<256x8xf32>
    %69 = tpu.concatenate %61, %9, %68 in 1 : vector<256x8xf32>, vector<256x8xf32>, vector<256x8xf32> -> vector<256x24xf32>
    %70 = arith.truncf %69 : vector<256x24xf32> to vector<256x24xbf16>
    %c1 = arith.constant 1 : index
    %c0_28 = arith.constant 0 : index
    %c0_29 = arith.constant 0 : index
    %71 = vector.load %arg4[%c1, %c0_28, %c0_29] : memref<3x24x8xbf16, #tpu.memory_space<vmem>>, vector<1x24x8xbf16>
    %72 = vector.shape_cast %71 : vector<1x24x8xbf16> to vector<24x8xbf16>
    %cst_30 = arith.constant dense<0.000000e+00> : vector<256x8xf32>
    %73 = tpu.matmul %70, %72, %cst_30 {dimension_numbers = #tpu.dot_dimension_numbers<[1], [0], [0], [1], [0, 0, 1, 1], [], []>} : vector<256x24xbf16>, vector<24x8xbf16>, vector<256x8xf32> -> vector<256x8xf32>
    %74 = arith.addf %54, %73 : vector<256x8xf32>
    %c240_i32 = arith.constant 240 : i32
    %75 = tpu.dynamic_rotate %9 by %c240_i32 dim 0 : vector<256x8xf32>, i32 -> vector<256x8xf32>
    %c240_i32_31 = arith.constant 240 : i32
    %76 = vector.broadcast %c240_i32_31 : i32 to vector<256x1xi32>
    %77 = arith.cmpi sge, %10, %76 : vector<256x1xi32>
    %cst_32 = arith.constant 0.000000e+00 : f32
    %78 = vector.shape_cast %77 : vector<256x1xi1> to vector<256x1xi1>
    %79 = vector.broadcast %78 : vector<256x1xi1> to vector<256x8xi1>
    %80 = vector.broadcast %cst_32 : f32 to vector<256x8xf32>
    %81 = arith.select %79, %80, %75 : vector<256x8xi1>, vector<256x8xf32>
    %c1_i32_33 = arith.constant 1 : i32
    %82 = tpu.dynamic_rotate %81 by %c1_i32_33 dim 0 : vector<256x8xf32>, i32 -> vector<256x8xf32>
    %c0_i32_34 = arith.constant 0 : i32
    %83 = vector.broadcast %c0_i32_34 : i32 to vector<256x1xi32>
    %84 = arith.cmpi eq, %26, %83 : vector<256x1xi32>
    %cst_35 = arith.constant 0.000000e+00 : f32
    %85 = vector.shape_cast %84 : vector<256x1xi1> to vector<256x1xi1>
    %86 = vector.broadcast %85 : vector<256x1xi1> to vector<256x8xi1>
    %87 = vector.broadcast %cst_35 : f32 to vector<256x8xf32>
    %88 = arith.select %86, %87, %82 : vector<256x8xi1>, vector<256x8xf32>
    %c255_i32_36 = arith.constant 255 : i32
    %89 = tpu.dynamic_rotate %81 by %c255_i32_36 dim 0 : vector<256x8xf32>, i32 -> vector<256x8xf32>
    %c15_i32_37 = arith.constant 15 : i32
    %90 = vector.broadcast %c15_i32_37 : i32 to vector<256x1xi32>
    %91 = arith.cmpi eq, %26, %90 : vector<256x1xi32>
    %cst_38 = arith.constant 0.000000e+00 : f32
    %92 = vector.shape_cast %91 : vector<256x1xi1> to vector<256x1xi1>
    %93 = vector.broadcast %92 : vector<256x1xi1> to vector<256x8xi1>
    %94 = vector.broadcast %cst_38 : f32 to vector<256x8xf32>
    %95 = arith.select %93, %94, %89 : vector<256x8xi1>, vector<256x8xf32>
    %96 = tpu.concatenate %88, %81, %95 in 1 : vector<256x8xf32>, vector<256x8xf32>, vector<256x8xf32> -> vector<256x24xf32>
    %97 = arith.truncf %96 : vector<256x24xf32> to vector<256x24xbf16>
    %c2 = arith.constant 2 : index
    %c0_39 = arith.constant 0 : index
    %c0_40 = arith.constant 0 : index
    %98 = vector.load %arg4[%c2, %c0_39, %c0_40] : memref<3x24x8xbf16, #tpu.memory_space<vmem>>, vector<1x24x8xbf16>
    %99 = vector.shape_cast %98 : vector<1x24x8xbf16> to vector<24x8xbf16>
    %cst_41 = arith.constant dense<0.000000e+00> : vector<256x8xf32>
    %100 = tpu.matmul %97, %99, %cst_41 {dimension_numbers = #tpu.dot_dimension_numbers<[1], [0], [0], [1], [0, 0, 1, 1], [], []>} : vector<256x24xbf16>, vector<24x8xbf16>, vector<256x8xf32> -> vector<256x8xf32>
    %101 = arith.addf %74, %100 : vector<256x8xf32>
    %c0_42 = arith.constant 0 : index
    %c0_43 = arith.constant 0 : index
    %102 = vector.load %arg5[%c0_42, %c0_43] : memref<1x8xf32, #tpu.memory_space<vmem>>, vector<1x8xf32>
    %103 = vector.broadcast %102 : vector<1x8xf32> to vector<256x8xf32>
    %104 = arith.addf %101, %103 : vector<256x8xf32>
    %cst_44 = arith.constant 0.000000e+00 : f32
    %105 = vector.broadcast %cst_44 : f32 to vector<256x8xf32>
    %106 = arith.maximumf %104, %105 : vector<256x8xf32>
    %107 = arith.truncf %106 : vector<256x8xf32> to vector<256x8xbf16>
    %c0_45 = arith.constant 0 : index
    %c0_46 = arith.constant 0 : index
    %108 = vector.load %arg6[%c0_45, %c0_46] : memref<8x16xbf16, #tpu.memory_space<vmem>>, vector<8x16xbf16>
    %cst_47 = arith.constant dense<0.000000e+00> : vector<256x16xf32>
    %109 = tpu.matmul %107, %108, %cst_47 {dimension_numbers = #tpu.dot_dimension_numbers<[1], [0], [0], [1], [0, 0, 1, 1], [], []>} : vector<256x8xbf16>, vector<8x16xbf16>, vector<256x16xf32> -> vector<256x16xf32>
    %c0_48 = arith.constant 0 : index
    %c0_49 = arith.constant 0 : index
    %110 = vector.load %arg7[%c0_48, %c0_49] : memref<1x16xf32, #tpu.memory_space<vmem>>, vector<1x16xf32>
    %111 = vector.broadcast %110 : vector<1x16xf32> to vector<256x16xf32>
    %112 = arith.addf %109, %111 : vector<256x16xf32>
    %113 = arith.addf %112, %1 : vector<256x16xf32>
    %cst_50 = arith.constant 0.000000e+00 : f32
    %114 = vector.broadcast %cst_50 : f32 to vector<256x16xf32>
    %115 = arith.maximumf %113, %114 : vector<256x16xf32>
    %c0_51 = arith.constant 0 : index
    %c0_52 = arith.constant 0 : index
    %c0_53 = arith.constant 0 : index
    %116 = vector.load %arg8[%c0_51, %c0_52, %c0_53] : memref<1x256x16xf32, #tpu.memory_space<vmem>>, vector<1x256x16xf32>
    %117 = vector.shape_cast %116 : vector<1x256x16xf32> to vector<256x16xf32>
    %118 = vector.shape_cast %115 : vector<256x16xf32> to vector<1x256x16xf32>
    tpu.vector_store %arg8[%c0_51, %c0_52, %c0_53], %118 {strides = array<i32>} : memref<1x256x16xf32, #tpu.memory_space<vmem>>, vector<1x256x16xf32>,
    return
  }
  func.func @transform_0(%arg0: i32) -> (i32, i32, i32) {
    %c0_i32 = arith.constant 0 : i32
    %c0_i32_0 = arith.constant 0 : i32
    %c0_i32_1 = arith.constant 0 : i32
    return %arg0, %c0_i32, %c0_i32_0 : i32, i32, i32
  }
  func.func @transform_1(%arg0: i32) -> (i32, i32) {
    %c0_i32 = arith.constant 0 : i32
    %c0_i32_0 = arith.constant 0 : i32
    %c0_i32_1 = arith.constant 0 : i32
    return %c0_i32, %c0_i32_0 : i32, i32
  }
  func.func @transform_2(%arg0: i32) -> (i32, i32) {
    %c0_i32 = arith.constant 0 : i32
    %c0_i32_0 = arith.constant 0 : i32
    %c0_i32_1 = arith.constant 0 : i32
    return %c0_i32, %c0_i32_0 : i32, i32
  }
  func.func @transform_3(%arg0: i32) -> (i32, i32, i32) {
    %c0_i32 = arith.constant 0 : i32
    %c0_i32_0 = arith.constant 0 : i32
    %c0_i32_1 = arith.constant 0 : i32
    %c0_i32_2 = arith.constant 0 : i32
    return %c0_i32, %c0_i32_0, %c0_i32_1 : i32, i32, i32
  }
  func.func @transform_4(%arg0: i32) -> (i32, i32) {
    %c0_i32 = arith.constant 0 : i32
    %c0_i32_0 = arith.constant 0 : i32
    %c0_i32_1 = arith.constant 0 : i32
    return %c0_i32, %c0_i32_0 : i32, i32
  }
  func.func @transform_5(%arg0: i32) -> (i32, i32) {
    %c0_i32 = arith.constant 0 : i32
    %c0_i32_0 = arith.constant 0 : i32
    %c0_i32_1 = arith.constant 0 : i32
    return %c0_i32, %c0_i32_0 : i32, i32
  }
  func.func @transform_6(%arg0: i32) -> (i32, i32) {
    %c0_i32 = arith.constant 0 : i32
    %c0_i32_0 = arith.constant 0 : i32
    %c0_i32_1 = arith.constant 0 : i32
    return %c0_i32, %c0_i32_0 : i32, i32
  }
  func.func @transform_7(%arg0: i32) -> (i32, i32, i32) {
    %c0_i32 = arith.constant 0 : i32
    %c0_i32_0 = arith.constant 0 : i32
    %c0_i32_1 = arith.constant 0 : i32
    return %arg0, %c0_i32, %c0_i32_0 : i32, i32, i32
  }
}

</mosaic_0001>

<bundles_post_ra>
// kernel: tpu_custom_call.1
= control target key start
LH: loop header
LB: loop body
LE: loop exit
PB: predicated region body
PF: predicated region fallthrough
CT: control target
= control target key end

     0   :  { %12 = vsyncpa [#allocation3], 0  ;;  %s8340_s0 = inlined_call_operand.hbm [shape: f32[2,256,16], index: 0, kind: input, shape index: {}]   ;;  %s8341_s1 = inlined_call_operand.hbm [shape: bf16[16,8], index: 1, kind: input, shape index: {}]   ;;  %s8342_s2 = inlined_call_operand.hbm [shape: f32[1,8], index: 2, kind: input, shape index: {}]   ;;  %s8343_s3 = inlined_call_operand.hbm [shape: bf16[3,24,8], index: 3, kind: input, shape index: {}]   ;;  %s8344_s4 = inlined_call_operand.hbm [shape: f32[1,8], index: 4, kind: input, shape index: {}]   ;;  %s8345_s5 = inlined_call_operand.hbm [shape: bf16[8,16], index: 5, kind: input, shape index: {}]   ;;  %s8346_s6 = inlined_call_operand.hbm [shape: f32[1,16], index: 6, kind: input, shape index: {}]   ;;  %s8347_s7 = inlined_call_operand.hbm [shape: f32[2,256,16], index: 7, kind: output, shape index: {}]  }
   0x1   :  { %14 = vsyncpa [#allocation3 + $0x1], 0 }
   0x2   :  { %15 = vsyncpa [#allocation6], 0 }
   0x3   :  { %16 = vsyncpa [#allocation9], 0 }
   0x4   :  { %17 = vsyncpa [#allocation12], 0 }
   0x5   :  { %18 = vsyncpa [#allocation4], 0 }
   0x6   :  { %20 = vsyncpa [#allocation4 + $0x1], 0  ;;  %s5812_s24 = smov 0   ;;  %s5814_s25 = smov 0  }
   0x7   :  { %s5816_s26 = smov 0   ;;  %s5818_s27 = smov 0  }
   0x8 LB: > { %s5756_s28 = smov [#allocation5]   ;;  %s5833_s30 = sadd.s32 4294967295, %s5754_s27   ;;  %s5754_s27 = sphi %s5818_s27, %s9155_s27   ;;  %s5750_s26 = sphi %s5816_s26, %s9154_s26   ;;  %s5746_s25 = sphi %s5814_s25, %s9153_s25   ;;  %s5742_s24 = sphi %s5812_s24, %s9152_s24  }
   0x9   : > { %s221_s29 = sshll.u32 %s5756_s28, 4  ;;  %p4390_p0 = scmp.ge.s32.totalorder %s5754_s27, 1  ;;  %s5838_s29 = int_to_ptr.vmem [resolvable:$true] %s221_s29 }
   0xa   : > { %p8348_p1 = scmp.eq.s32.totalorder %s5833_s30, 0  ;;  %p209_p2 = scmp.lt.s32.totalorder %s5754_s27, 3 }
   0xb   : > { %s5757_s9 = smov [#allocation8]   ;;  %s5758_s12 = smov [#allocation11]  }
   0xc   : > { %p5840_p3 = pnand %p4390_p0, %p209_p2  ;;  %s245_s10 = sshll.u32 %s5757_s9, 4  ;;  %s5853_s10 = int_to_ptr.vmem [resolvable:$true] %s245_s10 }
   0xd   : > { %s270_s13 = sshll.u32 %s5758_s12, 4  ;;  %s5478_s16 = scalar_lea.hbm %s8341_s1, 128  ;;  %s5855_s13 = int_to_ptr.vmem [resolvable:$true] %s270_s13 }
   0xe   : > { %s8495_s8 = scalar_select %p5840_p3, 1, 0 }
   0xf   : > { %p4872_p5 = pneg %p5840_p3  ;;  %p5479_p7 = scmp.ne.s32.totalorder %s8341_s1, %s5478_s16 }
  0x10   : > { %p5485_p11 = scmp.lt.u32.totalorder %s5478_s16, %s8341_s1 }
  0x11   : > { %p5849_p6 = pnand %p4872_p5, %p8348_p1 }
  0x13   : > { %p5865_p8 = pneg %p5849_p6 }
  0x15   : > { %p5481_p9 = pnand %p5865_p8, %p5479_p7 }
  0x17   : > { %p5482_p10 = pneg %p5481_p9 }
  0x19   : > { %p5487_p12 = pnand %p5485_p11, %p5482_p10 }
  0x1b   : > { %5490 = shalt.err (!%p5487_p12)
}
  0x1c   : > { %s5491_s22 = scalar_lea.vmem %s5838_s29, 128  ;;  %p5499_p5 = scmp.lt.s32.totalorder %s5838_s29, %s5838_s29 }
  0x1d   : > { %p5492_p13 = scmp.ne.s32.totalorder %s5838_s29, %s5491_s22  ;;  %p5500_p4 = scmp.lt.s32.totalorder %s5491_s22, %s5491_s22 }
  0x1f   : > { %p5494_p0 = pnand %p5492_p13, %p5865_p8  ;;  %p5501_p7 = por %p5500_p4, %p5499_p5 }
  0x21   : > { %p5495_p2 = pneg %p5494_p0 }
  0x23   : > { %p5502_p9 = pnand %p5501_p7, %p5495_p2 }
  0x25   : > { %5505 = shalt.err (!%p5502_p9)
}
  0x26   : > { %s5759_s23 = smov 64   ;;  %s5760_s28 = smov 4  }
  0x27   : > { %4875 = dma.hbm_to_vmem [thread:$0]  (!%p5849_p6), %s8341_s1, 128, %s5838_s29, [#allocation6], %s5759_s23, %s5759_s23, %s5760_s28  }
  0x28   : > { %s5506_s16 = scalar_lea.hbm %s8343_s3, 576 }
  0x29   : > { %p5507_p4 = scmp.ne.s32.totalorder %s8343_s3, %s5506_s16  ;;  %p5513_p12 = scmp.lt.u32.totalorder %s5506_s16, %s8343_s3 }
  0x2b   : > { %p5509_p10 = pnand %p5507_p4, %p5865_p8 }
  0x2d   : > { %p5510_p11 = pneg %p5509_p10 }
  0x2f   : > { %p5515_p13 = pnand %p5513_p12, %p5510_p11 }
  0x31   : > { %5518 = shalt.err (!%p5515_p13)
}
  0x32   : > { %s5519_s29 = scalar_lea.vmem %s5853_s10, 576  ;;  %p5527_p7 = scmp.lt.s32.totalorder %s5853_s10, %s5853_s10 }
  0x33   : > { %p5520_p0 = scmp.ne.s32.totalorder %s5853_s10, %s5519_s29  ;;  %p5528_p9 = scmp.lt.s32.totalorder %s5519_s29, %s5519_s29 }
  0x35   : > { %p5522_p2 = pnand %p5520_p0, %p5865_p8  ;;  %p5529_p4 = por %p5528_p9, %p5527_p7 }
  0x37   : > { %p5523_p5 = pneg %p5522_p2 }
  0x39   : > { %p5530_p10 = pnand %p5529_p4, %p5523_p5 }
  0x3b   : > { %5533 = shalt.err (!%p5530_p10)
}
  0x3c   : > { %4881 = dma.hbm_to_vmem [thread:$0]  (!%p5849_p6), %s8343_s3, 576, %s5853_s10, [#allocation9], %s5759_s23, %s5759_s23, %s5760_s28  }
  0x3d   : > { %s5534_s15 = scalar_lea.hbm %s8345_s5, 64 }
  0x3e   : > { %p5535_p11 = scmp.ne.s32.totalorder %s8345_s5, %s5534_s15  ;;  %p5541_p0 = scmp.lt.u32.totalorder %s5534_s15, %s8345_s5 }
  0x40   : > { %p5537_p12 = pnand %p5535_p11, %p5865_p8 }
  0x42   : > { %p5538_p13 = pneg %p5537_p12 }
  0x44   : > { %p5543_p2 = pnand %p5541_p0, %p5538_p13 }
  0x46   : > { %5546 = shalt.err (!%p5543_p2)
}
  0x47   : > { %s5547_s10 = scalar_lea.vmem %s5855_s13, 64  ;;  %p5555_p4 = scmp.lt.s32.totalorder %s5855_s13, %s5855_s13 }
  0x48   : > { %p5548_p5 = scmp.ne.s32.totalorder %s5855_s13, %s5547_s10  ;;  %p5556_p10 = scmp.lt.s32.totalorder %s5547_s10, %s5547_s10 }
  0x4a   : > { %p5550_p7 = pnand %p5548_p5, %p5865_p8  ;;  %p5557_p11 = por %p5556_p10, %p5555_p4 }
  0x4c   : > { %p5551_p9 = pneg %p5550_p7 }
  0x4e   : > { %p5558_p12 = pnand %p5557_p11, %p5551_p9 }
  0x50   : > { %5561 = shalt.err (!%p5558_p12)
}
  0x51   : > { %4887 = dma.hbm_to_vmem [thread:$0]  (!%p5849_p6), %s8345_s5, 64, %s5855_s13, [#allocation12]  }
  0x52   : > { %s5761_s21 = smov [#allocation7]   ;;  %s5762_s22 = smov [#allocation10]  }
  0x53   : > { %s235_s29 = sshll.u32 %s5761_s21, 4  ;;  %s259_s9 = sshll.u32 %s5762_s22, 4  ;;  %s236_s29 = int_to_ptr.vmem [resolvable:$true] %s235_s29  ;;  %s260_s9 = int_to_ptr.vmem [resolvable:$true] %s259_s9 }
  0x54   : > { %s5562_s15 = scalar_lea.hbm %s8342_s2, 16 }
  0x55   : > { %p5563_p13 = scmp.ne.s32.totalorder %s8342_s2, %s5562_s15  ;;  %p5569_p5 = scmp.lt.u32.totalorder %s5562_s15, %s8342_s2 }
  0x57   : > { %p5565_p0 = pnand %p5563_p13, %p5865_p8 }
  0x59   : > { %p5566_p2 = pneg %p5565_p0 }
  0x5b   : > { %p5571_p7 = pnand %p5569_p5, %p5566_p2 }
  0x5d   : > { %5574 = shalt.err (!%p5571_p7)
}
  0x5e   : > { %s5575_s13 = scalar_lea.vmem %s236_s29, 16  ;;  %s5582_s10 = scalar_lea.vmem %s236_s29, 32 }
  0x5f   : > { %p5576_p9 = scmp.ne.s32.totalorder %s236_s29, %s5575_s13  ;;  %p5583_p11 = scmp.lt.s32.totalorder %s236_s29, %s236_s29 }
  0x60   : > { %p5584_p12 = scmp.lt.s32.totalorder %s5582_s10, %s5575_s13 }
  0x61   : > { %p5578_p4 = pnand %p5576_p9, %p5865_p8 }
  0x62   : > { %p5585_p1 = por %p5584_p12, %p5583_p11 }
  0x63   : > { %p5579_p10 = pneg %p5578_p4 }
  0x65   : > { %p5586_p3 = pnand %p5585_p1, %p5579_p10 }
  0x67   : > { %5589 = shalt.err (!%p5586_p3)
}
  0x68   : > { %4878 = dma.hbm_to_vmem [thread:$0]  (!%p5849_p6), %s8342_s2, 16, %s236_s29, [#allocation6]  }
  0x69   : > { %s5590_s12 = scalar_lea.hbm %s8344_s4, 16 }
  0x6a   : > { %p5591_p13 = scmp.ne.s32.totalorder %s8344_s4, %s5590_s12  ;;  %p5597_p3 = scmp.lt.u32.totalorder %s5590_s12, %s8344_s4 }
  0x6c   : > { %p5593_p0 = pnand %p5591_p13, %p5865_p8 }
  0x6e   : > { %p5594_p1 = pneg %p5593_p0 }
  0x70   : > { %p5599_p2 = pnand %p5597_p3, %p5594_p1 }
  0x72   : > { %5602 = shalt.err (!%p5599_p2)
}
  0x73   : > { %s5603_s18 = scalar_lea.vmem %s260_s9, 16  ;;  %s5610_s29 = scalar_lea.vmem %s260_s9, 32 }
  0x74   : > { %p5604_p5 = scmp.ne.s32.totalorder %s260_s9, %s5603_s18  ;;  %p5611_p4 = scmp.lt.s32.totalorder %s260_s9, %s260_s9 }
  0x75   : > { %p5612_p10 = scmp.lt.s32.totalorder %s5610_s29, %s5603_s18 }
  0x76   : > { %p5606_p7 = pnand %p5604_p5, %p5865_p8 }
  0x77   : > { %p5613_p11 = por %p5612_p10, %p5611_p4 }
  0x78   : > { %p5607_p9 = pneg %p5606_p7 }
  0x7a   : > { %p5614_p12 = pnand %p5613_p11, %p5607_p9 }
  0x7c   : > { %5617 = shalt.err (!%p5614_p12)
}
  0x7d   : > { %4884 = dma.hbm_to_vmem [thread:$0]  (!%p5849_p6), %s8344_s4, 16, %s260_s9, [#allocation9]  }
  0x7e   : > { %s5763_s10 = smov [#allocation13]   ;;  %s5618_s22 = scalar_lea.hbm %s8346_s6, 16 }
  0x7f   : > { %s281_s23 = sshll.u32 %s5763_s10, 4  ;;  %p5619_p13 = scmp.ne.s32.totalorder %s8346_s6, %s5618_s22  ;;  %s282_s23 = int_to_ptr.vmem [resolvable:$true] %s281_s23 }
  0x80   : > { %p5625_p3 = scmp.lt.u32.totalorder %s5618_s22, %s8346_s6 }
  0x81   : > { %p5621_p0 = pnand %p5619_p13, %p5865_p8 }
  0x83   : > { %p5622_p1 = pneg %p5621_p0 }
  0x85   : > { %p5627_p2 = pnand %p5625_p3, %p5622_p1 }
  0x87   : > { %5630 = shalt.err (!%p5627_p2)
}
  0x88   : > { %s5631_s9 = scalar_lea.vmem %s282_s23, 16  ;;  %s5638_s17 = scalar_lea.vmem %s282_s23, 32 }
  0x89   : > { %p5632_p5 = scmp.ne.s32.totalorder %s282_s23, %s5631_s9  ;;  %p5639_p4 = scmp.lt.s32.totalorder %s282_s23, %s282_s23 }
  0x8a   : > { %p5640_p10 = scmp.lt.s32.totalorder %s5638_s17, %s5631_s9 }
  0x8b   : > { %p5634_p7 = pnand %p5632_p5, %p5865_p8 }
  0x8c   : > { %p5641_p11 = por %p5640_p10, %p5639_p4 }
  0x8d   : > { %p5635_p9 = pneg %p5634_p7 }
  0x8f   : > { %p5642_p12 = pnand %p5641_p11, %p5635_p9 }
  0x91   : > { %5645 = shalt.err (!%p5642_p12)
}
  0x92   : > { %4890 = dma.hbm_to_vmem [thread:$0]  (!%p5849_p6), %s8346_s6, 16, %s282_s23, [#allocation12]  }
  0x93   : > { %s4389_s19 = sadd.s32 4294967294, %s5754_s27   ;;  %s5988_s11 = sadd.s32 1, %s5754_s27  }
  0x94   : > { %s30_s20 = ssub.s32 %s5754_s27, %s5988_s11  ;;  %s33_s13 = sadd.s32 1, %s5750_s26 }
  0x95   : > { %p31_p8 = scmp.eq.s32.totalorder %s30_s20, 0  ;;  %p40_p13 = scmp.ne.s32.totalorder %s5750_s26, %s5746_s25 }
  0x96   : > { %p41_p0 = scmp.eq.s32.totalorder %s5754_s27, 0  ;;  %p46_p1 = scmp.ne.s32.totalorder %s5746_s25, %s5742_s24 }
  0x97   : > { %s5999_s10 = scalar_select %p31_p8, %s5750_s26, %s33_s13  }
  0x98   : > { %p6001_p3 = por %p41_p0, %p40_p13  ;;  %p8499_p2 = scmp.eq.s32.totalorder %s5833_s30, 0 }
  0x99   : > { %p196_p5 = scmp.eq.s32.totalorder %s5833_s30, 1  ;;  %p202_p7 = scmp.eq.s32.totalorder %s4389_s19, 1 }
  0x9a   : > { %p6007_p6 = por %p8499_p2, %p46_p1  ;;  %p4905_p9 = scmp.lt.s32.totalorder %s5754_s27, 2 }
  0x9b   : > { %s292_s21 = sand.u32 1, %s5750_s26   ;;  %p6014_p4 = por %p196_p5, %p40_p13 }
  0x9c   : > { %p6018_p10 = por %p202_p7, %p46_p1  ;;  %s4398_s14 = sshll.u32 %s292_s21, 8 }
  0x9d   : > { %s8501_s22 = scalar_select %p6014_p4, 1, 0 }
  0x9e   : > { %s8502_s12 = scalar_select %p6018_p10, 1, 0 }
  0x9f   : > { %s4505_s15 = sshll.u32 %s5754_s27, 12  ;;  %s296_s18 = scalar_lea.vmem [#allocation2], %s4398_s14 }
  0xa0   : > { %s6026_s17 = scalar_lea.hbm %s8340_s0, %s4505_s15  ;;  %s303_s29 = sshll.u32 %s296_s18, 4  ;;  %s6028_s29 = int_to_ptr.vmem [resolvable:$true] %s303_s29 }
  0xa1   : > { %p6032_p11 = pnand %p4905_p9, %p6001_p3  ;;  %s6036_s20 = scalar_lea.sflag [#allocation3], %s292_s21 }
  0xa2   : > { %s5646_s13 = scalar_lea.hbm %s6026_s17, 4096  ;;  %s5651_s28 = scalar_lea.hbm %s8340_s0, 8192 }
  0xa3   : > { %p5647_p12 = scmp.ne.s32.totalorder %s6026_s17, %s5646_s13  ;;  %p5648_p8 = pneg %p6032_p11 }
  0xa4   : > { %p5652_p1 = scmp.lt.u32.totalorder %s6026_s17, %s8340_s0  ;;  %p5653_p3 = scmp.lt.u32.totalorder %s5651_s28, %s5646_s13 }
  0xa5   : > { %p5649_p13 = pnand %p5648_p8, %p5647_p12  ;;  %p5655_p5 = scmp.lt.u32.totalorder %s5646_s13, %s6026_s17 }
  0xa6   : > { %p5654_p2 = por %p5653_p3, %p5652_p1 }
  0xa7   : > { %p5650_p0 = pneg %p5649_p13 }
  0xa8   : > { %p5656_p7 = por %p5655_p5, %p5654_p2 }
  0xaa   : > { %p5657_p9 = pnand %p5656_p7, %p5650_p0 }
  0xac   : > { %5660 = shalt.err (!%p5657_p9)
}
  0xad   : > { %s5661_s21 = scalar_lea.vmem %s6028_s29, 4096  ;;  %s5764_s18 = smov [#allocation2]  }
  0xae   : > { %p5662_p12 = scmp.ne.s32.totalorder %s6028_s29, %s5661_s21  ;;  %s5666_s14 = sshll.u32 %s5764_s18, 4  ;;  %s5667_s14 = int_to_ptr.vmem [resolvable:$false] %s5666_s14 }
  0xaf   : > { %s5668_s15 = scalar_lea.vmem %s5667_s14, 8192  ;;  %p5669_p4 = scmp.lt.s32.totalorder %s6028_s29, %s5667_s14 }
  0xb0   : > { %p5664_p13 = pnand %p5662_p12, %p5648_p8  ;;  %p5670_p1 = scmp.lt.s32.totalorder %s5668_s15, %s5661_s21 }
  0xb2   : > { %p5665_p10 = pneg %p5664_p13  ;;  %p5671_p3 = por %p5670_p1, %p5669_p4 }
  0xb4   : > { %p5672_p2 = pnand %p5671_p3, %p5665_p10 }
  0xb6   : > { %5675 = shalt.err (!%p5672_p2)
}
  0xb7   : > { %s5765_s13 = smov 128   ;;  %s5766_s28 = smov 8  }
  0xb8   : > { %4894 = dma.hbm_to_vmem [thread:$0]  (!%p6032_p11), %s6026_s17, 4096, %s6028_s29, %s6036_s20, %s5765_s13, %s5765_s13, %s5766_s28  }
  0xb9   : > { %p8504_p8 = scmp.ne.s32.totalorder %s8495_s8, 0 }
  0xbb   : > { %315 = sbr.rel (%p8504_p8) target bundleno = 1248 (0x4e0), region = 48 }
  0xc2   : > { %s6067_s16 = sand.u32 1, %s5746_s25  }
  0xc3   : > { %s4402_s9 = sshll.u32 %s6067_s16, 8  ;;  %s318_s21 = scalar_lea.sflag [#allocation3], %s6067_s16 }
  0xc4   : > { %s6073_s18 = scalar_lea.vmem [#allocation2], %s4402_s9 }
  0xc5   : > { %5721 = dma.done.wait (%p6007_p6), %s318_s21, 4096  }
  0xc6   : > { %5723 = vsyncadd (%p6007_p6), %s318_s21, 4294963200  ;;  %p8505_p4 = scmp.eq.s32.totalorder %s5833_s30, 0 }
  0xc8   : > { %5725 = dma.done.wait (%p8505_p4), [#allocation6], 144   ;;  %p8506_p10 = pmov %p8505_p4 }
  0xc9   : > { %p8507_p11 = pmov %p8505_p4 }
  0xca   : > { %5727 = vsyncadd (%p8506_p10), [#allocation6], 4294967152 }
  0xcb   : > { %5729 = dma.done.wait (%p8507_p11), [#allocation9], 592   ;;  %p8508_p0 = pmov %p8505_p4 }
  0xcd   : > { %5731 = vsyncadd (%p8508_p0), [#allocation9], 4294966704  ;;  %p8509_p5 = pmov %p8508_p0 }
  0xce   : > { %p8510_p7 = pmov %p8508_p0 }
  0xcf   : > { %5733 = dma.done.wait (%p8509_p5), [#allocation12], 80  }
  0xd0   : > { %5735 = vsyncadd (%p8510_p7), [#allocation12], 4294967216  ;;  %v8351_v0 = vmov 0.0   ;;  %s5768_s8 = smov 8   ;;  %v5439_v1 = vld [vmem:[#allocation5] sm:$0xff]   ;;  %v378_v3 = vld [vmem:[%s6073_s18 + $0x8] sm:$0xff]  ;;  %v682_v50 = vlaneseq }
  0xd1   : > { %4960 = vrot.lane.b32.xlu0 %v8351_v0, %s5768_s8  ;;  %v377_v2 = vld [vmem:[%s6073_s18] sm:$0xff]  ;;  %vm8406_vm0 = vcmask 130048   ;;  %v379_v4 = vld [vmem:[%s6073_s18 + $0x10] sm:$0xff]  ;;  %4595 = vmatprep.subr.bf16.mxu0 %v5439_v1  ;;  %v380_v6 = vld [vmem:[%s6073_s18 + $0x18] sm:$0xff]  ;;  %v6152_v56 = vrot.slane %v8351_v0, 7  ;;  %v6155_v57 = vrot.slane %v8351_v0, 1 }
  0xd2   : > { %v409_v5 = vpack.c.bf16 %v378_v3, %v377_v2  ;;  %v381_v7 = vld [vmem:[%s6073_s18 + $0x20] sm:$0xff]  ;;  %v382_v8 = vld [vmem:[%s6073_s18 + $0x28] sm:$0xff]  ;;  %4596 = vmatpush3.bf16.msra.mxu0 %v5439_v1  ;;  %v410_v9 = vpack.c.bf16 %v380_v6, %v379_v4  ;;  %v383_v11 = vld [vmem:[%s6073_s18 + $0x30] sm:$0xff]  ;;  %v6141_v51 = vshrl.u32 %v682_v50, 7  ;;  %s5769_s23 = smov 16   ;;  %s8166_s17 = scalar_lea.vmem [#allocation14], %s4402_s9 }
  0xd3   : > { %v411_v10 = vpack.c.bf16 %v382_v8, %v381_v7  ;;  %v384_v12 = vld [vmem:[%s6073_s18 + $0x38] sm:$0xff]  ;;  %v385_v13 = vld [vmem:[%s6073_s18 + $0x40] sm:$0xff]  ;;  %v386_v14 = vld [vmem:[%s6073_s18 + $0x48] sm:$0xff]  ;;  %8513 = vst [vmem:[#allocation22_spill] sm:$0xff] %v6152_v56  ;;  %s4506_s29 = sshll.u32 %s5833_s30, 12  ;;  %s4259_s19 = sshll.u32 %s8166_s17, 4  ;;  %s8291_s19 = int_to_ptr.vmem [resolvable:$true] %s4259_s19 }
  0xd4   : > { %4597 = vmatprep.mubr.msk.bf16.mxu0 %vm8406_vm0, %v409_v5  ;;  %v412_v15 = vpack.c.bf16 %v384_v12, %v383_v11  ;;  %v413_v16 = vpack.c.bf16 %v386_v14, %v385_v13  ;;  %v387_v17 = vld [vmem:[%s6073_s18 + $0x50] sm:$0xff]  ;;  %v388_v18 = vld [vmem:[%s6073_s18 + $0x58] sm:$0xff]  ;;  %v389_v19 = vld [vmem:[%s6073_s18 + $0x60] sm:$0xff]  ;;  %8511 = vst [vmem:[#allocation20_spill] sm:$0xff] %v6141_v51  ;;  %v684_v52 = vadd.s32 8, %v6141_v51  ;;  %v686_v53 = vadd.s32 24, %v6141_v51  ;;  %s8287_s15 = scalar_lea.hbm %s8347_s7, %s4506_s29 }
  0xd5   : > { %4598 = vmatmul.mubr.msk.bf16.vlgmr.msra.gmra.mrb[0].mxu0 %vm8406_vm0, %v410_v9  ;;  %v390_v20 = vld [vmem:[%s6073_s18 + $0x68] sm:$0xff]  ;;  %v414_v21 = vpack.c.bf16 %v388_v18, %v387_v17  ;;  %v391_v23 = vld [vmem:[%s6073_s18 + $0x70] sm:$0xff]  ;;  %v392_v24 = vld [vmem:[%s6073_s18 + $0x78] sm:$0xff]  ;;  %v6146_v54 = vadd.s32 248, %v6141_v51  ;;  %v6149_v55 = vadd.s32 32, %v6141_v51  ;;  %8514 = vst [vmem:[#allocation23_spill] sm:$0xff] %v6155_v57 }
  0xd6   : > { %4601 = vmatprep.mubr.msk.bf16.mxu0 %vm8406_vm0, %v411_v10  ;;  %v415_v22 = vpack.c.bf16 %v390_v20, %v389_v19  ;;  %v393_v25 = vld [vmem:[%s6073_s18 + $0x80] sm:$0xff]  ;;  %v394_v26 = vld [vmem:[%s6073_s18 + $0x88] sm:$0xff]  ;;  %v416_v27 = vpack.c.bf16 %v392_v24, %v391_v23  ;;  %v395_v29 = vld [vmem:[%s6073_s18 + $0x90] sm:$0xff]  ;;  %v6158_v58 = vadd.s32 40, %v6141_v51  ;;  %v6161_v59 = vadd.s32 16, %v6141_v51  ;;  %s4246_s30 = scalar_lea.sflag [#allocation4], %s6067_s16 }
  0xd7   : > { %v417_v28 = vpack.c.bf16 %v394_v26, %v393_v25  ;;  %v396_v30 = vld [vmem:[%s6073_s18 + $0x98] sm:$0xff]  ;;  %v397_v31 = vld [vmem:[%s6073_s18 + $0xa0] sm:$0xff]  ;;  %v398_v32 = vld [vmem:[%s6073_s18 + $0xa8] sm:$0xff]  ;;  %8512 = vst [vmem:[#allocation21_spill] sm:$0xff] %v6149_v55  ;;  %v726_v60 = vand.u32 15, %v684_v52  ;;  %v6164_v61 = vadd.s32 56, %v6141_v51 }
  0xd8   : > { %v418_v33 = vpack.c.bf16 %v396_v30, %v395_v29  ;;  %v419_v34 = vpack.c.bf16 %v398_v32, %v397_v31  ;;  %v399_v35 = vld [vmem:[%s6073_s18 + $0xb0] sm:$0xff]  ;;  %v400_v36 = vld [vmem:[%s6073_s18 + $0xb8] sm:$0xff]  ;;  %v401_v37 = vld [vmem:[%s6073_s18 + $0xc0] sm:$0xff]  ;;  %8515 = vst [vmem:[#allocation24_spill] sm:$0xff] %v6161_v59  ;;  %v6167_v62 = vadd.s32 72, %v6141_v51  ;;  %v740_v1 = vand.u32 15, %v686_v53 }
  0xd9   : > { %v402_v38 = vld [vmem:[%s6073_s18 + $0xc8] sm:$0xff]  ;;  %v420_v39 = vpack.c.bf16 %v400_v36, %v399_v35  ;;  %v403_v41 = vld [vmem:[%s6073_s18 + $0xd0] sm:$0xff]  ;;  %v404_v42 = vld [vmem:[%s6073_s18 + $0xd8] sm:$0xff]  ;;  %v6171_v2 = vadd.s32 88, %v6141_v51  ;;  %v6175_v4 = vadd.s32 64, %v6141_v51  ;;  %v6178_v5 = vadd.s32 104, %v6141_v51 }
  0xda   : > { %v421_v40 = vpack.c.bf16 %v402_v38, %v401_v37  ;;  %v405_v43 = vld [vmem:[%s6073_s18 + $0xe0] sm:$0xff]  ;;  %v406_v44 = vld [vmem:[%s6073_s18 + $0xe8] sm:$0xff]  ;;  %v422_v45 = vpack.c.bf16 %v404_v42, %v403_v41  ;;  %v407_v47 = vld [vmem:[%s6073_s18 + $0xf0] sm:$0xff]  ;;  %v6181_v6 = vadd.s32 120, %v6141_v51  ;;  %v6185_v8 = vadd.s32 48, %v6141_v51  ;;  %s5676_s13 = scalar_lea.vmem %s8291_s19, 4096 }
  0xdb   : > { %v423_v46 = vpack.c.bf16 %v406_v44, %v405_v43  ;;  %v408_v48 = vld [vmem:[%s6073_s18 + $0xf8] sm:$0xff]  ;;  %8516 = vst [vmem:[#allocation25_spill] sm:$0xff] %v6175_v4  ;;  %vm8428_vm1 = vcmp.lt.s32.totalorder %v6141_v51, 7  ;;  %v754_v9 = vand.u32 15, %v6158_v58  ;;  %v6190_v10 = vadd.s32 136, %v6141_v51  ;;  %p5677_p6 = scmp.ne.s32.totalorder %s8291_s19, %s5676_s13  ;;  %p9149_p9 = scmp.ne.s32.totalorder %s8501_s22, 0 }
  0xdc   : > { %v424_v49 = vpack.c.bf16 %v408_v48, %v407_v47  ;;  %8517 = vst [vmem:[#allocation26_spill] sm:$0xff] %v6185_v8  ;;  %v6193_v11 = vadd.s32 152, %v6141_v51  ;;  %v6196_v13 = vld [vmem:[#allocation7] ss:$0 sm:$0xff]  ;;  %vm6198_vm2 = vcmp.eq.s32.totalorder %v726_v60, 15  ;;  %v6205_v17 = vadd.s32 168, %v6141_v51 }
  0xdd   : > { %4602 = vmatmul.mubr.msk.bf16.gmra.mrb[4].mxu0 %vm8406_vm0, %v412_v15  ;;  %v768_v15 = vand.u32 15, %v6164_v61  ;;  %v6208_v18 = vadd.s32 184, %v6141_v51  ;;  %v796_v19 = vand.u32 15, %v6171_v2  ;;  %v6212_v20 = vadd.s32 200, %v6141_v51  ;;  %p5678_p12 = pnand %p5677_p6, %p9149_p9  ;;  %s5770_s28 = smov [#allocation14]  }
  0xde   : > { %4605 = vmatprep.mubr.msk.bf16.mxu0 %vm8406_vm0, %v413_v16  ;;  %v782_v16 = vand.u32 15, %v6167_v62  ;;  %vm6218_vm3 = vcmp.eq.s32.totalorder %v740_v1, 15  ;;  %v6223_v25 = vadd.s32 232, %v6141_v51  ;;  %vm8431_vm4 = vcmp.lt.s32.totalorder %v6141_v51, 1  ;;  %s5680_s9 = sshll.u32 %s5770_s28, 4  ;;  %s5681_s9 = int_to_ptr.vmem [resolvable:$false] %s5680_s9 }
  0xdf   : > { %v6252_v50 = vadd.s32 112, %v6141_v51  ;;  %v6255_v52 = vadd.s32 144, %v6141_v51  ;;  %v6258_v53 = vadd.s32 128, %v6141_v51  ;;  %vm6264_vm5 = vcmp.eq.s32.totalorder %v754_v9, 15  ;;  %p5679_p13 = pneg %p5678_p12  ;;  %s5682_s21 = scalar_lea.vmem %s5681_s9, 8192 }
  0xe0   : > { %vm6282_vm6 = vcmp.eq.s32.totalorder %v768_v15, 15  ;;  %vm6329_vm7 = vcmp.eq.s32.totalorder %v782_v16, 15  ;;  %vm6364_vm8 = vcmp.eq.s32.totalorder %v796_v19, 15  ;;  %v6404_v14 = vadd.s32 160, %v6141_v51  ;;  %p5683_p1 = scmp.lt.s32.totalorder %s8291_s19, %s5681_s9  ;;  %p5684_p3 = scmp.lt.s32.totalorder %s5682_s21, %s5676_s13 }
  0xe1   : > { %8524 = vst [vmem:[#allocation29_spill] sm:$0xff] %v6252_v50  ;;  %8525 = vst [vmem:[#allocation30_spill] sm:$0xff] %v6258_v53  ;;  %v8588_v53 = vmov 0 }
  0xe2   : > { %8546 = vst [vmem:[#allocation43_spill] sm:$0xff] %v6404_v14  ;;  %p5685_p2 = por %p5684_p3, %p5683_p1 }
  0xe4   : > { %p5686_p8 = pnand %p5685_p2, %p5679_p13 }
  0xe5   : > { %4606 = vmatmul.mubr.msk.bf16.gmra.mrb[8].mxu0 %vm8406_vm0, %v414_v21  ;;  %v6215_v21 = vadd.s32 216, %v6141_v51 }
  0xe6   : > { %4609 = vmatprep.mubr.msk.bf16.mxu0 %vm8406_vm0, %v415_v22 }
  0xed   : > { %4610 = vmatmul.mubr.msk.bf16.gmra.mrb[12].mxu0 %vm8406_vm0, %v416_v27 }
  0xee   : > { %4613 = vmatprep.mubr.msk.bf16.mxu0 %vm8406_vm0, %v417_v28 }
  0xf5   : > { %4614 = vmatmul.mubr.msk.bf16.gmra.mrb[16].mxu0 %vm8406_vm0, %v418_v33 }
  0xf6   : > { %4617 = vmatprep.mubr.msk.bf16.mxu0 %vm8406_vm0, %v419_v34  ;;  %v6234_v34 = vadd.s32 96, %v6141_v51 }
  0xf8   : > { %8522 = vst [vmem:[#allocation27_spill] sm:$0xff] %v6234_v34 }
  0xfd   : > { %4618 = vmatmul.mubr.msk.bf16.gmra.mrb[20].mxu0 %vm8406_vm0, %v420_v39  ;;  %v6240_v39 = vadd.s32 80, %v6141_v51 }
  0xfe   : > { %4621 = vmatprep.mubr.msk.bf16.mxu0 %vm8406_vm0, %v421_v40 }
  0xff   : > { %8523 = vst [vmem:[#allocation28_spill] sm:$0xff] %v6240_v39 }
 0x105   : > { %4622 = vmatmul.mubr.msk.bf16.gmra.mrb[24].mxu0 %vm8406_vm0, %v422_v45 }
 0x106   : > { %4625 = vmatprep.mubr.msk.bf16.mxu0 %vm8406_vm0, %v423_v46 }
 0x10d   : > { %4626 = vmatmul.mubr.msk.bf16.gmra.mrb[28].mxu0 %vm8406_vm0, %v424_v49 }
 0x143   : > { %v6231_v33 = vpop.permute.xlu0 %4960 }
 0x1a8   : > { %v4599_v23 = vpop.f32.mrb[0].mxu0 }
 0x1a9   : > { %v532_v29 = vadd.f32 %v4599_v23, %v6196_v13  ;;  %v523_v30 = vpop.f32.mrb[1].mxu0 }
 0x1aa   : > { %v524_v35 = vadd.f32 %v6196_v13, %v523_v30  ;;  %v4600_v36 = vpop.f32.mrb[2].mxu0 }
 0x1ab   : > { %v652_v40 = vmax.f32 %v532_v29, 0.0  ;;  %v535_v41 = vadd.f32 %v4600_v36, %v6196_v13  ;;  %v526_v42 = vpop.f32.mrb[3].mxu0 }
 0x1ac   : > { %v650_v45 = vmax.f32 %v524_v35, 0.0  ;;  %v527_v46 = vadd.f32 %v6196_v13, %v526_v42 }
 0x1ad   : > { %v6249_v49 = vmax.f32 %v535_v41, 0.0  ;;  %v6262_v61 = vrot.slane %v652_v40, 1  ;;  %v6268_v23 = vrot.slane %v652_v40, 7 }
 0x1ae   : > { %v6260_v58 = vrot.slane %v650_v45, 1  ;;  %v651_v60 = vmax.f32 %v527_v46, 0.0  ;;  %v6270_v29 = vrot.slane %v650_v45, 7 }
 0x1af   : > { %8526 = vst [vmem:[#allocation31_spill] sm:$0xff] %v6262_v61  ;;  %8529 = vst [vmem:[#allocation32_spill] sm:$0xff] %v6268_v23  ;;  %v6273_v30 = vpack.i.bf16 %v6249_v49, %v652_v40  ;;  %v1425_v9 = vrot.slane %v6249_v49, 1 }
 0x1b0   : > { %8530 = vst [vmem:[#allocation33_spill] sm:$0xff] %v6270_v29  ;;  %v1423_v35 = vrot.slane %v651_v60, 1  ;;  %v4603_v36 = vpop.f32.mrb[4].mxu0  ;;  %v6275_v41 = vpack.i.bf16 %v651_v60, %v650_v45  ;;  %v1482_v42 = vsel %vm8428_vm1, %v6155_v57, %v6260_v58  ;;  %v1230_v0 = vrot.slane %v651_v60, 7 }
 0x1b1   : > { %8531 = vst [vmem:[#allocation34_spill] sm:$0xff] %v6273_v30  ;;  %v548_v22 = vadd.f32 %v4603_v36, %v6196_v13  ;;  %4965 = vrot.lane.b32.xlu0 %v6273_v30, %s5768_s8  ;;  %v539_v40 = vpop.f32.mrb[5].mxu0  ;;  %v1582_v45 = vsel %vm6198_vm2, 0.0, %v1482_v42 }
 0x1b2   : > { %8532 = vst [vmem:[#allocation35_spill] sm:$0xff] %v6275_v41  ;;  %v540_v28 = vadd.f32 %v6196_v13, %v539_v40  ;;  %v4604_v7 = vpop.f32.mrb[6].mxu0  ;;  %4970 = vrot.lane.b32.xlu1 %v6275_v41, %s5768_s8  ;;  %v4974_v15 = vpack.i.bf16 %v1582_v45, %v6155_v57  ;;  %v1480_v60 = vsel %vm8428_vm1, %v1423_v35, %v6262_v61 }
 0x1b3   : > { %v1481_v36 = vsel %vm8428_vm1, %v6260_v58, %v1423_v35  ;;  %v6301_v12 = vmax.f32 %v548_v22, 0.0  ;;  %v551_v42 = vadd.f32 %v4604_v7, %v6196_v13  ;;  %v542_v47 = vpop.f32.mrb[7].mxu0  ;;  %v1584_v40 = vsel %vm6218_vm3, 0.0, %v1480_v60 }
 0x1b4   : > { %v2114_v63 = vsel %vm6198_vm2, 0.0, %v1480_v60  ;;  %v6308_v45 = vmax.f32 %v540_v28, 0.0  ;;  %v543_v3 = vadd.f32 %v6196_v13, %v542_v47  ;;  %v4979_v48 = vpack.i.bf16 %v1584_v40, %v1481_v36 }
 0x1b5   : > { %v6311_v44 = vpack.i.bf16 %v2114_v63, %v1481_v36  ;;  %v6313_v43 = vmax.f32 %v551_v42, 0.0  ;;  %4975 = vrot.lane.b32.xlu0 %v4974_v15, %s5769_s23  ;;  %v8352_v7 = vrot.slane %v6249_v49, 7  ;;  %v6320_v22 = vsel %vm8431_vm4, %v1230_v0, %v6268_v23 }
 0x1b6   : > { %8536 = vst [vmem:[#allocation37_spill] sm:$0xff] %v6320_v22  ;;  %v6323_v35 = vmax.f32 %v543_v3, 0.0  ;;  %4980 = vrot.lane.b32.xlu1 %v4979_v48, %s5769_s23  ;;  %v1426_v63 = vrot.slane %v6308_v45, 1  ;;  %v6336_v15 = vsel %vm8431_vm4, %v6270_v29, %v1230_v0  ;;  %v1428_v48 = vrot.slane %v6301_v12, 1 }
 0x1b7   : > { %8535 = vst [vmem:[#allocation36_spill] sm:$0xff] %v6311_v44  ;;  %8539 = vst [vmem:[#allocation38_spill] sm:$0xff] %v6336_v15  ;;  %v6341_v3 = vpack.i.bf16 %v6313_v43, %v6301_v12  ;;  %v1429_v36 = vrot.slane %v6313_v43, 1  ;;  %v6350_v62 = vsel %vm8431_vm4, %v6268_v23, %v8352_v7  ;;  %v1479_v40 = vsel %vm8428_vm1, %v6262_v61, %v1425_v9 }
 0x1b8   : > { %8541 = vst [vmem:[#allocation40_spill] sm:$0xff] %v6350_v62  ;;  %v4607_v16 = vpop.f32.mrb[8].mxu0  ;;  %v6354_v0 = vpack.i.bf16 %v6323_v35, %v6308_v45  ;;  %v1478_v42 = vsel %vm8428_vm1, %v1425_v9, %v1426_v63  ;;  %v1427_v28 = vrot.slane %v6323_v35, 1 }
 0x1b9   : > { %8540 = vst [vmem:[#allocation39_spill] sm:$0xff] %v6341_v3  ;;  %v564_v38 = vadd.f32 %v4607_v16, %v6196_v13  ;;  %v555_v37 = vpop.f32.mrb[9].mxu0  ;;  %4985 = vrot.lane.b32.xlu0 %v6341_v3, %s5768_s8  ;;  %v1586_v7 = vsel %vm6264_vm5, 0.0, %v1478_v42  ;;  %v6375_v9 = vsel %vm8428_vm1, %v1428_v48, %v1429_v36 }
 0x1ba   : > { %8542 = vst [vmem:[#allocation41_spill] sm:$0xff] %v6354_v0  ;;  %v556_v32 = vadd.f32 %v6196_v13, %v555_v37  ;;  %v4608_v2 = vpop.f32.mrb[10].mxu0  ;;  %4990 = vrot.lane.b32.xlu1 %v6354_v0, %s5768_s8  ;;  %v4994_v19 = vpack.i.bf16 %v1586_v7, %v1479_v40  ;;  %v1476_v16 = vsel %vm8428_vm1, %v1427_v28, %v1428_v48  ;;  %v3218_v37 = vsel %vm6198_vm2, 0.0, %v1478_v42 }
 0x1bb   : > { %v1477_v31 = vsel %vm8428_vm1, %v1426_v63, %v1427_v28  ;;  %v6384_v27 = vmax.f32 %v564_v38, 0.0  ;;  %v567_v26 = vadd.f32 %v4608_v2, %v6196_v13  ;;  %v558_v61 = vpop.f32.mrb[11].mxu0  ;;  %v1588_v15 = vsel %vm6282_vm6, 0.0, %v1476_v16 }
 0x1bc   : > { %v6391_v3 = vmax.f32 %v556_v32, 0.0  ;;  %v559_v7 = vadd.f32 %v6196_v13, %v558_v61  ;;  %v4999_v62 = vpack.i.bf16 %v1588_v15, %v1477_v31  ;;  %v6394_v48 = vpack.i.bf16 %v3218_v37, %v1479_v40 }
 0x1bd   : > { %v6396_v22 = vmax.f32 %v567_v26, 0.0  ;;  %4995 = vrot.lane.b32.xlu0 %v4994_v19, %s5769_s23  ;;  %v2116_v38 = vsel %vm6218_vm3, 0.0, %v1478_v42  ;;  %v3220_v28 = vsel %vm6218_vm3, 0.0, %v1476_v16  ;;  %v8547_v26 = vand.u32 15, %v6178_v5 }
 0x1be   : > { %8545 = vst [vmem:[#allocation42_spill] sm:$0xff] %v6394_v48  ;;  %v6406_v32 = vmax.f32 %v559_v7, 0.0  ;;  %5000 = vrot.lane.b32.xlu1 %v4999_v62, %s5769_s23  ;;  %v1430_v61 = vrot.slane %v6391_v3, 1  ;;  %v6416_v15 = vpack.i.bf16 %v2116_v38, %v1479_v40  ;;  %v6418_v42 = vpack.i.bf16 %v3220_v28, %v1477_v31 }
 0x1bf   : > { %vm6412_vm9 = vcmp.eq.s32.totalorder %v8547_v26, 15  ;;  %v6422_v24 = vpack.i.bf16 %v6396_v22, %v6384_v27  ;;  %v1432_v2 = vrot.slane %v6384_v27, 1  ;;  %v1433_v62 = vrot.slane %v6396_v22, 1 }
 0x1c0   : > { %8550 = vst [vmem:[#allocation44_spill] sm:$0xff] %v6416_v15  ;;  %8551 = vst [vmem:[#allocation45_spill] sm:$0xff] %v6418_v42  ;;  %v1234_v19 = vrot.slane %v6323_v35, 7  ;;  %v4611_v37 = vpop.f32.mrb[12].mxu0  ;;  %v6429_v5 = vpack.i.bf16 %v6406_v32, %v6391_v3  ;;  %v6433_v40 = vsel %vm8428_vm1, %v1429_v36, %v1430_v61  ;;  %v1431_v7 = vrot.slane %v6406_v32, 1 }
 0x1c1   : > { %8552 = vst [vmem:[#allocation46_spill] sm:$0xff] %v6422_v24  ;;  %v8554_v38 = vand.u32 15, %v6181_v6  ;;  %v580_v26 = vadd.f32 %v4611_v37, %v6196_v13  ;;  %v571_v35 = vpop.f32.mrb[13].mxu0  ;;  %5005 = vrot.lane.b32.xlu0 %v6422_v24, %s5768_s8  ;;  %v1590_v42 = vsel %vm6329_vm7, 0.0, %v6433_v40  ;;  %v6450_v36 = vsel %vm8428_vm1, %v1432_v2, %v1433_v62 }
 0x1c2   : > { %8553 = vst [vmem:[#allocation47_spill] sm:$0xff] %v6429_v5  ;;  %v572_v6 = vadd.f32 %v6196_v13, %v571_v35  ;;  %5010 = vrot.lane.b32.xlu1 %v6429_v5, %s5768_s8  ;;  %v5014_v37 = vpack.i.bf16 %v1590_v42, %v6375_v9  ;;  %v6458_v15 = vsel %vm8428_vm1, %v1431_v7, %v1432_v2  ;;  %v2118_v30 = vsel %vm6264_vm5, 0.0, %v1476_v16 }
 0x1c3   : > { %vm6438_vm10 = vcmp.eq.s32.totalorder %v8554_v38, 15  ;;  %v4612_v38 = vpop.f32.mrb[14].mxu0  ;;  %v6462_v24 = vsel %vm8428_vm1, %v1430_v61, %v1431_v7  ;;  %v6464_v48 = vmax.f32 %v580_v26, 0.0  ;;  %v1592_v35 = vsel %vm6364_vm8, 0.0, %v6458_v15 }
 0x1c4   : > { %v583_v0 = vadd.f32 %v4612_v38, %v6196_v13  ;;  %v574_v44 = vpop.f32.mrb[15].mxu0  ;;  %v6470_v5 = vmax.f32 %v572_v6, 0.0  ;;  %v5019_v2 = vpack.i.bf16 %v1592_v35, %v6462_v24  ;;  %v6479_v7 = vpack.i.bf16 %v2118_v30, %v1477_v31 }
 0x1c5   : > { %8557 = vst [vmem:[#allocation48_spill] sm:$0xff] %v6464_v48  ;;  %v575_v42 = vadd.f32 %v6196_v13, %v574_v44  ;;  %5015 = vrot.lane.b32.xlu0 %v5014_v37, %s5769_s23  ;;  %v1235_v26 = vrot.slane %v6301_v12, 7  ;;  %v8559_v44 = vand.u32 15, %v6190_v10  ;;  %v8560_v6 = vmov 0 }
 0x1c6   : > { %v6476_v61 = vmax.f32 %v583_v0, 0.0  ;;  %8558 = vst [vmem:[#allocation49_spill] sm:$0xff] %v6479_v7  ;;  %5020 = vrot.lane.b32.xlu1 %v5019_v2, %s5769_s23  ;;  %v1434_v0 = vrot.slane %v6470_v5, 1  ;;  %v1436_v16 = vrot.slane %v6464_v48, 1  ;;  %v1233_v10 = vrot.slane %v6308_v45, 7 }
 0x1c7   : > { %v6483_v41 = vmax.f32 %v575_v42, 0.0  ;;  %vm6488_vm11 = vcmp.eq.s32.totalorder %v8559_v44, 15  ;;  %v6502_v37 = vsel %vm8431_vm4, %v1234_v19, %v1235_v26  ;;  %v8565_v2 = vand.u32 15, %v6193_v11 }
 0x1c8   : > { %v8561_v6 = vsel %vm6488_vm11, 4294967295, %v8560_v6  ;;  %v6497_v12 = vpack.i.bf16 %v6476_v61, %v6464_v48  ;;  %v1437_v30 = vrot.slane %v6476_v61, 1  ;;  %8563 = vst [vmem:[#allocation51_spill] sm:$0xff] %v6502_v37  ;;  %v4615_v35 = vpop.f32.mrb[16].mxu0  ;;  %v8566_v44 = vmov 0 }
 0x1c9   : > { %8562 = vst [vmem:[#allocation50_spill] sm:$0xff] %v8561_v6  ;;  %v6507_v42 = vpack.i.bf16 %v6483_v41, %v6470_v5  ;;  %vm6511_vm12 = vcmp.eq.s32.totalorder %v8565_v2, 15  ;;  %v6517_v38 = vsel %vm8428_vm1, %v1433_v62, %v1434_v0  ;;  %v1435_v31 = vrot.slane %v6483_v41, 1  ;;  %v587_v4 = vpop.f32.mrb[17].mxu0 }
 0x1ca   : > { %v8567_v44 = vsel %vm6511_vm12, 4294967295, %v8566_v44  ;;  %v8569_v7 = vrot.slane %v6313_v43, 7  ;;  %v596_v37 = vadd.f32 %v4615_v35, %v6196_v13  ;;  %v1594_v11 = vsel %vm6412_vm9, 0.0, %v6517_v38  ;;  %v4616_v55 = vpop.f32.mrb[18].mxu0 }
 0x1cb   : > { %8564 = vst [vmem:[#allocation52_spill] sm:$0xff] %v6507_v42  ;;  %8568 = vst [vmem:[#allocation53_spill] sm:$0xff] %v8567_v44  ;;  %v6532_v2 = vsel %vm8428_vm1, %v1436_v16, %v1437_v30  ;;  %v6535_v62 = vadd.s32 176, %v6141_v51  ;;  %v588_v8 = vadd.f32 %v6196_v13, %v587_v4  ;;  %5025 = vrot.lane.b32.xlu1 %v6507_v42, %s5768_s8  ;;  %v590_v4 = vpop.f32.mrb[19].mxu0  ;;  %v8604_v44 = vand.u32 15, %v6215_v21 }
 0x1cc   : > { %v6524_v45 = vsel %vm8431_vm4, %v1235_v26, %v8569_v7  ;;  %8571 = vst [vmem:[#allocation55_spill] sm:$0xff] %v6532_v2  ;;  %v6541_v7 = vpack.i.bf16 %v1594_v11, %v6450_v36  ;;  %v6545_v26 = vsel %vm8428_vm1, %v1435_v31, %v1436_v16  ;;  %v6549_v35 = vsel %vm8428_vm1, %v1434_v0, %v1435_v31 }
 0x1cd   : > { %8570 = vst [vmem:[#allocation54_spill] sm:$0xff] %v6524_v45  ;;  %8572 = vst [vmem:[#allocation56_spill] sm:$0xff] %v6535_v62  ;;  %v6551_v45 = vmax.f32 %v596_v37, 0.0  ;;  %v599_v23 = vadd.f32 %v4616_v55, %v6196_v13  ;;  %v1596_v42 = vsel %vm6438_vm10, 0.0, %v6545_v26  ;;  %v6559_v11 = vsel %vm8431_vm4, %v1233_v10, %v1234_v19 }
 0x1ce   : > { %8573 = vst [vmem:[#allocation57_spill] sm:$0xff] %v6559_v11  ;;  %v6561_v29 = vmax.f32 %v588_v8, 0.0  ;;  %v591_v16 = vadd.f32 %v6196_v13, %v590_v4  ;;  %v6565_v0 = vpack.i.bf16 %v1596_v42, %v6549_v35  ;;  %v8574_v31 = vrot.slane %v6249_v49, 7 }
 0x1cf   : > { %v6573_v37 = vmax.f32 %v599_v23, 0.0  ;;  %v1440_v59 = vrot.slane %v6551_v45, 1  ;;  %v8576_v4 = vand.u32 15, %v6205_v17  ;;  %v8577_v42 = vmov 0 }
 0x1d0   : > { %v6571_v55 = vsel %vm8431_vm4, %v8574_v31, %v1233_v10  ;;  %v6577_v11 = vmax.f32 %v591_v16, 0.0  ;;  %v1438_v8 = vrot.slane %v6561_v29, 1  ;;  %v3222_v49 = vsel %vm6264_vm5, 0.0, %v6433_v40  ;;  %v5440_v31 = vld [vmem:[#allocation8 + $0xc] sm:$0xff]  }
 0x1d1   : > { %8575 = vst [vmem:[#allocation58_spill] sm:$0xff] %v6571_v55  ;;  %vm6582_vm13 = vcmp.eq.s32.totalorder %v8576_v4, 15  ;;  %v2120_v23 = vsel %vm6282_vm6, 0.0, %v6433_v40  ;;  %v6594_v10 = vpack.i.bf16 %v6573_v37, %v6551_v45  ;;  %v1441_v16 = vrot.slane %v6573_v37, 1  ;;  %v4619_v4 = vpop.f32.mrb[20].mxu0  ;;  %4771 = vmatprep.subr.bf16.mxu1 %v5440_v31  ;;  %4629 = vmatprep.subr.bf16.mxu0 %v5440_v31 }
 0x1d2   : > { %v8578_v42 = vsel %vm6582_vm13, 4294967295, %v8577_v42  ;;  %v6598_v17 = vpack.i.bf16 %v3222_v49, %v6375_v9  ;;  %v6602_v19 = vpack.i.bf16 %v6577_v11, %v6561_v29  ;;  %v1439_v1 = vrot.slane %v6577_v11, 1  ;;  %v603_v39 = vpop.f32.mrb[21].mxu0  ;;  %4773 = vmatpush3.bf16.msra.mxu1 %v5440_v31  ;;  %4630 = vmatpush3.bf16.msra.mxu0 %v5440_v31 }
 0x1d3   : > { %8579 = vst [vmem:[#allocation59_spill] sm:$0xff] %v8578_v42  ;;  %8580 = vst [vmem:[#allocation60_spill] sm:$0xff] %v6594_v10  ;;  %v6607_v40 = vsel %vm8428_vm1, %v1437_v30, %v1438_v8  ;;  %v6610_v55 = vadd.s32 192, %v6141_v51  ;;  %v612_v50 = vadd.f32 %v4619_v4, %v6196_v13  ;;  %5030 = vrot.lane.b32.xlu0 %v6594_v10, %s5768_s8  ;;  %v4620_v34 = vpop.f32.mrb[22].mxu0  ;;  %v8587_v10 = vand.u32 15, %v6208_v18 }
 0x1d4   : > { %8581 = vst [vmem:[#allocation61_spill] sm:$0xff] %v6598_v17  ;;  %8582 = vst [vmem:[#allocation62_spill] sm:$0xff] %v6602_v19  ;;  %v6617_v49 = vsel %vm8428_vm1, %v1440_v59, %v1441_v16  ;;  %v1598_v17 = vsel %vm6488_vm11, 0.0, %v6607_v40  ;;  %v604_v30 = vadd.f32 %v6196_v13, %v603_v39  ;;  %v6625_v48 = vsel %vm8428_vm1, %v1439_v1, %v1440_v59  ;;  %v606_v59 = vpop.f32.mrb[23].mxu0 }
 0x1d5   : > { %8583 = vst [vmem:[#allocation63_spill] sm:$0xff] %v6610_v55  ;;  %8584 = vst [vmem:[#allocation64_spill] sm:$0xff] %v6617_v49  ;;  %v6629_v4 = vsel %vm8428_vm1, %v1438_v8, %v1439_v1  ;;  %vm6633_vm14 = vcmp.eq.s32.totalorder %v8587_v10, 15  ;;  %v6638_v62 = vpack.i.bf16 %v1598_v17, %v6532_v2  ;;  %v6640_v39 = vmax.f32 %v612_v50, 0.0 }
 0x1d6   : > { %8585 = vst [vmem:[#allocation65_spill] sm:$0xff] %v6625_v48  ;;  %8586 = vst [vmem:[#allocation66_spill] sm:$0xff] %v6629_v4  ;;  %v8589_v53 = vsel %vm6633_vm14, 4294967295, %v8588_v53  ;;  %v615_v14 = vadd.f32 %v4620_v34, %v6196_v13  ;;  %v2130_v8 = vsel %vm6488_vm11, 0.0, %v6625_v48  ;;  %v1600_v18 = vsel %vm6511_vm12, 0.0, %v6625_v48 }
 0x1d7   : > { %8590 = vst [vmem:[#allocation67_spill] sm:$0xff] %v8589_v53  ;;  %8591 = vst [vmem:[#allocation68_spill] sm:$0xff] %v6638_v62  ;;  %v6649_v10 = vmax.f32 %v604_v30, 0.0  ;;  %v607_v17 = vadd.f32 %v6196_v13, %v606_v59  ;;  %v5039_v1 = vpack.i.bf16 %v2130_v8, %v6629_v4  ;;  %v6654_v50 = vpack.i.bf16 %v1600_v18, %v6629_v4 }
 0x1d8   : > { %v6656_v34 = vmax.f32 %v615_v14, 0.0  ;;  %5035 = vrot.lane.b32.xlu0 %v6602_v19, %s5768_s8  ;;  %v1444_v6 = vrot.slane %v6640_v39, 1  ;;  %v6662_v48 = vpack.i.bf16 %v2120_v23, %v6375_v9  ;;  %v3224_v30 = vsel %vm6282_vm6, 0.0, %v6458_v15 }
 0x1d9   : > { %8592 = vst [vmem:[#allocation69_spill] sm:$0xff] %v6654_v50  ;;  %v6668_v8 = vmax.f32 %v607_v17, 0.0  ;;  %5040 = vrot.lane.b32.xlu1 %v5039_v1, %s5769_s23  ;;  %v1442_v14 = vrot.slane %v6649_v10, 1  ;;  %v8594_v31 = vand.u32 15, %v6212_v20  ;;  %v8595_v18 = vmov 0  ;;  %v4623_v1 = vpop.f32.mrb[24].mxu0 }
 0x1da   : > { %8593 = vst [vmem:[#allocation70_spill] sm:$0xff] %v6662_v48  ;;  %v6679_v9 = vpack.i.bf16 %v3224_v30, %v6462_v24  ;;  %v6683_v46 = vpack.i.bf16 %v6656_v34, %v6640_v39  ;;  %v1445_v23 = vrot.slane %v6656_v34, 1  ;;  %v628_v30 = vadd.f32 %v4623_v1, %v6196_v13 }
 0x1db   : > { %vm6674_vm15 = vcmp.eq.s32.totalorder %v8594_v31, 15  ;;  %v6689_v59 = vpack.i.bf16 %v6668_v8, %v6649_v10  ;;  %v1443_v20 = vrot.slane %v6668_v8, 1  ;;  %v6694_v31 = vsel %vm8428_vm1, %v1441_v16, %v1442_v14 }
 0x1dc   : > { %v8596_v18 = vsel %vm6674_vm15, 4294967295, %v8595_v18  ;;  %8598 = vst [vmem:[#allocation72_spill] sm:$0xff] %v6679_v9  ;;  %8599 = vst [vmem:[#allocation73_spill] sm:$0xff] %v6683_v46  ;;  %v619_v9 = vpop.f32.mrb[25].mxu0  ;;  %v2132_v48 = vsel %vm6511_vm12, 0.0, %v6694_v31  ;;  %v6702_v17 = vsel %vm8428_vm1, %v1444_v6, %v1445_v23  ;;  %v1602_v50 = vsel %vm6582_vm13, 0.0, %v6694_v31 }
 0x1dd   : > { %8597 = vst [vmem:[#allocation71_spill] sm:$0xff] %v8596_v18  ;;  %8600 = vst [vmem:[#allocation74_spill] sm:$0xff] %v6689_v59  ;;  %v620_v4 = vadd.f32 %v6196_v13, %v619_v9  ;;  %v4624_v19 = vpop.f32.mrb[26].mxu0  ;;  %5050 = vrot.lane.b32.xlu0 %v6689_v59, %s5768_s8  ;;  %5045 = vrot.lane.b32.xlu1 %v6683_v46, %s5768_s8  ;;  %v6714_v16 = vsel %vm8428_vm1, %v1443_v20, %v1444_v6  ;;  %vm6722_vm2 = vcmp.eq.s32.totalorder %v8604_v44, 15  ;;  %vm8425_vm5 = vcmask 64512  }
 0x1de   : > { %8601 = vst [vmem:[#allocation75_spill] sm:$0xff] %v6694_v31  ;;  %8602 = vst [vmem:[#allocation76_spill] sm:$0xff] %v6714_v16  ;;  %v6718_v1 = vsel %vm8428_vm1, %v1442_v14, %v1443_v20  ;;  %v1239_v9 = vrot.slane %v6384_v27, 7  ;;  %v6727_v59 = vmax.f32 %v628_v30, 0.0  ;;  %v631_v46 = vadd.f32 %v4624_v19, %v6196_v13  ;;  %v622_v62 = vpop.f32.mrb[27].mxu0  ;;  %v8731_v31 = vld [vmem:[#allocation21_spill] sm:$0xff] }
 0x1df   : > { %8603 = vst [vmem:[#allocation77_spill] sm:$0xff] %v6718_v1  ;;  %v2134_v6 = vsel %vm6582_vm13, 0.0, %v6714_v16  ;;  %v5054_v14 = vpack.i.bf16 %v2132_v48, %v6617_v49  ;;  %v6734_v20 = vmax.f32 %v620_v4, 0.0  ;;  %v623_v21 = vadd.f32 %v6196_v13, %v622_v62 }
 0x1e0   : > { %v5059_v44 = vpack.i.bf16 %v2134_v6, %v6718_v1  ;;  %v6739_v2 = vpack.i.bf16 %v1602_v50, %v6617_v49  ;;  %v6741_v27 = vmax.f32 %v631_v46, 0.0  ;;  %v1448_v19 = vrot.slane %v6727_v59, 1 }
 0x1e1   : > { %v1604_v30 = vsel %vm6633_vm14, 0.0, %v6714_v16  ;;  %v8609_v42 = vrot.slane %v6396_v22, 7  ;;  %v6753_v62 = vmax.f32 %v623_v21, 0.0  ;;  %5055 = vrot.lane.b32.xlu1 %v5054_v14, %s5769_s23  ;;  %v1446_v4 = vrot.slane %v6734_v20, 1 }
 0x1e2   : > { %8607 = vst [vmem:[#allocation78_spill] sm:$0xff] %v6739_v2  ;;  %8608 = vst [vmem:[#allocation79_spill] sm:$0xff] %v6741_v27  ;;  %5060 = vrot.lane.b32.xlu0 %v5059_v44, %s5769_s23  ;;  %v8611_v50 = vand.u32 15, %v6223_v25  ;;  %v6765_v6 = vpack.i.bf16 %v1604_v30, %v6718_v1  ;;  %v6775_v14 = vpack.i.bf16 %v6741_v27, %v6727_v59  ;;  %v1449_v44 = vrot.slane %v6741_v27, 1 }
 0x1e3   : > { %v6751_v48 = vsel %vm8431_vm4, %v1239_v9, %v8609_v42  ;;  %v8615_v42 = vrot.slane %v6406_v32, 7  ;;  %v1447_v30 = vrot.slane %v6753_v62, 1  ;;  %v8620_v2 = vand.u32 15, %v6146_v54 }
 0x1e4   : > { %8610 = vst [vmem:[#allocation80_spill] sm:$0xff] %v6751_v48  ;;  %vm6760_vm3 = vcmp.eq.s32.totalorder %v8611_v50, 15  ;;  %8614 = vst [vmem:[#allocation81_spill] sm:$0xff] %v6765_v6  ;;  %v4627_v50 = vpop.f32.mrb[28].mxu0  ;;  %v6781_v48 = vpack.i.bf16 %v6753_v62, %v6734_v20  ;;  %v6786_v6 = vsel %vm8428_vm1, %v1445_v23, %v1446_v4  ;;  %v6794_v25 = vsel %vm8428_vm1, %v1448_v19, %v1449_v44 }
 0x1e5   : > { %v6771_v21 = vsel %vm8431_vm4, %v8615_v42, %v1239_v9  ;;  %8617 = vst [vmem:[#allocation83_spill] sm:$0xff] %v6775_v14  ;;  %8619 = vst [vmem:[#allocation85_spill] sm:$0xff] %v6786_v6  ;;  %v644_v9 = vadd.f32 %v4627_v50, %v6196_v13  ;;  %v635_v42 = vpop.f32.mrb[29].mxu0  ;;  %vm6798_vm6 = vcmp.eq.s32.totalorder %v8620_v2, 15  ;;  %v8621_v1 = vmov 0  ;;  %5065 = vrot.lane.b32.xlu1 %v6775_v14, %s5768_s8 }
 0x1e6   : > { %8616 = vst [vmem:[#allocation82_spill] sm:$0xff] %v6771_v21  ;;  %8618 = vst [vmem:[#allocation84_spill] sm:$0xff] %v6781_v48  ;;  %v2136_v21 = vsel %vm6633_vm14, 0.0, %v6786_v6  ;;  %v8622_v1 = vsel %vm6798_vm6, 4294967295, %v8621_v1  ;;  %v1606_v23 = vsel %vm6674_vm15, 0.0, %v6786_v6  ;;  %v636_v50 = vadd.f32 %v6196_v13, %v635_v42  ;;  %v4628_v16 = vpop.f32.mrb[30].mxu0  ;;  %5070 = vrot.lane.b32.xlu0 %v6781_v48, %s5768_s8 }
 0x1e7   : > { %8623 = vst [vmem:[#allocation86_spill] sm:$0xff] %v8622_v1  ;;  %v6812_v54 = vsel %vm8428_vm1, %v1447_v30, %v1448_v19  ;;  %v6816_v2 = vsel %vm8428_vm1, %v1446_v4, %v1447_v30  ;;  %v8624_v53 = vand.u32 15, %v6141_v51  ;;  %v8625_v6 = vmov 0  ;;  %v638_v49 = vpop.f32.mrb[31].mxu0 }
 0x1e8   : > { %v1237_v42 = vrot.slane %v6391_v3, 7  ;;  %v6825_v48 = vmax.f32 %v644_v9, 0.0  ;;  %v647_v14 = vadd.f32 %v4628_v16, %v6196_v13  ;;  %v2138_v19 = vsel %vm6674_vm15, 0.0, %v6812_v54 }
 0x1e9   : > { %vm6820_vm0 = vcmp.eq.s32.totalorder %v8624_v53, 0  ;;  %v5074_v4 = vpack.i.bf16 %v2136_v21, %v6702_v17  ;;  %v6832_v30 = vmax.f32 %v636_v50, 0.0  ;;  %v639_v53 = vadd.f32 %v6196_v13, %v638_v49 }
 0x1ea   : > { %v8626_v6 = vsel %vm6820_vm0, 4294967295, %v8625_v6  ;;  %v5079_v55 = vpack.i.bf16 %v2138_v19, %v6816_v2  ;;  %v6837_v27 = vpack.i.bf16 %v1606_v23, %v6702_v17  ;;  %v2079_v3 = vrot.slane %v6825_v48, 1 }
 0x1eb   : > { %8627 = vst [vmem:[#allocation87_spill] sm:$0xff] %v8626_v6  ;;  %v6840_v9 = vmax.f32 %v647_v14, 0.0  ;;  %v1608_v16 = vsel %vm6722_vm2, 0.0, %v6812_v54  ;;  %v6846_v18 = vadd.s32 208, %v6141_v51  ;;  %v679_v21 = vmax.f32 %v639_v53, 0.0  ;;  %5075 = vrot.lane.b32.xlu1 %v5074_v4, %s5769_s23 }
 0x1ec   : > { %8628 = vst [vmem:[#allocation88_spill] sm:$0xff] %v6837_v27  ;;  %5080 = vrot.lane.b32.xlu0 %v5079_v55, %s5769_s23  ;;  %v1450_v13 = vrot.slane %v6832_v30, 1  ;;  %v6852_v49 = vpack.i.bf16 %v1608_v16, %v6816_v2  ;;  %v8630_v14 = vrot.slane %v6406_v32, 7  ;;  %v8633_v55 = vrot.slane %v6313_v43, 7 }
 0x1ed   : > { %v6861_v50 = vrot.slane %v6840_v9, 1  ;;  %v6865_v19 = vpack.i.bf16 %v6840_v9, %v6825_v48  ;;  %v1241_v53 = vrot.slane %v6470_v5, 7  ;;  %v6874_v32 = vrot.slane %v679_v21, 7 }
 0x1ee   : > { %8629 = vst [vmem:[#allocation89_spill] sm:$0xff] %v6852_v49  ;;  %v6858_v23 = vsel %vm8431_vm4, %v1237_v42, %v8630_v14  ;;  %v6871_v4 = vsel %vm8431_vm4, %v8633_v55, %v1237_v42  ;;  %v6877_v16 = vpack.i.bf16 %v679_v21, %v6832_v30  ;;  %v1451_v14 = vrot.slane %v679_v21, 1 }
 0x1ef   : > { %8631 = vst [vmem:[#allocation90_spill] sm:$0xff] %v6858_v23  ;;  %8632 = vst [vmem:[#allocation91_spill] sm:$0xff] %v6865_v19  ;;  %v6881_v23 = vsel %vm8428_vm1, %v1449_v44, %v1450_v13  ;;  %v6889_v42 = vsel %vm8428_vm1, %v2079_v3, %v6861_v50  ;;  %v2112_v5 = vsel %vm8428_vm1, %v6861_v50, %v6260_v58  ;;  %5085 = vrot.lane.b32.xlu1 %v6865_v19, %s5768_s8  ;;  %v8655_v1 = vmov 0 }
 0x1f0   : > { %8634 = vst [vmem:[#allocation92_spill] sm:$0xff] %v6871_v4  ;;  %8635 = vst [vmem:[#allocation93_spill] sm:$0xff] %v6877_v16  ;;  %v2140_v43 = vsel %vm6722_vm2, 0.0, %v6881_v23  ;;  %v1610_v21 = vsel %vm6760_vm3, 0.0, %v6881_v23  ;;  %v1291_v44 = vsel %vm8431_vm4, %v6874_v32, %v6152_v56  ;;  %5090 = vrot.lane.b32.xlu0 %v6877_v16, %s5768_s8  ;;  %v6908_v55 = vsel %vm8428_vm1, %v1450_v13, %v1451_v14 }
 0x1f1   : > { %v6912_v58 = vsel %vm8428_vm1, %v1451_v14, %v2079_v3  ;;  %v2144_v49 = vsel %vm6798_vm6, 0.0, %v2112_v5  ;;  %v1388_v4 = vsel %vm6820_vm0, 0.0, %v1291_v44  ;;  %v5094_v19 = vpack.i.bf16 %v2140_v43, %v6794_v25 }
 0x1f2   : > { %v2142_v16 = vsel %vm6760_vm3, 0.0, %v6912_v58  ;;  %v5099_v27 = vpack.i.bf16 %v2144_v49, %v6889_v42  ;;  %v8636_v13 = vunpack.i.l.bf16 %v6231_v33  ;;  %v6930_v5 = vpack.i.bf16 %v1610_v21, %v6794_v25 }
 0x1f3   : > { %v5104_v3 = vpack.i.bf16 %v2142_v16, %v6908_v55  ;;  %v1484_v44 = vsel %vm8428_vm1, %v1451_v14, %v6155_v57  ;;  %5095 = vrot.lane.b32.xlu1 %v5094_v19, %s5769_s23  ;;  %v8637_v16 = vrot.slane %v6396_v22, 7  ;;  %v1246_v21 = vrot.slane %v6577_v11, 7 }
 0x1f4   : > { %v6926_v56 = vsel %vm8425_vm5, %v1388_v4, %v8636_v13  ;;  %v1612_v49 = vsel %vm6798_vm6, 0.0, %v1484_v44  ;;  %v8426_v4 = vrot.slane %v6483_v41, 7  ;;  %v2122_v19 = vsel %vm6329_vm7, 0.0, %v6458_v15 }
 0x1f5   : > { %5105 = vrot.lane.b32.xlu0 %v5104_v3, %s5769_s23  ;;  %v6945_v43 = vsel %vm8431_vm4, %v8637_v16, %v1241_v53  ;;  %v6949_v14 = vpack.i.bf16 %v1612_v49, %v6908_v55  ;;  %v6961_v22 = vpack.i.bf16 %v2122_v19, %v6462_v24  ;;  %v2124_v11 = vsel %vm6364_vm8, 0.0, %v6517_v38 }
 0x1f6   : > { %8638 = vst [vmem:[#allocation94_spill] sm:$0xff] %v6945_v43  ;;  %v6958_v13 = vsel %vm8431_vm4, %v1241_v53, %v8426_v4  ;;  %v3226_v3 = vsel %vm6329_vm7, 0.0, %v6517_v38  ;;  %v6970_v44 = vpack.i.bf16 %v2124_v11, %v6450_v36  ;;  %v1247_v53 = vrot.slane %v6551_v45, 7 }
 0x1f7   : > { %8639 = vst [vmem:[#allocation95_spill] sm:$0xff] %v6958_v13  ;;  %v6973_v15 = vpack.i.bf16 %v3226_v3, %v6450_v36  ;;  %v1248_v49 = vrot.slane %v6573_v37, 7  ;;  %5100 = vrot.lane.b32.xlu1 %v5099_v27, %s5769_s23  ;;  %v3228_v47 = vsel %vm6364_vm8, 0.0, %v6545_v26  ;;  %v1249_v45 = vrot.slane %v6649_v10, 7  ;;  %v5441_v3 = vld [vmem:[#allocation8 + $0x14] ss:$0 sps:$4 sm:$0xff]  }
 0x1f8   : > { %v6989_v36 = vsel %vm8431_vm4, %v1246_v21, %v1247_v53  ;;  %v6992_v38 = vpack.i.bf16 %v3228_v47, %v6549_v35  ;;  %v1250_v37 = vrot.slane %v6668_v8, 7  ;;  %v1251_v60 = vrot.slane %v6640_v39, 7 }
 0x1f9   : > { %5110 = vrot.lane.b32.xlu0 %v6541_v7, %s5769_s23  ;;  %v6985_v24 = vsel %vm8431_vm4, %v1247_v53, %v1248_v49  ;;  %v8427_v7 = vrot.slane %v6476_v61, 7  ;;  %v1252_v27 = vrot.slane %v6656_v34, 7  ;;  %v7001_v16 = vsel %vm8431_vm4, %v1248_v49, %v1249_v45 }
 0x1fa   : > { %v2126_v19 = vsel %vm6412_vm9, 0.0, %v6545_v26  ;;  %v1245_v11 = vrot.slane %v6561_v29, 7  ;;  %v7013_v39 = vsel %vm8431_vm4, %v1249_v45, %v1250_v37  ;;  %v7021_v26 = vsel %vm8431_vm4, %v1250_v37, %v1251_v60  ;;  %v7051_v37 = vld [vmem:[#allocation8] sm:$0xff]  }
 0x1fb   : > { %5115 = vrot.lane.b32.xlu1 %v6565_v0, %s5769_s23  ;;  %8640 = vst [vmem:[#allocation96_spill] sm:$0xff] %v7013_v39  ;;  %v7017_v10 = vsel %vm8431_vm4, %v1251_v60, %v1252_v27  ;;  %v711_v29 = vadd.s32 224, %v6141_v51  ;;  %v7025_v34 = vpack.i.bf16 %v2126_v19, %v6549_v35  ;;  %v713_v53 = vadd.s32 240, %v6141_v51  ;;  %v8645_v60 = vld [vmem:[#allocation43_spill] sm:$0xff]  ;;  %v8667_v39 = vld [vmem:[#allocation65_spill] sm:$0xff] }
 0x1fc   : > { %8641 = vst [vmem:[#allocation97_spill] sm:$0xff] %v7017_v10  ;;  %v7029_v0 = vsel %vm8431_vm4, %v1245_v11, %v1246_v21  ;;  %v7035_v8 = vsel %vm8431_vm4, %v8427_v7, %v1245_v11  ;;  %v1983_v49 = vrot.slane %v6825_v48, 7  ;;  %v7040_v47 = vrot.slane %v6840_v9, 7  ;;  %v8649_v9 = vld [vmem:[#allocation55_spill] sm:$0xff]  ;;  %v8653_v7 = vld [vmem:[#allocation56_spill] sm:$0xff] }
 0x1fd   : > { %5120 = vrot.lane.b32.xlu0 %v6497_v12, %s5768_s8  ;;  %v8642_v35 = vand.u32 15, %v6255_v52  ;;  %vm8432_vm8 = vcmask 1043456   ;;  %v2128_v21 = vsel %vm6438_vm10, 0.0, %v6607_v40  ;;  %v8646_v19 = vand.u32 15, %v8645_v60  ;;  %v8651_v60 = vld [vmem:[#allocation68_spill] sm:$0xff] }
 0x1fe   : > { %v8647_v48 = vmov 0  ;;  %4840 = vmatprep.subr.msk.bf16.mxu1 %vm8432_vm8, %v5441_v3  ;;  %v2545_v52 = vsel %vm8432_vm8, %v5441_v3, 0  ;;  %v7062_v11 = vpack.i.bf16 %v2128_v21, %v8649_v9  ;;  %v1253_v4 = vrot.slane %v6734_v20, 7  ;;  %4839 = vmatprep.subr.msk.bf16.mxu0 %vm8432_vm8, %v5441_v3  ;;  %v8657_v21 = vld [vmem:[#allocation30_spill] sm:$0xff] }
 0x1ff   : > { %vm7044_vm7 = vcmp.eq.s32.totalorder %v8642_v35, 0  ;;  %vm7055_vm5 = vcmp.eq.s32.totalorder %v8646_v19, 0  ;;  %v3230_v35 = vsel %vm6412_vm9, 0.0, %v6607_v40  ;;  %v8652_v19 = vld [vmem:[#allocation62_spill] sm:$0xff]  ;;  %v8654_v6 = vand.u32 15, %v8653_v7  ;;  %4774 = vmatpush3.bf16.msra.mxu1 %v2545_v52  ;;  %v8663_v7 = vld [vmem:[#allocation63_spill] sm:$0xff]  ;;  %4632 = vmatpush3.bf16.msra.mxu0 %v2545_v52 }
 0x200   : > { %v8648_v48 = vsel %vm7055_vm5, 4294967295, %v8647_v48  ;;  %8650 = vst [vmem:[#allocation43_spill] sm:$0xff] %v7062_v11  ;;  %5125 = vrot.lane.b32.xlu1 %v8652_v19, %s5768_s8  ;;  %v8658_v10 = vand.u32 15, %v8657_v21  ;;  %v7086_v40 = vpack.i.bf16 %v3230_v35, %v8649_v9  ;;  %v1254_v20 = vrot.slane %v6753_v62, 7  ;;  %v8668_v62 = vld [vmem:[#allocation75_spill] sm:$0xff]  ;;  %4665 = vmatprep.subr.bf16.mxu1 %v7051_v37 }
 0x201   : > { %5130 = vrot.lane.b32.xlu0 %v8651_v60, %s5769_s23  ;;  %vm7075_vm1 = vcmp.eq.s32.totalorder %v8654_v6, 0  ;;  %v1255_v3 = vrot.slane %v6727_v59, 7  ;;  %v8661_v60 = vld [vmem:[#allocation79_spill] sm:$0xff]  ;;  %vm8662_vm9 = vcmp.lt.s32.totalorder %v6141_v51, 1  ;;  %v8664_v21 = vand.u32 15, %v8663_v7 }
 0x202   : > { %v8656_v1 = vsel %vm7075_vm1, 4294967295, %v8655_v1  ;;  %vm7081_vm4 = vcmp.eq.s32.totalorder %v8658_v10, 0  ;;  %v1256_v11 = vrot.slane %v8661_v60, 7  ;;  %v7093_v6 = vsel %vm8662_vm9, %v1252_v27, %v1253_v4  ;;  %vm8670_vm6 = vmmov %vm8662_vm9 }
 0x203   : > { %vm7097_vm8 = vcmp.eq.s32.totalorder %v8664_v21, 0  ;;  %v3232_v9 = vsel %vm6438_vm10, 0.0, %v8667_v39  ;;  %v3234_v59 = vsel %vm6488_vm11, 0.0, %v8668_v62  ;;  %v7109_v60 = vsel %vm8670_vm6, %v1253_v4, %v1254_v20  ;;  %vm8672_vm9 = vmmov %vm8670_vm6  ;;  %v8675_v39 = vld [vmem:[#allocation66_spill] sm:$0xff]  ;;  %v8676_v62 = vld [vmem:[#allocation64_spill] sm:$0xff] }
 0x204   : > { %8671 = vst [vmem:[#allocation55_spill] sm:$0xff] %v7109_v60  ;;  %v7113_v27 = vsel %vm8672_vm9, %v1255_v3, %v1256_v11  ;;  %vm8674_vm0 = vmmov %vm8670_vm6  ;;  %v915_v28 = vand.u32 15, %v711_v29  ;;  %v7121_v21 = vpack.i.bf16 %v3232_v9, %v8675_v39  ;;  %v7124_v52 = vpack.i.bf16 %v3234_v59, %v8676_v62  ;;  %v8678_v4 = vld [vmem:[#allocation60_spill] sm:$0xff]  ;;  %v8679_v60 = vld [vmem:[#allocation69_spill] sm:$0xff] }
 0x205   : > { %8673 = vst [vmem:[#allocation68_spill] sm:$0xff] %v7113_v27  ;;  %v7117_v7 = vsel %vm8674_vm0, %v1254_v20, %v1255_v3  ;;  %v929_v35 = vand.u32 15, %v713_v53  ;;  %5140 = vrot.lane.b32.xlu0 %v8678_v4, %s5768_s8  ;;  %5135 = vrot.lane.b32.xlu1 %v8679_v60, %s5769_s23  ;;  %v1257_v27 = vrot.slane %v6832_v30, 7  ;;  %v7134_v20 = vsel %vm8674_vm0, %v1983_v49, %v7040_v47  ;;  %vm8681_vm10 = vmmov %vm8674_vm0  ;;  %v8686_v9 = vld [vmem:[#allocation76_spill] sm:$0xff]  ;;  %v8688_v60 = vld [vmem:[#allocation85_spill] sm:$0xff] }
 0x206   : > { %8677 = vst [vmem:[#allocation62_spill] sm:$0xff] %v7124_v52  ;;  %8680 = vst [vmem:[#allocation56_spill] sm:$0xff] %v7134_v20  ;;  %v7139_v29 = vsel %vm8681_vm10, %v6874_v32, %v1983_v49  ;;  %v8683_v53 = vand.u32 15, %v6846_v18  ;;  %v8684_v3 = vmov 0  ;;  %v3236_v30 = vsel %vm6511_vm12, 0.0, %v8686_v9  ;;  %v8692_v49 = vld [vmem:[#allocation77_spill] sm:$0xff] }
 0x207   : > { %8682 = vst [vmem:[#allocation30_spill] sm:$0xff] %v7139_v29  ;;  %v3238_v62 = vsel %vm6582_vm13, 0.0, %v8688_v60  ;;  %vm8690_vm6 = vmmov %vm8674_vm0  ;;  %vm7168_vm12 = vcmp.eq.s32.totalorder %v915_v28, 0  ;;  %v8694_v9 = vmov 0  ;;  %vm7172_vm13 = vcmp.eq.s32.totalorder %v929_v35, 0  ;;  %v8703_v28 = vld [vmem:[#allocation48_spill] sm:$0xff] }
 0x208   : > { %vm7143_vm11 = vcmp.eq.s32.totalorder %v8683_v53, 0  ;;  %v7156_v20 = vsel %vm8690_vm6, %v1257_v27, %v6874_v32  ;;  %vm8691_vm9 = vmmov %vm8674_vm0  ;;  %v7163_v53 = vpack.i.bf16 %v3236_v30, %v8692_v49  ;;  %v7166_v52 = vpack.i.bf16 %v3238_v62, %v6702_v17  ;;  %v8717_v35 = vld [vmem:[#allocation28_spill] sm:$0xff] }
 0x209   : > { %v8685_v3 = vsel %vm7143_vm11, 4294967295, %v8684_v3  ;;  %v7160_v18 = vsel %vm8691_vm9, %v1256_v11, %v1257_v27  ;;  %v8695_v9 = vsel %vm7168_vm12, 4294967295, %v8694_v9  ;;  %v8696_v59 = vmov 0  ;;  %v8700_v11 = vld [vmem:[#allocation78_spill] sm:$0xff]  ;;  %vm8729_vm10 = vmmov %vm8674_vm0 }
 0x20a   : > { %8693 = vst [vmem:[#allocation79_spill] sm:$0xff] %v7166_v52  ;;  %v8697_v59 = vsel %vm7172_vm13, 4294967295, %v8696_v59  ;;  %v3240_v60 = vsel %vm6633_vm14, 0.0, %v6812_v54  ;;  %5150 = vrot.lane.b32.xlu0 %v8700_v11, %s5769_s23  ;;  %v8701_v27 = vld [vmem:[#allocation74_spill] sm:$0xff]  ;;  %v1243_v30 = vrot.slane %v8703_v28, 7  ;;  %v3242_v39 = vsel %vm6674_vm15, 0.0, %v6881_v23  ;;  %vm8707_vm14 = vmmov %vm8674_vm0 }
 0x20b   : > { %8698 = vst [vmem:[#allocation63_spill] sm:$0xff] %v8697_v59  ;;  %5145 = vrot.lane.b32.xlu1 %v8701_v27, %s5768_s8  ;;  %v7184_v17 = vpack.i.bf16 %v3240_v60, %v6816_v2  ;;  %v7191_v62 = vpack.i.bf16 %v3242_v39, %v6794_v25  ;;  %v3244_v49 = vsel %vm6722_vm2, 0.0, %v6912_v58  ;;  %v8706_v2 = vrot.slane %v6476_v61, 7  ;;  %vm8710_vm15 = vmmov %vm8674_vm0  ;;  %v8713_v58 = vld [vmem:[#allocation27_spill] sm:$0xff]  ;;  %v8715_v28 = vld [vmem:[#allocation73_spill] sm:$0xff] }
 0x20c   : > { %v8709_v60 = vrot.slane %v6483_v41, 7  ;;  %v7212_v23 = vpack.i.bf16 %v3244_v49, %v6908_v55  ;;  %v803_v11 = vand.u32 15, %v8713_v58  ;;  %vm8714_vm2 = vcmp.lt.s32.totalorder %v6141_v51, 7 }
 0x20d   : > { %8702 = vst [vmem:[#allocation65_spill] sm:$0xff] %v7184_v17  ;;  %8705 = vst [vmem:[#allocation75_spill] sm:$0xff] %v7191_v62  ;;  %v7203_v32 = vsel %vm8707_vm14, %v1243_v30, %v8706_v2  ;;  %v3186_v41 = vsel %vm8714_vm2, %v6861_v50, %v6155_v57  ;;  %v789_v39 = vand.u32 15, %v8717_v35  ;;  %v8722_v2 = vmov 0  ;;  %v8725_v50 = vld [vmem:[#allocation33_spill] sm:$0xff]  ;;  %v8743_v57 = vld [vmem:[#allocation58_spill] sm:$0xff] }
 0x20e   : > { %8708 = vst [vmem:[#allocation50_spill] sm:$0xff] %v7203_v32  ;;  %v7209_v25 = vsel %vm8710_vm15, %v8709_v60, %v1243_v30  ;;  %8712 = vst [vmem:[#allocation64_spill] sm:$0xff] %v7212_v23  ;;  %5160 = vrot.lane.b32.xlu0 %v8715_v28, %s5768_s8  ;;  %v8716_v30 = vld [vmem:[#allocation81_spill] sm:$0xff]  ;;  %v3246_v49 = vsel %vm6760_vm3, 0.0, %v3186_v41  ;;  %v8720_v41 = vld [vmem:[#allocation24_spill] sm:$0xff]  ;;  %v8732_v46 = vand.u32 15, %v8731_v31 }
 0x20f   : > { %8711 = vst [vmem:[#allocation66_spill] sm:$0xff] %v7209_v25  ;;  %5155 = vrot.lane.b32.xlu1 %v8716_v30, %s5769_s23  ;;  %v8718_v60 = vld [vmem:[#allocation29_spill] sm:$0xff]  ;;  %v7243_v55 = vpack.i.bf16 %v3246_v49, %v6889_v42  ;;  %v8721_v35 = vand.u32 15, %v8720_v41  ;;  %v7261_v42 = vsel %vm8674_vm0, %v7040_v47, %v8725_v50  ;;  %v8727_v49 = vld [vmem:[#allocation32_spill] sm:$0xff]  ;;  %v8733_v41 = vmov 0  ;;  %v8763_v25 = vld [vmem:[#allocation83_spill] sm:$0xff] }
 0x210   : > { %v817_v58 = vand.u32 15, %v8718_v60  ;;  %8726 = vst [vmem:[#allocation76_spill] sm:$0xff] %v7261_v42  ;;  %v8728_v60 = vld [vmem:[#allocation22_spill] sm:$0xff]  ;;  %vm7271_vm6 = vcmp.eq.s32.totalorder %v8732_v46, 0  ;;  %v8738_v61 = vmov 0  ;;  %v8744_v31 = vld [vmem:[#allocation88_spill] sm:$0xff] }
 0x211   : > { %8719 = vst [vmem:[#allocation60_spill] sm:$0xff] %v7243_v55  ;;  %vm7253_vm3 = vcmp.eq.s32.totalorder %v8721_v35, 0  ;;  %v7267_v30 = vsel %vm8729_vm10, %v8728_v60, %v8727_v49  ;;  %v8734_v41 = vsel %vm7271_vm6, 4294967295, %v8733_v41  ;;  %v8736_v35 = vld [vmem:[#allocation26_spill] sm:$0xff]  ;;  %v8745_v46 = vld [vmem:[#allocation84_spill] sm:$0xff]  ;;  %v8746_v23 = vld [vmem:[#allocation25_spill] sm:$0xff] }
 0x212   : > { %v8723_v2 = vsel %vm7253_vm3, 4294967295, %v8722_v2  ;;  %8730 = vst [vmem:[#allocation53_spill] sm:$0xff] %v7267_v30  ;;  %8735 = vst [vmem:[#allocation85_spill] sm:$0xff] %v8734_v41  ;;  %v8737_v54 = vand.u32 15, %v8736_v35  ;;  %5170 = vrot.lane.b32.xlu0 %v8744_v31, %s5769_s23  ;;  %v8747_v35 = vand.u32 15, %v8746_v23  ;;  %vm7297_vm2 = vcmp.eq.s32.totalorder %v789_v39, 0 }
 0x213   : > { %8724 = vst [vmem:[#allocation69_spill] sm:$0xff] %v8723_v2  ;;  %5165 = vrot.lane.b32.xlu1 %v8745_v46, %s5768_s8  ;;  %v8751_v32 = vmov 0  ;;  %v8754_v55 = vld [vmem:[#allocation51_spill] sm:$0xff]  ;;  %v8755_v30 = vld [vmem:[#allocation92_spill] sm:$0xff]  ;;  %vm7307_vm0 = vcmp.eq.s32.totalorder %v803_v11, 0  ;;  %v8756_v42 = vmov 0 }
 0x214   : > { %vm7277_vm9 = vcmp.eq.s32.totalorder %v8737_v54, 0  ;;  %vm7293_vm15 = vcmp.eq.s32.totalorder %v8747_v35, 0  ;;  %v8748_v54 = vmov 0  ;;  %v8752_v32 = vsel %vm7297_vm2, 4294967295, %v8751_v32  ;;  %v8762_v39 = vld [vmem:[#allocation82_spill] sm:$0xff]  ;;  %v8768_v35 = vld [vmem:[#allocation35_spill] sm:$0xff] }
 0x215   : > { %v8739_v61 = vsel %vm7277_vm9, 4294967295, %v8738_v61  ;;  %v8749_v54 = vsel %vm7293_vm15, 4294967295, %v8748_v54  ;;  %8753 = vst [vmem:[#allocation67_spill] sm:$0xff] %v8752_v32  ;;  %v8757_v42 = vsel %vm7307_vm0, 4294967295, %v8756_v42  ;;  %vm7311_vm10 = vcmp.eq.s32.totalorder %v817_v58, 0  ;;  %v8764_v58 = vld [vmem:[#allocation89_spill] sm:$0xff] }
 0x216   : > { %8740 = vst [vmem:[#allocation59_spill] sm:$0xff] %v8739_v61  ;;  %8750 = vst [vmem:[#allocation77_spill] sm:$0xff] %v8749_v54  ;;  %v8759_v23 = vmov 0  ;;  %5180 = vrot.lane.b32.xlu0 %v8763_v25, %s5768_s8  ;;  %vm8765_vm14 = vcmp.lt.s32.totalorder %v6141_v51, 1  ;;  %v8769_v49 = vld [vmem:[#allocation34_spill] sm:$0xff]  ;;  %v8771_v11 = vld [vmem:[#allocation41_spill] sm:$0xff] }
 0x217   : > { %8758 = vst [vmem:[#allocation78_spill] sm:$0xff] %v8757_v42  ;;  %v8760_v23 = vsel %vm7311_vm10, 4294967295, %v8759_v23  ;;  %5175 = vrot.lane.b32.xlu1 %v8764_v58, %s5769_s23  ;;  %v7356_v31 = vsel %vm8765_vm14, %v7040_v47, %v8728_v60  ;;  %v8767_v58 = vld [vmem:[#allocation93_spill] sm:$0xff]  ;;  %v8770_v47 = vld [vmem:[#allocation36_spill] sm:$0xff]  ;;  %vm8776_vm13 = vcmask 64512  }
 0x218   : > { %8761 = vst [vmem:[#allocation74_spill] sm:$0xff] %v8760_v23  ;;  %8766 = vst [vmem:[#allocation48_spill] sm:$0xff] %v7356_v31  ;;  %v8773_v31 = vld [vmem:[#allocation44_spill] sm:$0xff]  ;;  %v8775_v17 = vld [vmem:[#allocation37_spill] sm:$0xff] }
 0x219   : > { %vm8778_vm12 = vmmov %vm8776_vm13 }
 0x21a   : > { %5190 = vrot.lane.b32.xlu0 %v6930_v5, %s5769_s23  ;;  %v8772_v5 = vld [vmem:[#allocation42_spill] sm:$0xff] }
 0x21b   : > { %5185 = vrot.lane.b32.xlu1 %v8767_v58, %s5768_s8  ;;  %v4963_v58 = vunpack.i.h.bf16 %v6231_v33 }
 0x21e   : > { %5195 = vrot.lane.b32.xlu0 %v8768_v35, %s5768_s8  ;;  %v8774_v35 = vld [vmem:[#allocation45_spill] sm:$0xff] }
 0x21f   : > { %5200 = vrot.lane.b32.xlu1 %v8769_v49, %s5768_s8 }
 0x222   : > { %5205 = vrot.lane.b32.xlu0 %v8769_v49, %s5768_s8  ;;  %v1289_v49 = vsel %vm8765_vm14, %v8728_v60, %v8725_v50  ;;  %vm8780_vm14 = vmmov %vm8778_vm12 }
 0x223   : > { %5210 = vrot.lane.b32.xlu1 %v8770_v47, %s5769_s23  ;;  %v4966_v62 = vpop.permute.xlu0 %4965  ;;  %v1390_v52 = vsel %vm7253_vm3, 0.0, %v1289_v49  ;;  %v1871_v50 = vsel %vm8780_vm14, %v8728_v60, %v4963_v58 }
 0x224   : > { %v4968_v47 = vunpack.i.h.bf16 %v4966_v62  ;;  %v4967_v59 = vunpack.i.l.bf16 %v4966_v62  ;;  %v4971_v29 = vpop.permute.xlu1 %4970  ;;  %v8779_v62 = vld [vmem:[#allocation39_spill] sm:$0xff] }
 0x225   : > { %v4973_v25 = vunpack.i.h.bf16 %v4971_v29 }
 0x226   : > { %5215 = vrot.lane.b32.xlu0 %v8771_v11, %s5768_s8 }
 0x227   : > { %5220 = vrot.lane.b32.xlu1 %v8772_v5, %s5769_s23  ;;  %v1392_v5 = vsel %vm7271_vm6, 0.0, %v8775_v17  ;;  %vm8781_vm6 = vmmov %vm8778_vm12 }
 0x228   : > { %v1874_v46 = vsel %vm8776_vm13, %v1392_v5, %v4967_v59  ;;  %vm8783_vm11 = vmmov %vm8781_vm6  ;;  %v4976_v5 = vpop.permute.xlu0 %4975 }
 0x229   : > { %v4978_v17 = vunpack.i.h.bf16 %v4976_v5 }
 0x22a   : > { %5225 = vrot.lane.b32.xlu0 %v8773_v31, %s5769_s23  ;;  %v4972_v31 = vunpack.i.l.bf16 %v4971_v29  ;;  %v8782_v29 = vld [vmem:[#allocation38_spill] sm:$0xff] }
 0x22b   : > { %5230 = vrot.lane.b32.xlu1 %v8774_v35, %s5769_s23  ;;  %v8777_v35 = vld [vmem:[#allocation40_spill] sm:$0xff]  ;;  %v1873_v59 = vsel %vm8783_vm11, %v8782_v29, %v4973_v25  ;;  %v8789_v25 = vld [vmem:[#allocation54_spill] sm:$0xff] }
 0x22c   : > { %v1875_v33 = vsel %vm8778_vm12, %v8777_v35, %v4968_v47  ;;  %v1872_v41 = vsel %vm8781_vm6, %v1390_v52, %v4972_v31  ;;  %v4977_v47 = vunpack.i.l.bf16 %v4976_v5  ;;  %v4981_v35 = vpop.permute.xlu1 %4980  ;;  %vm8784_vm12 = vcmask 130048   ;;  %v8786_v52 = vld [vmem:[#allocation49_spill] sm:$0xff]  ;;  %v8797_v29 = vld [vmem:[#allocation70_spill] sm:$0xff] }
 0x22d   : > { %v4983_v2 = vunpack.i.h.bf16 %v4981_v35  ;;  %v4982_v49 = vunpack.i.l.bf16 %v4981_v35  ;;  %v7404_v51 = vsel %vm8784_vm12, %v1871_v50, %v4978_v17  ;;  %vm8785_vm13 = vmmov %vm8784_vm12  ;;  %v4986_v17 = vpop.permute.xlu0 %4985 }
 0x22e   : > { %5235 = vrot.lane.b32.xlu0 %v8771_v11, %s5768_s8  ;;  %v7408_v11 = vsel %vm8785_vm13, %v6926_v56, %v4977_v47  ;;  %vm8787_vm11 = vmmov %vm8784_vm12  ;;  %v4988_v35 = vunpack.i.h.bf16 %v4986_v17  ;;  %v4987_v50 = vunpack.i.l.bf16 %v4986_v17  ;;  %v8792_v17 = vld [vmem:[#allocation61_spill] sm:$0xff] }
 0x22f   : > { %5240 = vrot.lane.b32.xlu1 %v8779_v62, %s5768_s8  ;;  %v7417_v58 = vsel %vm8787_vm11, %v1872_v41, %v4982_v49  ;;  %vm8788_vm6 = vmmov %vm8787_vm11  ;;  %v8793_v56 = vld [vmem:[#allocation57_spill] sm:$0xff] }
 0x230   : > { %v7420_v31 = vsel %vm8788_vm6, %v1873_v59, %v4983_v2  ;;  %v4991_v5 = vpop.permute.xlu1 %4990  ;;  %v1879_v41 = vsel %vm8780_vm14, %v8789_v25, %v4988_v35  ;;  %vm8790_vm12 = vmmov %vm8780_vm14  ;;  %v1394_v2 = vsel %vm7277_vm9, 0.0, %v8743_v57  ;;  %v8791_v59 = vld [vmem:[#allocation47_spill] sm:$0xff] }
 0x231   : > { %v4993_v47 = vunpack.i.h.bf16 %v4991_v5  ;;  %vm8794_vm13 = vmmov %vm8790_vm12  ;;  %v4996_v54 = vpop.permute.xlu0 %4995 }
 0x232   : > { %5245 = vrot.lane.b32.xlu0 %v8779_v62, %s5768_s8  ;;  %v1396_v62 = vsel %vm7293_vm15, 0.0, %v8754_v55  ;;  %vm8795_vm11 = vmmov %vm8790_vm12  ;;  %v4998_v55 = vunpack.i.h.bf16 %v4996_v54  ;;  %v4997_v35 = vunpack.i.l.bf16 %v4996_v54 }
 0x233   : > { %5250 = vrot.lane.b32.xlu1 %v8786_v52, %s5769_s23  ;;  %v4992_v52 = vunpack.i.l.bf16 %v4991_v5  ;;  %v1878_v49 = vsel %vm8790_vm12, %v1396_v62, %v4987_v50  ;;  %v1877_v60 = vsel %vm8794_vm13, %v8793_v56, %v4993_v47  ;;  %vm8796_vm14 = vmmov %vm8788_vm6  ;;  %v8801_v47 = vld [vmem:[#allocation80_spill] sm:$0xff] }
 0x234   : > { %v5001_v25 = vpop.permute.xlu1 %5000  ;;  %v7441_v61 = vsel %vm8788_vm6, %v1875_v33, %v4998_v55  ;;  %v7444_v57 = vsel %vm8796_vm14, %v1874_v46, %v4997_v35  ;;  %vm8799_vm12 = vmmov %vm8788_vm6 }
 0x235   : > { %v1876_v5 = vsel %vm8795_vm11, %v1394_v2, %v4992_v52  ;;  %v5003_v50 = vunpack.i.h.bf16 %v5001_v25  ;;  %v5002_v62 = vunpack.i.l.bf16 %v5001_v25  ;;  %vm8800_vm13 = vmmov %vm8788_vm6  ;;  %v5006_v55 = vpop.permute.xlu0 %5005 }
 0x236   : > { %5255 = vrot.lane.b32.xlu0 %v8791_v59, %s5768_s8  ;;  %v5008_v33 = vunpack.i.h.bf16 %v5006_v55  ;;  %v5007_v52 = vunpack.i.l.bf16 %v5006_v55  ;;  %vm8802_vm6 = vmmov %vm8795_vm11 }
 0x237   : > { %5260 = vrot.lane.b32.xlu1 %v8792_v17, %s5769_s23  ;;  %v8798_v17 = vld [vmem:[#allocation72_spill] sm:$0xff]  ;;  %v7453_v54 = vsel %vm8799_vm12, %v1876_v5, %v5002_v62  ;;  %v7456_v25 = vsel %vm8800_vm13, %v1877_v60, %v5003_v50  ;;  %v1398_v50 = vsel %vm7297_vm2, 0.0, %v8755_v30  ;;  %v8803_v62 = vld [vmem:[#allocation90_spill] sm:$0xff]  ;;  %vm8804_vm14 = vmmov %vm8802_vm6 }
 0x238   : > { %v5011_v2 = vpop.permute.xlu1 %5010  ;;  %v7465_v5 = vsel %vm8795_vm11, %v8801_v47, %v5008_v33  ;;  %vm8805_vm12 = vmmov %vm8802_vm6 }
 0x239   : > { %v5013_v35 = vunpack.i.h.bf16 %v5011_v2  ;;  %v5016_v33 = vpop.permute.xlu0 %5015  ;;  %vm8806_vm11 = vmmov %vm8800_vm13 }
 0x23a   : > { %5265 = vrot.lane.b32.xlu0 %v8797_v29, %s5769_s23  ;;  %v1400_v29 = vsel %vm7307_vm0, 0.0, %v8762_v39  ;;  %v5018_v46 = vunpack.i.h.bf16 %v5016_v33  ;;  %v5017_v42 = vunpack.i.l.bf16 %v5016_v33  ;;  %v8810_v33 = vld [vmem:[#allocation52_spill] sm:$0xff] }
 0x23b   : > { %5270 = vrot.lane.b32.xlu1 %v8798_v17, %s5769_s23  ;;  %v5012_v17 = vunpack.i.l.bf16 %v5011_v2  ;;  %v7468_v60 = vsel %vm8802_vm6, %v1400_v29, %v5007_v52  ;;  %v1881_v55 = vsel %vm8804_vm14, %v8803_v62, %v5013_v35  ;;  %vm8808_vm6 = vmmov %vm8806_vm11 }
 0x23c   : > { %v5021_v52 = vpop.permute.xlu1 %5020  ;;  %v7481_v32 = vsel %vm8800_vm13, %v1878_v49, %v5017_v42  ;;  %v7484_v39 = vsel %vm8806_vm11, %v1879_v41, %v5018_v46  ;;  %vm8809_vm14 = vmmov %vm8808_vm6 }
 0x23d   : > { %v1880_v2 = vsel %vm8805_vm12, %v1398_v50, %v5012_v17  ;;  %v5023_v29 = vunpack.i.h.bf16 %v5021_v52  ;;  %v5022_v47 = vunpack.i.l.bf16 %v5021_v52  ;;  %v1402_v50 = vsel %vm7311_vm10, 0.0, %v6945_v43  ;;  %vm8811_vm13 = vmmov %vm8805_vm12 }
 0x23e   : > { %5275 = vrot.lane.b32.xlu0 %v8791_v59, %s5768_s8  ;;  %v8807_v59 = vld [vmem:[#allocation46_spill] sm:$0xff]  ;;  %vm8812_vm11 = vmmov %vm8805_vm12 }
 0x23f   : > { %5280 = vrot.lane.b32.xlu1 %v6949_v14, %s5769_s23  ;;  %v7493_v35 = vsel %vm8808_vm6, %v1880_v2, %v5022_v47  ;;  %v7496_v17 = vsel %vm8809_vm14, %v1881_v55, %v5023_v29  ;;  %vm8813_vm6 = vmmov %vm8812_vm11 }
 0x240   : > { %v5026_v41 = vpop.permute.xlu1 %5025 }
 0x241   : > { %v5028_v49 = vunpack.i.h.bf16 %v5026_v41  ;;  %v5027_v46 = vunpack.i.l.bf16 %v5026_v41 }
 0x242   : > { %5290 = vrot.lane.b32.xlu0 %v8807_v59, %s5768_s8 }
 0x243   : > { %5285 = vrot.lane.b32.xlu1 %v8807_v59, %s5768_s8  ;;  %v7509_v47 = vsel %vm8805_vm12, %v6958_v13, %v5028_v49  ;;  %v7512_v55 = vsel %vm8811_vm13, %v1402_v50, %v5027_v46  ;;  %vm8814_vm12 = vmmov %vm8809_vm14  ;;  %vm8480_vm13 = vcmask 195584  }
 0x245   : > { %v5031_v2 = vpop.permute.xlu0 %5030 }
 0x246   : > { %5300 = vrot.lane.b32.xlu0 %v8810_v33, %s5768_s8  ;;  %v5032_v14 = vunpack.i.l.bf16 %v5031_v2 }
 0x247   : > { %5295 = vrot.lane.b32.xlu1 %v6961_v22, %s5769_s23 }
 0x24a   : > { %5310 = vrot.lane.b32.xlu0 %v6970_v44, %s5769_s23  ;;  %v5036_v22 = vpop.permute.xlu0 %5035  ;;  %v2033_v44 = vsel %vm7081_vm4, 0.0, %v7035_v8 }
 0x24b   : > { %5305 = vrot.lane.b32.xlu1 %v6973_v15, %s5769_s23  ;;  %v5038_v52 = vunpack.i.h.bf16 %v5036_v22  ;;  %v5037_v29 = vunpack.i.l.bf16 %v5036_v22  ;;  %v5041_v59 = vpop.permute.xlu1 %5040 }
 0x24c   : > { %v5043_v41 = vunpack.i.h.bf16 %v5041_v59  ;;  %v5042_v49 = vunpack.i.l.bf16 %v5041_v59 }
 0x24d   : > { %v2417_v15 = vsel %vm8812_vm11, %v2033_v44, %v5037_v29  ;;  %vm8815_vm11 = vmmov %vm8813_vm6 }
 0x24e   : > { %5320 = vrot.lane.b32.xlu0 %v8810_v33, %s5768_s8  ;;  %v2449_v46 = vsel %vm8809_vm14, %v2417_v15, %v5042_v49  ;;  %v5033_v33 = vunpack.i.h.bf16 %v5031_v2  ;;  %v2037_v2 = vsel %vm7055_vm5, 0.0, %v7001_v16  ;;  %vm8817_vm14 = vmmov %vm8813_vm6 }
 0x24f   : > { %5315 = vrot.lane.b32.xlu1 %v6992_v38, %s5769_s23  ;;  %v2418_v38 = vsel %vm8813_vm6, %v7029_v0, %v5038_v52  ;;  %v5051_v22 = vpop.permute.xlu0 %5050  ;;  %v5046_v59 = vpop.permute.xlu1 %5045 }
 0x250   : > { %v2450_v50 = vsel %vm8814_vm12, %v2418_v38, %v5043_v41  ;;  %v5053_v23 = vunpack.i.h.bf16 %v5051_v22  ;;  %v5052_v43 = vunpack.i.l.bf16 %v5051_v22  ;;  %v2420_v52 = vsel %vm8815_vm11, %v6985_v24, %v5033_v33  ;;  %vm8818_vm12 = vmmov %vm8813_vm6 }
 0x251   : > { %v2473_v42 = vpack.c.bf16 %v2450_v50, %v2449_v46  ;;  %v8819_v50 = vld [vmem:[#allocation43_spill] sm:$0xff]  ;;  %vm8820_vm11 = vcmask 130048  }
 0x252   : > { %5330 = vrot.lane.b32.xlu0 %v6497_v12, %s5768_s8  ;;  %v2421_v46 = vsel %vm8818_vm12, %v2037_v2, %v5052_v43  ;;  %vm8822_vm10 = vmmov %vm8820_vm11  ;;  %v5443_v43 = vld [vmem:[#allocation8 + $0x8] ss:$0 sps:$4 sm:$0xff]   ;;  %v5047_v2 = vunpack.i.l.bf16 %v5046_v59 }
 0x253   : > { %5325 = vrot.lane.b32.xlu1 %v6497_v12, %s5768_s8  ;;  %4649 = vmatprep.mubr.msk.bf16.mxu1 %vm8480_vm13, %v2473_v42  ;;  %v2035_v12 = vsel %vm7044_vm7, 0.0, %v6989_v36  ;;  %v5056_v41 = vpop.permute.xlu1 %5055  ;;  %v8816_v42 = vld [vmem:[#allocation96_spill] sm:$0xff]  ;;  %vm8821_vm13 = vmmov %vm8820_vm11 }
 0x254   : > { %v5061_v29 = vpop.permute.xlu0 %5060  ;;  %v5058_v44 = vunpack.i.h.bf16 %v5056_v41  ;;  %v5057_v15 = vunpack.i.l.bf16 %v5056_v41  ;;  %v2422_v38 = vsel %vm8817_vm14, %v8816_v42, %v5053_v23  ;;  %vm8823_vm0 = vmmov %vm8822_vm10 }
 0x255   : > { %v5063_v49 = vunpack.i.h.bf16 %v5061_v29 }
 0x256   : > { %5340 = vrot.lane.b32.xlu0 %v8652_v19, %s5768_s8  ;;  %v5062_v19 = vunpack.i.l.bf16 %v5061_v29  ;;  %v2452_v29 = vsel %vm8822_vm10, %v2420_v52, %v5058_v44  ;;  %v8825_v52 = vld [vmem:[#allocation97_spill] sm:$0xff] }
 0x257   : > { %5335 = vrot.lane.b32.xlu1 %v7025_v34, %s5769_s23  ;;  %v2419_v34 = vsel %vm8813_vm6, %v2035_v12, %v5032_v14  ;;  %v2454_v22 = vsel %vm8821_vm13, %v2422_v38, %v5063_v49  ;;  %v5048_v14 = vunpack.i.h.bf16 %v5046_v59  ;;  %v5066_v30 = vpop.permute.xlu1 %5065  ;;  %vm8824_vm13 = vcmask 195584   ;;  %v7576_v38 = vld [vmem:[#allocation8 + $0x18] sm:$0xff]  }
 0x258   : > { %v2453_v33 = vsel %vm8820_vm11, %v2421_v46, %v5062_v19  ;;  %v2451_v41 = vsel %vm8823_vm0, %v2419_v34, %v5057_v15  ;;  %v5071_v23 = vpop.permute.xlu0 %5070  ;;  %vm8826_vm0 = vmmov %vm8813_vm6  ;;  %v2041_v59 = vsel %vm7097_vm8, 0.0, %v7093_v6  ;;  %vm8828_vm6 = vcmask 1043456  }
 0x259   : > { %v2475_v12 = vpack.c.bf16 %v2454_v22, %v2453_v33  ;;  %v2474_v13 = vpack.c.bf16 %v2452_v29, %v2451_v41  ;;  %v5073_v62 = vunpack.i.h.bf16 %v5071_v23  ;;  %v2424_v49 = vsel %vm8826_vm0, %v8825_v52, %v5048_v14  ;;  %vm8827_vm10 = vmmov %vm8824_vm13  ;;  %v8831_v33 = vld [vmem:[#allocation55_spill] sm:$0xff]  ;;  %v8834_v29 = vld [vmem:[#allocation62_spill] sm:$0xff] }
 0x25a   : > { %5350 = vrot.lane.b32.xlu0 %v8819_v50, %s5769_s23  ;;  %v5072_v50 = vunpack.i.l.bf16 %v5071_v23  ;;  %vm8829_vm14 = vmmov %vm8828_vm6 }
 0x25b   : > { %5345 = vrot.lane.b32.xlu1 %v7086_v40, %s5769_s23  ;;  %4650 = vmatmul.mubr.msk.bf16.vlgmr.msra.gmra.mrb[0].mxu1 %vm8824_vm13, %v2474_v13  ;;  %v2039_v40 = vsel %vm7075_vm1, 0.0, %v7021_v26  ;;  %vm8830_vm12 = vmmov %vm8826_vm0 }
 0x25c   : > { %4666 = vmatpush3.bf16.msra.mxu1 %v7051_v37  ;;  %4653 = vmatprep.mubr.msk.bf16.mxu1 %vm8827_vm10, %v2475_v12  ;;  %v2423_v46 = vsel %vm8830_vm12, %v2039_v40, %v5047_v2  ;;  %vm8832_vm11 = vmmov %vm8826_vm0  ;;  %vm8839_vm12 = vcmask 195584  }
 0x25d   : > { %v5076_v19 = vpop.permute.xlu1 %5075  ;;  %4841 = vmatprep.subr.msk.bf16.mxu1 %vm8829_vm14, %v5443_v43  ;;  %v2426_v22 = vsel %vm8832_vm11, %v8831_v33, %v5073_v62  ;;  %vm8833_vm13 = vmmov %vm8826_vm0  ;;  %vm8835_vm0 = vcmask 130048   ;;  %vm8840_vm11 = vnez %v8685_v3 }
 0x25e   : > { %5360 = vrot.lane.b32.xlu0 %v8678_v4, %s5768_s8  ;;  %v5081_v4 = vpop.permute.xlu0 %5080  ;;  %v5078_v15 = vunpack.i.h.bf16 %v5076_v19  ;;  %v5077_v34 = vunpack.i.l.bf16 %v5076_v19  ;;  %v2425_v37 = vsel %vm8833_vm13, %v2041_v59, %v5072_v50  ;;  %vm8836_vm10 = vmmov %vm8835_vm0  ;;  %v5067_v50 = vunpack.i.l.bf16 %v5066_v30 }
 0x25f   : > { %5355 = vrot.lane.b32.xlu1 %v7121_v21, %s5769_s23  ;;  %v2766_v21 = vsel %vm8828_vm6, %v5443_v43, 0  ;;  %v5083_v13 = vunpack.i.h.bf16 %v5081_v4  ;;  %v5082_v44 = vunpack.i.l.bf16 %v5081_v4  ;;  %vm8837_vm6 = vmmov %vm8835_vm0  ;;  %v5068_v43 = vunpack.i.h.bf16 %v5066_v30 }
 0x260   : > { %v2455_v12 = vsel %vm8837_vm6, %v2423_v46, %v5077_v34  ;;  %vm8838_vm14 = vmmov %vm8835_vm0  ;;  %4668 = vmatpush3.bf16.msra.mxu1 %v2766_v21 }
 0x261   : > { %v2457_v41 = vsel %vm8835_vm0, %v2425_v37, %v5082_v44  ;;  %v2458_v14 = vsel %vm8836_vm10, %v2426_v22, %v5083_v13  ;;  %v2456_v23 = vsel %vm8838_vm14, %v2424_v49, %v5078_v15  ;;  %v5086_v4 = vpop.permute.xlu1 %5085  ;;  %4701 = vmatprep.subr.bf16.mxu1 %v7576_v38  ;;  %v8841_v49 = vld [vmem:[#allocation68_spill] sm:$0xff]  ;;  %vm8842_vm0 = vnez %v8695_v9  ;;  %vm8843_vm10 = vmmov %vm8839_vm12 }
 0x262   : > { %5370 = vrot.lane.b32.xlu0 %v8834_v29, %s5769_s23  ;;  %v2477_v2 = vpack.c.bf16 %v2458_v14, %v2457_v41  ;;  %v2476_v40 = vpack.c.bf16 %v2456_v23, %v2455_v12  ;;  %v5091_v62 = vpop.permute.xlu0 %5090  ;;  %v2428_v21 = vsel %vm8833_vm13, %v8841_v49, %v5068_v43  ;;  %v2045_v30 = vsel %vm8842_vm0, 0.0, %v7160_v18  ;;  %vm8844_vm6 = vmmov %vm8833_vm13  ;;  %v8847_v29 = vld [vmem:[#allocation79_spill] sm:$0xff]  ;;  %v8848_v41 = vld [vmem:[#allocation84_spill] sm:$0xff] }
 0x263   : > { %5365 = vrot.lane.b32.xlu1 %v8701_v27, %s5768_s8  ;;  %v5093_v59 = vunpack.i.h.bf16 %v5091_v62  ;;  %v5092_v19 = vunpack.i.l.bf16 %v5091_v62  ;;  %v2043_v27 = vsel %vm8840_vm11, 0.0, %v7117_v7  ;;  %vm8845_vm14 = vmmov %vm8844_vm6  ;;  %vm8849_vm13 = vcmask 130048   ;;  %v9094_v9 = vld [vmem:[#allocation48_spill] sm:$0xff] }
 0x264   : > { %4654 = vmatmul.mubr.msk.bf16.gmra.mrb[4].mxu1 %vm8839_vm12, %v2476_v40  ;;  %v2427_v46 = vsel %vm8844_vm6, %v2043_v27, %v5067_v50  ;;  %vm8846_vm12 = vmmov %vm8844_vm6  ;;  %vm8856_vm6 = vcmask 195584  }
 0x265   : > { %4657 = vmatprep.mubr.msk.bf16.mxu1 %vm8843_vm10, %v2477_v2  ;;  %v2430_v22 = vsel %vm8845_vm14, %v7156_v20, %v5093_v59  ;;  %v2429_v37 = vsel %vm8846_vm12, %v2045_v30, %v5092_v19  ;;  %vm8850_vm10 = vmmov %vm8849_vm13  ;;  %v5088_v59 = vunpack.i.h.bf16 %v5086_v4  ;;  %v5087_v19 = vunpack.i.l.bf16 %v5086_v4  ;;  %v8857_v4 = vld [vmem:[#allocation30_spill] sm:$0xff] }
 0x266   : > { %5380 = vrot.lane.b32.xlu0 %v8715_v28, %s5768_s8  ;;  %v5096_v28 = vpop.permute.xlu1 %5095  ;;  %vm8851_vm2 = vmmov %vm8850_vm10 }
 0x267   : > { %5375 = vrot.lane.b32.xlu1 %v7163_v53, %s5769_s23  ;;  %v5106_v13 = vpop.permute.xlu0 %5105  ;;  %v5098_v53 = vunpack.i.h.bf16 %v5096_v28  ;;  %v5097_v34 = vunpack.i.l.bf16 %v5096_v28  ;;  %vm8852_vm15 = vmmov %vm8851_vm2 }
 0x268   : > { %v5108_v44 = vunpack.i.h.bf16 %v5106_v13  ;;  %v5107_v15 = vunpack.i.l.bf16 %v5106_v13  ;;  %vm8860_vm12 = vmmov %vm8856_vm6 }
 0x269   : > { %v2459_v23 = vsel %vm8851_vm2, %v2427_v46, %v5097_v34  ;;  %v2460_v43 = vsel %vm8852_vm15, %v2428_v21, %v5098_v53  ;;  %vm8855_vm15 = vmmov %vm8851_vm2  ;;  %v8858_v53 = vld [vmem:[#allocation63_spill] sm:$0xff] }
 0x26a   : > { %5390 = vrot.lane.b32.xlu0 %v8847_v29, %s5769_s23  ;;  %v2461_v14 = vsel %vm8849_vm13, %v2429_v37, %v5107_v15  ;;  %v2462_v12 = vsel %vm8850_vm10, %v2430_v22, %v5108_v44  ;;  %v2478_v40 = vpack.c.bf16 %v2460_v43, %v2459_v23  ;;  %v5101_v50 = vpop.permute.xlu1 %5100  ;;  %v8853_v29 = vld [vmem:[#allocation83_spill] sm:$0xff]  ;;  %v8854_v15 = vld [vmem:[#allocation65_spill] sm:$0xff]  ;;  %vm8859_vm14 = vnez %v8858_v53 }
 0x26b   : > { %5385 = vrot.lane.b32.xlu1 %v8848_v41, %s5768_s8  ;;  %v2479_v2 = vpack.c.bf16 %v2462_v12, %v2461_v14  ;;  %v5111_v62 = vpop.permute.xlu0 %5110  ;;  %v5103_v13 = vunpack.i.h.bf16 %v5101_v50  ;;  %v5102_v28 = vunpack.i.l.bf16 %v5101_v50  ;;  %v2047_v34 = vsel %vm8859_vm14, 0.0, %v8857_v4  ;;  %v8861_v41 = vld [vmem:[#allocation56_spill] sm:$0xff]  ;;  %v8865_v50 = vld [vmem:[#allocation75_spill] sm:$0xff] }
 0x26c   : > { %v5113_v27 = vunpack.i.h.bf16 %v5111_v62  ;;  %v5112_v30 = vunpack.i.l.bf16 %v5111_v62  ;;  %4658 = vmatmul.mubr.msk.bf16.gmra.mrb[8].mxu1 %vm8856_vm6, %v2478_v40  ;;  %vm8862_vm13 = vcmask 64512   ;;  %vm8867_vm6 = vmmov %vm8851_vm2 }
 0x26d   : > { %4661 = vmatprep.mubr.msk.bf16.mxu1 %vm8860_vm12, %v2479_v2  ;;  %vm8863_vm10 = vmmov %vm8862_vm13  ;;  %v8866_v2 = vld [vmem:[#allocation93_spill] sm:$0xff] }
 0x26e   : > { %5400 = vrot.lane.b32.xlu0 %v8853_v29, %s5768_s8  ;;  %v7623_v44 = vsel %vm8851_vm2, %v7468_v60, %v5112_v30  ;;  %v7627_v21 = vsel %vm8855_vm15, %v7465_v5, %v5113_v27  ;;  %v5116_v37 = vpop.permute.xlu1 %5115  ;;  %v2432_v60 = vsel %vm8862_vm13, %v8861_v41, %v5088_v59  ;;  %v2431_v14 = vsel %vm8863_vm10, %v2047_v34, %v5087_v19  ;;  %vm8864_vm15 = vmmov %vm8851_vm2  ;;  %v8869_v34 = vld [vmem:[#allocation50_spill] sm:$0xff] }
 0x26f   : > { %5395 = vrot.lane.b32.xlu1 %v8854_v15, %s5769_s23  ;;  %v1940_v46 = vpack.c.bf16 %v7627_v21, %v7623_v44  ;;  %v5121_v22 = vpop.permute.xlu0 %5120  ;;  %v5118_v5 = vunpack.i.h.bf16 %v5116_v37  ;;  %v5117_v12 = vunpack.i.l.bf16 %v5116_v37  ;;  %v2463_v23 = vsel %vm8851_vm2, %v2431_v14, %v5102_v28  ;;  %vm8868_vm12 = vmmov %vm8851_vm2  ;;  %v8871_v37 = vld [vmem:[#allocation66_spill] sm:$0xff]  ;;  %v8874_v14 = vld [vmem:[#allocation64_spill] sm:$0xff] }
 0x270   : > { %v2464_v43 = vsel %vm8864_vm15, %v2432_v60, %v5103_v13  ;;  %v5123_v40 = vunpack.i.h.bf16 %v5121_v22  ;;  %v5122_v62 = vunpack.i.l.bf16 %v5121_v22  ;;  %vm8870_vm13 = vmmov %vm8863_vm10  ;;  %v8905_v44 = vsel %vm7055_vm5, 0.0, %v6989_v36 }
 0x271   : > { %v7647_v27 = vsel %vm8867_vm6, %v7512_v55, %v5117_v12  ;;  %v7651_v59 = vsel %vm8868_vm12, %v7509_v47, %v5118_v5  ;;  %v2480_v28 = vpack.c.bf16 %v2464_v43, %v2463_v23  ;;  %v8872_v55 = vsel %vm7081_vm4, 0.0, %v8871_v37  ;;  %v8873_v47 = vld [vmem:[#allocation91_spill] sm:$0xff]  ;;  %v8877_v23 = vld [vmem:[#allocation20_spill] sm:$0xff]  ;;  %vm8879_vm15 = vmmov %vm8867_vm6 }
 0x272   : > { %5410 = vrot.lane.b32.xlu0 %v8865_v50, %s5769_s23  ;;  %v5126_v13 = vpop.permute.xlu1 %5125  ;;  %v1887_v22 = vsel %vm8870_vm13, %v8869_v34, %v5123_v40  ;;  %v1886_v60 = vsel %vm8863_vm10, %v8872_v55, %v5122_v62  ;;  %v8875_v5 = vld [vmem:[#allocation31_spill] sm:$0xff]  ;;  %vm8878_vm2 = vcmp.lt.s32.totalorder %v8877_v23, 7  ;;  %vm8880_vm12 = vcmask 195584  }
 0x273   : > { %5405 = vrot.lane.b32.xlu1 %v8866_v2, %s5768_s8  ;;  %v5131_v30 = vpop.permute.xlu0 %5130  ;;  %v8876_v12 = vld [vmem:[#allocation23_spill] sm:$0xff]  ;;  %v8881_v2 = vpack.c.bf16 %v7404_v51, %v7408_v11  ;;  %vm8882_vm13 = vmmov %vm8880_vm12  ;;  %v8887_v51 = vpack.c.bf16 %v7420_v31, %v7417_v58  ;;  %v8889_v11 = vpack.c.bf16 %v7441_v61, %v7444_v57  ;;  %v8893_v31 = vpack.c.bf16 %v7456_v25, %v7453_v54 }
 0x274   : > { %v5133_v29 = vunpack.i.h.bf16 %v5131_v30  ;;  %v5132_v15 = vunpack.i.l.bf16 %v5131_v30  ;;  %v3216_v43 = vsel %vm8878_vm2, %v8876_v12, %v8875_v5  ;;  %4662 = vmatmul.mubr.msk.bf16.gmra.mrb[12].mxu1 %vm8880_vm12, %v2480_v28  ;;  %v5445_v5 = vld [vmem:[#allocation8 + $0x20] ss:$0 sps:$4 sm:$0xff]   ;;  %vm8888_vm2 = vmmov %vm8880_vm12  ;;  %v8895_v57 = vpack.c.bf16 %v7484_v39, %v7481_v32 }
 0x275   : > { %4669 = vmatprep.mubr.msk.bf16.mxu1 %vm8882_vm13, %v8881_v2  ;;  %vm8894_vm13 = vmmov %vm8888_vm2  ;;  %v8899_v39 = vsel %vm7044_vm7, 0.0, %v7035_v8 }
 0x276   : > { %5415 = vrot.lane.b32.xlu0 %v8873_v47, %s5768_s8  ;;  %v7671_v50 = vsel %vm8879_vm15, %v1886_v60, %v5132_v15  ;;  %v7674_v40 = vsel %vm8867_vm6, %v1887_v22, %v5133_v29  ;;  %v8883_v47 = vld [vmem:[#allocation86_spill] sm:$0xff]  ;;  %v8885_v15 = vld [vmem:[#allocation60_spill] sm:$0xff]  ;;  %v8886_v29 = vmov 0.0   ;;  %vm8890_vm15 = vmmov %vm8888_vm2  ;;  %vm8891_vm6 = vcmask 1043456  }
 0x277   : > { %5420 = vrot.lane.b32.xlu1 %v8874_v14, %s5769_s23  ;;  %v5141_v30 = vpop.permute.xlu0 %5140  ;;  %v5136_v55 = vpop.permute.xlu1 %5135  ;;  %vm8884_vm10 = vnez %v8883_v47  ;;  %vm8892_vm12 = vmmov %vm8891_vm6  ;;  %v5128_v47 = vunpack.i.h.bf16 %v5126_v13 }
 0x278   : > { %v3248_v14 = vsel %vm8884_vm10, 0.0, %v3216_v43  ;;  %vm8896_vm10 = vmmov %vm8888_vm2  ;;  %v5143_v54 = vunpack.i.h.bf16 %v5141_v30  ;;  %v5142_v25 = vunpack.i.l.bf16 %v5141_v30 }
 0x279   : > { %v5434_v60 = vpack.i.bf16 %v3248_v14, %v8876_v12  ;;  %v3647_v12 = vsel %vm8892_vm12, %v5445_v5, 0  ;;  %v5127_v14 = vunpack.i.l.bf16 %v5126_v13  ;;  %vm8901_vm12 = vmmov %vm8888_vm2 }
 0x27a   : > { %5430 = vrot.lane.b32.xlu0 %v8885_v15, %s5769_s23 }
 0x27b   : > { %5425 = vrot.lane.b32.xlu1 %v8886_v29, %s5768_s8 }
 0x27c   : > { %v5151_v28 = vpop.permute.xlu0 %5150  ;;  %4670 = vmatmul.mubr.msk.bf16.vlgmr.msra.gmra.mrb[16].mxu1 %vm8888_vm2, %v8887_v51  ;;  %v8897_v51 = vpack.c.bf16 %v7496_v17, %v7493_v35 }
 0x27d   : > { %v5146_v22 = vpop.permute.xlu1 %5145  ;;  %4702 = vmatpush3.bf16.msra.mxu1 %v7576_v38  ;;  %4673 = vmatprep.mubr.msk.bf16.mxu1 %vm8890_vm15, %v8889_v11  ;;  %vm8898_vm15 = vcmask 64512   ;;  %v5153_v11 = vunpack.i.h.bf16 %v5151_v28 }
 0x27e   : > { %4842 = vmatprep.subr.msk.bf16.mxu1 %vm8891_vm6, %v5445_v5  ;;  %v5137_v5 = vunpack.i.l.bf16 %v5136_v55  ;;  %v1889_v32 = vsel %vm8898_vm15, %v7029_v0, %v5128_v47  ;;  %vm8900_vm6 = vmmov %vm8898_vm15 }
 0x27f   : > { %5435 = vrot.lane.b32.xlu1 %v5434_v60, %s5769_s23  ;;  %v5138_v60 = vunpack.i.h.bf16 %v5136_v55  ;;  %v1888_v13 = vsel %vm8900_vm6, %v8899_v39, %v5127_v14  ;;  %v8911_v39 = vld [vmem:[#allocation76_spill] sm:$0xff] }
 0x280   : > { %v7700_v23 = vpop.permute.xlu0 %5160 }
 0x281   : > { %v7702_v43 = vpop.permute.xlu1 %5155  ;;  %4704 = vmatpush3.bf16.msra.mxu1 %v3647_v12  ;;  %v5152_v12 = vunpack.i.l.bf16 %v5151_v28 }
 0x284   : > { %v7706_v2 = vpop.permute.xlu0 %5170  ;;  %4674 = vmatmul.mubr.msk.bf16.gmra.mrb[20].mxu1 %vm8894_vm13, %v8893_v31  ;;  %vm8902_vm13 = vcmask 130048   ;;  %v5148_v31 = vunpack.i.h.bf16 %v5146_v22 }
 0x285   : > { %v7708_v58 = vpop.permute.xlu1 %5165  ;;  %4677 = vmatprep.mubr.msk.bf16.mxu1 %vm8896_vm10, %v8895_v57  ;;  %v7742_v17 = vsel %vm8902_vm13, %v1888_v13, %v5137_v5  ;;  %vm8903_vm10 = vmmov %vm8902_vm13  ;;  %v5147_v57 = vunpack.i.l.bf16 %v5146_v22  ;;  %v8912_v13 = vld [vmem:[#allocation87_spill] sm:$0xff] }
 0x286   : > { %v7745_v55 = vsel %vm8903_vm10, %v1889_v32, %v5138_v60  ;;  %vm8913_vm13 = vnez %v8912_v13 }
 0x287   : > { %v1943_v60 = vpack.c.bf16 %v7745_v55, %v7742_v17  ;;  %v8915_v17 = vsel %vm7075_vm1, 0.0, %v7001_v16  ;;  %v8917_v55 = vld [vmem:[#allocation38_spill] sm:$0xff] }
 0x288   : > { %v7718_v61 = vpop.permute.xlu0 %5180 }
 0x289   : > { %v7720_v38 = vpop.permute.xlu1 %5175 }
 0x28c   : > { %v7722_v15 = vpop.permute.xlu0 %5190  ;;  %4678 = vmatmul.mubr.msk.bf16.gmra.mrb[24].mxu1 %vm8888_vm2, %v8897_v51  ;;  %vm8904_vm2 = vmmov %vm8900_vm6 }
 0x28d   : > { %v7724_v29 = vpop.permute.xlu1 %5185  ;;  %4681 = vmatprep.mubr.msk.bf16.mxu1 %vm8901_vm12, %v1940_v46  ;;  %v1891_v28 = vsel %vm8904_vm2, %v6985_v24, %v5143_v54  ;;  %vm8906_vm15 = vmmov %vm8904_vm2  ;;  %v8907_v46 = vld [vmem:[#allocation37_spill] sm:$0xff]  ;;  %v2017_v54 = vsel %vm8913_vm13, 0.0, %v8911_v39 }
 0x28e   : > { %v1890_v21 = vsel %vm8906_vm15, %v8905_v44, %v5142_v25  ;;  %v2019_v5 = vsel %vm7253_vm3, 0.0, %v8907_v46  ;;  %vm8909_vm6 = vmmov %vm8903_vm10 }
 0x28f   : > { %v1922_v22 = vsel %vm8909_vm6, %v1890_v21, %v5152_v12  ;;  %vm8910_vm12 = vmmov %vm8909_vm6  ;;  %v1892_v12 = vsel %vm8904_vm2, %v8915_v17, %v5147_v57  ;;  %v5158_v21 = vunpack.i.h.bf16 %v7702_v43  ;;  %v5163_v57 = vunpack.i.h.bf16 %v7700_v23  ;;  %v8924_v17 = vld [vmem:[#allocation40_spill] sm:$0xff] }
 0x290   : > { %v5196_v30 = vpop.permute.xlu0 %5195  ;;  %v1923_v32 = vsel %vm8910_vm12, %v1891_v28, %v5153_v11  ;;  %vm8914_vm10 = vmmov %vm8904_vm2 }
 0x291   : > { %v5201_v35 = vpop.permute.xlu1 %5200  ;;  %v5198_v47 = vunpack.i.h.bf16 %v5196_v30  ;;  %v5197_v51 = vunpack.i.l.bf16 %v5196_v30  ;;  %v1893_v46 = vsel %vm8914_vm10, %v8816_v42, %v5148_v31  ;;  %vm8916_vm15 = vmmov %vm8904_vm2  ;;  %v8920_v31 = vpack.c.bf16 %v7651_v59, %v7647_v27  ;;  %v8926_v27 = vld [vmem:[#allocation53_spill] sm:$0xff] }
 0x292   : > { %v5203_v19 = vunpack.i.h.bf16 %v5201_v35  ;;  %v5202_v4 = vunpack.i.l.bf16 %v5201_v35  ;;  %vm8918_vm6 = vmmov %vm8904_vm2  ;;  %v5157_v35 = vunpack.i.l.bf16 %v7702_v43  ;;  %vm8921_vm10 = vcmask 195584  }
 0x293   : > { %v2401_v11 = vsel %vm8916_vm15, %v2017_v54, %v5197_v51  ;;  %v2402_v28 = vsel %vm8918_vm6, %v8917_v55, %v5198_v47  ;;  %vm8919_vm5 = vmmov %vm8910_vm12  ;;  %v1944_v41 = vpack.c.bf16 %v1923_v32, %v1922_v22  ;;  %v5162_v51 = vunpack.i.l.bf16 %v7700_v23 }
 0x294   : > { %v5206_v30 = vpop.permute.xlu0 %5205  ;;  %4682 = vmatmul.mubr.msk.bf16.gmra.mrb[28].mxu1 %vm8921_vm10, %v8920_v31  ;;  %v8922_v47 = vpack.c.bf16 %v7674_v40, %v7671_v50  ;;  %vm8923_vm2 = vmmov %vm8921_vm10  ;;  %v8927_v59 = vsel %vm8913_vm13, 0.0, %v8926_v27  ;;  %v1924_v50 = vsel %vm8910_vm12, %v1892_v12, %v5157_v35 }
 0x295   : > { %v5211_v62 = vpop.permute.xlu1 %5210  ;;  %v5208_v23 = vunpack.i.h.bf16 %v5206_v30  ;;  %v5207_v55 = vunpack.i.l.bf16 %v5206_v30  ;;  %vm8930_vm10 = vmmov %vm8910_vm12  ;;  %v5168_v30 = vunpack.i.h.bf16 %v7708_v58 }
 0x296   : > { %v5213_v25 = vunpack.i.h.bf16 %v5211_v62  ;;  %v5212_v44 = vunpack.i.l.bf16 %v5211_v62  ;;  %4685 = vmatprep.mubr.msk.bf16.mxu1 %vm8923_vm2, %v8922_v47  ;;  %v1925_v40 = vsel %vm8930_vm10, %v1893_v46, %v5158_v21 }
 0x298   : > { %v2433_v62 = vsel %vm8910_vm12, %v2401_v11, %v5212_v44  ;;  %v2434_v39 = vsel %vm8919_vm5, %v2402_v28, %v5213_v25  ;;  %v5216_v43 = vpop.permute.xlu0 %5215  ;;  %vm8925_vm5 = vmmov %vm8918_vm6 }
 0x299   : > { %v2465_v54 = vpack.c.bf16 %v2434_v39, %v2433_v62  ;;  %v5221_v44 = vpop.permute.xlu1 %5220  ;;  %v3506_v25 = vsel %vm8925_vm5, %v8924_v17, %v5203_v19  ;;  %vm8928_vm15 = vmmov %vm8925_vm5  ;;  %v5218_v28 = vunpack.i.h.bf16 %v5216_v43  ;;  %v5217_v62 = vunpack.i.l.bf16 %v5216_v43 }
 0x29a   : > { %v3505_v22 = vsel %vm8928_vm15, %v8927_v59, %v5202_v4  ;;  %v5223_v32 = vunpack.i.h.bf16 %v5221_v44  ;;  %v5222_v11 = vunpack.i.l.bf16 %v5221_v44  ;;  %vm8929_vm6 = vmmov %vm8923_vm2  ;;  %v5173_v4 = vunpack.i.h.bf16 %v7706_v2 }
 0x29b   : > { %4633 = vmatprep.mubr.msk.bf16.mxu0 %vm8929_vm6, %v2465_v54  ;;  %vm8931_vm2 = vmmov %vm8930_vm10  ;;  %v5172_v39 = vunpack.i.l.bf16 %v7706_v2  ;;  %v8936_v2 = vld [vmem:[#allocation58_spill] sm:$0xff] }
 0x29c   : > { %v7799_v19 = vsel %vm8931_vm2, %v3505_v22, %v5222_v11  ;;  %vm8932_vm5 = vmmov %vm8931_vm2  ;;  %v5226_v54 = vpop.permute.xlu0 %5225  ;;  %v8937_v27 = vsel %vm7253_vm3, 0.0, %v8936_v2 }
 0x29d   : > { %v7802_v13 = vsel %vm8932_vm5, %v3506_v25, %v5223_v32  ;;  %v5231_v47 = vpop.permute.xlu1 %5230  ;;  %v5228_v12 = vunpack.i.h.bf16 %v5226_v54  ;;  %v5227_v35 = vunpack.i.l.bf16 %v5226_v54  ;;  %vm8933_vm13 = vmmov %vm8928_vm15  ;;  %v8945_v54 = vsel %vm7097_vm8, 0.0, %v7021_v26 }
 0x29e   : > { %v3569_v31 = vpack.c.bf16 %v7802_v13, %v7799_v19  ;;  %v5233_v46 = vunpack.i.h.bf16 %v5231_v47  ;;  %v5232_v21 = vunpack.i.l.bf16 %v5231_v47  ;;  %v2404_v43 = vsel %vm8933_vm13, %v8924_v17, %v5208_v23  ;;  %vm8934_vm15 = vmmov %vm8933_vm13 }
 0x29f   : > { %v2403_v44 = vsel %vm8934_vm15, %v2019_v5, %v5207_v55  ;;  %vm8935_vm6 = vmmov %vm8933_vm13  ;;  %v2436_v32 = vsel %vm8931_vm2, %v2404_v43, %v5228_v12  ;;  %vm8942_vm13 = vcmask 195584   ;;  %v5167_v5 = vunpack.i.l.bf16 %v7708_v58  ;;  %v8947_v58 = vld [vmem:[#allocation85_spill] sm:$0xff] }
 0x2a0   : > { %v3508_v25 = vsel %vm8935_vm6, %v8793_v56, %v5218_v28  ;;  %vm8938_vm12 = vmmov %vm8935_vm6  ;;  %4686 = vmatmul.mubr.msk.bf16.gmra.mrb[0].mxu1 %vm8942_vm13, %v1943_v60  ;;  %v5236_v55 = vpop.permute.xlu0 %5235  ;;  %v1945_v60 = vpack.c.bf16 %v1925_v40, %v1924_v50  ;;  %v5177_v50 = vunpack.i.l.bf16 %v7720_v38  ;;  %v8952_v40 = vsel %vm8840_vm11, 0.0, %v7093_v6 }
 0x2a1   : > { %v3507_v59 = vsel %vm8938_vm12, %v8937_v27, %v5217_v62  ;;  %vm8939_vm10 = vmmov %vm8931_vm2  ;;  %v5241_v28 = vpop.permute.xlu1 %5240 }
 0x2a2   : > { %v2435_v22 = vsel %vm8939_vm10, %v2403_v44, %v5227_v35  ;;  %vm8940_vm5 = vmmov %vm8931_vm2  ;;  %v5178_v44 = vunpack.i.h.bf16 %v7720_v38  ;;  %v8956_v38 = vsel %vm8842_vm0, 0.0, %v7117_v7 }
 0x2a3   : > { %v7822_v11 = vsel %vm8940_vm5, %v3508_v25, %v5233_v46  ;;  %vm8941_vm1 = vmmov %vm8931_vm2  ;;  %v2466_v23 = vpack.c.bf16 %v2436_v32, %v2435_v22  ;;  %v5238_v46 = vunpack.i.h.bf16 %v5236_v55  ;;  %v5193_v25 = vunpack.i.h.bf16 %v7722_v15 }
 0x2a4   : > { %v7825_v17 = vsel %vm8941_vm1, %v3507_v59, %v5232_v21  ;;  %vm8943_vm3 = vmmov %vm8942_vm13  ;;  %v5237_v21 = vunpack.i.l.bf16 %v5236_v55  ;;  %v5243_v59 = vunpack.i.h.bf16 %v5241_v28 }
 0x2a5   : > { %v3570_v14 = vpack.c.bf16 %v7822_v11, %v7825_v17  ;;  %4689 = vmatprep.mubr.msk.bf16.mxu1 %vm8943_vm3, %v1944_v41  ;;  %vm8944_vm15 = vmmov %vm8935_vm6  ;;  %v5183_v41 = vunpack.i.h.bf16 %v7718_v61  ;;  %v5251_v27 = vpop.permute.xlu1 %5250 }
 0x2a6   : > { %v1895_v62 = vsel %vm8944_vm15, %v8825_v52, %v5163_v57  ;;  %vm8946_vm1 = vmmov %vm8935_vm6  ;;  %vm8948_vm6 = vnez %v8947_v58  ;;  %v5253_v22 = vunpack.i.h.bf16 %v5251_v27 }
 0x2a7   : > { %v1894_v47 = vsel %vm8946_vm1, %v8945_v54, %v5162_v51  ;;  %v2021_v12 = vsel %vm8948_vm6, 0.0, %v8936_v2  ;;  %vm8949_vm12 = vmmov %vm8931_vm2  ;;  %v1927_v57 = vsel %vm8931_vm2, %v1895_v62, %v5173_v4  ;;  %v5182_v51 = vunpack.i.l.bf16 %v7718_v61  ;;  %v5246_v4 = vpop.permute.xlu0 %5245 }
 0x2a8   : > { %v1926_v35 = vsel %vm8949_vm12, %v1894_v47, %v5172_v39  ;;  %vm8950_vm10 = vmmov %vm8943_vm3  ;;  %v5192_v2 = vunpack.i.l.bf16 %v7722_v15  ;;  %v5252_v61 = vunpack.i.l.bf16 %v5251_v27 }
 0x2a9   : > { %4634 = vmatmul.mubr.msk.bf16.vlgmr.msra.gmra.mrb[32].mxu0 %vm8950_vm10, %v2466_v23  ;;  %vm8951_vm5 = vmmov %vm8946_vm1  ;;  %v1946_v32 = vpack.c.bf16 %v1927_v57, %v1926_v35 }
 0x2aa   : > { %v1897_v43 = vsel %vm8951_vm5, %v8831_v33, %v5168_v30  ;;  %vm8953_vm13 = vmmov %vm8946_vm1  ;;  %v5242_v30 = vunpack.i.l.bf16 %v5241_v28 }
 0x2ab   : > { %v1896_v39 = vsel %vm8953_vm13, %v8952_v40, %v5167_v5  ;;  %vm8954_vm3 = vmmov %vm8946_vm1  ;;  %v2405_v5 = vsel %vm8946_vm1, %v2021_v12, %v5237_v21  ;;  %vm8960_vm13 = vcmask 195584   ;;  %v8965_v21 = vld [vmem:[#allocation54_spill] sm:$0xff] }
 0x2ac   : > { %v1899_v23 = vsel %vm8954_vm3, %v8841_v49, %v5183_v41  ;;  %vm8955_vm15 = vmmov %vm8946_vm1  ;;  %4690 = vmatmul.mubr.msk.bf16.gmra.mrb[4].mxu1 %vm8960_vm13, %v1945_v60  ;;  %v5256_v41 = vpop.permute.xlu0 %5255 }
 0x2ad   : > { %v2406_v55 = vsel %vm8955_vm15, %v8793_v56, %v5238_v46  ;;  %vm8957_vm12 = vmmov %vm8946_vm1  ;;  %v5261_v46 = vpop.permute.xlu1 %5260 }
 0x2ae   : > { %v1898_v15 = vsel %vm8957_vm12, %v8956_v38, %v5182_v51  ;;  %vm8958_vm10 = vmmov %vm8931_vm2  ;;  %v2438_v28 = vsel %vm8931_vm2, %v2406_v55, %v5253_v22  ;;  %v3510_v57 = vsel %vm8957_vm12, %v8965_v21, %v5243_v59  ;;  %v8966_v51 = vld [vmem:[#allocation51_spill] sm:$0xff]  ;;  %v5263_v40 = vunpack.i.h.bf16 %v5261_v46 }
 0x2af   : > { %v1928_v62 = vsel %vm8958_vm10, %v1896_v39, %v5177_v50  ;;  %vm8959_vm5 = vmmov %vm8931_vm2  ;;  %v8967_v50 = vsel %vm8948_vm6, 0.0, %v8966_v51  ;;  %v5248_v39 = vunpack.i.h.bf16 %v5246_v4 }
 0x2b0   : > { %v2437_v54 = vsel %vm8959_vm5, %v2405_v5, %v5252_v61  ;;  %vm8961_vm3 = vmmov %vm8931_vm2  ;;  %v2023_v61 = vsel %vm7277_vm9, 0.0, %v8966_v51  ;;  %v5266_v55 = vpop.permute.xlu0 %5265 }
 0x2b1   : > { %v1929_v47 = vsel %vm8961_vm3, %v1897_v43, %v5178_v44  ;;  %vm8962_vm11 = vmmov %vm8931_vm2  ;;  %v2467_v35 = vpack.c.bf16 %v2438_v28, %v2437_v54  ;;  %v5262_v43 = vunpack.i.l.bf16 %v5261_v46  ;;  %v5247_v44 = vunpack.i.l.bf16 %v5246_v4  ;;  %v5271_v5 = vpop.permute.xlu1 %5270 }
 0x2b2   : > { %v1930_v56 = vsel %vm8962_vm11, %v1898_v15, %v5192_v2  ;;  %vm8963_vm15 = vmmov %vm8931_vm2  ;;  %v5258_v2 = vunpack.i.h.bf16 %v5256_v41  ;;  %v1947_v27 = vpack.c.bf16 %v1929_v47, %v1928_v62  ;;  %v5187_v4 = vunpack.i.l.bf16 %v7724_v29 }
 0x2b3   : > { %v1931_v12 = vsel %vm8963_vm15, %v1899_v23, %v5193_v25  ;;  %vm8964_vm1 = vmmov %vm8960_vm13  ;;  %v5257_v25 = vunpack.i.l.bf16 %v5256_v41  ;;  %v5268_v38 = vunpack.i.h.bf16 %v5266_v55  ;;  %v5267_v15 = vunpack.i.l.bf16 %v5266_v55 }
 0x2b4   : > { %4693 = vmatprep.mubr.msk.bf16.mxu1 %vm8964_vm1, %v1946_v32  ;;  %vm8968_vm10 = vmmov %vm8957_vm12  ;;  %v5188_v32 = vunpack.i.h.bf16 %v7724_v29  ;;  %v5273_v62 = vunpack.i.h.bf16 %v5271_v5  ;;  %v5272_v28 = vunpack.i.l.bf16 %v5271_v5  ;;  %v8976_v29 = vld [vmem:[#allocation92_spill] sm:$0xff] }
 0x2b5   : > { %v3509_v60 = vsel %vm8968_vm10, %v8967_v50, %v5242_v30  ;;  %vm8969_vm11 = vmmov %vm8964_vm1  ;;  %v1948_v30 = vpack.c.bf16 %v1931_v12, %v1930_v56  ;;  %v8977_v12 = vsel %vm7277_vm9, 0.0, %v8976_v29 }
 0x2b6   : > { %4637 = vmatprep.mubr.msk.bf16.mxu0 %vm8969_vm11, %v2467_v35  ;;  %v7888_v59 = vsel %vm8931_vm2, %v3509_v60, %v5262_v43  ;;  %vm8971_vm5 = vmmov %vm8931_vm2  ;;  %v8974_v35 = vld [vmem:[#allocation90_spill] sm:$0xff]  ;;  %v5281_v43 = vpop.permute.xlu1 %5280 }
 0x2b7   : > { %v7891_v58 = vsel %vm8971_vm5, %v3510_v57, %v5263_v40  ;;  %vm8972_vm6 = vmmov %vm8968_vm10  ;;  %v5276_v40 = vpop.permute.xlu0 %5275 }
 0x2b8   : > { %v3571_v23 = vpack.c.bf16 %v7891_v58, %v7888_v59  ;;  %v2408_v54 = vsel %vm8972_vm6, %v8965_v21, %v5248_v39  ;;  %vm8973_vm13 = vmmov %vm8972_vm6  ;;  %v5283_v39 = vunpack.i.h.bf16 %v5281_v43 }
 0x2b9   : > { %v2407_v47 = vsel %vm8973_vm13, %v2023_v61, %v5247_v44  ;;  %vm8975_vm3 = vmmov %vm8972_vm6  ;;  %v5282_v44 = vunpack.i.l.bf16 %v5281_v43  ;;  %v8998_v43 = vld [vmem:[#allocation67_spill] sm:$0xff] }
 0x2ba   : > { %v3512_v56 = vsel %vm8975_vm3, %v8974_v35, %v5258_v2  ;;  %vm8978_vm15 = vmmov %vm8975_vm3  ;;  %v5286_v5 = vpop.permute.xlu1 %5285 }
 0x2bb   : > { %v3511_v41 = vsel %vm8978_vm15, %v8977_v12, %v5257_v25  ;;  %vm8979_vm1 = vmmov %vm8931_vm2  ;;  %vm8983_vm2 = vcmask 195584   ;;  %v8986_v25 = vsel %vm8859_vm14, 0.0, %v7160_v18  ;;  %v5291_v55 = vpop.permute.xlu0 %5290 }
 0x2bc   : > { %v2439_v46 = vsel %vm8979_vm1, %v2407_v47, %v5267_v15  ;;  %vm8980_vm12 = vmmov %vm8979_vm1  ;;  %4694 = vmatmul.mubr.msk.bf16.gmra.mrb[8].mxu1 %vm8983_vm2, %v1947_v27  ;;  %v5277_v15 = vunpack.i.l.bf16 %v5276_v40 }
 0x2bd   : > { %v2440_v57 = vsel %vm8980_vm12, %v2408_v54, %v5268_v38  ;;  %vm8981_vm10 = vmmov %vm8979_vm1  ;;  %v5278_v38 = vunpack.i.h.bf16 %v5276_v40  ;;  %v8993_v54 = vld [vmem:[#allocation77_spill] sm:$0xff]  ;;  %v8997_v40 = vld [vmem:[#allocation82_spill] sm:$0xff] }
 0x2be   : > { %v7910_v51 = vsel %vm8981_vm10, %v3512_v56, %v5273_v62  ;;  %vm8982_vm11 = vmmov %vm8979_vm1  ;;  %v2468_v50 = vpack.c.bf16 %v2440_v57, %v2439_v46  ;;  %v5292_v62 = vunpack.i.l.bf16 %v5291_v55  ;;  %vm8994_vm10 = vnez %v8993_v54 }
 0x2bf   : > { %v7913_v21 = vsel %vm8982_vm11, %v3511_v41, %v5272_v28  ;;  %vm8984_vm5 = vmmov %vm8983_vm2  ;;  %v5296_v28 = vpop.permute.xlu1 %5295  ;;  %v2025_v47 = vsel %vm8994_vm10, 0.0, %v8976_v29  ;;  %v5288_v57 = vunpack.i.h.bf16 %v5286_v5 }
 0x2c0   : > { %v3572_v60 = vpack.c.bf16 %v7910_v51, %v7913_v21  ;;  %4697 = vmatprep.mubr.msk.bf16.mxu1 %vm8984_vm5, %v1948_v30  ;;  %vm8985_vm9 = vmmov %vm8975_vm3  ;;  %v5298_v56 = vunpack.i.h.bf16 %v5296_v28  ;;  %v5297_v12 = vunpack.i.l.bf16 %v5296_v28  ;;  %vm8999_vm5 = vnez %v8998_v43 }
 0x2c1   : > { %v1901_v2 = vsel %vm8985_vm9, %v7156_v20, %v5188_v32  ;;  %vm8987_vm6 = vmmov %vm8975_vm3  ;;  %v5293_v32 = vunpack.i.h.bf16 %v5291_v55  ;;  %v2027_v19 = vsel %vm8999_vm5, 0.0, %v8997_v40 }
 0x2c2   : > { %v1900_v22 = vsel %vm8987_vm6, %v8986_v25, %v5187_v4  ;;  %vm8988_vm13 = vmmov %vm8983_vm2  ;;  %v5301_v4 = vpop.permute.xlu0 %5300 }
 0x2c3   : > { %4638 = vmatmul.mubr.msk.bf16.gmra.mrb[36].mxu0 %vm8988_vm13, %v2468_v50  ;;  %vm8989_vm3 = vmmov %vm8979_vm1  ;;  %v5287_v50 = vunpack.i.l.bf16 %v5286_v5  ;;  %v9006_v5 = vsel %vm8994_vm10, 0.0, %v8997_v40 }
 0x2c4   : > { %v1932_v27 = vsel %vm8989_vm3, %v1900_v22, %v5282_v44  ;;  %vm8990_vm15 = vmmov %vm8979_vm1 }
 0x2c5   : > { %v1933_v61 = vsel %vm8990_vm15, %v1901_v2, %v5283_v39  ;;  %vm8991_vm1 = vmmov %vm8983_vm2  ;;  %v9002_v39 = vld [vmem:[#allocation80_spill] sm:$0xff] }
 0x2c6   : > { %v1949_v30 = vpack.c.bf16 %v1933_v61, %v1932_v27  ;;  %vm8992_vm12 = vmmov %vm8991_vm1  ;;  %v5311_v25 = vpop.permute.xlu0 %5310 }
 0x2c7   : > { %vm8995_vm11 = vmmov %vm8987_vm6  ;;  %v5313_v22 = vunpack.i.h.bf16 %v5311_v25  ;;  %v5312_v27 = vunpack.i.l.bf16 %v5311_v25  ;;  %v9024_v25 = vld [vmem:[#allocation78_spill] sm:$0xff] }
 0x2c8   : > { %4698 = vmatmul.mubr.msk.bf16.gmra.mrb[12].mxu1 %vm8991_vm1, %v1949_v30  ;;  %v2410_v41 = vsel %vm8995_vm11, %v8974_v35, %v5278_v38  ;;  %vm8996_vm2 = vmmov %vm8987_vm6  ;;  %v5306_v35 = vpop.permute.xlu1 %5305 }
 0x2c9   : > { %4705 = vmatprep.mubr.msk.bf16.mxu1 %vm8992_vm12, %v3569_v31  ;;  %v2409_v46 = vsel %vm8996_vm2, %v2025_v47, %v5277_v15  ;;  %vm9000_vm9 = vmmov %vm8989_vm3  ;;  %v5308_v61 = vunpack.i.h.bf16 %v5306_v35  ;;  %v5307_v30 = vunpack.i.l.bf16 %v5306_v35  ;;  %v5303_v15 = vunpack.i.h.bf16 %v5301_v4 }
 0x2ca   : > { %v2442_v13 = vsel %vm9000_vm9, %v2410_v41, %v5298_v56  ;;  %vm9001_vm6 = vmmov %vm8989_vm3 }
 0x2cb   : > { %v2441_v31 = vsel %vm9001_vm6, %v2409_v46, %v5297_v12  ;;  %vm9003_vm13 = vmmov %vm8996_vm2 }
 0x2cc   : > { %v2412_v29 = vsel %vm9003_vm13, %v9002_v39, %v5293_v32  ;;  %vm9004_vm3 = vmmov %vm8996_vm2  ;;  %v2469_v2 = vpack.c.bf16 %v2442_v13, %v2441_v31  ;;  %v5302_v32 = vunpack.i.l.bf16 %v5301_v4  ;;  %v5321_v4 = vpop.permute.xlu0 %5320  ;;  %v5316_v41 = vpop.permute.xlu1 %5315 }
 0x2cd   : > { %v2411_v44 = vsel %vm9004_vm3, %v2027_v19, %v5292_v62  ;;  %vm9005_vm15 = vmmov %vm8996_vm2  ;;  %v5318_v46 = vunpack.i.h.bf16 %v5316_v41  ;;  %v9016_v19 = vld [vmem:[#allocation94_spill] sm:$0xff]  ;;  %v5323_v31 = vunpack.i.h.bf16 %v5321_v4 }
 0x2ce   : > { %v3514_v55 = vsel %vm9005_vm15, %v9002_v39, %v5288_v57  ;;  %vm9007_vm1 = vmmov %vm8996_vm2  ;;  %4641 = vmatprep.mubr.msk.bf16.mxu0 %vm8992_vm12, %v2469_v2  ;;  %v5317_v57 = vunpack.i.l.bf16 %v5316_v41  ;;  %v9017_v11 = vsel %vm8999_vm5, 0.0, %v9016_v19  ;;  %v5322_v39 = vunpack.i.l.bf16 %v5321_v4 }
 0x2cf   : > { %v3513_v38 = vsel %vm9007_vm1, %v9006_v5, %v5287_v50  ;;  %vm9008_vm11 = vmmov %vm9001_vm6  ;;  %v9014_v50 = vld [vmem:[#allocation95_spill] sm:$0xff] }
 0x2d0   : > { %v2443_v62 = vsel %vm9008_vm11, %v2411_v44, %v5312_v27  ;;  %vm9009_vm2 = vmmov %vm9001_vm6  ;;  %v5326_v13 = vpop.permute.xlu1 %5325 }
 0x2d1   : > { %v2444_v28 = vsel %vm9009_vm2, %v2412_v29, %v5313_v22  ;;  %vm9010_vm9 = vmmov %vm9009_vm2  ;;  %v5328_v51 = vunpack.i.h.bf16 %v5326_v13  ;;  %v5327_v21 = vunpack.i.l.bf16 %v5326_v13 }
 0x2d2   : > { %v3545_v47 = vsel %vm9010_vm9, %v3513_v38, %v5307_v30  ;;  %vm9011_vm6 = vmmov %vm9009_vm2  ;;  %v2470_v54 = vpack.c.bf16 %v2444_v28, %v2443_v62  ;;  %vm9025_vm9 = vnez %v9024_v25 }
 0x2d3   : > { %v3546_v56 = vsel %vm9011_vm6, %v3514_v55, %v5308_v61  ;;  %vm9012_vm13 = vmmov %vm8992_vm12  ;;  %v2029_v35 = vsel %vm9025_vm9, 0.0, %v9016_v19 }
 0x2d4   : > { %4706 = vmatmul.mubr.msk.bf16.vlgmr.msra.gmra.mrb[16].mxu1 %vm9012_vm13, %v3570_v14  ;;  %v3573_v12 = vpack.c.bf16 %v3546_v56, %v3545_v47  ;;  %vm9013_vm10 = vmmov %vm8992_vm12  ;;  %v5336_v2 = vpop.permute.xlu1 %5335 }
 0x2d5   : > { %4709 = vmatprep.mubr.msk.bf16.mxu1 %vm9013_vm10, %v3571_v23  ;;  %vm9015_vm3 = vmmov %vm9007_vm1  ;;  %v5331_v23 = vpop.permute.xlu0 %5330  ;;  %v5338_v22 = vunpack.i.h.bf16 %v5336_v2  ;;  %v5337_v27 = vunpack.i.l.bf16 %v5336_v2 }
 0x2d6   : > { %v3516_v40 = vsel %vm9015_vm3, %v9014_v50, %v5303_v15  ;;  %vm9018_vm15 = vmmov %vm9007_vm1  ;;  %v5333_v43 = vunpack.i.h.bf16 %v5331_v23  ;;  %v5332_v29 = vunpack.i.l.bf16 %v5331_v23 }
 0x2d7   : > { %v3515_v17 = vsel %vm9018_vm15, %v9017_v11, %v5302_v32  ;;  %vm9019_vm1 = vmmov %vm9013_vm10 }
 0x2d8   : > { %4642 = vmatmul.mubr.msk.bf16.gmra.mrb[40].mxu0 %vm9019_vm1, %v2470_v54  ;;  %vm9020_vm12 = vmmov %vm9009_vm2  ;;  %v5346_v47 = vpop.permute.xlu1 %5345 }
 0x2d9   : > { %v3548_v14 = vsel %vm9020_vm12, %v3516_v40, %v5318_v46  ;;  %vm9021_vm11 = vmmov %vm9009_vm2  ;;  %v5341_v44 = vpop.permute.xlu0 %5340  ;;  %v5347_v4 = vunpack.i.l.bf16 %v5346_v47  ;;  %v9035_v46 = vsel %vm9025_vm9, 0.0, %v8871_v37 }
 0x2da   : > { %v3547_v59 = vsel %vm9021_vm11, %v3515_v17, %v5317_v57  ;;  %vm9022_vm2 = vmmov %vm9019_vm1  ;;  %v5342_v40 = vunpack.i.l.bf16 %v5341_v44 }
 0x2db   : > { %v3574_v58 = vpack.c.bf16 %v3548_v14, %v3547_v59  ;;  %vm9023_vm5 = vmmov %vm9019_vm1 }
 0x2dc   : > { %4710 = vmatmul.mubr.msk.bf16.gmra.mrb[20].mxu1 %vm9022_vm2, %v3572_v60  ;;  %vm9026_vm6 = vmmov %vm9015_vm3  ;;  %v9028_v60 = vld [vmem:[#allocation74_spill] sm:$0xff] }
 0x2dd   : > { %4713 = vmatprep.mubr.msk.bf16.mxu1 %vm9023_vm5, %v3573_v12  ;;  %v2414_v61 = vsel %vm9026_vm6, %v9014_v50, %v5323_v31  ;;  %vm9027_vm13 = vmmov %vm9015_vm3  ;;  %vm9029_vm10 = vnez %v9028_v60  ;;  %v5351_v28 = vpop.permute.xlu0 %5350  ;;  %v5348_v12 = vunpack.i.h.bf16 %v5346_v47  ;;  %v5343_v50 = vunpack.i.h.bf16 %v5341_v44 }
 0x2de   : > { %v2413_v30 = vsel %vm9027_vm13, %v2029_v35, %v5322_v39  ;;  %v2031_v55 = vsel %vm9029_vm10, 0.0, %v8871_v37  ;;  %vm9030_vm3 = vmmov %vm9021_vm11  ;;  %v5353_v56 = vunpack.i.h.bf16 %v5351_v28  ;;  %v5352_v54 = vunpack.i.l.bf16 %v5351_v28  ;;  %v5356_v37 = vpop.permute.xlu1 %5355 }
 0x2df   : > { %v2446_v5 = vsel %vm9030_vm3, %v2414_v61, %v5338_v22  ;;  %vm9031_vm15 = vmmov %vm9030_vm3  ;;  %v5358_v13 = vunpack.i.h.bf16 %v5356_v37  ;;  %v5357_v31 = vunpack.i.l.bf16 %v5356_v37 }
 0x2e0   : > { %v2445_v38 = vsel %vm9031_vm15, %v2413_v30, %v5337_v27  ;;  %vm9032_vm1 = vmmov %vm9026_vm6  ;;  %v9049_v30 = vsel %vm7081_vm4, 0.0, %v6989_v36  ;;  %v9052_v36 = vsel %vm7044_vm7, 0.0, %v7001_v16  ;;  %vm9058_vm7 = vnez %v8648_v48 }
 0x2e1   : > { %v2416_v15 = vsel %vm9032_vm1, %v8869_v34, %v5333_v43  ;;  %vm9033_vm12 = vmmov %vm9032_vm1  ;;  %v2471_v62 = vpack.c.bf16 %v2446_v5, %v2445_v38  ;;  %v5361_v23 = vpop.permute.xlu0 %5360  ;;  %v9042_v43 = vsel %vm9029_vm10, 0.0, %v7035_v8  ;;  %v9059_v16 = vsel %vm9058_vm7, 0.0, %v7021_v26 }
 0x2e2   : > { %v2415_v32 = vsel %vm9033_vm12, %v2031_v55, %v5332_v29  ;;  %vm9034_vm11 = vmmov %vm9032_vm1  ;;  %v5363_v44 = vunpack.i.h.bf16 %v5361_v23  ;;  %v5362_v2 = vunpack.i.l.bf16 %v5361_v23  ;;  %v5366_v27 = vpop.permute.xlu1 %5365 }
 0x2e3   : > { %v3518_v41 = vsel %vm9034_vm11, %v8869_v34, %v5328_v51  ;;  %vm9036_vm2 = vmmov %vm9032_vm1  ;;  %4645 = vmatprep.mubr.msk.bf16.mxu0 %vm9023_vm5, %v2471_v62  ;;  %v5367_v60 = vunpack.i.l.bf16 %v5366_v27 }
 0x2e4   : > { %v3517_v57 = vsel %vm9036_vm2, %v9035_v46, %v5327_v21  ;;  %vm9037_vm6 = vmmov %vm9030_vm3  ;;  %v5368_v21 = vunpack.i.h.bf16 %v5366_v27 }
 0x2e5   : > { %v2447_v19 = vsel %vm9037_vm6, %v2415_v32, %v5352_v54  ;;  %vm9038_vm13 = vmmov %vm9030_vm3  ;;  %v3549_v17 = vsel %vm9030_vm3, %v3517_v57, %v5347_v4  ;;  %v5371_v22 = vpop.permute.xlu0 %5370 }
 0x2e6   : > { %v2448_v11 = vsel %vm9038_vm13, %v2416_v15, %v5353_v56  ;;  %vm9039_vm15 = vmmov %vm9030_vm3  ;;  %v5372_v61 = vunpack.i.l.bf16 %v5371_v22  ;;  %v5376_v32 = vpop.permute.xlu1 %5375 }
 0x2e7   : > { %v3550_v14 = vsel %vm9039_vm15, %v3518_v41, %v5348_v12  ;;  %vm9040_vm1 = vmmov %vm9023_vm5  ;;  %v2472_v34 = vpack.c.bf16 %v2448_v11, %v2447_v19  ;;  %v5378_v62 = vunpack.i.h.bf16 %v5376_v32  ;;  %v5377_v28 = vunpack.i.l.bf16 %v5376_v32 }
 0x2e8   : > { %4714 = vmatmul.mubr.msk.bf16.gmra.mrb[24].mxu1 %vm9040_vm1, %v3574_v58  ;;  %v3575_v59 = vpack.c.bf16 %v3550_v14, %v3549_v17  ;;  %vm9041_vm9 = vmmov %vm9036_vm2 }
 0x2e9   : > { %v3520_v39 = vsel %vm9041_vm9, %v7029_v0, %v5343_v50  ;;  %vm9043_vm12 = vmmov %vm9036_vm2  ;;  %v5373_v0 = vunpack.i.h.bf16 %v5371_v22  ;;  %v5381_v15 = vpop.permute.xlu0 %5380 }
 0x2ea   : > { %v3519_v29 = vsel %vm9043_vm12, %v9042_v43, %v5342_v40  ;;  %vm9044_vm11 = vmmov %vm9040_vm1  ;;  %v5383_v47 = vunpack.i.h.bf16 %v5381_v15  ;;  %v5382_v56 = vunpack.i.l.bf16 %v5381_v15  ;;  %v5386_v46 = vpop.permute.xlu1 %5385 }
 0x2eb   : > { %4646 = vmatmul.mubr.msk.bf16.gmra.mrb[44].mxu0 %vm9044_vm11, %v2472_v34  ;;  %vm9045_vm2 = vmmov %vm9040_vm1  ;;  %v5388_v40 = vunpack.i.h.bf16 %v5386_v46  ;;  %v5387_v19 = vunpack.i.l.bf16 %v5386_v46 }
 0x2ec   : > { %4717 = vmatprep.mubr.msk.bf16.mxu1 %vm9045_vm2, %v3575_v59  ;;  %vm9046_vm5 = vmmov %vm9030_vm3 }
 0x2ed   : > { %v3552_v58 = vsel %vm9046_vm5, %v3520_v39, %v5358_v13  ;;  %vm9047_vm6 = vmmov %vm9030_vm3  ;;  %v5391_v41 = vpop.permute.xlu0 %5390 }
 0x2ee   : > { %v3551_v25 = vsel %vm9047_vm6, %v3519_v29, %v5357_v31  ;;  %vm9048_vm13 = vmmov %vm9041_vm9  ;;  %v5393_v57 = vunpack.i.h.bf16 %v5391_v41  ;;  %v5392_v50 = vunpack.i.l.bf16 %v5391_v41  ;;  %v5396_v59 = vpop.permute.xlu1 %5395  ;;  %v9092_v41 = vld [vmem:[#allocation22_spill] sm:$0xff] }
 0x2ef   : > { %v3576_v35 = vpack.c.bf16 %v3552_v58, %v3551_v25  ;;  %v3522_v8 = vsel %vm9048_vm13, %v6985_v24, %v5363_v44  ;;  %vm9050_vm10 = vmmov %vm9041_vm9  ;;  %v3524_v24 = vsel %vm9041_vm9, %v8816_v42, %v5368_v21  ;;  %v5398_v23 = vunpack.i.h.bf16 %v5396_v59 }
 0x2f0   : > { %v3521_v51 = vsel %vm9050_vm10, %v9049_v30, %v5362_v2  ;;  %vm9051_vm15 = vmmov %vm9030_vm3  ;;  %v5397_v37 = vunpack.i.l.bf16 %v5396_v59 }
 0x2f1   : > { %v3553_v55 = vsel %vm9030_vm3, %v3521_v51, %v5372_v61  ;;  %v3554_v5 = vsel %vm9051_vm15, %v3522_v8, %v5373_v0  ;;  %4718 = vmatmul.mubr.msk.bf16.gmra.mrb[28].mxu1 %vm9040_vm1, %v3576_v35  ;;  %vm9053_vm4 = vmmov %vm9041_vm9  ;;  %v5401_v34 = vpop.permute.xlu0 %5400 }
 0x2f2   : > { %v3577_v38 = vpack.c.bf16 %v3554_v5, %v3553_v55  ;;  %v3523_v63 = vsel %vm9053_vm4, %v9052_v36, %v5367_v60  ;;  %vm9054_vm12 = vmmov %vm9040_vm1  ;;  %v5403_v13 = vunpack.i.h.bf16 %v5401_v34  ;;  %v5402_v31 = vunpack.i.l.bf16 %v5401_v34  ;;  %v5406_v2 = vpop.permute.xlu1 %5405  ;;  %v9084_v36 = vld [vmem:[#allocation56_spill] sm:$0xff] }
 0x2f3   : > { %vm9055_vm11 = vmmov %vm9030_vm3  ;;  %v5408_v35 = vunpack.i.h.bf16 %v5406_v2  ;;  %v5407_v22 = vunpack.i.l.bf16 %v5406_v2 }
 0x2f4   : > { %4721 = vmatprep.mubr.msk.bf16.mxu1 %vm9054_vm12, %v3577_v38  ;;  %v3555_v54 = vsel %vm9055_vm11, %v3523_v63, %v5377_v28  ;;  %vm9056_vm2 = vmmov %vm9030_vm3 }
 0x2f5   : > { %v3556_v12 = vsel %vm9056_vm2, %v3524_v24, %v5378_v62  ;;  %vm9057_vm5 = vmmov %vm9053_vm4  ;;  %v5411_v44 = vpop.permute.xlu0 %5410 }
 0x2f6   : > { %v3578_v4 = vpack.c.bf16 %v3556_v12, %v3555_v54  ;;  %v3526_v45 = vsel %vm9057_vm5, %v8825_v52, %v5383_v47  ;;  %vm9060_vm6 = vmmov %vm9053_vm4  ;;  %v5413_v58 = vunpack.i.h.bf16 %v5411_v44  ;;  %v5412_v25 = vunpack.i.l.bf16 %v5411_v44  ;;  %v5421_v30 = vpop.permute.xlu1 %5420 }
 0x2f7   : > { %v3525_v42 = vsel %vm9060_vm6, %v9059_v16, %v5382_v56  ;;  %vm9061_vm13 = vmmov %vm9056_vm2  ;;  %v5423_v51 = vunpack.i.h.bf16 %v5421_v30  ;;  %v5422_v21 = vunpack.i.l.bf16 %v5421_v30  ;;  %v9095_v16 = vsel %vm8859_vm14, 0.0, %v9094_v9 }
 0x2f8   : > { %v3557_v11 = vsel %vm9061_vm13, %v3525_v42, %v5392_v50  ;;  %vm9062_vm10 = vmmov %vm9056_vm2 }
 0x2f9   : > { %v3558_v17 = vsel %vm9062_vm10, %v3526_v45, %v5393_v57  ;;  %vm9063_vm3 = vmmov %vm9040_vm1  ;;  %vm9065_vm1 = vnez %v8656_v1  ;;  %v5416_v8 = vpop.permute.xlu0 %5415 }
 0x2fa   : > { %4722 = vmatmul.mubr.msk.bf16.gmra.mrb[0].mxu1 %vm9063_vm3, %v3578_v4  ;;  %v3579_v14 = vpack.c.bf16 %v3558_v17, %v3557_v11  ;;  %vm9064_vm15 = vmmov %vm9053_vm4  ;;  %v9066_v26 = vsel %vm9065_vm1, 0.0, %v7093_v6  ;;  %v9072_v6 = vsel %vm7097_vm8, 0.0, %v7117_v7  ;;  %vm9078_vm8 = vnez %v8685_v3  ;;  %v5426_v62 = vpop.permute.xlu1 %5425  ;;  %v3929_v17 = vld [vmem:[#allocation11] sm:$0xf] }
 0x2fb   : > { %v3528_v48 = vsel %vm9064_vm15, %v8831_v33, %v5388_v40  ;;  %vm9067_vm9 = vmmov %vm9053_vm4  ;;  %v9079_v7 = vsel %vm9078_vm8, 0.0, %v7160_v18  ;;  %v5418_v60 = vunpack.i.h.bf16 %v5416_v8  ;;  %v5417_v55 = vunpack.i.l.bf16 %v5416_v8  ;;  %v9086_v18 = vld [vmem:[#allocation30_spill] sm:$0xff] }
 0x2fc   : > { %v3527_v52 = vsel %vm9067_vm9, %v9066_v26, %v5387_v19  ;;  %vm9068_vm4 = vmmov %vm9063_vm3  ;;  %v9087_v63 = vsel %vm8842_vm0, 0.0, %v9086_v18  ;;  %v5427_v56 = vunpack.i.l.bf16 %v5426_v62 }
 0x2fd   : > { %4725 = vmatprep.mubr.msk.bf16.mxu1 %vm9068_vm4, %v3579_v14  ;;  %vm9069_vm12 = vmmov %vm9056_vm2  ;;  %v5431_v32 = vpop.permute.xlu0 %5430 }
 0x2fe   : > { %v3559_v39 = vsel %vm9069_vm12, %v3527_v52, %v5397_v37  ;;  %vm9070_vm11 = vmmov %vm9056_vm2  ;;  %v5433_v28 = vunpack.i.h.bf16 %v5431_v32  ;;  %v5432_v24 = vunpack.i.l.bf16 %v5431_v32  ;;  %v5436_v57 = vpop.permute.xlu1 %5435 }
 0x2ff   : > { %v3560_v43 = vsel %vm9070_vm11, %v3528_v48, %v5398_v23  ;;  %vm9071_vm2 = vmmov %vm9057_vm5  ;;  %v5438_v50 = vunpack.i.h.bf16 %v5436_v57  ;;  %v5437_v45 = vunpack.i.l.bf16 %v5436_v57 }
 0x300   : > { %v3580_v29 = vpack.c.bf16 %v3560_v43, %v3559_v39  ;;  %v3530_v1 = vsel %vm9071_vm2, %v8841_v49, %v5403_v13  ;;  %vm9073_vm5 = vmmov %vm9071_vm2 }
 0x301   : > { %v3529_v33 = vsel %vm9073_vm5, %v9072_v6, %v5402_v31  ;;  %vm9074_vm7 = vmmov %vm9062_vm10  ;;  %v8104_v31 = vld [vmem:[#allocation10] ss:$0 sm:$0xff] }
 0x302   : > { %v3561_v27 = vsel %vm9074_vm7, %v3529_v33, %v5412_v25  ;;  %vm9075_vm6 = vmmov %vm9074_vm7 }
 0x303   : > { %v3562_v0 = vsel %vm9075_vm6, %v3530_v1, %v5413_v58  ;;  %vm9076_vm13 = vmmov %vm9063_vm3 }
 0x304   : > { %4726 = vmatmul.mubr.msk.bf16.gmra.mrb[4].mxu1 %vm9076_vm13, %v3580_v29  ;;  %v3581_v61 = vpack.c.bf16 %v3562_v0, %v3561_v27  ;;  %vm9077_vm10 = vmmov %vm9071_vm2 }
 0x305   : > { %v3532_v10 = vsel %vm9077_vm10, %v7156_v20, %v5408_v35  ;;  %vm9080_vm3 = vmmov %vm9071_vm2  ;;  %v5428_v20 = vunpack.i.h.bf16 %v5426_v62 }
 0x306   : > { %v3531_v49 = vsel %vm9080_vm3, %v9079_v7, %v5407_v22  ;;  %vm9081_vm15 = vmmov %vm9068_vm4 }
 0x307   : > { %4729 = vmatprep.mubr.msk.bf16.mxu1 %vm9081_vm15, %v3581_v61  ;;  %vm9082_vm1 = vmmov %vm9075_vm6 }
 0x308   : > { %v3563_v5 = vsel %vm9082_vm1, %v3531_v49, %v5422_v21  ;;  %vm9083_vm9 = vmmov %vm9082_vm1 }
 0x309   : > { %v3564_v38 = vsel %vm9083_vm9, %v3532_v10, %v5423_v51  ;;  %vm9085_vm4 = vmmov %vm9071_vm2 }
 0x30a   : > { %v3582_v15 = vpack.c.bf16 %v3564_v38, %v3563_v5  ;;  %v3534_v3 = vsel %vm9085_vm4, %v9084_v36, %v5418_v60  ;;  %vm9088_vm12 = vmmov %vm9071_vm2 }
 0x30b   : > { %v3533_v47 = vsel %vm9088_vm12, %v9087_v63, %v5417_v55  ;;  %vm9089_vm11 = vmmov %vm9082_vm1 }
 0x30c   : > { %v3565_v54 = vsel %vm9089_vm11, %v3533_v47, %v5432_v24  ;;  %vm9090_vm2 = vmmov %vm9082_vm1 }
 0x30d   : > { %v3566_v12 = vsel %vm9090_vm2, %v3534_v3, %v5433_v28  ;;  %vm9091_vm5 = vmmov %vm9076_vm13 }
 0x30e   : > { %4730 = vmatmul.mubr.msk.bf16.gmra.mrb[8].mxu1 %vm9091_vm5, %v3582_v15  ;;  %v3583_v4 = vpack.c.bf16 %v3566_v12, %v3565_v54  ;;  %vm9093_vm7 = vmmov %vm9080_vm3 }
 0x30f   : > { %v3536_v46 = vsel %vm9093_vm7, %v9092_v41, %v5428_v20  ;;  %vm9096_vm0 = vmmov %vm9080_vm3  ;;  %vm9101_vm3 = vcmask 1043456  }
 0x310   : > { %v3535_v42 = vsel %vm9096_vm0, %v9095_v16, %v5427_v56  ;;  %vm9097_vm6 = vmmov %vm9091_vm5  ;;  %4843 = vmatprep.subr.msk.bf16.mxu0 %vm9101_vm3, %v3929_v17 }
 0x311   : > { %4733 = vmatprep.mubr.msk.bf16.mxu1 %vm9097_vm6, %v3583_v4  ;;  %vm9098_vm13 = vmmov %vm9082_vm1 }
 0x312   : > { %v3567_v40 = vsel %vm9098_vm13, %v3535_v42, %v5437_v45  ;;  %vm9099_vm10 = vmmov %vm9082_vm1 }
 0x313   : > { %v3568_v19 = vsel %vm9099_vm10, %v3536_v46, %v5438_v50  ;;  %vm9100_vm8 = vmmov %vm9091_vm5 }
 0x314   : > { %v3584_v11 = vpack.c.bf16 %v3568_v19, %v3567_v40  ;;  %vm9102_vm15 = vmmov %vm9101_vm3 }
 0x315   : > { %v3986_v14 = vsel %vm9102_vm15, %v3929_v17, 0  ;;  %vm9103_vm14 = vmmov %vm9096_vm0 }
 0x316   : > { %4734 = vmatmul.mubr.msk.bf16.gmra.mrb[12].mxu1 %vm9100_vm8, %v3584_v11  ;;  %4738 = vmatpush3.bf16.msra.mxu0 %v3986_v14  ;;  %vm9104_vm1 = vmmov %vm9096_vm0 }
 0x317   : > { %vm9105_vm9 = vmmov %vm9096_vm0 }
 0x318   : > { %vm9106_vm4 = vmmov %vm9096_vm0 }
 0x319   : > { %vm9107_vm12 = vmmov %vm9096_vm0 }
 0x31a   : > { %vm9108_vm11 = vmmov %vm9096_vm0 }
 0x31b   : > { %vm9109_vm2 = vmmov %vm9096_vm0 }
 0x31c   : > { %vm9110_vm5 = vmmov %vm9096_vm0 }
 0x31d   : > { %vm9111_vm7 = vmmov %vm9096_vm0 }
 0x31e   : > { %vm9112_vm6 = vmmov %vm9096_vm0 }
 0x31f   : > { %vm9113_vm13 = vmmov %vm9096_vm0 }
 0x320   : > { %vm9114_vm10 = vmmov %vm9096_vm0 }
 0x321   : > { %vm9115_vm8 = vmmov %vm9096_vm0 }
 0x322   : > { %vm9116_vm3 = vmmov %vm9096_vm0 }
 0x323   : > { %vm9117_vm15 = vmmov %vm9096_vm0 }
 0x37c   : > { %v4635_v53 = vpop.f32.mrb[32].mxu0 }
 0x37d   : > { %v2581_v34 = vpop.f32.mrb[33].mxu0 }
 0x37e   : > { %v4636_v59 = vpop.f32.mrb[34].mxu0 }
 0x37f   : > { %v2584_v23 = vpop.f32.mrb[35].mxu0 }
 0x396   : > { %v4639_v37 = vpop.f32.mrb[36].mxu0 }
 0x397   : > { %v2597_v48 = vpop.f32.mrb[37].mxu0 }
 0x398   : > { %v4640_v26 = vpop.f32.mrb[38].mxu0 }
 0x399   : > { %v2600_v52 = vpop.f32.mrb[39].mxu0 }
 0x3a7   : > { %v4707_v13 = vpop.f32.mrb[16].mxu1 }
 0x3a8   : > { %v4775_v39 = vadd.f32 %v4707_v13, %v4635_v53  ;;  %v3683_v43 = vpop.f32.mrb[17].mxu1 }
 0x3a9   : > { %v4776_v29 = vadd.f32 %v3683_v43, %v2581_v34  ;;  %v4708_v44 = vpop.f32.mrb[18].mxu1 }
 0x3aa   : > { %v3851_v2 = vadd.f32 %v4775_v39, %v8104_v31  ;;  %v4777_v58 = vadd.f32 %v4708_v44, %v4636_v59  ;;  %v3686_v25 = vpop.f32.mrb[19].mxu1 }
 0x3ab   : > { %v4643_v1 = vpop.f32.mrb[40].mxu0  ;;  %v3849_v6 = vadd.f32 %v4776_v29, %v8104_v31  ;;  %v4778_v33 = vadd.f32 %v3686_v25, %v2584_v23 }
 0x3ac   : > { %v2613_v35 = vpop.f32.mrb[41].mxu0  ;;  %v3852_v22 = vadd.f32 %v4777_v58, %v8104_v31  ;;  %v3883_v8 = vmax.f32 %v3851_v2, 0.0 }
 0x3ad   : > { %v4644_v27 = vpop.f32.mrb[42].mxu0  ;;  %v3850_v0 = vadd.f32 %v4778_v33, %v8104_v31  ;;  %v3881_v51 = vmax.f32 %v3849_v6, 0.0 }
 0x3ae   : > { %v2616_v61 = vpop.f32.mrb[43].mxu0  ;;  %v3884_v30 = vmax.f32 %v3852_v22, 0.0 }
 0x3af   : > { %v3882_v21 = vmax.f32 %v3850_v0, 0.0  ;;  %v4711_v10 = vpop.f32.mrb[20].mxu1 }
 0x3b0   : > { %v3914_v7 = vpack.c.bf16 %v3884_v30, %v3883_v8  ;;  %v4779_v49 = vadd.f32 %v4711_v10, %v4639_v37  ;;  %v3699_v60 = vpop.f32.mrb[21].mxu1 }
 0x3b1   : > { %v3913_v55 = vpack.c.bf16 %v3882_v21, %v3881_v51  ;;  %v4780_v5 = vadd.f32 %v3699_v60, %v2597_v48  ;;  %v4712_v38 = vpop.f32.mrb[22].mxu1 }
 0x3b2   : > { %v3855_v15 = vadd.f32 %v4779_v49, %v8104_v31  ;;  %v4781_v32 = vadd.f32 %v4712_v38, %v4640_v26  ;;  %v3702_v62 = vpop.f32.mrb[23].mxu1 }
 0x3b3   : > { %v3853_v28 = vadd.f32 %v4780_v5, %v8104_v31  ;;  %v4782_v24 = vadd.f32 %v3702_v62, %v2600_v52  ;;  %4739 = vmatprep.mubr.msk.bf16.mxu0 %vm9103_vm14, %v3913_v55  ;;  %vm9118_vm14 = vcmask 130048  }
 0x3b4   : > { %v3856_v20 = vadd.f32 %v4781_v32, %v8104_v31  ;;  %4740 = vmatmul.mubr.msk.bf16.vlgmr.msra.gmra.mrb[48].mxu0 %vm9104_vm1, %v3914_v7  ;;  %v3887_v3 = vmax.f32 %v3855_v15, 0.0  ;;  %vm9119_vm1 = vmmov %vm9118_vm14 }
 0x3b5   : > { %v3854_v36 = vadd.f32 %v4782_v24, %v8104_v31  ;;  %v3885_v63 = vmax.f32 %v3853_v28, 0.0 }
 0x3b6   : > { %v3888_v18 = vmax.f32 %v3856_v20, 0.0 }
 0x3b7   : > { %v3886_v47 = vmax.f32 %v3854_v36, 0.0 }
 0x3b8   : > { %v3916_v54 = vpack.c.bf16 %v3888_v18, %v3887_v3 }
 0x3b9   : > { %v3915_v41 = vpack.c.bf16 %v3886_v47, %v3885_v63 }
 0x3bb   : > { %v4715_v56 = vpop.f32.mrb[24].mxu1  ;;  %4743 = vmatprep.mubr.msk.bf16.mxu0 %vm9105_vm9, %v3915_v41  ;;  %vm9120_vm9 = vmmov %vm9119_vm1 }
 0x3bc   : > { %v4783_v12 = vadd.f32 %v4715_v56, %v4643_v1  ;;  %v3715_v4 = vpop.f32.mrb[25].mxu1  ;;  %4744 = vmatmul.mubr.msk.bf16.gmra.mrb[52].mxu0 %vm9106_vm4, %v3916_v54  ;;  %vm9121_vm4 = vmmov %vm9119_vm1 }
 0x3bd   : > { %v4784_v46 = vadd.f32 %v3715_v4, %v2613_v35  ;;  %v4716_v57 = vpop.f32.mrb[26].mxu1 }
 0x3be   : > { %v3859_v50 = vadd.f32 %v4783_v12, %v8104_v31  ;;  %v4785_v45 = vadd.f32 %v4716_v57, %v4644_v27  ;;  %v3718_v9 = vpop.f32.mrb[27].mxu1  ;;  %v4647_v16 = vpop.f32.mrb[44].mxu0 }
 0x3bf   : > { %v3857_v42 = vadd.f32 %v4784_v46, %v8104_v31  ;;  %v4786_v40 = vadd.f32 %v3718_v9, %v2616_v61  ;;  %v2629_v19 = vpop.f32.mrb[45].mxu0 }
 0x3c0   : > { %v3860_v11 = vadd.f32 %v4785_v45, %v8104_v31  ;;  %v4648_v17 = vpop.f32.mrb[46].mxu0  ;;  %v3891_v34 = vmax.f32 %v3859_v50, 0.0 }
 0x3c1   : > { %v3858_v14 = vadd.f32 %v4786_v40, %v8104_v31  ;;  %v2632_v53 = vpop.f32.mrb[47].mxu0  ;;  %v3889_v23 = vmax.f32 %v3857_v42, 0.0 }
 0x3c2   : > { %v3892_v59 = vmax.f32 %v3860_v11, 0.0 }
 0x3c3   : > { %v3890_v37 = vmax.f32 %v3858_v14, 0.0 }
 0x3c4   : > { %v4719_v48 = vpop.f32.mrb[28].mxu1  ;;  %v3918_v26 = vpack.c.bf16 %v3892_v59, %v3891_v34 }
 0x3c5   : > { %v4787_v52 = vadd.f32 %v4719_v48, %v4647_v16  ;;  %v3731_v13 = vpop.f32.mrb[29].mxu1  ;;  %v3917_v39 = vpack.c.bf16 %v3890_v37, %v3889_v23 }
 0x3c6   : > { %v4788_v43 = vadd.f32 %v3731_v13, %v2629_v19  ;;  %v4720_v29 = vpop.f32.mrb[30].mxu1 }
 0x3c7   : > { %v3863_v44 = vadd.f32 %v4787_v52, %v8104_v31  ;;  %v4789_v2 = vadd.f32 %v4720_v29, %v4648_v17  ;;  %v3734_v58 = vpop.f32.mrb[31].mxu1  ;;  %4747 = vmatprep.mubr.msk.bf16.mxu0 %vm9107_vm12, %v3917_v39  ;;  %vm9122_vm12 = vmmov %vm9119_vm1 }
 0x3c8   : > { %v3861_v25 = vadd.f32 %v4788_v43, %v8104_v31  ;;  %v4790_v1 = vadd.f32 %v3734_v58, %v2632_v53  ;;  %4748 = vmatmul.mubr.msk.bf16.gmra.mrb[56].mxu0 %vm9108_vm11, %v3918_v26  ;;  %vm9123_vm11 = vmmov %vm9119_vm1 }
 0x3c9   : > { %v3864_v6 = vadd.f32 %v4789_v2, %v8104_v31  ;;  %v3895_v35 = vmax.f32 %v3863_v44, 0.0 }
 0x3ca   : > { %v3862_v33 = vadd.f32 %v4790_v1, %v8104_v31  ;;  %v3893_v27 = vmax.f32 %v3861_v25, 0.0 }
 0x3cb   : > { %v3896_v22 = vmax.f32 %v3864_v6, 0.0 }
 0x3cc   : > { %v3894_v0 = vmax.f32 %v3862_v33, 0.0  ;;  %v8154_v33 = vld [vmem:[#allocation13] ss:$0 sm:$0xff] }
 0x3cd   : > { %v4723_v61 = vpop.f32.mrb[0].mxu1  ;;  %v3920_v8 = vpack.c.bf16 %v3896_v22, %v3895_v35 }
 0x3ce   : > { %v3867_v30 = vadd.f32 %v4723_v61, %v8104_v31  ;;  %v3747_v51 = vpop.f32.mrb[1].mxu1  ;;  %v3919_v21 = vpack.c.bf16 %v3894_v0, %v3893_v27  ;;  %v5446_v61 = vld [vmem:[%s6073_s18 + $0x10] sm:$0xff] }
 0x3cf   : > { %v3865_v10 = vadd.f32 %v8104_v31, %v3747_v51  ;;  %v4724_v7 = vpop.f32.mrb[2].mxu1 }
 0x3d0   : > { %v3868_v49 = vadd.f32 %v4724_v7, %v8104_v31  ;;  %v3750_v60 = vpop.f32.mrb[3].mxu1  ;;  %4751 = vmatprep.mubr.msk.bf16.mxu0 %vm9109_vm2, %v3919_v21  ;;  %v3899_v5 = vmax.f32 %v3867_v30, 0.0  ;;  %v5447_v21 = vld [vmem:[%s6073_s18] sm:$0xff]  ;;  %vm9124_vm2 = vmmov %vm9119_vm1 }
 0x3d1   : > { %v3866_v55 = vadd.f32 %v8104_v31, %v3750_v60  ;;  %4752 = vmatmul.mubr.msk.bf16.gmra.mrb[60].mxu0 %vm9110_vm5, %v3920_v8  ;;  %v3897_v15 = vmax.f32 %v3865_v10, 0.0  ;;  %v5448_v60 = vld [vmem:[%s6073_s18 + $0x18] sm:$0xff]  ;;  %vm9125_vm5 = vmmov %vm9119_vm1 }
 0x3d2   : > { %v3900_v38 = vmax.f32 %v3868_v49, 0.0 }
 0x3d3   : > { %v3898_v32 = vmax.f32 %v3866_v55, 0.0 }
 0x3d4   : > { %v3922_v62 = vpack.c.bf16 %v3900_v38, %v3899_v5  ;;  %v5449_v38 = vld [vmem:[%s6073_s18 + $0x8] sm:$0xff] }
 0x3d5   : > { %v3921_v28 = vpack.c.bf16 %v3898_v32, %v3897_v15 }
 0x3d7   : > { %v4727_v24 = vpop.f32.mrb[4].mxu1  ;;  %4755 = vmatprep.mubr.msk.bf16.mxu0 %vm9111_vm7, %v3921_v28  ;;  %vm9126_vm7 = vmmov %vm9119_vm1 }
 0x3d8   : > { %v3871_v20 = vadd.f32 %v4727_v24, %v8104_v31  ;;  %v3763_v36 = vpop.f32.mrb[5].mxu1 }
 0x3d9   : > { %v3869_v3 = vadd.f32 %v8104_v31, %v3763_v36  ;;  %v4728_v18 = vpop.f32.mrb[6].mxu1  ;;  %4756 = vmatmul.mubr.msk.bf16.gmra.mrb[64].mxu0 %vm9096_vm0, %v3922_v62  ;;  %vm9127_vm0 = vmmov %vm9119_vm1 }
 0x3da   : > { %v3872_v63 = vadd.f32 %v4728_v18, %v8104_v31  ;;  %v3766_v47 = vpop.f32.mrb[7].mxu1  ;;  %v3903_v54 = vmax.f32 %v3871_v20, 0.0  ;;  %v5450_v18 = vld [vmem:[%s6073_s18 + $0x30] sm:$0xff] }
 0x3db   : > { %v3870_v56 = vadd.f32 %v8104_v31, %v3766_v47  ;;  %v3901_v4 = vmax.f32 %v3869_v3, 0.0 }
 0x3dc   : > { %v3904_v12 = vmax.f32 %v3872_v63, 0.0 }
 0x3dd   : > { %v3902_v41 = vmax.f32 %v3870_v56, 0.0 }
 0x3de   : > { %v3924_v46 = vpack.c.bf16 %v3904_v12, %v3903_v54  ;;  %v5451_v54 = vld [vmem:[%s6073_s18 + $0x20] sm:$0xff] }
 0x3df   : > { %v3923_v57 = vpack.c.bf16 %v3902_v41, %v3901_v4 }
 0x3e1   : > { %v4731_v50 = vpop.f32.mrb[8].mxu1  ;;  %4759 = vmatprep.mubr.msk.bf16.mxu0 %vm9112_vm6, %v3923_v57  ;;  %vm9128_vm6 = vmmov %vm9127_vm0 }
 0x3e2   : > { %v3875_v45 = vadd.f32 %v4731_v50, %v8104_v31  ;;  %v3779_v9 = vpop.f32.mrb[9].mxu1  ;;  %4760 = vmatmul.mubr.msk.bf16.gmra.mrb[68].mxu0 %vm9113_vm13, %v3924_v46  ;;  %v5452_v46 = vld [vmem:[%s6073_s18 + $0x38] sm:$0xff]  ;;  %vm9129_vm13 = vmmov %vm9127_vm0 }
 0x3e3   : > { %v3873_v16 = vadd.f32 %v8104_v31, %v3779_v9  ;;  %v4732_v42 = vpop.f32.mrb[10].mxu1 }
 0x3e4   : > { %v3876_v40 = vadd.f32 %v4732_v42, %v8104_v31  ;;  %v3782_v19 = vpop.f32.mrb[11].mxu1  ;;  %v3907_v17 = vmax.f32 %v3875_v45, 0.0  ;;  %v5453_v45 = vld [vmem:[%s6073_s18 + $0x28] sm:$0xff] }
 0x3e5   : > { %v3874_v11 = vadd.f32 %v8104_v31, %v3782_v19  ;;  %v3905_v53 = vmax.f32 %v3873_v16, 0.0 }
 0x3e6   : > { %v3908_v14 = vmax.f32 %v3876_v40, 0.0 }
 0x3e7   : > { %v3906_v34 = vmax.f32 %v3874_v11, 0.0 }
 0x3e8   : > { %v3926_v59 = vpack.c.bf16 %v3908_v14, %v3907_v17 }
 0x3e9   : > { %v3925_v23 = vpack.c.bf16 %v3906_v34, %v3905_v53  ;;  %v4735_v37 = vpop.f32.mrb[12].mxu1  ;;  %v5454_v53 = vld [vmem:[%s6073_s18 + $0x50] sm:$0xff] }
 0x3ea   : > { %v3879_v48 = vadd.f32 %v4735_v37, %v8104_v31  ;;  %v3795_v26 = vpop.f32.mrb[13].mxu1  ;;  %v5455_v37 = vld [vmem:[%s6073_s18 + $0x40] sm:$0xff] }
 0x3eb   : > { %v3877_v52 = vadd.f32 %v8104_v31, %v3795_v26  ;;  %v4736_v13 = vpop.f32.mrb[14].mxu1  ;;  %4763 = vmatprep.mubr.msk.bf16.mxu0 %vm9114_vm10, %v3925_v23  ;;  %vm9130_vm10 = vmmov %vm9127_vm0 }
 0x3ec   : > { %v3880_v39 = vadd.f32 %v4736_v13, %v8104_v31  ;;  %v3798_v43 = vpop.f32.mrb[15].mxu1  ;;  %v3911_v44 = vmax.f32 %v3879_v48, 0.0  ;;  %4764 = vmatmul.mubr.msk.bf16.gmra.mrb[72].mxu0 %vm9115_vm8, %v3926_v59  ;;  %v5456_v13 = vld [vmem:[%s6073_s18 + $0x58] sm:$0xff]  ;;  %vm9131_vm8 = vmmov %vm9127_vm0 }
 0x3ed   : > { %v3878_v29 = vadd.f32 %v8104_v31, %v3798_v43  ;;  %v3909_v58 = vmax.f32 %v3877_v52, 0.0 }
 0x3ee   : > { %v3912_v2 = vmax.f32 %v3880_v39, 0.0 }
 0x3ef   : > { %v3910_v25 = vmax.f32 %v3878_v29, 0.0  ;;  %v5457_v29 = vld [vmem:[%s6073_s18 + $0x48] sm:$0xff] }
 0x3f0   : > { %v3928_v1 = vpack.c.bf16 %v3912_v2, %v3911_v44 }
 0x3f1   : > { %v3927_v6 = vpack.c.bf16 %v3910_v25, %v3909_v58 }
 0x3f3   : > { %4767 = vmatprep.mubr.msk.bf16.mxu0 %vm9116_vm3, %v3927_v6  ;;  %vm9132_vm3 = vmmov %vm9127_vm0 }
 0x3f4   : > { %4768 = vmatmul.mubr.msk.bf16.gmra.mrb[76].mxu0 %vm9117_vm15, %v3928_v1  ;;  %vm9133_vm15 = vmmov %vm9127_vm0 }
 0x487   : > { %v4741_v35 = vpop.f32.mrb[48].mxu0 }
 0x488   : > { %v4031_v31 = vadd.f32 %v4741_v35, %v8154_v33  ;;  %v4022_v22 = vpop.f32.mrb[49].mxu0 }
 0x489   : > { %v4023_v27 = vadd.f32 %v8154_v33, %v4022_v22  ;;  %v4742_v0 = vpop.f32.mrb[50].mxu0  ;;  %v5458_v22 = vld [vmem:[%s6073_s18 + $0x70] sm:$0xff] }
 0x48a   : > { %v4151_v8 = vadd.f32 %v5446_v61, %v4031_v31  ;;  %v4034_v30 = vadd.f32 %v4742_v0, %v8154_v33  ;;  %v4025_v51 = vpop.f32.mrb[51].mxu0 }
 0x48b   : > { %v4149_v10 = vadd.f32 %v5447_v21, %v4023_v27  ;;  %v4026_v7 = vadd.f32 %v8154_v33, %v4025_v51 }
 0x48c   : > { %v4183_v49 = vmax.f32 %v4151_v8, 0.0  ;;  %v4152_v55 = vadd.f32 %v5448_v60, %v4034_v30  ;;  %v5459_v8 = vld [vmem:[%s6073_s18 + $0x60] sm:$0xff]  ;;  %v5461_v60 = vld [vmem:[%s6073_s18 + $0x68] sm:$0xff] }
 0x48d   : > { %v4181_v5 = vmax.f32 %v4149_v10, 0.0  ;;  %v4150_v15 = vadd.f32 %v5449_v38, %v4026_v7  ;;  %v5460_v10 = vld [vmem:[%s6073_s18 + $0x78] sm:$0xff] }
 0x48e   : > { %4215 = vst.msk [vmem:[%s8166_s17 + $0x10] sm:$0xff] %vm9118_vm14, %v4183_v49  ;;  %v4184_v32 = vmax.f32 %v4152_v55, 0.0  ;;  %vm9134_vm14 = vmmov %vm9127_vm0 }
 0x48f   : > { %4213 = vst.msk [vmem:[%s8166_s17] sm:$0xff] %vm9119_vm1, %v4181_v5  ;;  %v4182_v62 = vmax.f32 %v4150_v15, 0.0  ;;  %v4745_v28 = vpop.f32.mrb[52].mxu0  ;;  %vm9135_vm1 = vmmov %vm9127_vm0 }
 0x490   : > { %4216 = vst.msk [vmem:[%s8166_s17 + $0x18] sm:$0xff] %vm9120_vm9, %v4184_v32  ;;  %v4047_v24 = vadd.f32 %v4745_v28, %v8154_v33  ;;  %v4038_v20 = vpop.f32.mrb[53].mxu0  ;;  %vm9136_vm9 = vmmov %vm9127_vm0 }
 0x491   : > { %4214 = vst.msk [vmem:[%s8166_s17 + $0x8] sm:$0xff] %vm9121_vm4, %v4182_v62  ;;  %v4039_v36 = vadd.f32 %v8154_v33, %v4038_v20  ;;  %v4746_v3 = vpop.f32.mrb[54].mxu0  ;;  %v5462_v20 = vld [vmem:[%s6073_s18 + $0x90] sm:$0xff]  ;;  %vm9137_vm4 = vmmov %vm9127_vm0 }
 0x492   : > { %v4155_v63 = vadd.f32 %v5450_v18, %v4047_v24  ;;  %v4050_v47 = vadd.f32 %v4746_v3, %v8154_v33  ;;  %v4041_v56 = vpop.f32.mrb[55].mxu0 }
 0x493   : > { %v4153_v12 = vadd.f32 %v5451_v54, %v4039_v36  ;;  %v4042_v4 = vadd.f32 %v8154_v33, %v4041_v56 }
 0x494   : > { %v4187_v41 = vmax.f32 %v4155_v63, 0.0  ;;  %v4156_v57 = vadd.f32 %v5452_v46, %v4050_v47  ;;  %v5463_v63 = vld [vmem:[%s6073_s18 + $0x80] sm:$0xff]  ;;  %v5465_v46 = vld [vmem:[%s6073_s18 + $0x88] sm:$0xff] }
 0x495   : > { %v4185_v50 = vmax.f32 %v4153_v12, 0.0  ;;  %v4154_v9 = vadd.f32 %v5453_v45, %v4042_v4  ;;  %v5464_v12 = vld [vmem:[%s6073_s18 + $0x98] sm:$0xff] }
 0x496   : > { %4219 = vst.msk [vmem:[%s8166_s17 + $0x30] sm:$0xff] %vm9122_vm12, %v4187_v41  ;;  %v4188_v16 = vmax.f32 %v4156_v57, 0.0  ;;  %vm9138_vm12 = vmmov %vm9127_vm0 }
 0x497   : > { %4217 = vst.msk [vmem:[%s8166_s17 + $0x20] sm:$0xff] %vm9123_vm11, %v4185_v50  ;;  %v4186_v42 = vmax.f32 %v4154_v9, 0.0  ;;  %vm9139_vm11 = vmmov %vm9127_vm0 }
 0x498   : > { %4220 = vst.msk [vmem:[%s8166_s17 + $0x38] sm:$0xff] %vm9124_vm2, %v4188_v16  ;;  %vm9140_vm2 = vmmov %vm9127_vm0 }
 0x499   : > { %4218 = vst.msk [vmem:[%s8166_s17 + $0x28] sm:$0xff] %vm9125_vm5, %v4186_v42  ;;  %vm9141_vm5 = vmmov %vm9127_vm0 }
 0x49b   : > { %v4749_v40 = vpop.f32.mrb[56].mxu0 }
 0x49c   : > { %v4063_v19 = vadd.f32 %v4749_v40, %v8154_v33  ;;  %v4054_v11 = vpop.f32.mrb[57].mxu0 }
 0x49d   : > { %v4055_v17 = vadd.f32 %v8154_v33, %v4054_v11  ;;  %v4750_v14 = vpop.f32.mrb[58].mxu0  ;;  %v5466_v11 = vld [vmem:[%s6073_s18 + $0xb0] sm:$0xff] }
 0x49e   : > { %v4159_v34 = vadd.f32 %v5454_v53, %v4063_v19  ;;  %v4066_v59 = vadd.f32 %v4750_v14, %v8154_v33  ;;  %v4057_v23 = vpop.f32.mrb[59].mxu0 }
 0x49f   : > { %v4157_v48 = vadd.f32 %v5455_v37, %v4055_v17  ;;  %v4058_v26 = vadd.f32 %v8154_v33, %v4057_v23 }
 0x4a0   : > { %v4191_v52 = vmax.f32 %v4159_v34, 0.0  ;;  %v4160_v39 = vadd.f32 %v5456_v13, %v4066_v59  ;;  %v5467_v34 = vld [vmem:[%s6073_s18 + $0xa0] sm:$0xff]  ;;  %v5469_v13 = vld [vmem:[%s6073_s18 + $0xa8] sm:$0xff] }
 0x4a1   : > { %v4189_v43 = vmax.f32 %v4157_v48, 0.0  ;;  %v4158_v44 = vadd.f32 %v5457_v29, %v4058_v26  ;;  %v5468_v48 = vld [vmem:[%s6073_s18 + $0xb8] sm:$0xff] }
 0x4a2   : > { %4223 = vst.msk [vmem:[%s8166_s17 + $0x50] sm:$0xff] %vm9126_vm7, %v4191_v52  ;;  %v4192_v2 = vmax.f32 %v4160_v39, 0.0  ;;  %vm9142_vm7 = vmmov %vm9127_vm0 }
 0x4a3   : > { %4221 = vst.msk [vmem:[%s8166_s17 + $0x40] sm:$0xff] %vm9127_vm0, %v4189_v43  ;;  %v4190_v58 = vmax.f32 %v4158_v44, 0.0 }
 0x4a4   : > { %v4753_v25 = vpop.f32.mrb[60].mxu0  ;;  %4224 = vst.msk [vmem:[%s8166_s17 + $0x58] sm:$0xff] %vm9128_vm6, %v4192_v2  ;;  %vm9143_vm6 = vmmov %vm9127_vm0 }
 0x4a5   : > { %v4079_v1 = vadd.f32 %v4753_v25, %v8154_v33  ;;  %v4070_v6 = vpop.f32.mrb[61].mxu0  ;;  %4222 = vst.msk [vmem:[%s8166_s17 + $0x48] sm:$0xff] %vm9129_vm13, %v4190_v58  ;;  %vm9144_vm13 = vmmov %vm9127_vm0 }
 0x4a6   : > { %v4071_v35 = vadd.f32 %v8154_v33, %v4070_v6  ;;  %v4754_v31 = vpop.f32.mrb[62].mxu0  ;;  %v5470_v6 = vld [vmem:[%s6073_s18 + $0xd0] sm:$0xff] }
 0x4a7   : > { %v4163_v27 = vadd.f32 %v5458_v22, %v4079_v1  ;;  %v4082_v0 = vadd.f32 %v4754_v31, %v8154_v33  ;;  %v4073_v61 = vpop.f32.mrb[63].mxu0 }
 0x4a8   : > { %v4161_v30 = vadd.f32 %v5459_v8, %v4071_v35  ;;  %v4074_v51 = vadd.f32 %v8154_v33, %v4073_v61 }
 0x4a9   : > { %v4195_v21 = vmax.f32 %v4163_v27, 0.0  ;;  %v4164_v7 = vadd.f32 %v5460_v10, %v4082_v0  ;;  %v5471_v27 = vld [vmem:[%s6073_s18 + $0xc0] sm:$0xff]  ;;  %v5473_v10 = vld [vmem:[%s6073_s18 + $0xc8] sm:$0xff] }
 0x4aa   : > { %v4193_v49 = vmax.f32 %v4161_v30, 0.0  ;;  %v4162_v55 = vadd.f32 %v5461_v60, %v4074_v51  ;;  %v5472_v30 = vld [vmem:[%s6073_s18 + $0xd8] sm:$0xff] }
 0x4ab   : > { %4227 = vst.msk [vmem:[%s8166_s17 + $0x70] sm:$0xff] %vm9130_vm10, %v4195_v21  ;;  %v4196_v5 = vmax.f32 %v4164_v7, 0.0  ;;  %vm9145_vm10 = vmmov %vm9127_vm0 }
 0x4ac   : > { %4225 = vst.msk [vmem:[%s8166_s17 + $0x60] sm:$0xff] %vm9131_vm8, %v4193_v49  ;;  %v4194_v38 = vmax.f32 %v4162_v55, 0.0  ;;  %v4757_v15 = vpop.f32.mrb[64].mxu0  ;;  %vm9146_vm8 = vmmov %vm9127_vm0 }
 0x4ad   : > { %4228 = vst.msk [vmem:[%s8166_s17 + $0x78] sm:$0xff] %vm9132_vm3, %v4196_v5  ;;  %v4095_v32 = vadd.f32 %v4757_v15, %v8154_v33  ;;  %v4086_v62 = vpop.f32.mrb[65].mxu0  ;;  %vm9147_vm3 = vmmov %vm9127_vm0 }
 0x4ae   : > { %4226 = vst.msk [vmem:[%s8166_s17 + $0x68] sm:$0xff] %vm9133_vm15, %v4194_v38  ;;  %v4087_v28 = vadd.f32 %v8154_v33, %v4086_v62  ;;  %v4758_v24 = vpop.f32.mrb[66].mxu0  ;;  %v5474_v62 = vld [vmem:[%s6073_s18 + $0xf0] sm:$0xff]  ;;  %vm9148_vm15 = vmmov %vm9127_vm0 }
 0x4af   : > { %v4167_v36 = vadd.f32 %v5462_v20, %v4095_v32  ;;  %v4098_v3 = vadd.f32 %v4758_v24, %v8154_v33  ;;  %v4089_v18 = vpop.f32.mrb[67].mxu0 }
 0x4b0   : > { %v4165_v47 = vadd.f32 %v5463_v63, %v4087_v28  ;;  %v4090_v56 = vadd.f32 %v8154_v33, %v4089_v18 }
 0x4b1   : > { %v4199_v54 = vmax.f32 %v4167_v36, 0.0  ;;  %v4168_v4 = vadd.f32 %v5464_v12, %v4098_v3  ;;  %v5475_v36 = vld [vmem:[%s6073_s18 + $0xe0] sm:$0xff]  ;;  %v5477_v12 = vld [vmem:[%s6073_s18 + $0xe8] sm:$0xff] }
 0x4b2   : > { %v4197_v41 = vmax.f32 %v4165_v47, 0.0  ;;  %v4166_v57 = vadd.f32 %v5465_v46, %v4090_v56  ;;  %v5476_v47 = vld [vmem:[%s6073_s18 + $0xf8] sm:$0xff] }
 0x4b3   : > { %4231 = vst.msk [vmem:[%s8166_s17 + $0x90] sm:$0xff] %vm9134_vm14, %v4199_v54  ;;  %v4200_v50 = vmax.f32 %v4168_v4, 0.0 }
 0x4b4   : > { %4229 = vst.msk [vmem:[%s8166_s17 + $0x80] sm:$0xff] %vm9135_vm1, %v4197_v41  ;;  %v4198_v45 = vmax.f32 %v4166_v57, 0.0 }
 0x4b5   : > { %v4761_v9 = vpop.f32.mrb[68].mxu0  ;;  %4232 = vst.msk [vmem:[%s8166_s17 + $0x98] sm:$0xff] %vm9136_vm9, %v4200_v50 }
 0x4b6   : > { %v4111_v16 = vadd.f32 %v4761_v9, %v8154_v33  ;;  %v4102_v42 = vpop.f32.mrb[69].mxu0  ;;  %4230 = vst.msk [vmem:[%s8166_s17 + $0x88] sm:$0xff] %vm9137_vm4, %v4198_v45 }
 0x4b7   : > { %v4103_v40 = vadd.f32 %v8154_v33, %v4102_v42  ;;  %v4762_v19 = vpop.f32.mrb[70].mxu0 }
 0x4b8   : > { %v4171_v17 = vadd.f32 %v5466_v11, %v4111_v16  ;;  %v4114_v14 = vadd.f32 %v4762_v19, %v8154_v33  ;;  %v4105_v53 = vpop.f32.mrb[71].mxu0 }
 0x4b9   : > { %v4169_v59 = vadd.f32 %v5467_v34, %v4103_v40  ;;  %v4106_v23 = vadd.f32 %v8154_v33, %v4105_v53 }
 0x4ba   : > { %v4203_v37 = vmax.f32 %v4171_v17, 0.0  ;;  %v4172_v26 = vadd.f32 %v5468_v48, %v4114_v14 }
 0x4bb   : > { %v4201_v52 = vmax.f32 %v4169_v59, 0.0  ;;  %v4170_v39 = vadd.f32 %v5469_v13, %v4106_v23 }
 0x4bc   : > { %4235 = vst.msk [vmem:[%s8166_s17 + $0xb0] sm:$0xff] %vm9138_vm12, %v4203_v37  ;;  %v4204_v43 = vmax.f32 %v4172_v26, 0.0 }
 0x4bd   : > { %4233 = vst.msk [vmem:[%s8166_s17 + $0xa0] sm:$0xff] %vm9139_vm11, %v4201_v52  ;;  %v4202_v29 = vmax.f32 %v4170_v39, 0.0 }
 0x4be   : > { %4236 = vst.msk [vmem:[%s8166_s17 + $0xb8] sm:$0xff] %vm9140_vm2, %v4204_v43 }
 0x4bf   : > { %v4765_v44 = vpop.f32.mrb[72].mxu0  ;;  %4234 = vst.msk [vmem:[%s8166_s17 + $0xa8] sm:$0xff] %vm9141_vm5, %v4202_v29 }
 0x4c0   : > { %v4127_v2 = vadd.f32 %v4765_v44, %v8154_v33  ;;  %v4118_v58 = vpop.f32.mrb[73].mxu0 }
 0x4c1   : > { %v4119_v25 = vadd.f32 %v8154_v33, %v4118_v58  ;;  %v4766_v1 = vpop.f32.mrb[74].mxu0 }
 0x4c2   : > { %v4175_v35 = vadd.f32 %v5470_v6, %v4127_v2  ;;  %v4130_v31 = vadd.f32 %v4766_v1, %v8154_v33  ;;  %v4121_v22 = vpop.f32.mrb[75].mxu0 }
 0x4c3   : > { %v4173_v0 = vadd.f32 %v5471_v27, %v4119_v25  ;;  %v4122_v61 = vadd.f32 %v8154_v33, %v4121_v22 }
 0x4c4   : > { %v4207_v8 = vmax.f32 %v4175_v35, 0.0  ;;  %v4176_v51 = vadd.f32 %v5472_v30, %v4130_v31 }
 0x4c5   : > { %v4205_v21 = vmax.f32 %v4173_v0, 0.0  ;;  %v4174_v7 = vadd.f32 %v5473_v10, %v4122_v61 }
 0x4c6   : > { %4239 = vst.msk [vmem:[%s8166_s17 + $0xd0] sm:$0xff] %vm9142_vm7, %v4207_v8  ;;  %v4208_v49 = vmax.f32 %v4176_v51, 0.0 }
 0x4c7   : > { %4237 = vst.msk [vmem:[%s8166_s17 + $0xc0] sm:$0xff] %vm9127_vm0, %v4205_v21  ;;  %v4206_v60 = vmax.f32 %v4174_v7, 0.0  ;;  %v4769_v55 = vpop.f32.mrb[76].mxu0 }
 0x4c8   : > { %4240 = vst.msk [vmem:[%s8166_s17 + $0xd8] sm:$0xff] %vm9143_vm6, %v4208_v49  ;;  %v4143_v5 = vadd.f32 %v4769_v55, %v8154_v33  ;;  %v4134_v38 = vpop.f32.mrb[77].mxu0 }
 0x4c9   : > { %4238 = vst.msk [vmem:[%s8166_s17 + $0xc8] sm:$0xff] %vm9144_vm13, %v4206_v60  ;;  %v4135_v15 = vadd.f32 %v8154_v33, %v4134_v38  ;;  %v4770_v32 = vpop.f32.mrb[78].mxu0 }
 0x4ca   : > { %v4179_v28 = vadd.f32 %v5474_v62, %v4143_v5  ;;  %v4146_v24 = vadd.f32 %v4770_v32, %v8154_v33  ;;  %v4137_v20 = vpop.f32.mrb[79].mxu0 }
 0x4cb   : > { %v4177_v3 = vadd.f32 %v5475_v36, %v4135_v15  ;;  %v4138_v18 = vadd.f32 %v8154_v33, %v4137_v20 }
 0x4cc   : > { %v4211_v63 = vmax.f32 %v4179_v28, 0.0  ;;  %v4180_v56 = vadd.f32 %v5476_v47, %v4146_v24 }
 0x4cd   : > { %v4209_v54 = vmax.f32 %v4177_v3, 0.0  ;;  %v4178_v4 = vadd.f32 %v5477_v12, %v4138_v18 }
 0x4ce   : > { %4243 = vst.msk [vmem:[%s8166_s17 + $0xf0] sm:$0xff] %vm9145_vm10, %v4211_v63  ;;  %v4212_v41 = vmax.f32 %v4180_v56, 0.0 }
 0x4cf   : > { %4241 = vst.msk [vmem:[%s8166_s17 + $0xe0] sm:$0xff] %vm9146_vm8, %v4209_v54  ;;  %v4210_v33 = vmax.f32 %v4178_v4, 0.0 }
 0x4d0   : > { %4244 = vst.msk [vmem:[%s8166_s17 + $0xf8] sm:$0xff] %vm9147_vm3, %v4212_v41 }
 0x4d1   : > { %4242 = vst.msk [vmem:[%s8166_s17 + $0xe8] sm:$0xff] %vm9148_vm15, %v4210_v33 }
 0x4d2   : > { %5689 = shalt.err (!%p5686_p8)
}
 0x4d3   : > { %s5690_s18 = scalar_lea.hbm %s8287_s15, 4096  ;;  %s5694_s29 = scalar_lea.hbm %s8347_s7, 8192 }
 0x4d4   : > { %p5691_p4 = scmp.ne.s32.totalorder %s8287_s15, %s5690_s18  ;;  %p5695_p0 = scmp.lt.u32.totalorder %s8287_s15, %s8347_s7 }
 0x4d5   : > { %p5696_p5 = scmp.lt.u32.totalorder %s5694_s29, %s5690_s18  ;;  %p5698_p6 = scmp.lt.u32.totalorder %s5690_s18, %s8287_s15 }
 0x4d6   : > { %p5692_p10 = pnand %p5691_p4, %p9149_p9 }
 0x4d7   : > { %p5697_p7 = por %p5696_p5, %p5695_p0 }
 0x4d8   : > { %p5693_p11 = pneg %p5692_p10 }
 0x4d9   : > { %p5699_p12 = por %p5698_p6, %p5697_p7 }
 0x4db   : > { %p5700_p13 = pnand %p5699_p12, %p5693_p11 }
 0x4dd   : > { %5703 = shalt.err (!%p5700_p13)
}
 0x4de   : > { %s5771_s13 = smov 128  }
 0x4df   : > { %4870 = dma.vmem_to_hbm [thread:$0]  (%p9149_p9), %s8291_s19, 4096, %s8287_s15, %s4246_s30, %s5771_s13, %s5771_s13, %s5768_s8  }
 0x4e0 PF: > { %s4274_s28 = sand.u32 1, %s5742_s24   ;;  %p9150_p1 = scmp.ne.s32.totalorder %s8502_s12, 0 }
 0x4e1   : > { %p9151_p3 = scmp.ge.s32.totalorder %s5754_s27, 2  ;;  %s4275_s9 = scalar_lea.sflag [#allocation4], %s4274_s28 }
 0x4e3   : > { %p4896_p2 = pnand %p9151_p3, %p9150_p1 }
 0x4e5   : > { %5737 = dma.done.wait (!%p4896_p2), %s4275_s9, 4096  }
 0x4e6   : > { %5739 = vsyncadd (!%p4896_p2), %s4275_s9, 4294963200  ;;  %p23_p8 = scmp.ge.s32.totalorder %s5988_s11, 4   ;;  %s9152_s24 = smov %s5746_s25 }
 0x4e7   : > { %s9153_s25 = smov %s5750_s26  ;;  %s9154_s26 = smov %s5999_s10 }
 0x4e8   : > { %s9155_s27 = smov %s5988_s11  ;;  %25 = sbr.rel (!%p23_p8) target bundleno = 8 (0x8), region = 119 }
 0x4ef   :  { %4280 = vsyncpa [#allocation3], 1 }
 0x4f0   :  { %4282 = vsyncpa [#allocation3 + $0x1], 1 }
 0x4f1   :  { %4283 = vsyncpa [#allocation6], 1 }
 0x4f2   :  { %4284 = vsyncpa [#allocation9], 1 }
 0x4f3   :  { %4285 = vsyncpa [#allocation12], 1 }
 0x4f4   :  { %4286 = vsyncpa [#allocation4], 1 }
 0x4f5   :  { %4288 = vsyncpa [#allocation4 + $0x1], 1 }

// kernel: tpu_custom_call.1
= control target key start
LH: loop header
LB: loop body
LE: loop exit
PB: predicated region body
PF: predicated region fallthrough
CT: control target
= control target key end

     0   :  { %12 = vsyncpa [#allocation3], 0  ;;  %s8340_s0 = inlined_call_operand.hbm [shape: f32[2,256,16], index: 0, kind: input, shape index: {}]   ;;  %s8341_s1 = inlined_call_operand.hbm [shape: bf16[16,8], index: 1, kind: input, shape index: {}]   ;;  %s8342_s2 = inlined_call_operand.hbm [shape: f32[1,8], index: 2, kind: input, shape index: {}]   ;;  %s8343_s3 = inlined_call_operand.hbm [shape: bf16[3,24,8], index: 3, kind: input, shape index: {}]   ;;  %s8344_s4 = inlined_call_operand.hbm [shape: f32[1,8], index: 4, kind: input, shape index: {}]   ;;  %s8345_s5 = inlined_call_operand.hbm [shape: bf16[8,16], index: 5, kind: input, shape index: {}]   ;;  %s8346_s6 = inlined_call_operand.hbm [shape: f32[1,16], index: 6, kind: input, shape index: {}]   ;;  %s8347_s7 = inlined_call_operand.hbm [shape: f32[2,256,16], index: 7, kind: output, shape index: {}]  }
   0x1   :  { %14 = vsyncpa [#allocation3 + $0x1], 0 }
   0x2   :  { %15 = vsyncpa [#allocation6], 0 }
   0x3   :  { %16 = vsyncpa [#allocation9], 0 }
   0x4   :  { %17 = vsyncpa [#allocation12], 0 }
   0x5   :  { %18 = vsyncpa [#allocation4], 0 }
   0x6   :  { %20 = vsyncpa [#allocation4 + $0x1], 0  ;;  %s5812_s24 = smov 0   ;;  %s5814_s25 = smov 0  }
   0x7   :  { %s5816_s26 = smov 0   ;;  %s5818_s27 = smov 0  }
   0x8 LB: > { %s5756_s28 = smov [#allocation5]   ;;  %s5833_s30 = sadd.s32 4294967295, %s5754_s27   ;;  %s5754_s27 = sphi %s5818_s27, %s9155_s27   ;;  %s5750_s26 = sphi %s5816_s26, %s9154_s26   ;;  %s5746_s25 = sphi %s5814_s25, %s9153_s25   ;;  %s5742_s24 = sphi %s5812_s24, %s9152_s24  }
   0x9   : > { %s221_s29 = sshll.u32 %s5756_s28, 4  ;;  %p4390_p0 = scmp.ge.s32.totalorder %s5754_s27, 1  ;;  %s5838_s29 = int_to_ptr.vmem [resolvable:$true] %s221_s29 }
   0xa   : > { %p8348_p1 = scmp.eq.s32.totalorder %s5833_s30, 0  ;;  %p209_p2 = scmp.lt.s32.totalorder %s5754_s27, 3 }
   0xb   : > { %s5757_s9 = smov [#allocation8]   ;;  %s5758_s12 = smov [#allocation11]  }
   0xc   : > { %p5840_p3 = pnand %p4390_p0, %p209_p2  ;;  %s245_s10 = sshll.u32 %s5757_s9, 4  ;;  %s5853_s10 = int_to_ptr.vmem [resolvable:$true] %s245_s10 }
   0xd   : > { %s270_s13 = sshll.u32 %s5758_s12, 4  ;;  %s5478_s16 = scalar_lea.hbm %s8341_s1, 128  ;;  %s5855_s13 = int_to_ptr.vmem [resolvable:$true] %s270_s13 }
   0xe   : > { %s8495_s8 = scalar_select %p5840_p3, 1, 0 }
   0xf   : > { %p4872_p5 = pneg %p5840_p3  ;;  %p5479_p7 = scmp.ne.s32.totalorder %s8341_s1, %s5478_s16 }
  0x10   : > { %p5485_p11 = scmp.lt.u32.totalorder %s5478_s16, %s8341_s1 }
  0x11   : > { %p5849_p6 = pnand %p4872_p5, %p8348_p1 }
  0x13   : > { %p5865_p8 = pneg %p5849_p6 }
  0x15   : > { %p5481_p9 = pnand %p5865_p8, %p5479_p7 }
  0x17   : > { %p5482_p10 = pneg %p5481_p9 }
  0x19   : > { %p5487_p12 = pnand %p5485_p11, %p5482_p10 }
  0x1b   : > { %5490 = shalt.err (!%p5487_p12)
}
  0x1c   : > { %s5491_s22 = scalar_lea.vmem %s5838_s29, 128  ;;  %p5499_p5 = scmp.lt.s32.totalorder %s5838_s29, %s5838_s29 }
  0x1d   : > { %p5492_p13 = scmp.ne.s32.totalorder %s5838_s29, %s5491_s22  ;;  %p5500_p4 = scmp.lt.s32.totalorder %s5491_s22, %s5491_s22 }
  0x1f   : > { %p5494_p0 = pnand %p5492_p13, %p5865_p8  ;;  %p5501_p7 = por %p5500_p4, %p5499_p5 }
  0x21   : > { %p5495_p2 = pneg %p5494_p0 }
  0x23   : > { %p5502_p9 = pnand %p5501_p7, %p5495_p2 }
  0x25   : > { %5505 = shalt.err (!%p5502_p9)
}
  0x26   : > { %s5759_s23 = smov 64   ;;  %s5760_s28 = smov 4  }
  0x27   : > { %4875 = dma.hbm_to_vmem [thread:$0]  (!%p5849_p6), %s8341_s1, 128, %s5838_s29, [#allocation6], %s5759_s23, %s5759_s23, %s5760_s28  }
  0x28   : > { %s5506_s16 = scalar_lea.hbm %s8343_s3, 576 }
  0x29   : > { %p5507_p4 = scmp.ne.s32.totalorder %s8343_s3, %s5506_s16  ;;  %p5513_p12 = scmp.lt.u32.totalorder %s5506_s16, %s8343_s3 }
  0x2b   : > { %p5509_p10 = pnand %p5507_p4, %p5865_p8 }
  0x2d   : > { %p5510_p11 = pneg %p5509_p10 }
  0x2f   : > { %p5515_p13 = pnand %p5513_p12, %p5510_p11 }
  0x31   : > { %5518 = shalt.err (!%p5515_p13)
}
  0x32   : > { %s5519_s29 = scalar_lea.vmem %s5853_s10, 576  ;;  %p5527_p7 = scmp.lt.s32.totalorder %s5853_s10, %s5853_s10 }
  0x33   : > { %p5520_p0 = scmp.ne.s32.totalorder %s5853_s10, %s5519_s29  ;;  %p5528_p9 = scmp.lt.s32.totalorder %s5519_s29, %s5519_s29 }
  0x35   : > { %p5522_p2 = pnand %p5520_p0, %p5865_p8  ;;  %p5529_p4 = por %p5528_p9, %p5527_p7 }
  0x37   : > { %p5523_p5 = pneg %p5522_p2 }
  0x39   : > { %p5530_p10 = pnand %p5529_p4, %p5523_p5 }
  0x3b   : > { %5533 = shalt.err (!%p5530_p10)
}
  0x3c   : > { %4881 = dma.hbm_to_vmem [thread:$0]  (!%p5849_p6), %s8343_s3, 576, %s5853_s10, [#allocation9], %s5759_s23, %s5759_s23, %s5760_s28  }
  0x3d   : > { %s5534_s15 = scalar_lea.hbm %s8345_s5, 64 }
  0x3e   : > { %p5535_p11 = scmp.ne.s32.totalorder %s8345_s5, %s5534_s15  ;;  %p5541_p0 = scmp.lt.u32.totalorder %s5534_s15, %s8345_s5 }
  0x40   : > { %p5537_p12 = pnand %p5535_p11, %p5865_p8 }
  0x42   : > { %p5538_p13 = pneg %p5537_p12 }
  0x44   : > { %p5543_p2 = pnand %p5541_p0, %p5538_p13 }
  0x46   : > { %5546 = shalt.err (!%p5543_p2)
}
  0x47   : > { %s5547_s10 = scalar_lea.vmem %s5855_s13, 64  ;;  %p5555_p4 = scmp.lt.s32.totalorder %s5855_s13, %s5855_s13 }
  0x48   : > { %p5548_p5 = scmp.ne.s32.totalorder %s5855_s13, %s5547_s10  ;;  %p5556_p10 = scmp.lt.s32.totalorder %s5547_s10, %s5547_s10 }
  0x4a   : > { %p5550_p7 = pnand %p5548_p5, %p5865_p8  ;;  %p5557_p11 = por %p5556_p10, %p5555_p4 }
  0x4c   : > { %p5551_p9 = pneg %p5550_p7 }
  0x4e   : > { %p5558_p12 = pnand %p5557_p11, %p5551_p9 }
  0x50   : > { %5561 = shalt.err (!%p5558_p12)
}
  0x51   : > { %4887 = dma.hbm_to_vmem [thread:$0]  (!%p5849_p6), %s8345_s5, 64, %s5855_s13, [#allocation12]  }
  0x52   : > { %s5761_s21 = smov [#allocation7]   ;;  %s5762_s22 = smov [#allocation10]  }
  0x53   : > { %s235_s29 = sshll.u32 %s5761_s21, 4  ;;  %s259_s9 = sshll.u32 %s5762_s22, 4  ;;  %s236_s29 = int_to_ptr.vmem [resolvable:$true] %s235_s29  ;;  %s260_s9 = int_to_ptr.vmem [resolvable:$true] %s259_s9 }
  0x54   : > { %s5562_s15 = scalar_lea.hbm %s8342_s2, 16 }
  0x55   : > { %p5563_p13 = scmp.ne.s32.totalorder %s8342_s2, %s5562_s15  ;;  %p5569_p5 = scmp.lt.u32.totalorder %s5562_s15, %s8342_s2 }
  0x57   : > { %p5565_p0 = pnand %p5563_p13, %p5865_p8 }
  0x59   : > { %p5566_p2 = pneg %p5565_p0 }
  0x5b   : > { %p5571_p7 = pnand %p5569_p5, %p5566_p2 }
  0x5d   : > { %5574 = shalt.err (!%p5571_p7)
}
  0x5e   : > { %s5575_s13 = scalar_lea.vmem %s236_s29, 16  ;;  %s5582_s10 = scalar_lea.vmem %s236_s29, 32 }
  0x5f   : > { %p5576_p9 = scmp.ne.s32.totalorder %s236_s29, %s5575_s13  ;;  %p5583_p11 = scmp.lt.s32.totalorder %s236_s29, %s236_s29 }
  0x60   : > { %p5584_p12 = scmp.lt.s32.totalorder %s5582_s10, %s5575_s13 }
  0x61   : > { %p5578_p4 = pnand %p5576_p9, %p5865_p8 }
  0x62   : > { %p5585_p1 = por %p5584_p12, %p5583_p11 }
  0x63   : > { %p5579_p10 = pneg %p5578_p4 }
  0x65   : > { %p5586_p3 = pnand %p5585_p1, %p5579_p10 }
  0x67   : > { %5589 = shalt.err (!%p5586_p3)
}
  0x68   : > { %4878 = dma.hbm_to_vmem [thread:$0]  (!%p5849_p6), %s8342_s2, 16, %s236_s29, [#allocation6]  }
  0x69   : > { %s5590_s12 = scalar_lea.hbm %s8344_s4, 16 }
  0x6a   : > { %p5591_p13 = scmp.ne.s32.totalorder %s8344_s4, %s5590_s12  ;;  %p5597_p3 = scmp.lt.u32.totalorder %s5590_s12, %s8344_s4 }
  0x6c   : > { %p5593_p0 = pnand %p5591_p13, %p5865_p8 }
  0x6e   : > { %p5594_p1 = pneg %p5593_p0 }
  0x70   : > { %p5599_p2 = pnand %p5597_p3, %p5594_p1 }
  0x72   : > { %5602 = shalt.err (!%p5599_p2)
}
  0x73   : > { %s5603_s18 = scalar_lea.vmem %s260_s9, 16  ;;  %s5610_s29 = scalar_lea.vmem %s260_s9, 32 }
  0x74   : > { %p5604_p5 = scmp.ne.s32.totalorder %s260_s9, %s5603_s18  ;;  %p5611_p4 = scmp.lt.s32.totalorder %s260_s9, %s260_s9 }
  0x75   : > { %p5612_p10 = scmp.lt.s32.totalorder %s5610_s29, %s5603_s18 }
  0x76   : > { %p5606_p7 = pnand %p5604_p5, %p5865_p8 }
  0x77   : > { %p5613_p11 = por %p5612_p10, %p5611_p4 }
  0x78   : > { %p5607_p9 = pneg %p5606_p7 }
  0x7a   : > { %p5614_p12 = pnand %p5613_p11, %p5607_p9 }
  0x7c   : > { %5617 = shalt.err (!%p5614_p12)
}
  0x7d   : > { %4884 = dma.hbm_to_vmem [thread:$0]  (!%p5849_p6), %s8344_s4, 16, %s260_s9, [#allocation9]  }
  0x7e   : > { %s5763_s10 = smov [#allocation13]   ;;  %s5618_s22 = scalar_lea.hbm %s8346_s6, 16 }
  0x7f   : > { %s281_s23 = sshll.u32 %s5763_s10, 4  ;;  %p5619_p13 = scmp.ne.s32.totalorder %s8346_s6, %s5618_s22  ;;  %s282_s23 = int_to_ptr.vmem [resolvable:$true] %s281_s23 }
  0x80   : > { %p5625_p3 = scmp.lt.u32.totalorder %s5618_s22, %s8346_s6 }
  0x81   : > { %p5621_p0 = pnand %p5619_p13, %p5865_p8 }
  0x83   : > { %p5622_p1 = pneg %p5621_p0 }
  0x85   : > { %p5627_p2 = pnand %p5625_p3, %p5622_p1 }
  0x87   : > { %5630 = shalt.err (!%p5627_p2)
}
  0x88   : > { %s5631_s9 = scalar_lea.vmem %s282_s23, 16  ;;  %s5638_s17 = scalar_lea.vmem %s282_s23, 32 }
  0x89   : > { %p5632_p5 = scmp.ne.s32.totalorder %s282_s23, %s5631_s9  ;;  %p5639_p4 = scmp.lt.s32.totalorder %s282_s23, %s282_s23 }
  0x8a   : > { %p5640_p10 = scmp.lt.s32.totalorder %s5638_s17, %s5631_s9 }
  0x8b   : > { %p5634_p7 = pnand %p5632_p5, %p5865_p8 }
  0x8c   : > { %p5641_p11 = por %p5640_p10, %p5639_p4 }
  0x8d   : > { %p5635_p9 = pneg %p5634_p7 }
  0x8f   : > { %p5642_p12 = pnand %p5641_p11, %p5635_p9 }
  0x91   : > { %5645 = shalt.err (!%p5642_p12)
}
  0x92   : > { %4890 = dma.hbm_to_vmem [thread:$0]  (!%p5849_p6), %s8346_s6, 16, %s282_s23, [#allocation12]  }
  0x93   : > { %s4389_s19 = sadd.s32 4294967294, %s5754_s27   ;;  %s5988_s11 = sadd.s32 1, %s5754_s27  }
  0x94   : > { %s30_s20 = ssub.s32 %s5754_s27, %s5988_s11  ;;  %s33_s13 = sadd.s32 1, %s5750_s26 }
  0x95   : > { %p31_p8 = scmp.eq.s32.totalorder %s30_s20, 0  ;;  %p40_p13 = scmp.ne.s32.totalorder %s5750_s26, %s5746_s25 }
  0x96   : > { %p41_p0 = scmp.eq.s32.totalorder %s5754_s27, 0  ;;  %p46_p1 = scmp.ne.s32.totalorder %s5746_s25, %s5742_s24 }
  0x97   : > { %s5999_s10 = scalar_select %p31_p8, %s5750_s26, %s33_s13  }
  0x98   : > { %p6001_p3 = por %p41_p0, %p40_p13  ;;  %p8499_p2 = scmp.eq.s32.totalorder %s5833_s30, 0 }
  0x99   : > { %p196_p5 = scmp.eq.s32.totalorder %s5833_s30, 1  ;;  %p202_p7 = scmp.eq.s32.totalorder %s4389_s19, 1 }
  0x9a   : > { %p6007_p6 = por %p8499_p2, %p46_p1  ;;  %p4905_p9 = scmp.lt.s32.totalorder %s5754_s27, 2 }
  0x9b   : > { %s292_s21 = sand.u32 1, %s5750_s26   ;;  %p6014_p4 = por %p196_p5, %p40_p13 }
  0x9c   : > { %p6018_p10 = por %p202_p7, %p46_p1  ;;  %s4398_s14 = sshll.u32 %s292_s21, 8 }
  0x9d   : > { %s8501_s22 = scalar_select %p6014_p4, 1, 0 }
  0x9e   : > { %s8502_s12 = scalar_select %p6018_p10, 1, 0 }
  0x9f   : > { %s4505_s15 = sshll.u32 %s5754_s27, 12  ;;  %s296_s18 = scalar_lea.vmem [#allocation2], %s4398_s14 }
  0xa0   : > { %s6026_s17 = scalar_lea.hbm %s8340_s0, %s4505_s15  ;;  %s303_s29 = sshll.u32 %s296_s18, 4  ;;  %s6028_s29 = int_to_ptr.vmem [resolvable:$true] %s303_s29 }
  0xa1   : > { %p6032_p11 = pnand %p4905_p9, %p6001_p3  ;;  %s6036_s20 = scalar_lea.sflag [#allocation3], %s292_s21 }
  0xa2   : > { %s5646_s13 = scalar_lea.hbm %s6026_s17, 4096  ;;  %s5651_s28 = scalar_lea.hbm %s8340_s0, 8192 }
  0xa3   : > { %p5647_p12 = scmp.ne.s32.totalorder %s6026_s17, %s5646_s13  ;;  %p5648_p8 = pneg %p6032_p11 }
  0xa4   : > { %p5652_p1 = scmp.lt.u32.totalorder %s6026_s17, %s8340_s0  ;;  %p5653_p3 = scmp.lt.u32.totalorder %s5651_s28, %s5646_s13 }
  0xa5   : > { %p5649_p13 = pnand %p5648_p8, %p5647_p12  ;;  %p5655_p5 = scmp.lt.u32.totalorder %s5646_s13, %s6026_s17 }
  0xa6   : > { %p5654_p2 = por %p5653_p3, %p5652_p1 }
  0xa7   : > { %p5650_p0 = pneg %p5649_p13 }
  0xa8   : > { %p5656_p7 = por %p5655_p5, %p5654_p2 }
  0xaa   : > { %p5657_p9 = pnand %p5656_p7, %p5650_p0 }
  0xac   : > { %5660 = shalt.err (!%p5657_p9)
}
  0xad   : > { %s5661_s21 = scalar_lea.vmem %s6028_s29, 4096  ;;  %s5764_s18 = smov [#allocation2]  }
  0xae   : > { %p5662_p12 = scmp.ne.s32.totalorder %s6028_s29, %s5661_s21  ;;  %s5666_s14 = sshll.u32 %s5764_s18, 4  ;;  %s5667_s14 = int_to_ptr.vmem [resolvable:$false] %s5666_s14 }
  0xaf   : > { %s5668_s15 = scalar_lea.vmem %s5667_s14, 8192  ;;  %p5669_p4 = scmp.lt.s32.totalorder %s6028_s29, %s5667_s14 }
  0xb0   : > { %p5664_p13 = pnand %p5662_p12, %p5648_p8  ;;  %p5670_p1 = scmp.lt.s32.totalorder %s5668_s15, %s5661_s21 }
  0xb2   : > { %p5665_p10 = pneg %p5664_p13  ;;  %p5671_p3 = por %p5670_p1, %p5669_p4 }
  0xb4   : > { %p5672_p2 = pnand %p5671_p3, %p5665_p10 }
  0xb6   : > { %5675 = shalt.err (!%p5672_p2)
}
  0xb7   : > { %s5765_s13 = smov 128   ;;  %s5766_s28 = smov 8  }
  0xb8   : > { %4894 = dma.hbm_to_vmem [thread:$0]  (!%p6032_p11), %s6026_s17, 4096, %s6028_s29, %s6036_s20, %s5765_s13, %s5765_s13, %s5766_s28  }
  0xb9   : > { %p8504_p8 = scmp.ne.s32.totalorder %s8495_s8, 0 }
  0xbb   : > { %315 = sbr.rel (%p8504_p8) target bundleno = 1248 (0x4e0), region = 48 }
  0xc2   : > { %s6067_s16 = sand.u32 1, %s5746_s25  }
  0xc3   : > { %s4402_s9 = sshll.u32 %s6067_s16, 8  ;;  %s318_s21 = scalar_lea.sflag [#allocation3], %s6067_s16 }
  0xc4   : > { %s6073_s18 = scalar_lea.vmem [#allocation2], %s4402_s9 }
  0xc5   : > { %5721 = dma.done.wait (%p6007_p6), %s318_s21, 4096  }
  0xc6   : > { %5723 = vsyncadd (%p6007_p6), %s318_s21, 4294963200  ;;  %p8505_p4 = scmp.eq.s32.totalorder %s5833_s30, 0 }
  0xc8   : > { %5725 = dma.done.wait (%p8505_p4), [#allocation6], 144   ;;  %p8506_p10 = pmov %p8505_p4 }
  0xc9   : > { %p8507_p11 = pmov %p8505_p4 }
  0xca   : > { %5727 = vsyncadd (%p8506_p10), [#allocation6], 4294967152 }
  0xcb   : > { %5729 = dma.done.wait (%p8507_p11), [#allocation9], 592   ;;  %p8508_p0 = pmov %p8505_p4 }
  0xcd   : > { %5731 = vsyncadd (%p8508_p0), [#allocation9], 4294966704  ;;  %p8509_p5 = pmov %p8508_p0 }
  0xce   : > { %p8510_p7 = pmov %p8508_p0 }
  0xcf   : > { %5733 = dma.done.wait (%p8509_p5), [#allocation12], 80  }
  0xd0   : > { %5735 = vsyncadd (%p8510_p7), [#allocation12], 4294967216  ;;  %v8351_v0 = vmov 0.0   ;;  %s5768_s8 = smov 8   ;;  %v5439_v1 = vld [vmem:[#allocation5] sm:$0xff]   ;;  %v378_v3 = vld [vmem:[%s6073_s18 + $0x8] sm:$0xff]  ;;  %v682_v50 = vlaneseq }
  0xd1   : > { %4960 = vrot.lane.b32.xlu0 %v8351_v0, %s5768_s8  ;;  %v377_v2 = vld [vmem:[%s6073_s18] sm:$0xff]  ;;  %vm8406_vm0 = vcmask 130048   ;;  %v379_v4 = vld [vmem:[%s6073_s18 + $0x10] sm:$0xff]  ;;  %4595 = vmatprep.subr.bf16.mxu0 %v5439_v1  ;;  %v380_v6 = vld [vmem:[%s6073_s18 + $0x18] sm:$0xff]  ;;  %v6152_v56 = vrot.slane %v8351_v0, 7  ;;  %v6155_v57 = vrot.slane %v8351_v0, 1 }
  0xd2   : > { %v409_v5 = vpack.c.bf16 %v378_v3, %v377_v2  ;;  %v381_v7 = vld [vmem:[%s6073_s18 + $0x20] sm:$0xff]  ;;  %v382_v8 = vld [vmem:[%s6073_s18 + $0x28] sm:$0xff]  ;;  %4596 = vmatpush3.bf16.msra.mxu0 %v5439_v1  ;;  %v410_v9 = vpack.c.bf16 %v380_v6, %v379_v4  ;;  %v383_v11 = vld [vmem:[%s6073_s18 + $0x30] sm:$0xff]  ;;  %v6141_v51 = vshrl.u32 %v682_v50, 7  ;;  %s5769_s23 = smov 16   ;;  %s8166_s17 = scalar_lea.vmem [#allocation14], %s4402_s9 }
  0xd3   : > { %v411_v10 = vpack.c.bf16 %v382_v8, %v381_v7  ;;  %v384_v12 = vld [vmem:[%s6073_s18 + $0x38] sm:$0xff]  ;;  %v385_v13 = vld [vmem:[%s6073_s18 + $0x40] sm:$0xff]  ;;  %v386_v14 = vld [vmem:[%s6073_s18 + $0x48] sm:$0xff]  ;;  %8513 = vst [vmem:[#allocation22_spill] sm:$0xff] %v6152_v56  ;;  %s4506_s29 = sshll.u32 %s5833_s30, 12  ;;  %s4259_s19 = sshll.u32 %s8166_s17, 4  ;;  %s8291_s19 = int_to_ptr.vmem [resolvable:$true] %s4259_s19 }
  0xd4   : > { %4597 = vmatprep.mubr.msk.bf16.mxu0 %vm8406_vm0, %v409_v5  ;;  %v412_v15 = vpack.c.bf16 %v384_v12, %v383_v11  ;;  %v413_v16 = vpack.c.bf16 %v386_v14, %v385_v13  ;;  %v387_v17 = vld [vmem:[%s6073_s18 + $0x50] sm:$0xff]  ;;  %v388_v18 = vld [vmem:[%s6073_s18 + $0x58] sm:$0xff]  ;;  %v389_v19 = vld [vmem:[%s6073_s18 + $0x60] sm:$0xff]  ;;  %8511 = vst [vmem:[#allocation20_spill] sm:$0xff] %v6141_v51  ;;  %v684_v52 = vadd.s32 8, %v6141_v51  ;;  %v686_v53 = vadd.s32 24, %v6141_v51  ;;  %s8287_s15 = scalar_lea.hbm %s8347_s7, %s4506_s29 }
  0xd5   : > { %4598 = vmatmul.mubr.msk.bf16.vlgmr.msra.gmra.mrb[0].mxu0 %vm8406_vm0, %v410_v9  ;;  %v390_v20 = vld [vmem:[%s6073_s18 + $0x68] sm:$0xff]  ;;  %v414_v21 = vpack.c.bf16 %v388_v18, %v387_v17  ;;  %v391_v23 = vld [vmem:[%s6073_s18 + $0x70] sm:$0xff]  ;;  %v392_v24 = vld [vmem:[%s6073_s18 + $0x78] sm:$0xff]  ;;  %v6146_v54 = vadd.s32 248, %v6141_v51  ;;  %v6149_v55 = vadd.s32 32, %v6141_v51  ;;  %8514 = vst [vmem:[#allocation23_spill] sm:$0xff] %v6155_v57 }
  0xd6   : > { %4601 = vmatprep.mubr.msk.bf16.mxu0 %vm8406_vm0, %v411_v10  ;;  %v415_v22 = vpack.c.bf16 %v390_v20, %v389_v19  ;;  %v393_v25 = vld [vmem:[%s6073_s18 + $0x80] sm:$0xff]  ;;  %v394_v26 = vld [vmem:[%s6073_s18 + $0x88] sm:$0xff]  ;;  %v416_v27 = vpack.c.bf16 %v392_v24, %v391_v23  ;;  %v395_v29 = vld [vmem:[%s6073_s18 + $0x90] sm:$0xff]  ;;  %v6158_v58 = vadd.s32 40, %v6141_v51  ;;  %v6161_v59 = vadd.s32 16, %v6141_v51  ;;  %s4246_s30 = scalar_lea.sflag [#allocation4], %s6067_s16 }
  0xd7   : > { %v417_v28 = vpack.c.bf16 %v394_v26, %v393_v25  ;;  %v396_v30 = vld [vmem:[%s6073_s18 + $0x98] sm:$0xff]  ;;  %v397_v31 = vld [vmem:[%s6073_s18 + $0xa0] sm:$0xff]  ;;  %v398_v32 = vld [vmem:[%s6073_s18 + $0xa8] sm:$0xff]  ;;  %8512 = vst [vmem:[#allocation21_spill] sm:$0xff] %v6149_v55  ;;  %v726_v60 = vand.u32 15, %v684_v52  ;;  %v6164_v61 = vadd.s32 56, %v6141_v51 }
  0xd8   : > { %v418_v33 = vpack.c.bf16 %v396_v30, %v395_v29  ;;  %v419_v34 = vpack.c.bf16 %v398_v32, %v397_v31  ;;  %v399_v35 = vld [vmem:[%s6073_s18 + $0xb0] sm:$0xff]  ;;  %v400_v36 = vld [vmem:[%s6073_s18 + $0xb8] sm:$0xff]  ;;  %v401_v37 = vld [vmem:[%s6073_s18 + $0xc0] sm:$0xff]  ;;  %8515 = vst [vmem:[#allocation24_spill] sm:$0xff] %v6161_v59  ;;  %v6167_v62 = vadd.s32 72, %v6141_v51  ;;  %v740_v1 = vand.u32 15, %v686_v53 }
  0xd9   : > { %v402_v38 = vld [vmem:[%s6073_s18 + $0xc8] sm:$0xff]  ;;  %v420_v39 = vpack.c.bf16 %v400_v36, %v399_v35  ;;  %v403_v41 = vld [vmem:[%s6073_s18 + $0xd0] sm:$0xff]  ;;  %v404_v42 = vld [vmem:[%s6073_s18 + $0xd8] sm:$0xff]  ;;  %v6171_v2 = vadd.s32 88, %v6141_v51  ;;  %v6175_v4 = vadd.s32 64, %v6141_v51  ;;  %v6178_v5 = vadd.s32 104, %v6141_v51 }
  0xda   : > { %v421_v40 = vpack.c.bf16 %v402_v38, %v401_v37  ;;  %v405_v43 = vld [vmem:[%s6073_s18 + $0xe0] sm:$0xff]  ;;  %v406_v44 = vld [vmem:[%s6073_s18 + $0xe8] sm:$0xff]  ;;  %v422_v45 = vpack.c.bf16 %v404_v42, %v403_v41  ;;  %v407_v47 = vld [vmem:[%s6073_s18 + $0xf0] sm:$0xff]  ;;  %v6181_v6 = vadd.s32 120, %v6141_v51  ;;  %v6185_v8 = vadd.s32 48, %v6141_v51  ;;  %s5676_s13 = scalar_lea.vmem %s8291_s19, 4096 }
  0xdb   : > { %v423_v46 = vpack.c.bf16 %v406_v44, %v405_v43  ;;  %v408_v48 = vld [vmem:[%s6073_s18 + $0xf8] sm:$0xff]  ;;  %8516 = vst [vmem:[#allocation25_spill] sm:$0xff] %v6175_v4  ;;  %vm8428_vm1 = vcmp.lt.s32.totalorder %v6141_v51, 7  ;;  %v754_v9 = vand.u32 15, %v6158_v58  ;;  %v6190_v10 = vadd.s32 136, %v6141_v51  ;;  %p5677_p6 = scmp.ne.s32.totalorder %s8291_s19, %s5676_s13  ;;  %p9149_p9 = scmp.ne.s32.totalorder %s8501_s22, 0 }
  0xdc   : > { %v424_v49 = vpack.c.bf16 %v408_v48, %v407_v47  ;;  %8517 = vst [vmem:[#allocation26_spill] sm:$0xff] %v6185_v8  ;;  %v6193_v11 = vadd.s32 152, %v6141_v51  ;;  %v6196_v13 = vld [vmem:[#allocation7] ss:$0 sm:$0xff]  ;;  %vm6198_vm2 = vcmp.eq.s32.totalorder %v726_v60, 15  ;;  %v6205_v17 = vadd.s32 168, %v6141_v51 }
  0xdd   : > { %4602 = vmatmul.mubr.msk.bf16.gmra.mrb[4].mxu0 %vm8406_vm0, %v412_v15  ;;  %v768_v15 = vand.u32 15, %v6164_v61  ;;  %v6208_v18 = vadd.s32 184, %v6141_v51  ;;  %v796_v19 = vand.u32 15, %v6171_v2  ;;  %v6212_v20 = vadd.s32 200, %v6141_v51  ;;  %p5678_p12 = pnand %p5677_p6, %p9149_p9  ;;  %s5770_s28 = smov [#allocation14]  }
  0xde   : > { %4605 = vmatprep.mubr.msk.bf16.mxu0 %vm8406_vm0, %v413_v16  ;;  %v782_v16 = vand.u32 15, %v6167_v62  ;;  %vm6218_vm3 = vcmp.eq.s32.totalorder %v740_v1, 15  ;;  %v6223_v25 = vadd.s32 232, %v6141_v51  ;;  %vm8431_vm4 = vcmp.lt.s32.totalorder %v6141_v51, 1  ;;  %s5680_s9 = sshll.u32 %s5770_s28, 4  ;;  %s5681_s9 = int_to_ptr.vmem [resolvable:$false] %s5680_s9 }
  0xdf   : > { %v6252_v50 = vadd.s32 112, %v6141_v51  ;;  %v6255_v52 = vadd.s32 144, %v6141_v51  ;;  %v6258_v53 = vadd.s32 128, %v6141_v51  ;;  %vm6264_vm5 = vcmp.eq.s32.totalorder %v754_v9, 15  ;;  %p5679_p13 = pneg %p5678_p12  ;;  %s5682_s21 = scalar_lea.vmem %s5681_s9, 8192 }
  0xe0   : > { %vm6282_vm6 = vcmp.eq.s32.totalorder %v768_v15, 15  ;;  %vm6329_vm7 = vcmp.eq.s32.totalorder %v782_v16, 15  ;;  %vm6364_vm8 = vcmp.eq.s32.totalorder %v796_v19, 15  ;;  %v6404_v14 = vadd.s32 160, %v6141_v51  ;;  %p5683_p1 = scmp.lt.s32.totalorder %s8291_s19, %s5681_s9  ;;  %p5684_p3 = scmp.lt.s32.totalorder %s5682_s21, %s5676_s13 }
  0xe1   : > { %8524 = vst [vmem:[#allocation29_spill] sm:$0xff] %v6252_v50  ;;  %8525 = vst [vmem:[#allocation30_spill] sm:$0xff] %v6258_v53  ;;  %v8588_v53 = vmov 0 }
  0xe2   : > { %8546 = vst [vmem:[#allocation43_spill] sm:$0xff] %v6404_v14  ;;  %p5685_p2 = por %p5684_p3, %p5683_p1 }
  0xe4   : > { %p5686_p8 = pnand %p5685_p2, %p5679_p13 }
  0xe5   : > { %4606 = vmatmul.mubr.msk.bf16.gmra.mrb[8].mxu0 %vm8406_vm0, %v414_v21  ;;  %v6215_v21 = vadd.s32 216, %v6141_v51 }
  0xe6   : > { %4609 = vmatprep.mubr.msk.bf16.mxu0 %vm8406_vm0, %v415_v22 }
  0xed   : > { %4610 = vmatmul.mubr.msk.bf16.gmra.mrb[12].mxu0 %vm8406_vm0, %v416_v27 }
  0xee   : > { %4613 = vmatprep.mubr.msk.bf16.mxu0 %vm8406_vm0, %v417_v28 }
  0xf5   : > { %4614 = vmatmul.mubr.msk.bf16.gmra.mrb[16].mxu0 %vm8406_vm0, %v418_v33 }
  0xf6   : > { %4617 = vmatprep.mubr.msk.bf16.mxu0 %vm8406_vm0, %v419_v34  ;;  %v6234_v34 = vadd.s32 96, %v6141_v51 }
  0xf8   : > { %8522 = vst [vmem:[#allocation27_spill] sm:$0xff] %v6234_v34 }
  0xfd   : > { %4618 = vmatmul.mubr.msk.bf16.gmra.mrb[20].mxu0 %vm8406_vm0, %v420_v39  ;;  %v6240_v39 = vadd.s32 80, %v6141_v51 }
  0xfe   : > { %4621 = vmatprep.mubr.msk.bf16.mxu0 %vm8406_vm0, %v421_v40 }
  0xff   : > { %8523 = vst [vmem:[#allocation28_spill] sm:$0xff] %v6240_v39 }
 0x105   : > { %4622 = vmatmul.mubr.msk.bf16.gmra.mrb[24].mxu0 %vm8406_vm0, %v422_v45 }
 0x106   : > { %4625 = vmatprep.mubr.msk.bf16.mxu0 %vm8406_vm0, %v423_v46 }
 0x10d   : > { %4626 = vmatmul.mubr.msk.bf16.gmra.mrb[28].mxu0 %vm8406_vm0, %v424_v49 }
 0x143   : > { %v6231_v33 = vpop.permute.xlu0 %4960 }
 0x1a8   : > { %v4599_v23 = vpop.f32.mrb[0].mxu0 }
 0x1a9   : > { %v532_v29 = vadd.f32 %v4599_v23, %v6196_v13  ;;  %v523_v30 = vpop.f32.mrb[1].mxu0 }
 0x1aa   : > { %v524_v35 = vadd.f32 %v6196_v13, %v523_v30  ;;  %v4600_v36 = vpop.f32.mrb[2].mxu0 }
 0x1ab   : > { %v652_v40 = vmax.f32 %v532_v29, 0.0  ;;  %v535_v41 = vadd.f32 %v4600_v36, %v6196_v13  ;;  %v526_v42 = vpop.f32.mrb[3].mxu0 }
 0x1ac   : > { %v650_v45 = vmax.f32 %v524_v35, 0.0  ;;  %v527_v46 = vadd.f32 %v6196_v13, %v526_v42 }
 0x1ad   : > { %v6249_v49 = vmax.f32 %v535_v41, 0.0  ;;  %v6262_v61 = vrot.slane %v652_v40, 1  ;;  %v6268_v23 = vrot.slane %v652_v40, 7 }
 0x1ae   : > { %v6260_v58 = vrot.slane %v650_v45, 1  ;;  %v651_v60 = vmax.f32 %v527_v46, 0.0  ;;  %v6270_v29 = vrot.slane %v650_v45, 7 }
 0x1af   : > { %8526 = vst [vmem:[#allocation31_spill] sm:$0xff] %v6262_v61  ;;  %8529 = vst [vmem:[#allocation32_spill] sm:$0xff] %v6268_v23  ;;  %v6273_v30 = vpack.i.bf16 %v6249_v49, %v652_v40  ;;  %v1425_v9 = vrot.slane %v6249_v49, 1 }
 0x1b0   : > { %8530 = vst [vmem:[#allocation33_spill] sm:$0xff] %v6270_v29  ;;  %v1423_v35 = vrot.slane %v651_v60, 1  ;;  %v4603_v36 = vpop.f32.mrb[4].mxu0  ;;  %v6275_v41 = vpack.i.bf16 %v651_v60, %v650_v45  ;;  %v1482_v42 = vsel %vm8428_vm1, %v6155_v57, %v6260_v58  ;;  %v1230_v0 = vrot.slane %v651_v60, 7 }
 0x1b1   : > { %8531 = vst [vmem:[#allocation34_spill] sm:$0xff] %v6273_v30  ;;  %v548_v22 = vadd.f32 %v4603_v36, %v6196_v13  ;;  %4965 = vrot.lane.b32.xlu0 %v6273_v30, %s5768_s8  ;;  %v539_v40 = vpop.f32.mrb[5].mxu0  ;;  %v1582_v45 = vsel %vm6198_vm2, 0.0, %v1482_v42 }
 0x1b2   : > { %8532 = vst [vmem:[#allocation35_spill] sm:$0xff] %v6275_v41  ;;  %v540_v28 = vadd.f32 %v6196_v13, %v539_v40  ;;  %v4604_v7 = vpop.f32.mrb[6].mxu0  ;;  %4970 = vrot.lane.b32.xlu1 %v6275_v41, %s5768_s8  ;;  %v4974_v15 = vpack.i.bf16 %v1582_v45, %v6155_v57  ;;  %v1480_v60 = vsel %vm8428_vm1, %v1423_v35, %v6262_v61 }
 0x1b3   : > { %v1481_v36 = vsel %vm8428_vm1, %v6260_v58, %v1423_v35  ;;  %v6301_v12 = vmax.f32 %v548_v22, 0.0  ;;  %v551_v42 = vadd.f32 %v4604_v7, %v6196_v13  ;;  %v542_v47 = vpop.f32.mrb[7].mxu0  ;;  %v1584_v40 = vsel %vm6218_vm3, 0.0, %v1480_v60 }
 0x1b4   : > { %v2114_v63 = vsel %vm6198_vm2, 0.0, %v1480_v60  ;;  %v6308_v45 = vmax.f32 %v540_v28, 0.0  ;;  %v543_v3 = vadd.f32 %v6196_v13, %v542_v47  ;;  %v4979_v48 = vpack.i.bf16 %v1584_v40, %v1481_v36 }
 0x1b5   : > { %v6311_v44 = vpack.i.bf16 %v2114_v63, %v1481_v36  ;;  %v6313_v43 = vmax.f32 %v551_v42, 0.0  ;;  %4975 = vrot.lane.b32.xlu0 %v4974_v15, %s5769_s23  ;;  %v8352_v7 = vrot.slane %v6249_v49, 7  ;;  %v6320_v22 = vsel %vm8431_vm4, %v1230_v0, %v6268_v23 }
 0x1b6   : > { %8536 = vst [vmem:[#allocation37_spill] sm:$0xff] %v6320_v22  ;;  %v6323_v35 = vmax.f32 %v543_v3, 0.0  ;;  %4980 = vrot.lane.b32.xlu1 %v4979_v48, %s5769_s23  ;;  %v1426_v63 = vrot.slane %v6308_v45, 1  ;;  %v6336_v15 = vsel %vm8431_vm4, %v6270_v29, %v1230_v0  ;;  %v1428_v48 = vrot.slane %v6301_v12, 1 }
 0x1b7   : > { %8535 = vst [vmem:[#allocation36_spill] sm:$0xff] %v6311_v44  ;;  %8539 = vst [vmem:[#allocation38_spill] sm:$0xff] %v6336_v15  ;;  %v6341_v3 = vpack.i.bf16 %v6313_v43, %v6301_v12  ;;  %v1429_v36 = vrot.slane %v6313_v43, 1  ;;  %v6350_v62 = vsel %vm8431_vm4, %v6268_v23, %v8352_v7  ;;  %v1479_v40 = vsel %vm8428_vm1, %v6262_v61, %v1425_v9 }
 0x1b8   : > { %8541 = vst [vmem:[#allocation40_spill] sm:$0xff] %v6350_v62  ;;  %v4607_v16 = vpop.f32.mrb[8].mxu0  ;;  %v6354_v0 = vpack.i.bf16 %v6323_v35, %v6308_v45  ;;  %v1478_v42 = vsel %vm8428_vm1, %v1425_v9, %v1426_v63  ;;  %v1427_v28 = vrot.slane %v6323_v35, 1 }
 0x1b9   : > { %8540 = vst [vmem:[#allocation39_spill] sm:$0xff] %v6341_v3  ;;  %v564_v38 = vadd.f32 %v4607_v16, %v6196_v13  ;;  %v555_v37 = vpop.f32.mrb[9].mxu0  ;;  %4985 = vrot.lane.b32.xlu0 %v6341_v3, %s5768_s8  ;;  %v1586_v7 = vsel %vm6264_vm5, 0.0, %v1478_v42  ;;  %v6375_v9 = vsel %vm8428_vm1, %v1428_v48, %v1429_v36 }
 0x1ba   : > { %8542 = vst [vmem:[#allocation41_spill] sm:$0xff] %v6354_v0  ;;  %v556_v32 = vadd.f32 %v6196_v13, %v555_v37  ;;  %v4608_v2 = vpop.f32.mrb[10].mxu0  ;;  %4990 = vrot.lane.b32.xlu1 %v6354_v0, %s5768_s8  ;;  %v4994_v19 = vpack.i.bf16 %v1586_v7, %v1479_v40  ;;  %v1476_v16 = vsel %vm8428_vm1, %v1427_v28, %v1428_v48  ;;  %v3218_v37 = vsel %vm6198_vm2, 0.0, %v1478_v42 }
 0x1bb   : > { %v1477_v31 = vsel %vm8428_vm1, %v1426_v63, %v1427_v28  ;;  %v6384_v27 = vmax.f32 %v564_v38, 0.0  ;;  %v567_v26 = vadd.f32 %v4608_v2, %v6196_v13  ;;  %v558_v61 = vpop.f32.mrb[11].mxu0  ;;  %v1588_v15 = vsel %vm6282_vm6, 0.0, %v1476_v16 }
 0x1bc   : > { %v6391_v3 = vmax.f32 %v556_v32, 0.0  ;;  %v559_v7 = vadd.f32 %v6196_v13, %v558_v61  ;;  %v4999_v62 = vpack.i.bf16 %v1588_v15, %v1477_v31  ;;  %v6394_v48 = vpack.i.bf16 %v3218_v37, %v1479_v40 }
 0x1bd   : > { %v6396_v22 = vmax.f32 %v567_v26, 0.0  ;;  %4995 = vrot.lane.b32.xlu0 %v4994_v19, %s5769_s23  ;;  %v2116_v38 = vsel %vm6218_vm3, 0.0, %v1478_v42  ;;  %v3220_v28 = vsel %vm6218_vm3, 0.0, %v1476_v16  ;;  %v8547_v26 = vand.u32 15, %v6178_v5 }
 0x1be   : > { %8545 = vst [vmem:[#allocation42_spill] sm:$0xff] %v6394_v48  ;;  %v6406_v32 = vmax.f32 %v559_v7, 0.0  ;;  %5000 = vrot.lane.b32.xlu1 %v4999_v62, %s5769_s23  ;;  %v1430_v61 = vrot.slane %v6391_v3, 1  ;;  %v6416_v15 = vpack.i.bf16 %v2116_v38, %v1479_v40  ;;  %v6418_v42 = vpack.i.bf16 %v3220_v28, %v1477_v31 }
 0x1bf   : > { %vm6412_vm9 = vcmp.eq.s32.totalorder %v8547_v26, 15  ;;  %v6422_v24 = vpack.i.bf16 %v6396_v22, %v6384_v27  ;;  %v1432_v2 = vrot.slane %v6384_v27, 1  ;;  %v1433_v62 = vrot.slane %v6396_v22, 1 }
 0x1c0   : > { %8550 = vst [vmem:[#allocation44_spill] sm:$0xff] %v6416_v15  ;;  %8551 = vst [vmem:[#allocation45_spill] sm:$0xff] %v6418_v42  ;;  %v1234_v19 = vrot.slane %v6323_v35, 7  ;;  %v4611_v37 = vpop.f32.mrb[12].mxu0  ;;  %v6429_v5 = vpack.i.bf16 %v6406_v32, %v6391_v3  ;;  %v6433_v40 = vsel %vm8428_vm1, %v1429_v36, %v1430_v61  ;;  %v1431_v7 = vrot.slane %v6406_v32, 1 }
 0x1c1   : > { %8552 = vst [vmem:[#allocation46_spill] sm:$0xff] %v6422_v24  ;;  %v8554_v38 = vand.u32 15, %v6181_v6  ;;  %v580_v26 = vadd.f32 %v4611_v37, %v6196_v13  ;;  %v571_v35 = vpop.f32.mrb[13].mxu0  ;;  %5005 = vrot.lane.b32.xlu0 %v6422_v24, %s5768_s8  ;;  %v1590_v42 = vsel %vm6329_vm7, 0.0, %v6433_v40  ;;  %v6450_v36 = vsel %vm8428_vm1, %v1432_v2, %v1433_v62 }
 0x1c2   : > { %8553 = vst [vmem:[#allocation47_spill] sm:$0xff] %v6429_v5  ;;  %v572_v6 = vadd.f32 %v6196_v13, %v571_v35  ;;  %5010 = vrot.lane.b32.xlu1 %v6429_v5, %s5768_s8  ;;  %v5014_v37 = vpack.i.bf16 %v1590_v42, %v6375_v9  ;;  %v6458_v15 = vsel %vm8428_vm1, %v1431_v7, %v1432_v2  ;;  %v2118_v30 = vsel %vm6264_vm5, 0.0, %v1476_v16 }
 0x1c3   : > { %vm6438_vm10 = vcmp.eq.s32.totalorder %v8554_v38, 15  ;;  %v4612_v38 = vpop.f32.mrb[14].mxu0  ;;  %v6462_v24 = vsel %vm8428_vm1, %v1430_v61, %v1431_v7  ;;  %v6464_v48 = vmax.f32 %v580_v26, 0.0  ;;  %v1592_v35 = vsel %vm6364_vm8, 0.0, %v6458_v15 }
 0x1c4   : > { %v583_v0 = vadd.f32 %v4612_v38, %v6196_v13  ;;  %v574_v44 = vpop.f32.mrb[15].mxu0  ;;  %v6470_v5 = vmax.f32 %v572_v6, 0.0  ;;  %v5019_v2 = vpack.i.bf16 %v1592_v35, %v6462_v24  ;;  %v6479_v7 = vpack.i.bf16 %v2118_v30, %v1477_v31 }
 0x1c5   : > { %8557 = vst [vmem:[#allocation48_spill] sm:$0xff] %v6464_v48  ;;  %v575_v42 = vadd.f32 %v6196_v13, %v574_v44  ;;  %5015 = vrot.lane.b32.xlu0 %v5014_v37, %s5769_s23  ;;  %v1235_v26 = vrot.slane %v6301_v12, 7  ;;  %v8559_v44 = vand.u32 15, %v6190_v10  ;;  %v8560_v6 = vmov 0 }
 0x1c6   : > { %v6476_v61 = vmax.f32 %v583_v0, 0.0  ;;  %8558 = vst [vmem:[#allocation49_spill] sm:$0xff] %v6479_v7  ;;  %5020 = vrot.lane.b32.xlu1 %v5019_v2, %s5769_s23  ;;  %v1434_v0 = vrot.slane %v6470_v5, 1  ;;  %v1436_v16 = vrot.slane %v6464_v48, 1  ;;  %v1233_v10 = vrot.slane %v6308_v45, 7 }
 0x1c7   : > { %v6483_v41 = vmax.f32 %v575_v42, 0.0  ;;  %vm6488_vm11 = vcmp.eq.s32.totalorder %v8559_v44, 15  ;;  %v6502_v37 = vsel %vm8431_vm4, %v1234_v19, %v1235_v26  ;;  %v8565_v2 = vand.u32 15, %v6193_v11 }
 0x1c8   : > { %v8561_v6 = vsel %vm6488_vm11, 4294967295, %v8560_v6  ;;  %v6497_v12 = vpack.i.bf16 %v6476_v61, %v6464_v48  ;;  %v1437_v30 = vrot.slane %v6476_v61, 1  ;;  %8563 = vst [vmem:[#allocation51_spill] sm:$0xff] %v6502_v37  ;;  %v4615_v35 = vpop.f32.mrb[16].mxu0  ;;  %v8566_v44 = vmov 0 }
 0x1c9   : > { %8562 = vst [vmem:[#allocation50_spill] sm:$0xff] %v8561_v6  ;;  %v6507_v42 = vpack.i.bf16 %v6483_v41, %v6470_v5  ;;  %vm6511_vm12 = vcmp.eq.s32.totalorder %v8565_v2, 15  ;;  %v6517_v38 = vsel %vm8428_vm1, %v1433_v62, %v1434_v0  ;;  %v1435_v31 = vrot.slane %v6483_v41, 1  ;;  %v587_v4 = vpop.f32.mrb[17].mxu0 }
 0x1ca   : > { %v8567_v44 = vsel %vm6511_vm12, 4294967295, %v8566_v44  ;;  %v8569_v7 = vrot.slane %v6313_v43, 7  ;;  %v596_v37 = vadd.f32 %v4615_v35, %v6196_v13  ;;  %v1594_v11 = vsel %vm6412_vm9, 0.0, %v6517_v38  ;;  %v4616_v55 = vpop.f32.mrb[18].mxu0 }
 0x1cb   : > { %8564 = vst [vmem:[#allocation52_spill] sm:$0xff] %v6507_v42  ;;  %8568 = vst [vmem:[#allocation53_spill] sm:$0xff] %v8567_v44  ;;  %v6532_v2 = vsel %vm8428_vm1, %v1436_v16, %v1437_v30  ;;  %v6535_v62 = vadd.s32 176, %v6141_v51  ;;  %v588_v8 = vadd.f32 %v6196_v13, %v587_v4  ;;  %5025 = vrot.lane.b32.xlu1 %v6507_v42, %s5768_s8  ;;  %v590_v4 = vpop.f32.mrb[19].mxu0  ;;  %v8604_v44 = vand.u32 15, %v6215_v21 }
 0x1cc   : > { %v6524_v45 = vsel %vm8431_vm4, %v1235_v26, %v8569_v7  ;;  %8571 = vst [vmem:[#allocation55_spill] sm:$0xff] %v6532_v2  ;;  %v6541_v7 = vpack.i.bf16 %v1594_v11, %v6450_v36  ;;  %v6545_v26 = vsel %vm8428_vm1, %v1435_v31, %v1436_v16  ;;  %v6549_v35 = vsel %vm8428_vm1, %v1434_v0, %v1435_v31 }
 0x1cd   : > { %8570 = vst [vmem:[#allocation54_spill] sm:$0xff] %v6524_v45  ;;  %8572 = vst [vmem:[#allocation56_spill] sm:$0xff] %v6535_v62  ;;  %v6551_v45 = vmax.f32 %v596_v37, 0.0  ;;  %v599_v23 = vadd.f32 %v4616_v55, %v6196_v13  ;;  %v1596_v42 = vsel %vm6438_vm10, 0.0, %v6545_v26  ;;  %v6559_v11 = vsel %vm8431_vm4, %v1233_v10, %v1234_v19 }
 0x1ce   : > { %8573 = vst [vmem:[#allocation57_spill] sm:$0xff] %v6559_v11  ;;  %v6561_v29 = vmax.f32 %v588_v8, 0.0  ;;  %v591_v16 = vadd.f32 %v6196_v13, %v590_v4  ;;  %v6565_v0 = vpack.i.bf16 %v1596_v42, %v6549_v35  ;;  %v8574_v31 = vrot.slane %v6249_v49, 7 }
 0x1cf   : > { %v6573_v37 = vmax.f32 %v599_v23, 0.0  ;;  %v1440_v59 = vrot.slane %v6551_v45, 1  ;;  %v8576_v4 = vand.u32 15, %v6205_v17  ;;  %v8577_v42 = vmov 0 }
 0x1d0   : > { %v6571_v55 = vsel %vm8431_vm4, %v8574_v31, %v1233_v10  ;;  %v6577_v11 = vmax.f32 %v591_v16, 0.0  ;;  %v1438_v8 = vrot.slane %v6561_v29, 1  ;;  %v3222_v49 = vsel %vm6264_vm5, 0.0, %v6433_v40  ;;  %v5440_v31 = vld [vmem:[#allocation8 + $0xc] sm:$0xff]  }
 0x1d1   : > { %8575 = vst [vmem:[#allocation58_spill] sm:$0xff] %v6571_v55  ;;  %vm6582_vm13 = vcmp.eq.s32.totalorder %v8576_v4, 15  ;;  %v2120_v23 = vsel %vm6282_vm6, 0.0, %v6433_v40  ;;  %v6594_v10 = vpack.i.bf16 %v6573_v37, %v6551_v45  ;;  %v1441_v16 = vrot.slane %v6573_v37, 1  ;;  %v4619_v4 = vpop.f32.mrb[20].mxu0  ;;  %4771 = vmatprep.subr.bf16.mxu1 %v5440_v31  ;;  %4629 = vmatprep.subr.bf16.mxu0 %v5440_v31 }
 0x1d2   : > { %v8578_v42 = vsel %vm6582_vm13, 4294967295, %v8577_v42  ;;  %v6598_v17 = vpack.i.bf16 %v3222_v49, %v6375_v9  ;;  %v6602_v19 = vpack.i.bf16 %v6577_v11, %v6561_v29  ;;  %v1439_v1 = vrot.slane %v6577_v11, 1  ;;  %v603_v39 = vpop.f32.mrb[21].mxu0  ;;  %4773 = vmatpush3.bf16.msra.mxu1 %v5440_v31  ;;  %4630 = vmatpush3.bf16.msra.mxu0 %v5440_v31 }
 0x1d3   : > { %8579 = vst [vmem:[#allocation59_spill] sm:$0xff] %v8578_v42  ;;  %8580 = vst [vmem:[#allocation60_spill] sm:$0xff] %v6594_v10  ;;  %v6607_v40 = vsel %vm8428_vm1, %v1437_v30, %v1438_v8  ;;  %v6610_v55 = vadd.s32 192, %v6141_v51  ;;  %v612_v50 = vadd.f32 %v4619_v4, %v6196_v13  ;;  %5030 = vrot.lane.b32.xlu0 %v6594_v10, %s5768_s8  ;;  %v4620_v34 = vpop.f32.mrb[22].mxu0  ;;  %v8587_v10 = vand.u32 15, %v6208_v18 }
 0x1d4   : > { %8581 = vst [vmem:[#allocation61_spill] sm:$0xff] %v6598_v17  ;;  %8582 = vst [vmem:[#allocation62_spill] sm:$0xff] %v6602_v19  ;;  %v6617_v49 = vsel %vm8428_vm1, %v1440_v59, %v1441_v16  ;;  %v1598_v17 = vsel %vm6488_vm11, 0.0, %v6607_v40  ;;  %v604_v30 = vadd.f32 %v6196_v13, %v603_v39  ;;  %v6625_v48 = vsel %vm8428_vm1, %v1439_v1, %v1440_v59  ;;  %v606_v59 = vpop.f32.mrb[23].mxu0 }
 0x1d5   : > { %8583 = vst [vmem:[#allocation63_spill] sm:$0xff] %v6610_v55  ;;  %8584 = vst [vmem:[#allocation64_spill] sm:$0xff] %v6617_v49  ;;  %v6629_v4 = vsel %vm8428_vm1, %v1438_v8, %v1439_v1  ;;  %vm6633_vm14 = vcmp.eq.s32.totalorder %v8587_v10, 15  ;;  %v6638_v62 = vpack.i.bf16 %v1598_v17, %v6532_v2  ;;  %v6640_v39 = vmax.f32 %v612_v50, 0.0 }
 0x1d6   : > { %8585 = vst [vmem:[#allocation65_spill] sm:$0xff] %v6625_v48  ;;  %8586 = vst [vmem:[#allocation66_spill] sm:$0xff] %v6629_v4  ;;  %v8589_v53 = vsel %vm6633_vm14, 4294967295, %v8588_v53  ;;  %v615_v14 = vadd.f32 %v4620_v34, %v6196_v13  ;;  %v2130_v8 = vsel %vm6488_vm11, 0.0, %v6625_v48  ;;  %v1600_v18 = vsel %vm6511_vm12, 0.0, %v6625_v48 }
 0x1d7   : > { %8590 = vst [vmem:[#allocation67_spill] sm:$0xff] %v8589_v53  ;;  %8591 = vst [vmem:[#allocation68_spill] sm:$0xff] %v6638_v62  ;;  %v6649_v10 = vmax.f32 %v604_v30, 0.0  ;;  %v607_v17 = vadd.f32 %v6196_v13, %v606_v59  ;;  %v5039_v1 = vpack.i.bf16 %v2130_v8, %v6629_v4  ;;  %v6654_v50 = vpack.i.bf16 %v1600_v18, %v6629_v4 }
 0x1d8   : > { %v6656_v34 = vmax.f32 %v615_v14, 0.0  ;;  %5035 = vrot.lane.b32.xlu0 %v6602_v19, %s5768_s8  ;;  %v1444_v6 = vrot.slane %v6640_v39, 1  ;;  %v6662_v48 = vpack.i.bf16 %v2120_v23, %v6375_v9  ;;  %v3224_v30 = vsel %vm6282_vm6, 0.0, %v6458_v15 }
 0x1d9   : > { %8592 = vst [vmem:[#allocation69_spill] sm:$0xff] %v6654_v50  ;;  %v6668_v8 = vmax.f32 %v607_v17, 0.0  ;;  %5040 = vrot.lane.b32.xlu1 %v5039_v1, %s5769_s23  ;;  %v1442_v14 = vrot.slane %v6649_v10, 1  ;;  %v8594_v31 = vand.u32 15, %v6212_v20  ;;  %v8595_v18 = vmov 0  ;;  %v4623_v1 = vpop.f32.mrb[24].mxu0 }
 0x1da   : > { %8593 = vst [vmem:[#allocation70_spill] sm:$0xff] %v6662_v48  ;;  %v6679_v9 = vpack.i.bf16 %v3224_v30, %v6462_v24  ;;  %v6683_v46 = vpack.i.bf16 %v6656_v34, %v6640_v39  ;;  %v1445_v23 = vrot.slane %v6656_v34, 1  ;;  %v628_v30 = vadd.f32 %v4623_v1, %v6196_v13 }
 0x1db   : > { %vm6674_vm15 = vcmp.eq.s32.totalorder %v8594_v31, 15  ;;  %v6689_v59 = vpack.i.bf16 %v6668_v8, %v6649_v10  ;;  %v1443_v20 = vrot.slane %v6668_v8, 1  ;;  %v6694_v31 = vsel %vm8428_vm1, %v1441_v16, %v1442_v14 }
 0x1dc   : > { %v8596_v18 = vsel %vm6674_vm15, 4294967295, %v8595_v18  ;;  %8598 = vst [vmem:[#allocation72_spill] sm:$0xff] %v6679_v9  ;;  %8599 = vst [vmem:[#allocation73_spill] sm:$0xff] %v6683_v46  ;;  %v619_v9 = vpop.f32.mrb[25].mxu0  ;;  %v2132_v48 = vsel %vm6511_vm12, 0.0, %v6694_v31  ;;  %v6702_v17 = vsel %vm8428_vm1, %v1444_v6, %v1445_v23  ;;  %v1602_v50 = vsel %vm6582_vm13, 0.0, %v6694_v31 }
 0x1dd   : > { %8597 = vst [vmem:[#allocation71_spill] sm:$0xff] %v8596_v18  ;;  %8600 = vst [vmem:[#allocation74_spill] sm:$0xff] %v6689_v59  ;;  %v620_v4 = vadd.f32 %v6196_v13, %v619_v9  ;;  %v4624_v19 = vpop.f32.mrb[26].mxu0  ;;  %5050 = vrot.lane.b32.xlu0 %v6689_v59, %s5768_s8  ;;  %5045 = vrot.lane.b32.xlu1 %v6683_v46, %s5768_s8  ;;  %v6714_v16 = vsel %vm8428_vm1, %v1443_v20, %v1444_v6  ;;  %vm6722_vm2 = vcmp.eq.s32.totalorder %v8604_v44, 15  ;;  %vm8425_vm5 = vcmask 64512  }
 0x1de   : > { %8601 = vst [vmem:[#allocation75_spill] sm:$0xff] %v6694_v31  ;;  %8602 = vst [vmem:[#allocation76_spill] sm:$0xff] %v6714_v16  ;;  %v6718_v1 = vsel %vm8428_vm1, %v1442_v14, %v1443_v20  ;;  %v1239_v9 = vrot.slane %v6384_v27, 7  ;;  %v6727_v59 = vmax.f32 %v628_v30, 0.0  ;;  %v631_v46 = vadd.f32 %v4624_v19, %v6196_v13  ;;  %v622_v62 = vpop.f32.mrb[27].mxu0  ;;  %v8731_v31 = vld [vmem:[#allocation21_spill] sm:$0xff] }
 0x1df   : > { %8603 = vst [vmem:[#allocation77_spill] sm:$0xff] %v6718_v1  ;;  %v2134_v6 = vsel %vm6582_vm13, 0.0, %v6714_v16  ;;  %v5054_v14 = vpack.i.bf16 %v2132_v48, %v6617_v49  ;;  %v6734_v20 = vmax.f32 %v620_v4, 0.0  ;;  %v623_v21 = vadd.f32 %v6196_v13, %v622_v62 }
 0x1e0   : > { %v5059_v44 = vpack.i.bf16 %v2134_v6, %v6718_v1  ;;  %v6739_v2 = vpack.i.bf16 %v1602_v50, %v6617_v49  ;;  %v6741_v27 = vmax.f32 %v631_v46, 0.0  ;;  %v1448_v19 = vrot.slane %v6727_v59, 1 }
 0x1e1   : > { %v1604_v30 = vsel %vm6633_vm14, 0.0, %v6714_v16  ;;  %v8609_v42 = vrot.slane %v6396_v22, 7  ;;  %v6753_v62 = vmax.f32 %v623_v21, 0.0  ;;  %5055 = vrot.lane.b32.xlu1 %v5054_v14, %s5769_s23  ;;  %v1446_v4 = vrot.slane %v6734_v20, 1 }
 0x1e2   : > { %8607 = vst [vmem:[#allocation78_spill] sm:$0xff] %v6739_v2  ;;  %8608 = vst [vmem:[#allocation79_spill] sm:$0xff] %v6741_v27  ;;  %5060 = vrot.lane.b32.xlu0 %v5059_v44, %s5769_s23  ;;  %v8611_v50 = vand.u32 15, %v6223_v25  ;;  %v6765_v6 = vpack.i.bf16 %v1604_v30, %v6718_v1  ;;  %v6775_v14 = vpack.i.bf16 %v6741_v27, %v6727_v59  ;;  %v1449_v44 = vrot.slane %v6741_v27, 1 }
 0x1e3   : > { %v6751_v48 = vsel %vm8431_vm4, %v1239_v9, %v8609_v42  ;;  %v8615_v42 = vrot.slane %v6406_v32, 7  ;;  %v1447_v30 = vrot.slane %v6753_v62, 1  ;;  %v8620_v2 = vand.u32 15, %v6146_v54 }
 0x1e4   : > { %8610 = vst [vmem:[#allocation80_spill] sm:$0xff] %v6751_v48  ;;  %vm6760_vm3 = vcmp.eq.s32.totalorder %v8611_v50, 15  ;;  %8614 = vst [vmem:[#allocation81_spill] sm:$0xff] %v6765_v6  ;;  %v4627_v50 = vpop.f32.mrb[28].mxu0  ;;  %v6781_v48 = vpack.i.bf16 %v6753_v62, %v6734_v20  ;;  %v6786_v6 = vsel %vm8428_vm1, %v1445_v23, %v1446_v4  ;;  %v6794_v25 = vsel %vm8428_vm1, %v1448_v19, %v1449_v44 }
 0x1e5   : > { %v6771_v21 = vsel %vm8431_vm4, %v8615_v42, %v1239_v9  ;;  %8617 = vst [vmem:[#allocation83_spill] sm:$0xff] %v6775_v14  ;;  %8619 = vst [vmem:[#allocation85_spill] sm:$0xff] %v6786_v6  ;;  %v644_v9 = vadd.f32 %v4627_v50, %v6196_v13  ;;  %v635_v42 = vpop.f32.mrb[29].mxu0  ;;  %vm6798_vm6 = vcmp.eq.s32.totalorder %v8620_v2, 15  ;;  %v8621_v1 = vmov 0  ;;  %5065 = vrot.lane.b32.xlu1 %v6775_v14, %s5768_s8 }
 0x1e6   : > { %8616 = vst [vmem:[#allocation82_spill] sm:$0xff] %v6771_v21  ;;  %8618 = vst [vmem:[#allocation84_spill] sm:$0xff] %v6781_v48  ;;  %v2136_v21 = vsel %vm6633_vm14, 0.0, %v6786_v6  ;;  %v8622_v1 = vsel %vm6798_vm6, 4294967295, %v8621_v1  ;;  %v1606_v23 = vsel %vm6674_vm15, 0.0, %v6786_v6  ;;  %v636_v50 = vadd.f32 %v6196_v13, %v635_v42  ;;  %v4628_v16 = vpop.f32.mrb[30].mxu0  ;;  %5070 = vrot.lane.b32.xlu0 %v6781_v48, %s5768_s8 }
 0x1e7   : > { %8623 = vst [vmem:[#allocation86_spill] sm:$0xff] %v8622_v1  ;;  %v6812_v54 = vsel %vm8428_vm1, %v1447_v30, %v1448_v19  ;;  %v6816_v2 = vsel %vm8428_vm1, %v1446_v4, %v1447_v30  ;;  %v8624_v53 = vand.u32 15, %v6141_v51  ;;  %v8625_v6 = vmov 0  ;;  %v638_v49 = vpop.f32.mrb[31].mxu0 }
 0x1e8   : > { %v1237_v42 = vrot.slane %v6391_v3, 7  ;;  %v6825_v48 = vmax.f32 %v644_v9, 0.0  ;;  %v647_v14 = vadd.f32 %v4628_v16, %v6196_v13  ;;  %v2138_v19 = vsel %vm6674_vm15, 0.0, %v6812_v54 }
 0x1e9   : > { %vm6820_vm0 = vcmp.eq.s32.totalorder %v8624_v53, 0  ;;  %v5074_v4 = vpack.i.bf16 %v2136_v21, %v6702_v17  ;;  %v6832_v30 = vmax.f32 %v636_v50, 0.0  ;;  %v639_v53 = vadd.f32 %v6196_v13, %v638_v49 }
 0x1ea   : > { %v8626_v6 = vsel %vm6820_vm0, 4294967295, %v8625_v6  ;;  %v5079_v55 = vpack.i.bf16 %v2138_v19, %v6816_v2  ;;  %v6837_v27 = vpack.i.bf16 %v1606_v23, %v6702_v17  ;;  %v2079_v3 = vrot.slane %v6825_v48, 1 }
 0x1eb   : > { %8627 = vst [vmem:[#allocation87_spill] sm:$0xff] %v8626_v6  ;;  %v6840_v9 = vmax.f32 %v647_v14, 0.0  ;;  %v1608_v16 = vsel %vm6722_vm2, 0.0, %v6812_v54  ;;  %v6846_v18 = vadd.s32 208, %v6141_v51  ;;  %v679_v21 = vmax.f32 %v639_v53, 0.0  ;;  %5075 = vrot.lane.b32.xlu1 %v5074_v4, %s5769_s23 }
 0x1ec   : > { %8628 = vst [vmem:[#allocation88_spill] sm:$0xff] %v6837_v27  ;;  %5080 = vrot.lane.b32.xlu0 %v5079_v55, %s5769_s23  ;;  %v1450_v13 = vrot.slane %v6832_v30, 1  ;;  %v6852_v49 = vpack.i.bf16 %v1608_v16, %v6816_v2  ;;  %v8630_v14 = vrot.slane %v6406_v32, 7  ;;  %v8633_v55 = vrot.slane %v6313_v43, 7 }
 0x1ed   : > { %v6861_v50 = vrot.slane %v6840_v9, 1  ;;  %v6865_v19 = vpack.i.bf16 %v6840_v9, %v6825_v48  ;;  %v1241_v53 = vrot.slane %v6470_v5, 7  ;;  %v6874_v32 = vrot.slane %v679_v21, 7 }
 0x1ee   : > { %8629 = vst [vmem:[#allocation89_spill] sm:$0xff] %v6852_v49  ;;  %v6858_v23 = vsel %vm8431_vm4, %v1237_v42, %v8630_v14  ;;  %v6871_v4 = vsel %vm8431_vm4, %v8633_v55, %v1237_v42  ;;  %v6877_v16 = vpack.i.bf16 %v679_v21, %v6832_v30  ;;  %v1451_v14 = vrot.slane %v679_v21, 1 }
 0x1ef   : > { %8631 = vst [vmem:[#allocation90_spill] sm:$0xff] %v6858_v23  ;;  %8632 = vst [vmem:[#allocation91_spill] sm:$0xff] %v6865_v19  ;;  %v6881_v23 = vsel %vm8428_vm1, %v1449_v44, %v1450_v13  ;;  %v6889_v42 = vsel %vm8428_vm1, %v2079_v3, %v6861_v50  ;;  %v2112_v5 = vsel %vm8428_vm1, %v6861_v50, %v6260_v58  ;;  %5085 = vrot.lane.b32.xlu1 %v6865_v19, %s5768_s8  ;;  %v8655_v1 = vmov 0 }
 0x1f0   : > { %8634 = vst [vmem:[#allocation92_spill] sm:$0xff] %v6871_v4  ;;  %8635 = vst [vmem:[#allocation93_spill] sm:$0xff] %v6877_v16  ;;  %v2140_v43 = vsel %vm6722_vm2, 0.0, %v6881_v23  ;;  %v1610_v21 = vsel %vm6760_vm3, 0.0, %v6881_v23  ;;  %v1291_v44 = vsel %vm8431_vm4, %v6874_v32, %v6152_v56  ;;  %5090 = vrot.lane.b32.xlu0 %v6877_v16, %s5768_s8  ;;  %v6908_v55 = vsel %vm8428_vm1, %v1450_v13, %v1451_v14 }
 0x1f1   : > { %v6912_v58 = vsel %vm8428_vm1, %v1451_v14, %v2079_v3  ;;  %v2144_v49 = vsel %vm6798_vm6, 0.0, %v2112_v5  ;;  %v1388_v4 = vsel %vm6820_vm0, 0.0, %v1291_v44  ;;  %v5094_v19 = vpack.i.bf16 %v2140_v43, %v6794_v25 }
 0x1f2   : > { %v2142_v16 = vsel %vm6760_vm3, 0.0, %v6912_v58  ;;  %v5099_v27 = vpack.i.bf16 %v2144_v49, %v6889_v42  ;;  %v8636_v13 = vunpack.i.l.bf16 %v6231_v33  ;;  %v6930_v5 = vpack.i.bf16 %v1610_v21, %v6794_v25 }
 0x1f3   : > { %v5104_v3 = vpack.i.bf16 %v2142_v16, %v6908_v55  ;;  %v1484_v44 = vsel %vm8428_vm1, %v1451_v14, %v6155_v57  ;;  %5095 = vrot.lane.b32.xlu1 %v5094_v19, %s5769_s23  ;;  %v8637_v16 = vrot.slane %v6396_v22, 7  ;;  %v1246_v21 = vrot.slane %v6577_v11, 7 }
 0x1f4   : > { %v6926_v56 = vsel %vm8425_vm5, %v1388_v4, %v8636_v13  ;;  %v1612_v49 = vsel %vm6798_vm6, 0.0, %v1484_v44  ;;  %v8426_v4 = vrot.slane %v6483_v41, 7  ;;  %v2122_v19 = vsel %vm6329_vm7, 0.0, %v6458_v15 }
 0x1f5   : > { %5105 = vrot.lane.b32.xlu0 %v5104_v3, %s5769_s23  ;;  %v6945_v43 = vsel %vm8431_vm4, %v8637_v16, %v1241_v53  ;;  %v6949_v14 = vpack.i.bf16 %v1612_v49, %v6908_v55  ;;  %v6961_v22 = vpack.i.bf16 %v2122_v19, %v6462_v24  ;;  %v2124_v11 = vsel %vm6364_vm8, 0.0, %v6517_v38 }
 0x1f6   : > { %8638 = vst [vmem:[#allocation94_spill] sm:$0xff] %v6945_v43  ;;  %v6958_v13 = vsel %vm8431_vm4, %v1241_v53, %v8426_v4  ;;  %v3226_v3 = vsel %vm6329_vm7, 0.0, %v6517_v38  ;;  %v6970_v44 = vpack.i.bf16 %v2124_v11, %v6450_v36  ;;  %v1247_v53 = vrot.slane %v6551_v45, 7 }
 0x1f7   : > { %8639 = vst [vmem:[#allocation95_spill] sm:$0xff] %v6958_v13  ;;  %v6973_v15 = vpack.i.bf16 %v3226_v3, %v6450_v36  ;;  %v1248_v49 = vrot.slane %v6573_v37, 7  ;;  %5100 = vrot.lane.b32.xlu1 %v5099_v27, %s5769_s23  ;;  %v3228_v47 = vsel %vm6364_vm8, 0.0, %v6545_v26  ;;  %v1249_v45 = vrot.slane %v6649_v10, 7  ;;  %v5441_v3 = vld [vmem:[#allocation8 + $0x14] ss:$0 sps:$4 sm:$0xff]  }
 0x1f8   : > { %v6989_v36 = vsel %vm8431_vm4, %v1246_v21, %v1247_v53  ;;  %v6992_v38 = vpack.i.bf16 %v3228_v47, %v6549_v35  ;;  %v1250_v37 = vrot.slane %v6668_v8, 7  ;;  %v1251_v60 = vrot.slane %v6640_v39, 7 }
 0x1f9   : > { %5110 = vrot.lane.b32.xlu0 %v6541_v7, %s5769_s23  ;;  %v6985_v24 = vsel %vm8431_vm4, %v1247_v53, %v1248_v49  ;;  %v8427_v7 = vrot.slane %v6476_v61, 7  ;;  %v1252_v27 = vrot.slane %v6656_v34, 7  ;;  %v7001_v16 = vsel %vm8431_vm4, %v1248_v49, %v1249_v45 }
 0x1fa   : > { %v2126_v19 = vsel %vm6412_vm9, 0.0, %v6545_v26  ;;  %v1245_v11 = vrot.slane %v6561_v29, 7  ;;  %v7013_v39 = vsel %vm8431_vm4, %v1249_v45, %v1250_v37  ;;  %v7021_v26 = vsel %vm8431_vm4, %v1250_v37, %v1251_v60  ;;  %v7051_v37 = vld [vmem:[#allocation8] sm:$0xff]  }
 0x1fb   : > { %5115 = vrot.lane.b32.xlu1 %v6565_v0, %s5769_s23  ;;  %8640 = vst [vmem:[#allocation96_spill] sm:$0xff] %v7013_v39  ;;  %v7017_v10 = vsel %vm8431_vm4, %v1251_v60, %v1252_v27  ;;  %v711_v29 = vadd.s32 224, %v6141_v51  ;;  %v7025_v34 = vpack.i.bf16 %v2126_v19, %v6549_v35  ;;  %v713_v53 = vadd.s32 240, %v6141_v51  ;;  %v8645_v60 = vld [vmem:[#allocation43_spill] sm:$0xff]  ;;  %v8667_v39 = vld [vmem:[#allocation65_spill] sm:$0xff] }
 0x1fc   : > { %8641 = vst [vmem:[#allocation97_spill] sm:$0xff] %v7017_v10  ;;  %v7029_v0 = vsel %vm8431_vm4, %v1245_v11, %v1246_v21  ;;  %v7035_v8 = vsel %vm8431_vm4, %v8427_v7, %v1245_v11  ;;  %v1983_v49 = vrot.slane %v6825_v48, 7  ;;  %v7040_v47 = vrot.slane %v6840_v9, 7  ;;  %v8649_v9 = vld [vmem:[#allocation55_spill] sm:$0xff]  ;;  %v8653_v7 = vld [vmem:[#allocation56_spill] sm:$0xff] }
 0x1fd   : > { %5120 = vrot.lane.b32.xlu0 %v6497_v12, %s5768_s8  ;;  %v8642_v35 = vand.u32 15, %v6255_v52  ;;  %vm8432_vm8 = vcmask 1043456   ;;  %v2128_v21 = vsel %vm6438_vm10, 0.0, %v6607_v40  ;;  %v8646_v19 = vand.u32 15, %v8645_v60  ;;  %v8651_v60 = vld [vmem:[#allocation68_spill] sm:$0xff] }
 0x1fe   : > { %v8647_v48 = vmov 0  ;;  %4840 = vmatprep.subr.msk.bf16.mxu1 %vm8432_vm8, %v5441_v3  ;;  %v2545_v52 = vsel %vm8432_vm8, %v5441_v3, 0  ;;  %v7062_v11 = vpack.i.bf16 %v2128_v21, %v8649_v9  ;;  %v1253_v4 = vrot.slane %v6734_v20, 7  ;;  %4839 = vmatprep.subr.msk.bf16.mxu0 %vm8432_vm8, %v5441_v3  ;;  %v8657_v21 = vld [vmem:[#allocation30_spill] sm:$0xff] }
 0x1ff   : > { %vm7044_vm7 = vcmp.eq.s32.totalorder %v8642_v35, 0  ;;  %vm7055_vm5 = vcmp.eq.s32.totalorder %v8646_v19, 0  ;;  %v3230_v35 = vsel %vm6412_vm9, 0.0, %v6607_v40  ;;  %v8652_v19 = vld [vmem:[#allocation62_spill] sm:$0xff]  ;;  %v8654_v6 = vand.u32 15, %v8653_v7  ;;  %4774 = vmatpush3.bf16.msra.mxu1 %v2545_v52  ;;  %v8663_v7 = vld [vmem:[#allocation63_spill] sm:$0xff]  ;;  %4632 = vmatpush3.bf16.msra.mxu0 %v2545_v52 }
 0x200   : > { %v8648_v48 = vsel %vm7055_vm5, 4294967295, %v8647_v48  ;;  %8650 = vst [vmem:[#allocation43_spill] sm:$0xff] %v7062_v11  ;;  %5125 = vrot.lane.b32.xlu1 %v8652_v19, %s5768_s8  ;;  %v8658_v10 = vand.u32 15, %v8657_v21  ;;  %v7086_v40 = vpack.i.bf16 %v3230_v35, %v8649_v9  ;;  %v1254_v20 = vrot.slane %v6753_v62, 7  ;;  %v8668_v62 = vld [vmem:[#allocation75_spill] sm:$0xff]  ;;  %4665 = vmatprep.subr.bf16.mxu1 %v7051_v37 }
 0x201   : > { %5130 = vrot.lane.b32.xlu0 %v8651_v60, %s5769_s23  ;;  %vm7075_vm1 = vcmp.eq.s32.totalorder %v8654_v6, 0  ;;  %v1255_v3 = vrot.slane %v6727_v59, 7  ;;  %v8661_v60 = vld [vmem:[#allocation79_spill] sm:$0xff]  ;;  %vm8662_vm9 = vcmp.lt.s32.totalorder %v6141_v51, 1  ;;  %v8664_v21 = vand.u32 15, %v8663_v7 }
 0x202   : > { %v8656_v1 = vsel %vm7075_vm1, 4294967295, %v8655_v1  ;;  %vm7081_vm4 = vcmp.eq.s32.totalorder %v8658_v10, 0  ;;  %v1256_v11 = vrot.slane %v8661_v60, 7  ;;  %v7093_v6 = vsel %vm8662_vm9, %v1252_v27, %v1253_v4  ;;  %vm8670_vm6 = vmmov %vm8662_vm9 }
 0x203   : > { %vm7097_vm8 = vcmp.eq.s32.totalorder %v8664_v21, 0  ;;  %v3232_v9 = vsel %vm6438_vm10, 0.0, %v8667_v39  ;;  %v3234_v59 = vsel %vm6488_vm11, 0.0, %v8668_v62  ;;  %v7109_v60 = vsel %vm8670_vm6, %v1253_v4, %v1254_v20  ;;  %vm8672_vm9 = vmmov %vm8670_vm6  ;;  %v8675_v39 = vld [vmem:[#allocation66_spill] sm:$0xff]  ;;  %v8676_v62 = vld [vmem:[#allocation64_spill] sm:$0xff] }
 0x204   : > { %8671 = vst [vmem:[#allocation55_spill] sm:$0xff] %v7109_v60  ;;  %v7113_v27 = vsel %vm8672_vm9, %v1255_v3, %v1256_v11  ;;  %vm8674_vm0 = vmmov %vm8670_vm6  ;;  %v915_v28 = vand.u32 15, %v711_v29  ;;  %v7121_v21 = vpack.i.bf16 %v3232_v9, %v8675_v39  ;;  %v7124_v52 = vpack.i.bf16 %v3234_v59, %v8676_v62  ;;  %v8678_v4 = vld [vmem:[#allocation60_spill] sm:$0xff]  ;;  %v8679_v60 = vld [vmem:[#allocation69_spill] sm:$0xff] }
 0x205   : > { %8673 = vst [vmem:[#allocation68_spill] sm:$0xff] %v7113_v27  ;;  %v7117_v7 = vsel %vm8674_vm0, %v1254_v20, %v1255_v3  ;;  %v929_v35 = vand.u32 15, %v713_v53  ;;  %5140 = vrot.lane.b32.xlu0 %v8678_v4, %s5768_s8  ;;  %5135 = vrot.lane.b32.xlu1 %v8679_v60, %s5769_s23  ;;  %v1257_v27 = vrot.slane %v6832_v30, 7  ;;  %v7134_v20 = vsel %vm8674_vm0, %v1983_v49, %v7040_v47  ;;  %vm8681_vm10 = vmmov %vm8674_vm0  ;;  %v8686_v9 = vld [vmem:[#allocation76_spill] sm:$0xff]  ;;  %v8688_v60 = vld [vmem:[#allocation85_spill] sm:$0xff] }
 0x206   : > { %8677 = vst [vmem:[#allocation62_spill] sm:$0xff] %v7124_v52  ;;  %8680 = vst [vmem:[#allocation56_spill] sm:$0xff] %v7134_v20  ;;  %v7139_v29 = vsel %vm8681_vm10, %v6874_v32, %v1983_v49  ;;  %v8683_v53 = vand.u32 15, %v6846_v18  ;;  %v8684_v3 = vmov 0  ;;  %v3236_v30 = vsel %vm6511_vm12, 0.0, %v8686_v9  ;;  %v8692_v49 = vld [vmem:[#allocation77_spill] sm:$0xff] }
 0x207   : > { %8682 = vst [vmem:[#allocation30_spill] sm:$0xff] %v7139_v29  ;;  %v3238_v62 = vsel %vm6582_vm13, 0.0, %v8688_v60  ;;  %vm8690_vm6 = vmmov %vm8674_vm0  ;;  %vm7168_vm12 = vcmp.eq.s32.totalorder %v915_v28, 0  ;;  %v8694_v9 = vmov 0  ;;  %vm7172_vm13 = vcmp.eq.s32.totalorder %v929_v35, 0  ;;  %v8703_v28 = vld [vmem:[#allocation48_spill] sm:$0xff] }
 0x208   : > { %vm7143_vm11 = vcmp.eq.s32.totalorder %v8683_v53, 0  ;;  %v7156_v20 = vsel %vm8690_vm6, %v1257_v27, %v6874_v32  ;;  %vm8691_vm9 = vmmov %vm8674_vm0  ;;  %v7163_v53 = vpack.i.bf16 %v3236_v30, %v8692_v49  ;;  %v7166_v52 = vpack.i.bf16 %v3238_v62, %v6702_v17  ;;  %v8717_v35 = vld [vmem:[#allocation28_spill] sm:$0xff] }
 0x209   : > { %v8685_v3 = vsel %vm7143_vm11, 4294967295, %v8684_v3  ;;  %v7160_v18 = vsel %vm8691_vm9, %v1256_v11, %v1257_v27  ;;  %v8695_v9 = vsel %vm7168_vm12, 4294967295, %v8694_v9  ;;  %v8696_v59 = vmov 0  ;;  %v8700_v11 = vld [vmem:[#allocation78_spill] sm:$0xff]  ;;  %vm8729_vm10 = vmmov %vm8674_vm0 }
 0x20a   : > { %8693 = vst [vmem:[#allocation79_spill] sm:$0xff] %v7166_v52  ;;  %v8697_v59 = vsel %vm7172_vm13, 4294967295, %v8696_v59  ;;  %v3240_v60 = vsel %vm6633_vm14, 0.0, %v6812_v54  ;;  %5150 = vrot.lane.b32.xlu0 %v8700_v11, %s5769_s23  ;;  %v8701_v27 = vld [vmem:[#allocation74_spill] sm:$0xff]  ;;  %v1243_v30 = vrot.slane %v8703_v28, 7  ;;  %v3242_v39 = vsel %vm6674_vm15, 0.0, %v6881_v23  ;;  %vm8707_vm14 = vmmov %vm8674_vm0 }
 0x20b   : > { %8698 = vst [vmem:[#allocation63_spill] sm:$0xff] %v8697_v59  ;;  %5145 = vrot.lane.b32.xlu1 %v8701_v27, %s5768_s8  ;;  %v7184_v17 = vpack.i.bf16 %v3240_v60, %v6816_v2  ;;  %v7191_v62 = vpack.i.bf16 %v3242_v39, %v6794_v25  ;;  %v3244_v49 = vsel %vm6722_vm2, 0.0, %v6912_v58  ;;  %v8706_v2 = vrot.slane %v6476_v61, 7  ;;  %vm8710_vm15 = vmmov %vm8674_vm0  ;;  %v8713_v58 = vld [vmem:[#allocation27_spill] sm:$0xff]  ;;  %v8715_v28 = vld [vmem:[#allocation73_spill] sm:$0xff] }
 0x20c   : > { %v8709_v60 = vrot.slane %v6483_v41, 7  ;;  %v7212_v23 = vpack.i.bf16 %v3244_v49, %v6908_v55  ;;  %v803_v11 = vand.u32 15, %v8713_v58  ;;  %vm8714_vm2 = vcmp.lt.s32.totalorder %v6141_v51, 7 }
 0x20d   : > { %8702 = vst [vmem:[#allocation65_spill] sm:$0xff] %v7184_v17  ;;  %8705 = vst [vmem:[#allocation75_spill] sm:$0xff] %v7191_v62  ;;  %v7203_v32 = vsel %vm8707_vm14, %v1243_v30, %v8706_v2  ;;  %v3186_v41 = vsel %vm8714_vm2, %v6861_v50, %v6155_v57  ;;  %v789_v39 = vand.u32 15, %v8717_v35  ;;  %v8722_v2 = vmov 0  ;;  %v8725_v50 = vld [vmem:[#allocation33_spill] sm:$0xff]  ;;  %v8743_v57 = vld [vmem:[#allocation58_spill] sm:$0xff] }
 0x20e   : > { %8708 = vst [vmem:[#allocation50_spill] sm:$0xff] %v7203_v32  ;;  %v7209_v25 = vsel %vm8710_vm15, %v8709_v60, %v1243_v30  ;;  %8712 = vst [vmem:[#allocation64_spill] sm:$0xff] %v7212_v23  ;;  %5160 = vrot.lane.b32.xlu0 %v8715_v28, %s5768_s8  ;;  %v8716_v30 = vld [vmem:[#allocation81_spill] sm:$0xff]  ;;  %v3246_v49 = vsel %vm6760_vm3, 0.0, %v3186_v41  ;;  %v8720_v41 = vld [vmem:[#allocation24_spill] sm:$0xff]  ;;  %v8732_v46 = vand.u32 15, %v8731_v31 }
 0x20f   : > { %8711 = vst [vmem:[#allocation66_spill] sm:$0xff] %v7209_v25  ;;  %5155 = vrot.lane.b32.xlu1 %v8716_v30, %s5769_s23  ;;  %v8718_v60 = vld [vmem:[#allocation29_spill] sm:$0xff]  ;;  %v7243_v55 = vpack.i.bf16 %v3246_v49, %v6889_v42  ;;  %v8721_v35 = vand.u32 15, %v8720_v41  ;;  %v7261_v42 = vsel %vm8674_vm0, %v7040_v47, %v8725_v50  ;;  %v8727_v49 = vld [vmem:[#allocation32_spill] sm:$0xff]  ;;  %v8733_v41 = vmov 0  ;;  %v8763_v25 = vld [vmem:[#allocation83_spill] sm:$0xff] }
 0x210   : > { %v817_v58 = vand.u32 15, %v8718_v60  ;;  %8726 = vst [vmem:[#allocation76_spill] sm:$0xff] %v7261_v42  ;;  %v8728_v60 = vld [vmem:[#allocation22_spill] sm:$0xff]  ;;  %vm7271_vm6 = vcmp.eq.s32.totalorder %v8732_v46, 0  ;;  %v8738_v61 = vmov 0  ;;  %v8744_v31 = vld [vmem:[#allocation88_spill] sm:$0xff] }
 0x211   : > { %8719 = vst [vmem:[#allocation60_spill] sm:$0xff] %v7243_v55  ;;  %vm7253_vm3 = vcmp.eq.s32.totalorder %v8721_v35, 0  ;;  %v7267_v30 = vsel %vm8729_vm10, %v8728_v60, %v8727_v49  ;;  %v8734_v41 = vsel %vm7271_vm6, 4294967295, %v8733_v41  ;;  %v8736_v35 = vld [vmem:[#allocation26_spill] sm:$0xff]  ;;  %v8745_v46 = vld [vmem:[#allocation84_spill] sm:$0xff]  ;;  %v8746_v23 = vld [vmem:[#allocation25_spill] sm:$0xff] }
 0x212   : > { %v8723_v2 = vsel %vm7253_vm3, 4294967295, %v8722_v2  ;;  %8730 = vst [vmem:[#allocation53_spill] sm:$0xff] %v7267_v30  ;;  %8735 = vst [vmem:[#allocation85_spill] sm:$0xff] %v8734_v41  ;;  %v8737_v54 = vand.u32 15, %v8736_v35  ;;  %5170 = vrot.lane.b32.xlu0 %v8744_v31, %s5769_s23  ;;  %v8747_v35 = vand.u32 15, %v8746_v23  ;;  %vm7297_vm2 = vcmp.eq.s32.totalorder %v789_v39, 0 }
 0x213   : > { %8724 = vst [vmem:[#allocation69_spill] sm:$0xff] %v8723_v2  ;;  %5165 = vrot.lane.b32.xlu1 %v8745_v46, %s5768_s8  ;;  %v8751_v32 = vmov 0  ;;  %v8754_v55 = vld [vmem:[#allocation51_spill] sm:$0xff]  ;;  %v8755_v30 = vld [vmem:[#allocation92_spill] sm:$0xff]  ;;  %vm7307_vm0 = vcmp.eq.s32.totalorder %v803_v11, 0  ;;  %v8756_v42 = vmov 0 }
 0x214   : > { %vm7277_vm9 = vcmp.eq.s32.totalorder %v8737_v54, 0  ;;  %vm7293_vm15 = vcmp.eq.s32.totalorder %v8747_v35, 0  ;;  %v8748_v54 = vmov 0  ;;  %v8752_v32 = vsel %vm7297_vm2, 4294967295, %v8751_v32  ;;  %v8762_v39 = vld [vmem:[#allocation82_spill] sm:$0xff]  ;;  %v8768_v35 = vld [vmem:[#allocation35_spill] sm:$0xff] }
 0x215   : > { %v8739_v61 = vsel %vm7277_vm9, 4294967295, %v8738_v61  ;;  %v8749_v54 = vsel %vm7293_vm15, 4294967295, %v8748_v54  ;;  %8753 = vst [vmem:[#allocation67_spill] sm:$0xff] %v8752_v32  ;;  %v8757_v42 = vsel %vm7307_vm0, 4294967295, %v8756_v42  ;;  %vm7311_vm10 = vcmp.eq.s32.totalorder %v817_v58, 0  ;;  %v8764_v58 = vld [vmem:[#allocation89_spill] sm:$0xff] }
 0x216   : > { %8740 = vst [vmem:[#allocation59_spill] sm:$0xff] %v8739_v61  ;;  %8750 = vst [vmem:[#allocation77_spill] sm:$0xff] %v8749_v54  ;;  %v8759_v23 = vmov 0  ;;  %5180 = vrot.lane.b32.xlu0 %v8763_v25, %s5768_s8  ;;  %vm8765_vm14 = vcmp.lt.s32.totalorder %v6141_v51, 1  ;;  %v8769_v49 = vld [vmem:[#allocation34_spill] sm:$0xff]  ;;  %v8771_v11 = vld [vmem:[#allocation41_spill] sm:$0xff] }
 0x217   : > { %8758 = vst [vmem:[#allocation78_spill] sm:$0xff] %v8757_v42  ;;  %v8760_v23 = vsel %vm7311_vm10, 4294967295, %v8759_v23  ;;  %5175 = vrot.lane.b32.xlu1 %v8764_v58, %s5769_s23  ;;  %v7356_v31 = vsel %vm8765_vm14, %v7040_v47, %v8728_v60  ;;  %v8767_v58 = vld [vmem:[#allocation93_spill] sm:$0xff]  ;;  %v8770_v47 = vld [vmem:[#allocation36_spill] sm:$0xff]  ;;  %vm8776_vm13 = vcmask 64512  }
 0x218   : > { %8761 = vst [vmem:[#allocation74_spill] sm:$0xff] %v8760_v23  ;;  %8766 = vst [vmem:[#allocation48_spill] sm:$0xff] %v7356_v31  ;;  %v8773_v31 = vld [vmem:[#allocation44_spill] sm:$0xff]  ;;  %v8775_v17 = vld [vmem:[#allocation37_spill] sm:$0xff] }
 0x219   : > { %vm8778_vm12 = vmmov %vm8776_vm13 }
 0x21a   : > { %5190 = vrot.lane.b32.xlu0 %v6930_v5, %s5769_s23  ;;  %v8772_v5 = vld [vmem:[#allocation42_spill] sm:$0xff] }
 0x21b   : > { %5185 = vrot.lane.b32.xlu1 %v8767_v58, %s5768_s8  ;;  %v4963_v58 = vunpack.i.h.bf16 %v6231_v33 }
 0x21e   : > { %5195 = vrot.lane.b32.xlu0 %v8768_v35, %s5768_s8  ;;  %v8774_v35 = vld [vmem:[#allocation45_spill] sm:$0xff] }
 0x21f   : > { %5200 = vrot.lane.b32.xlu1 %v8769_v49, %s5768_s8 }
 0x222   : > { %5205 = vrot.lane.b32.xlu0 %v8769_v49, %s5768_s8  ;;  %v1289_v49 = vsel %vm8765_vm14, %v8728_v60, %v8725_v50  ;;  %vm8780_vm14 = vmmov %vm8778_vm12 }
 0x223   : > { %5210 = vrot.lane.b32.xlu1 %v8770_v47, %s5769_s23  ;;  %v4966_v62 = vpop.permute.xlu0 %4965  ;;  %v1390_v52 = vsel %vm7253_vm3, 0.0, %v1289_v49  ;;  %v1871_v50 = vsel %vm8780_vm14, %v8728_v60, %v4963_v58 }
 0x224   : > { %v4968_v47 = vunpack.i.h.bf16 %v4966_v62  ;;  %v4967_v59 = vunpack.i.l.bf16 %v4966_v62  ;;  %v4971_v29 = vpop.permute.xlu1 %4970  ;;  %v8779_v62 = vld [vmem:[#allocation39_spill] sm:$0xff] }
 0x225   : > { %v4973_v25 = vunpack.i.h.bf16 %v4971_v29 }
 0x226   : > { %5215 = vrot.lane.b32.xlu0 %v8771_v11, %s5768_s8 }
 0x227   : > { %5220 = vrot.lane.b32.xlu1 %v8772_v5, %s5769_s23  ;;  %v1392_v5 = vsel %vm7271_vm6, 0.0, %v8775_v17  ;;  %vm8781_vm6 = vmmov %vm8778_vm12 }
 0x228   : > { %v1874_v46 = vsel %vm8776_vm13, %v1392_v5, %v4967_v59  ;;  %vm8783_vm11 = vmmov %vm8781_vm6  ;;  %v4976_v5 = vpop.permute.xlu0 %4975 }
 0x229   : > { %v4978_v17 = vunpack.i.h.bf16 %v4976_v5 }
 0x22a   : > { %5225 = vrot.lane.b32.xlu0 %v8773_v31, %s5769_s23  ;;  %v4972_v31 = vunpack.i.l.bf16 %v4971_v29  ;;  %v8782_v29 = vld [vmem:[#allocation38_spill] sm:$0xff] }
 0x22b   : > { %5230 = vrot.lane.b32.xlu1 %v8774_v35, %s5769_s23  ;;  %v8777_v35 = vld [vmem:[#allocation40_spill] sm:$0xff]  ;;  %v1873_v59 = vsel %vm8783_vm11, %v8782_v29, %v4973_v25  ;;  %v8789_v25 = vld [vmem:[#allocation54_spill] sm:$0xff] }
 0x22c   : > { %v1875_v33 = vsel %vm8778_vm12, %v8777_v35, %v4968_v47  ;;  %v1872_v41 = vsel %vm8781_vm6, %v1390_v52, %v4972_v31  ;;  %v4977_v47 = vunpack.i.l.bf16 %v4976_v5  ;;  %v4981_v35 = vpop.permute.xlu1 %4980  ;;  %vm8784_vm12 = vcmask 130048   ;;  %v8786_v52 = vld [vmem:[#allocation49_spill] sm:$0xff]  ;;  %v8797_v29 = vld [vmem:[#allocation70_spill] sm:$0xff] }
 0x22d   : > { %v4983_v2 = vunpack.i.h.bf16 %v4981_v35  ;;  %v4982_v49 = vunpack.i.l.bf16 %v4981_v35  ;;  %v7404_v51 = vsel %vm8784_vm12, %v1871_v50, %v4978_v17  ;;  %vm8785_vm13 = vmmov %vm8784_vm12  ;;  %v4986_v17 = vpop.permute.xlu0 %4985 }
 0x22e   : > { %5235 = vrot.lane.b32.xlu0 %v8771_v11, %s5768_s8  ;;  %v7408_v11 = vsel %vm8785_vm13, %v6926_v56, %v4977_v47  ;;  %vm8787_vm11 = vmmov %vm8784_vm12  ;;  %v4988_v35 = vunpack.i.h.bf16 %v4986_v17  ;;  %v4987_v50 = vunpack.i.l.bf16 %v4986_v17  ;;  %v8792_v17 = vld [vmem:[#allocation61_spill] sm:$0xff] }
 0x22f   : > { %5240 = vrot.lane.b32.xlu1 %v8779_v62, %s5768_s8  ;;  %v7417_v58 = vsel %vm8787_vm11, %v1872_v41, %v4982_v49  ;;  %vm8788_vm6 = vmmov %vm8787_vm11  ;;  %v8793_v56 = vld [vmem:[#allocation57_spill] sm:$0xff] }
 0x230   : > { %v7420_v31 = vsel %vm8788_vm6, %v1873_v59, %v4983_v2  ;;  %v4991_v5 = vpop.permute.xlu1 %4990  ;;  %v1879_v41 = vsel %vm8780_vm14, %v8789_v25, %v4988_v35  ;;  %vm8790_vm12 = vmmov %vm8780_vm14  ;;  %v1394_v2 = vsel %vm7277_vm9, 0.0, %v8743_v57  ;;  %v8791_v59 = vld [vmem:[#allocation47_spill] sm:$0xff] }
 0x231   : > { %v4993_v47 = vunpack.i.h.bf16 %v4991_v5  ;;  %vm8794_vm13 = vmmov %vm8790_vm12  ;;  %v4996_v54 = vpop.permute.xlu0 %4995 }
 0x232   : > { %5245 = vrot.lane.b32.xlu0 %v8779_v62, %s5768_s8  ;;  %v1396_v62 = vsel %vm7293_vm15, 0.0, %v8754_v55  ;;  %vm8795_vm11 = vmmov %vm8790_vm12  ;;  %v4998_v55 = vunpack.i.h.bf16 %v4996_v54  ;;  %v4997_v35 = vunpack.i.l.bf16 %v4996_v54 }
 0x233   : > { %5250 = vrot.lane.b32.xlu1 %v8786_v52, %s5769_s23  ;;  %v4992_v52 = vunpack.i.l.bf16 %v4991_v5  ;;  %v1878_v49 = vsel %vm8790_vm12, %v1396_v62, %v4987_v50  ;;  %v1877_v60 = vsel %vm8794_vm13, %v8793_v56, %v4993_v47  ;;  %vm8796_vm14 = vmmov %vm8788_vm6  ;;  %v8801_v47 = vld [vmem:[#allocation80_spill] sm:$0xff] }
 0x234   : > { %v5001_v25 = vpop.permute.xlu1 %5000  ;;  %v7441_v61 = vsel %vm8788_vm6, %v1875_v33, %v4998_v55  ;;  %v7444_v57 = vsel %vm8796_vm14, %v1874_v46, %v4997_v35  ;;  %vm8799_vm12 = vmmov %vm8788_vm6 }
 0x235   : > { %v1876_v5 = vsel %vm8795_vm11, %v1394_v2, %v4992_v52  ;;  %v5003_v50 = vunpack.i.h.bf16 %v5001_v25  ;;  %v5002_v62 = vunpack.i.l.bf16 %v5001_v25  ;;  %vm8800_vm13 = vmmov %vm8788_vm6  ;;  %v5006_v55 = vpop.permute.xlu0 %5005 }
 0x236   : > { %5255 = vrot.lane.b32.xlu0 %v8791_v59, %s5768_s8  ;;  %v5008_v33 = vunpack.i.h.bf16 %v5006_v55  ;;  %v5007_v52 = vunpack.i.l.bf16 %v5006_v55  ;;  %vm8802_vm6 = vmmov %vm8795_vm11 }
 0x237   : > { %5260 = vrot.lane.b32.xlu1 %v8792_v17, %s5769_s23  ;;  %v8798_v17 = vld [vmem:[#allocation72_spill] sm:$0xff]  ;;  %v7453_v54 = vsel %vm8799_vm12, %v1876_v5, %v5002_v62  ;;  %v7456_v25 = vsel %vm8800_vm13, %v1877_v60, %v5003_v50  ;;  %v1398_v50 = vsel %vm7297_vm2, 0.0, %v8755_v30  ;;  %v8803_v62 = vld [vmem:[#allocation90_spill] sm:$0xff]  ;;  %vm8804_vm14 = vmmov %vm8802_vm6 }
 0x238   : > { %v5011_v2 = vpop.permute.xlu1 %5010  ;;  %v7465_v5 = vsel %vm8795_vm11, %v8801_v47, %v5008_v33  ;;  %vm8805_vm12 = vmmov %vm8802_vm6 }
 0x239   : > { %v5013_v35 = vunpack.i.h.bf16 %v5011_v2  ;;  %v5016_v33 = vpop.permute.xlu0 %5015  ;;  %vm8806_vm11 = vmmov %vm8800_vm13 }
 0x23a   : > { %5265 = vrot.lane.b32.xlu0 %v8797_v29, %s5769_s23  ;;  %v1400_v29 = vsel %vm7307_vm0, 0.0, %v8762_v39  ;;  %v5018_v46 = vunpack.i.h.bf16 %v5016_v33  ;;  %v5017_v42 = vunpack.i.l.bf16 %v5016_v33  ;;  %v8810_v33 = vld [vmem:[#allocation52_spill] sm:$0xff] }
 0x23b   : > { %5270 = vrot.lane.b32.xlu1 %v8798_v17, %s5769_s23  ;;  %v5012_v17 = vunpack.i.l.bf16 %v5011_v2  ;;  %v7468_v60 = vsel %vm8802_vm6, %v1400_v29, %v5007_v52  ;;  %v1881_v55 = vsel %vm8804_vm14, %v8803_v62, %v5013_v35  ;;  %vm8808_vm6 = vmmov %vm8806_vm11 }
 0x23c   : > { %v5021_v52 = vpop.permute.xlu1 %5020  ;;  %v7481_v32 = vsel %vm8800_vm13, %v1878_v49, %v5017_v42  ;;  %v7484_v39 = vsel %vm8806_vm11, %v1879_v41, %v5018_v46  ;;  %vm8809_vm14 = vmmov %vm8808_vm6 }
 0x23d   : > { %v1880_v2 = vsel %vm8805_vm12, %v1398_v50, %v5012_v17  ;;  %v5023_v29 = vunpack.i.h.bf16 %v5021_v52  ;;  %v5022_v47 = vunpack.i.l.bf16 %v5021_v52  ;;  %v1402_v50 = vsel %vm7311_vm10, 0.0, %v6945_v43  ;;  %vm8811_vm13 = vmmov %vm8805_vm12 }
 0x23e   : > { %5275 = vrot.lane.b32.xlu0 %v8791_v59, %s5768_s8  ;;  %v8807_v59 = vld [vmem:[#allocation46_spill] sm:$0xff]  ;;  %vm8812_vm11 = vmmov %vm8805_vm12 }
 0x23f   : > { %5280 = vrot.lane.b32.xlu1 %v6949_v14, %s5769_s23  ;;  %v7493_v35 = vsel %vm8808_vm6, %v1880_v2, %v5022_v47  ;;  %v7496_v17 = vsel %vm8809_vm14, %v1881_v55, %v5023_v29  ;;  %vm8813_vm6 = vmmov %vm8812_vm11 }
 0x240   : > { %v5026_v41 = vpop.permute.xlu1 %5025 }
 0x241   : > { %v5028_v49 = vunpack.i.h.bf16 %v5026_v41  ;;  %v5027_v46 = vunpack.i.l.bf16 %v5026_v41 }
 0x242   : > { %5290 = vrot.lane.b32.xlu0 %v8807_v59, %s5768_s8 }
 0x243   : > { %5285 = vrot.lane.b32.xlu1 %v8807_v59, %s5768_s8  ;;  %v7509_v47 = vsel %vm8805_vm12, %v6958_v13, %v5028_v49  ;;  %v7512_v55 = vsel %vm8811_vm13, %v1402_v50, %v5027_v46  ;;  %vm8814_vm12 = vmmov %vm8809_vm14  ;;  %vm8480_vm13 = vcmask 195584  }
 0x245   : > { %v5031_v2 = vpop.permute.xlu0 %5030 }
 0x246   : > { %5300 = vrot.lane.b32.xlu0 %v8810_v33, %s5768_s8  ;;  %v5032_v14 = vunpack.i.l.bf16 %v5031_v2 }
 0x247   : > { %5295 = vrot.lane.b32.xlu1 %v6961_v22, %s5769_s23 }
 0x24a   : > { %5310 = vrot.lane.b32.xlu0 %v6970_v44, %s5769_s23  ;;  %v5036_v22 = vpop.permute.xlu0 %5035  ;;  %v2033_v44 = vsel %vm7081_vm4, 0.0, %v7035_v8 }
 0x24b   : > { %5305 = vrot.lane.b32.xlu1 %v6973_v15, %s5769_s23  ;;  %v5038_v52 = vunpack.i.h.bf16 %v5036_v22  ;;  %v5037_v29 = vunpack.i.l.bf16 %v5036_v22  ;;  %v5041_v59 = vpop.permute.xlu1 %5040 }
 0x24c   : > { %v5043_v41 = vunpack.i.h.bf16 %v5041_v59  ;;  %v5042_v49 = vunpack.i.l.bf16 %v5041_v59 }
 0x24d   : > { %v2417_v15 = vsel %vm8812_vm11, %v2033_v44, %v5037_v29  ;;  %vm8815_vm11 = vmmov %vm8813_vm6 }
 0x24e   : > { %5320 = vrot.lane.b32.xlu0 %v8810_v33, %s5768_s8  ;;  %v2449_v46 = vsel %vm8809_vm14, %v2417_v15, %v5042_v49  ;;  %v5033_v33 = vunpack.i.h.bf16 %v5031_v2  ;;  %v2037_v2 = vsel %vm7055_vm5, 0.0, %v7001_v16  ;;  %vm8817_vm14 = vmmov %vm8813_vm6 }
 0x24f   : > { %5315 = vrot.lane.b32.xlu1 %v6992_v38, %s5769_s23  ;;  %v2418_v38 = vsel %vm8813_vm6, %v7029_v0, %v5038_v52  ;;  %v5051_v22 = vpop.permute.xlu0 %5050  ;;  %v5046_v59 = vpop.permute.xlu1 %5045 }
 0x250   : > { %v2450_v50 = vsel %vm8814_vm12, %v2418_v38, %v5043_v41  ;;  %v5053_v23 = vunpack.i.h.bf16 %v5051_v22  ;;  %v5052_v43 = vunpack.i.l.bf16 %v5051_v22  ;;  %v2420_v52 = vsel %vm8815_vm11, %v6985_v24, %v5033_v33  ;;  %vm8818_vm12 = vmmov %vm8813_vm6 }
 0x251   : > { %v2473_v42 = vpack.c.bf16 %v2450_v50, %v2449_v46  ;;  %v8819_v50 = vld [vmem:[#allocation43_spill] sm:$0xff]  ;;  %vm8820_vm11 = vcmask 130048  }
 0x252   : > { %5330 = vrot.lane.b32.xlu0 %v6497_v12, %s5768_s8  ;;  %v2421_v46 = vsel %vm8818_vm12, %v2037_v2, %v5052_v43  ;;  %vm8822_vm10 = vmmov %vm8820_vm11  ;;  %v5443_v43 = vld [vmem:[#allocation8 + $0x8] ss:$0 sps:$4 sm:$0xff]   ;;  %v5047_v2 = vunpack.i.l.bf16 %v5046_v59 }
 0x253   : > { %5325 = vrot.lane.b32.xlu1 %v6497_v12, %s5768_s8  ;;  %4649 = vmatprep.mubr.msk.bf16.mxu1 %vm8480_vm13, %v2473_v42  ;;  %v2035_v12 = vsel %vm7044_vm7, 0.0, %v6989_v36  ;;  %v5056_v41 = vpop.permute.xlu1 %5055  ;;  %v8816_v42 = vld [vmem:[#allocation96_spill] sm:$0xff]  ;;  %vm8821_vm13 = vmmov %vm8820_vm11 }
 0x254   : > { %v5061_v29 = vpop.permute.xlu0 %5060  ;;  %v5058_v44 = vunpack.i.h.bf16 %v5056_v41  ;;  %v5057_v15 = vunpack.i.l.bf16 %v5056_v41  ;;  %v2422_v38 = vsel %vm8817_vm14, %v8816_v42, %v5053_v23  ;;  %vm8823_vm0 = vmmov %vm8822_vm10 }
 0x255   : > { %v5063_v49 = vunpack.i.h.bf16 %v5061_v29 }
 0x256   : > { %5340 = vrot.lane.b32.xlu0 %v8652_v19, %s5768_s8  ;;  %v5062_v19 = vunpack.i.l.bf16 %v5061_v29  ;;  %v2452_v29 = vsel %vm8822_vm10, %v2420_v52, %v5058_v44  ;;  %v8825_v52 = vld [vmem:[#allocation97_spill] sm:$0xff] }
 0x257   : > { %5335 = vrot.lane.b32.xlu1 %v7025_v34, %s5769_s23  ;;  %v2419_v34 = vsel %vm8813_vm6, %v2035_v12, %v5032_v14  ;;  %v2454_v22 = vsel %vm8821_vm13, %v2422_v38, %v5063_v49  ;;  %v5048_v14 = vunpack.i.h.bf16 %v5046_v59  ;;  %v5066_v30 = vpop.permute.xlu1 %5065  ;;  %vm8824_vm13 = vcmask 195584   ;;  %v7576_v38 = vld [vmem:[#allocation8 + $0x18] sm:$0xff]  }
 0x258   : > { %v2453_v33 = vsel %vm8820_vm11, %v2421_v46, %v5062_v19  ;;  %v2451_v41 = vsel %vm8823_vm0, %v2419_v34, %v5057_v15  ;;  %v5071_v23 = vpop.permute.xlu0 %5070  ;;  %vm8826_vm0 = vmmov %vm8813_vm6  ;;  %v2041_v59 = vsel %vm7097_vm8, 0.0, %v7093_v6  ;;  %vm8828_vm6 = vcmask 1043456  }
 0x259   : > { %v2475_v12 = vpack.c.bf16 %v2454_v22, %v2453_v33  ;;  %v2474_v13 = vpack.c.bf16 %v2452_v29, %v2451_v41  ;;  %v5073_v62 = vunpack.i.h.bf16 %v5071_v23  ;;  %v2424_v49 = vsel %vm8826_vm0, %v8825_v52, %v5048_v14  ;;  %vm8827_vm10 = vmmov %vm8824_vm13  ;;  %v8831_v33 = vld [vmem:[#allocation55_spill] sm:$0xff]  ;;  %v8834_v29 = vld [vmem:[#allocation62_spill] sm:$0xff] }
 0x25a   : > { %5350 = vrot.lane.b32.xlu0 %v8819_v50, %s5769_s23  ;;  %v5072_v50 = vunpack.i.l.bf16 %v5071_v23  ;;  %vm8829_vm14 = vmmov %vm8828_vm6 }
 0x25b   : > { %5345 = vrot.lane.b32.xlu1 %v7086_v40, %s5769_s23  ;;  %4650 = vmatmul.mubr.msk.bf16.vlgmr.msra.gmra.mrb[0].mxu1 %vm8824_vm13, %v2474_v13  ;;  %v2039_v40 = vsel %vm7075_vm1, 0.0, %v7021_v26  ;;  %vm8830_vm12 = vmmov %vm8826_vm0 }
 0x25c   : > { %4666 = vmatpush3.bf16.msra.mxu1 %v7051_v37  ;;  %4653 = vmatprep.mubr.msk.bf16.mxu1 %vm8827_vm10, %v2475_v12  ;;  %v2423_v46 = vsel %vm8830_vm12, %v2039_v40, %v5047_v2  ;;  %vm8832_vm11 = vmmov %vm8826_vm0  ;;  %vm8839_vm12 = vcmask 195584  }
 0x25d   : > { %v5076_v19 = vpop.permute.xlu1 %5075  ;;  %4841 = vmatprep.subr.msk.bf16.mxu1 %vm8829_vm14, %v5443_v43  ;;  %v2426_v22 = vsel %vm8832_vm11, %v8831_v33, %v5073_v62  ;;  %vm8833_vm13 = vmmov %vm8826_vm0  ;;  %vm8835_vm0 = vcmask 130048   ;;  %vm8840_vm11 = vnez %v8685_v3 }
 0x25e   : > { %5360 = vrot.lane.b32.xlu0 %v8678_v4, %s5768_s8  ;;  %v5081_v4 = vpop.permute.xlu0 %5080  ;;  %v5078_v15 = vunpack.i.h.bf16 %v5076_v19  ;;  %v5077_v34 = vunpack.i.l.bf16 %v5076_v19  ;;  %v2425_v37 = vsel %vm8833_vm13, %v2041_v59, %v5072_v50  ;;  %vm8836_vm10 = vmmov %vm8835_vm0  ;;  %v5067_v50 = vunpack.i.l.bf16 %v5066_v30 }
 0x25f   : > { %5355 = vrot.lane.b32.xlu1 %v7121_v21, %s5769_s23  ;;  %v2766_v21 = vsel %vm8828_vm6, %v5443_v43, 0  ;;  %v5083_v13 = vunpack.i.h.bf16 %v5081_v4  ;;  %v5082_v44 = vunpack.i.l.bf16 %v5081_v4  ;;  %vm8837_vm6 = vmmov %vm8835_vm0  ;;  %v5068_v43 = vunpack.i.h.bf16 %v5066_v30 }
 0x260   : > { %v2455_v12 = vsel %vm8837_vm6, %v2423_v46, %v5077_v34  ;;  %vm8838_vm14 = vmmov %vm8835_vm0  ;;  %4668 = vmatpush3.bf16.msra.mxu1 %v2766_v21 }
 0x261   : > { %v2457_v41 = vsel %vm8835_vm0, %v2425_v37, %v5082_v44  ;;  %v2458_v14 = vsel %vm8836_vm10, %v2426_v22, %v5083_v13  ;;  %v2456_v23 = vsel %vm8838_vm14, %v2424_v49, %v5078_v15  ;;  %v5086_v4 = vpop.permute.xlu1 %5085  ;;  %4701 = vmatprep.subr.bf16.mxu1 %v7576_v38  ;;  %v8841_v49 = vld [vmem:[#allocation68_spill] sm:$0xff]  ;;  %vm8842_vm0 = vnez %v8695_v9  ;;  %vm8843_vm10 = vmmov %vm8839_vm12 }
 0x262   : > { %5370 = vrot.lane.b32.xlu0 %v8834_v29, %s5769_s23  ;;  %v2477_v2 = vpack.c.bf16 %v2458_v14, %v2457_v41  ;;  %v2476_v40 = vpack.c.bf16 %v2456_v23, %v2455_v12  ;;  %v5091_v62 = vpop.permute.xlu0 %5090  ;;  %v2428_v21 = vsel %vm8833_vm13, %v8841_v49, %v5068_v43  ;;  %v2045_v30 = vsel %vm8842_vm0, 0.0, %v7160_v18  ;;  %vm8844_vm6 = vmmov %vm8833_vm13  ;;  %v8847_v29 = vld [vmem:[#allocation79_spill] sm:$0xff]  ;;  %v8848_v41 = vld [vmem:[#allocation84_spill] sm:$0xff] }
 0x263   : > { %5365 = vrot.lane.b32.xlu1 %v8701_v27, %s5768_s8  ;;  %v5093_v59 = vunpack.i.h.bf16 %v5091_v62  ;;  %v5092_v19 = vunpack.i.l.bf16 %v5091_v62  ;;  %v2043_v27 = vsel %vm8840_vm11, 0.0, %v7117_v7  ;;  %vm8845_vm14 = vmmov %vm8844_vm6  ;;  %vm8849_vm13 = vcmask 130048   ;;  %v9094_v9 = vld [vmem:[#allocation48_spill] sm:$0xff] }
 0x264   : > { %4654 = vmatmul.mubr.msk.bf16.gmra.mrb[4].mxu1 %vm8839_vm12, %v2476_v40  ;;  %v2427_v46 = vsel %vm8844_vm6, %v2043_v27, %v5067_v50  ;;  %vm8846_vm12 = vmmov %vm8844_vm6  ;;  %vm8856_vm6 = vcmask 195584  }
 0x265   : > { %4657 = vmatprep.mubr.msk.bf16.mxu1 %vm8843_vm10, %v2477_v2  ;;  %v2430_v22 = vsel %vm8845_vm14, %v7156_v20, %v5093_v59  ;;  %v2429_v37 = vsel %vm8846_vm12, %v2045_v30, %v5092_v19  ;;  %vm8850_vm10 = vmmov %vm8849_vm13  ;;  %v5088_v59 = vunpack.i.h.bf16 %v5086_v4  ;;  %v5087_v19 = vunpack.i.l.bf16 %v5086_v4  ;;  %v8857_v4 = vld [vmem:[#allocation30_spill] sm:$0xff] }
 0x266   : > { %5380 = vrot.lane.b32.xlu0 %v8715_v28, %s5768_s8  ;;  %v5096_v28 = vpop.permute.xlu1 %5095  ;;  %vm8851_vm2 = vmmov %vm8850_vm10 }
 0x267   : > { %5375 = vrot.lane.b32.xlu1 %v7163_v53, %s5769_s23  ;;  %v5106_v13 = vpop.permute.xlu0 %5105  ;;  %v5098_v53 = vunpack.i.h.bf16 %v5096_v28  ;;  %v5097_v34 = vunpack.i.l.bf16 %v5096_v28  ;;  %vm8852_vm15 = vmmov %vm8851_vm2 }
 0x268   : > { %v5108_v44 = vunpack.i.h.bf16 %v5106_v13  ;;  %v5107_v15 = vunpack.i.l.bf16 %v5106_v13  ;;  %vm8860_vm12 = vmmov %vm8856_vm6 }
 0x269   : > { %v2459_v23 = vsel %vm8851_vm2, %v2427_v46, %v5097_v34  ;;  %v2460_v43 = vsel %vm8852_vm15, %v2428_v21, %v5098_v53  ;;  %vm8855_vm15 = vmmov %vm8851_vm2  ;;  %v8858_v53 = vld [vmem:[#allocation63_spill] sm:$0xff] }
 0x26a   : > { %5390 = vrot.lane.b32.xlu0 %v8847_v29, %s5769_s23  ;;  %v2461_v14 = vsel %vm8849_vm13, %v2429_v37, %v5107_v15  ;;  %v2462_v12 = vsel %vm8850_vm10, %v2430_v22, %v5108_v44  ;;  %v2478_v40 = vpack.c.bf16 %v2460_v43, %v2459_v23  ;;  %v5101_v50 = vpop.permute.xlu1 %5100  ;;  %v8853_v29 = vld [vmem:[#allocation83_spill] sm:$0xff]  ;;  %v8854_v15 = vld [vmem:[#allocation65_spill] sm:$0xff]  ;;  %vm8859_vm14 = vnez %v8858_v53 }
 0x26b   : > { %5385 = vrot.lane.b32.xlu1 %v8848_v41, %s5768_s8  ;;  %v2479_v2 = vpack.c.bf16 %v2462_v12, %v2461_v14  ;;  %v5111_v62 = vpop.permute.xlu0 %5110  ;;  %v5103_v13 = vunpack.i.h.bf16 %v5101_v50  ;;  %v5102_v28 = vunpack.i.l.bf16 %v5101_v50  ;;  %v2047_v34 = vsel %vm8859_vm14, 0.0, %v8857_v4  ;;  %v8861_v41 = vld [vmem:[#allocation56_spill] sm:$0xff]  ;;  %v8865_v50 = vld [vmem:[#allocation75_spill] sm:$0xff] }
 0x26c   : > { %v5113_v27 = vunpack.i.h.bf16 %v5111_v62  ;;  %v5112_v30 = vunpack.i.l.bf16 %v5111_v62  ;;  %4658 = vmatmul.mubr.msk.bf16.gmra.mrb[8].mxu1 %vm8856_vm6, %v2478_v40  ;;  %vm8862_vm13 = vcmask 64512   ;;  %vm8867_vm6 = vmmov %vm8851_vm2 }
 0x26d   : > { %4661 = vmatprep.mubr.msk.bf16.mxu1 %vm8860_vm12, %v2479_v2  ;;  %vm8863_vm10 = vmmov %vm8862_vm13  ;;  %v8866_v2 = vld [vmem:[#allocation93_spill] sm:$0xff] }
 0x26e   : > { %5400 = vrot.lane.b32.xlu0 %v8853_v29, %s5768_s8  ;;  %v7623_v44 = vsel %vm8851_vm2, %v7468_v60, %v5112_v30  ;;  %v7627_v21 = vsel %vm8855_vm15, %v7465_v5, %v5113_v27  ;;  %v5116_v37 = vpop.permute.xlu1 %5115  ;;  %v2432_v60 = vsel %vm8862_vm13, %v8861_v41, %v5088_v59  ;;  %v2431_v14 = vsel %vm8863_vm10, %v2047_v34, %v5087_v19  ;;  %vm8864_vm15 = vmmov %vm8851_vm2  ;;  %v8869_v34 = vld [vmem:[#allocation50_spill] sm:$0xff] }
 0x26f   : > { %5395 = vrot.lane.b32.xlu1 %v8854_v15, %s5769_s23  ;;  %v1940_v46 = vpack.c.bf16 %v7627_v21, %v7623_v44  ;;  %v5121_v22 = vpop.permute.xlu0 %5120  ;;  %v5118_v5 = vunpack.i.h.bf16 %v5116_v37  ;;  %v5117_v12 = vunpack.i.l.bf16 %v5116_v37  ;;  %v2463_v23 = vsel %vm8851_vm2, %v2431_v14, %v5102_v28  ;;  %vm8868_vm12 = vmmov %vm8851_vm2  ;;  %v8871_v37 = vld [vmem:[#allocation66_spill] sm:$0xff]  ;;  %v8874_v14 = vld [vmem:[#allocation64_spill] sm:$0xff] }
 0x270   : > { %v2464_v43 = vsel %vm8864_vm15, %v2432_v60, %v5103_v13  ;;  %v5123_v40 = vunpack.i.h.bf16 %v5121_v22  ;;  %v5122_v62 = vunpack.i.l.bf16 %v5121_v22  ;;  %vm8870_vm13 = vmmov %vm8863_vm10  ;;  %v8905_v44 = vsel %vm7055_vm5, 0.0, %v6989_v36 }
 0x271   : > { %v7647_v27 = vsel %vm8867_vm6, %v7512_v55, %v5117_v12  ;;  %v7651_v59 = vsel %vm8868_vm12, %v7509_v47, %v5118_v5  ;;  %v2480_v28 = vpack.c.bf16 %v2464_v43, %v2463_v23  ;;  %v8872_v55 = vsel %vm7081_vm4, 0.0, %v8871_v37  ;;  %v8873_v47 = vld [vmem:[#allocation91_spill] sm:$0xff]  ;;  %v8877_v23 = vld [vmem:[#allocation20_spill] sm:$0xff]  ;;  %vm8879_vm15 = vmmov %vm8867_vm6 }
 0x272   : > { %5410 = vrot.lane.b32.xlu0 %v8865_v50, %s5769_s23  ;;  %v5126_v13 = vpop.permute.xlu1 %5125  ;;  %v1887_v22 = vsel %vm8870_vm13, %v8869_v34, %v5123_v40  ;;  %v1886_v60 = vsel %vm8863_vm10, %v8872_v55, %v5122_v62  ;;  %v8875_v5 = vld [vmem:[#allocation31_spill] sm:$0xff]  ;;  %vm8878_vm2 = vcmp.lt.s32.totalorder %v8877_v23, 7  ;;  %vm8880_vm12 = vcmask 195584  }
 0x273   : > { %5405 = vrot.lane.b32.xlu1 %v8866_v2, %s5768_s8  ;;  %v5131_v30 = vpop.permute.xlu0 %5130  ;;  %v8876_v12 = vld [vmem:[#allocation23_spill] sm:$0xff]  ;;  %v8881_v2 = vpack.c.bf16 %v7404_v51, %v7408_v11  ;;  %vm8882_vm13 = vmmov %vm8880_vm12  ;;  %v8887_v51 = vpack.c.bf16 %v7420_v31, %v7417_v58  ;;  %v8889_v11 = vpack.c.bf16 %v7441_v61, %v7444_v57  ;;  %v8893_v31 = vpack.c.bf16 %v7456_v25, %v7453_v54 }
 0x274   : > { %v5133_v29 = vunpack.i.h.bf16 %v5131_v30  ;;  %v5132_v15 = vunpack.i.l.bf16 %v5131_v30  ;;  %v3216_v43 = vsel %vm8878_vm2, %v8876_v12, %v8875_v5  ;;  %4662 = vmatmul.mubr.msk.bf16.gmra.mrb[12].mxu1 %vm8880_vm12, %v2480_v28  ;;  %v5445_v5 = vld [vmem:[#allocation8 + $0x20] ss:$0 sps:$4 sm:$0xff]   ;;  %vm8888_vm2 = vmmov %vm8880_vm12  ;;  %v8895_v57 = vpack.c.bf16 %v7484_v39, %v7481_v32 }
 0x275   : > { %4669 = vmatprep.mubr.msk.bf16.mxu1 %vm8882_vm13, %v8881_v2  ;;  %vm8894_vm13 = vmmov %vm8888_vm2  ;;  %v8899_v39 = vsel %vm7044_vm7, 0.0, %v7035_v8 }
 0x276   : > { %5415 = vrot.lane.b32.xlu0 %v8873_v47, %s5768_s8  ;;  %v7671_v50 = vsel %vm8879_vm15, %v1886_v60, %v5132_v15  ;;  %v7674_v40 = vsel %vm8867_vm6, %v1887_v22, %v5133_v29  ;;  %v8883_v47 = vld [vmem:[#allocation86_spill] sm:$0xff]  ;;  %v8885_v15 = vld [vmem:[#allocation60_spill] sm:$0xff]  ;;  %v8886_v29 = vmov 0.0   ;;  %vm8890_vm15 = vmmov %vm8888_vm2  ;;  %vm8891_vm6 = vcmask 1043456  }
 0x277   : > { %5420 = vrot.lane.b32.xlu1 %v8874_v14, %s5769_s23  ;;  %v5141_v30 = vpop.permute.xlu0 %5140  ;;  %v5136_v55 = vpop.permute.xlu1 %5135  ;;  %vm8884_vm10 = vnez %v8883_v47  ;;  %vm8892_vm12 = vmmov %vm8891_vm6  ;;  %v5128_v47 = vunpack.i.h.bf16 %v5126_v13 }
 0x278   : > { %v3248_v14 = vsel %vm8884_vm10, 0.0, %v3216_v43  ;;  %vm8896_vm10 = vmmov %vm8888_vm2  ;;  %v5143_v54 = vunpack.i.h.bf16 %v5141_v30  ;;  %v5142_v25 = vunpack.i.l.bf16 %v5141_v30 }
 0x279   : > { %v5434_v60 = vpack.i.bf16 %v3248_v14, %v8876_v12  ;;  %v3647_v12 = vsel %vm8892_vm12, %v5445_v5, 0  ;;  %v5127_v14 = vunpack.i.l.bf16 %v5126_v13  ;;  %vm8901_vm12 = vmmov %vm8888_vm2 }
 0x27a   : > { %5430 = vrot.lane.b32.xlu0 %v8885_v15, %s5769_s23 }
 0x27b   : > { %5425 = vrot.lane.b32.xlu1 %v8886_v29, %s5768_s8 }
 0x27c   : > { %v5151_v28 = vpop.permute.xlu0 %5150  ;;  %4670 = vmatmul.mubr.msk.bf16.vlgmr.msra.gmra.mrb[16].mxu1 %vm8888_vm2, %v8887_v51  ;;  %v8897_v51 = vpack.c.bf16 %v7496_v17, %v7493_v35 }
 0x27d   : > { %v5146_v22 = vpop.permute.xlu1 %5145  ;;  %4702 = vmatpush3.bf16.msra.mxu1 %v7576_v38  ;;  %4673 = vmatprep.mubr.msk.bf16.mxu1 %vm8890_vm15, %v8889_v11  ;;  %vm8898_vm15 = vcmask 64512   ;;  %v5153_v11 = vunpack.i.h.bf16 %v5151_v28 }
 0x27e   : > { %4842 = vmatprep.subr.msk.bf16.mxu1 %vm8891_vm6, %v5445_v5  ;;  %v5137_v5 = vunpack.i.l.bf16 %v5136_v55  ;;  %v1889_v32 = vsel %vm8898_vm15, %v7029_v0, %v5128_v47  ;;  %vm8900_vm6 = vmmov %vm8898_vm15 }
 0x27f   : > { %5435 = vrot.lane.b32.xlu1 %v5434_v60, %s5769_s23  ;;  %v5138_v60 = vunpack.i.h.bf16 %v5136_v55  ;;  %v1888_v13 = vsel %vm8900_vm6, %v8899_v39, %v5127_v14  ;;  %v8911_v39 = vld [vmem:[#allocation76_spill] sm:$0xff] }
 0x280   : > { %v7700_v23 = vpop.permute.xlu0 %5160 }
 0x281   : > { %v7702_v43 = vpop.permute.xlu1 %5155  ;;  %4704 = vmatpush3.bf16.msra.mxu1 %v3647_v12  ;;  %v5152_v12 = vunpack.i.l.bf16 %v5151_v28 }
 0x284   : > { %v7706_v2 = vpop.permute.xlu0 %5170  ;;  %4674 = vmatmul.mubr.msk.bf16.gmra.mrb[20].mxu1 %vm8894_vm13, %v8893_v31  ;;  %vm8902_vm13 = vcmask 130048   ;;  %v5148_v31 = vunpack.i.h.bf16 %v5146_v22 }
 0x285   : > { %v7708_v58 = vpop.permute.xlu1 %5165  ;;  %4677 = vmatprep.mubr.msk.bf16.mxu1 %vm8896_vm10, %v8895_v57  ;;  %v7742_v17 = vsel %vm8902_vm13, %v1888_v13, %v5137_v5  ;;  %vm8903_vm10 = vmmov %vm8902_vm13  ;;  %v5147_v57 = vunpack.i.l.bf16 %v5146_v22  ;;  %v8912_v13 = vld [vmem:[#allocation87_spill] sm:$0xff] }
 0x286   : > { %v7745_v55 = vsel %vm8903_vm10, %v1889_v32, %v5138_v60  ;;  %vm8913_vm13 = vnez %v8912_v13 }
 0x287   : > { %v1943_v60 = vpack.c.bf16 %v7745_v55, %v7742_v17  ;;  %v8915_v17 = vsel %vm7075_vm1, 0.0, %v7001_v16  ;;  %v8917_v55 = vld [vmem:[#allocation38_spill] sm:$0xff] }
 0x288   : > { %v7718_v61 = vpop.permute.xlu0 %5180 }
 0x289   : > { %v7720_v38 = vpop.permute.xlu1 %5175 }
 0x28c   : > { %v7722_v15 = vpop.permute.xlu0 %5190  ;;  %4678 = vmatmul.mubr.msk.bf16.gmra.mrb[24].mxu1 %vm8888_vm2, %v8897_v51  ;;  %vm8904_vm2 = vmmov %vm8900_vm6 }
 0x28d   : > { %v7724_v29 = vpop.permute.xlu1 %5185  ;;  %4681 = vmatprep.mubr.msk.bf16.mxu1 %vm8901_vm12, %v1940_v46  ;;  %v1891_v28 = vsel %vm8904_vm2, %v6985_v24, %v5143_v54  ;;  %vm8906_vm15 = vmmov %vm8904_vm2  ;;  %v8907_v46 = vld [vmem:[#allocation37_spill] sm:$0xff]  ;;  %v2017_v54 = vsel %vm8913_vm13, 0.0, %v8911_v39 }
 0x28e   : > { %v1890_v21 = vsel %vm8906_vm15, %v8905_v44, %v5142_v25  ;;  %v2019_v5 = vsel %vm7253_vm3, 0.0, %v8907_v46  ;;  %vm8909_vm6 = vmmov %vm8903_vm10 }
 0x28f   : > { %v1922_v22 = vsel %vm8909_vm6, %v1890_v21, %v5152_v12  ;;  %vm8910_vm12 = vmmov %vm8909_vm6  ;;  %v1892_v12 = vsel %vm8904_vm2, %v8915_v17, %v5147_v57  ;;  %v5158_v21 = vunpack.i.h.bf16 %v7702_v43  ;;  %v5163_v57 = vunpack.i.h.bf16 %v7700_v23  ;;  %v8924_v17 = vld [vmem:[#allocation40_spill] sm:$0xff] }
 0x290   : > { %v5196_v30 = vpop.permute.xlu0 %5195  ;;  %v1923_v32 = vsel %vm8910_vm12, %v1891_v28, %v5153_v11  ;;  %vm8914_vm10 = vmmov %vm8904_vm2 }
 0x291   : > { %v5201_v35 = vpop.permute.xlu1 %5200  ;;  %v5198_v47 = vunpack.i.h.bf16 %v5196_v30  ;;  %v5197_v51 = vunpack.i.l.bf16 %v5196_v30  ;;  %v1893_v46 = vsel %vm8914_vm10, %v8816_v42, %v5148_v31  ;;  %vm8916_vm15 = vmmov %vm8904_vm2  ;;  %v8920_v31 = vpack.c.bf16 %v7651_v59, %v7647_v27  ;;  %v8926_v27 = vld [vmem:[#allocation53_spill] sm:$0xff] }
 0x292   : > { %v5203_v19 = vunpack.i.h.bf16 %v5201_v35  ;;  %v5202_v4 = vunpack.i.l.bf16 %v5201_v35  ;;  %vm8918_vm6 = vmmov %vm8904_vm2  ;;  %v5157_v35 = vunpack.i.l.bf16 %v7702_v43  ;;  %vm8921_vm10 = vcmask 195584  }
 0x293   : > { %v2401_v11 = vsel %vm8916_vm15, %v2017_v54, %v5197_v51  ;;  %v2402_v28 = vsel %vm8918_vm6, %v8917_v55, %v5198_v47  ;;  %vm8919_vm5 = vmmov %vm8910_vm12  ;;  %v1944_v41 = vpack.c.bf16 %v1923_v32, %v1922_v22  ;;  %v5162_v51 = vunpack.i.l.bf16 %v7700_v23 }
 0x294   : > { %v5206_v30 = vpop.permute.xlu0 %5205  ;;  %4682 = vmatmul.mubr.msk.bf16.gmra.mrb[28].mxu1 %vm8921_vm10, %v8920_v31  ;;  %v8922_v47 = vpack.c.bf16 %v7674_v40, %v7671_v50  ;;  %vm8923_vm2 = vmmov %vm8921_vm10  ;;  %v8927_v59 = vsel %vm8913_vm13, 0.0, %v8926_v27  ;;  %v1924_v50 = vsel %vm8910_vm12, %v1892_v12, %v5157_v35 }
 0x295   : > { %v5211_v62 = vpop.permute.xlu1 %5210  ;;  %v5208_v23 = vunpack.i.h.bf16 %v5206_v30  ;;  %v5207_v55 = vunpack.i.l.bf16 %v5206_v30  ;;  %vm8930_vm10 = vmmov %vm8910_vm12  ;;  %v5168_v30 = vunpack.i.h.bf16 %v7708_v58 }
 0x296   : > { %v5213_v25 = vunpack.i.h.bf16 %v5211_v62  ;;  %v5212_v44 = vunpack.i.l.bf16 %v5211_v62  ;;  %4685 = vmatprep.mubr.msk.bf16.mxu1 %vm8923_vm2, %v8922_v47  ;;  %v1925_v40 = vsel %vm8930_vm10, %v1893_v46, %v5158_v21 }
 0x298   : > { %v2433_v62 = vsel %vm8910_vm12, %v2401_v11, %v5212_v44  ;;  %v2434_v39 = vsel %vm8919_vm5, %v2402_v28, %v5213_v25  ;;  %v5216_v43 = vpop.permute.xlu0 %5215  ;;  %vm8925_vm5 = vmmov %vm8918_vm6 }
 0x299   : > { %v2465_v54 = vpack.c.bf16 %v2434_v39, %v2433_v62  ;;  %v5221_v44 = vpop.permute.xlu1 %5220  ;;  %v3506_v25 = vsel %vm8925_vm5, %v8924_v17, %v5203_v19  ;;  %vm8928_vm15 = vmmov %vm8925_vm5  ;;  %v5218_v28 = vunpack.i.h.bf16 %v5216_v43  ;;  %v5217_v62 = vunpack.i.l.bf16 %v5216_v43 }
 0x29a   : > { %v3505_v22 = vsel %vm8928_vm15, %v8927_v59, %v5202_v4  ;;  %v5223_v32 = vunpack.i.h.bf16 %v5221_v44  ;;  %v5222_v11 = vunpack.i.l.bf16 %v5221_v44  ;;  %vm8929_vm6 = vmmov %vm8923_vm2  ;;  %v5173_v4 = vunpack.i.h.bf16 %v7706_v2 }
 0x29b   : > { %4633 = vmatprep.mubr.msk.bf16.mxu0 %vm8929_vm6, %v2465_v54  ;;  %vm8931_vm2 = vmmov %vm8930_vm10  ;;  %v5172_v39 = vunpack.i.l.bf16 %v7706_v2  ;;  %v8936_v2 = vld [vmem:[#allocation58_spill] sm:$0xff] }
 0x29c   : > { %v7799_v19 = vsel %vm8931_vm2, %v3505_v22, %v5222_v11  ;;  %vm8932_vm5 = vmmov %vm8931_vm2  ;;  %v5226_v54 = vpop.permute.xlu0 %5225  ;;  %v8937_v27 = vsel %vm7253_vm3, 0.0, %v8936_v2 }
 0x29d   : > { %v7802_v13 = vsel %vm8932_vm5, %v3506_v25, %v5223_v32  ;;  %v5231_v47 = vpop.permute.xlu1 %5230  ;;  %v5228_v12 = vunpack.i.h.bf16 %v5226_v54  ;;  %v5227_v35 = vunpack.i.l.bf16 %v5226_v54  ;;  %vm8933_vm13 = vmmov %vm8928_vm15  ;;  %v8945_v54 = vsel %vm7097_vm8, 0.0, %v7021_v26 }
 0x29e   : > { %v3569_v31 = vpack.c.bf16 %v7802_v13, %v7799_v19  ;;  %v5233_v46 = vunpack.i.h.bf16 %v5231_v47  ;;  %v5232_v21 = vunpack.i.l.bf16 %v5231_v47  ;;  %v2404_v43 = vsel %vm8933_vm13, %v8924_v17, %v5208_v23  ;;  %vm8934_vm15 = vmmov %vm8933_vm13 }
 0x29f   : > { %v2403_v44 = vsel %vm8934_vm15, %v2019_v5, %v5207_v55  ;;  %vm8935_vm6 = vmmov %vm8933_vm13  ;;  %v2436_v32 = vsel %vm8931_vm2, %v2404_v43, %v5228_v12  ;;  %vm8942_vm13 = vcmask 195584   ;;  %v5167_v5 = vunpack.i.l.bf16 %v7708_v58  ;;  %v8947_v58 = vld [vmem:[#allocation85_spill] sm:$0xff] }
 0x2a0   : > { %v3508_v25 = vsel %vm8935_vm6, %v8793_v56, %v5218_v28  ;;  %vm8938_vm12 = vmmov %vm8935_vm6  ;;  %4686 = vmatmul.mubr.msk.bf16.gmra.mrb[0].mxu1 %vm8942_vm13, %v1943_v60  ;;  %v5236_v55 = vpop.permute.xlu0 %5235  ;;  %v1945_v60 = vpack.c.bf16 %v1925_v40, %v1924_v50  ;;  %v5177_v50 = vunpack.i.l.bf16 %v7720_v38  ;;  %v8952_v40 = vsel %vm8840_vm11, 0.0, %v7093_v6 }
 0x2a1   : > { %v3507_v59 = vsel %vm8938_vm12, %v8937_v27, %v5217_v62  ;;  %vm8939_vm10 = vmmov %vm8931_vm2  ;;  %v5241_v28 = vpop.permute.xlu1 %5240 }
 0x2a2   : > { %v2435_v22 = vsel %vm8939_vm10, %v2403_v44, %v5227_v35  ;;  %vm8940_vm5 = vmmov %vm8931_vm2  ;;  %v5178_v44 = vunpack.i.h.bf16 %v7720_v38  ;;  %v8956_v38 = vsel %vm8842_vm0, 0.0, %v7117_v7 }
 0x2a3   : > { %v7822_v11 = vsel %vm8940_vm5, %v3508_v25, %v5233_v46  ;;  %vm8941_vm1 = vmmov %vm8931_vm2  ;;  %v2466_v23 = vpack.c.bf16 %v2436_v32, %v2435_v22  ;;  %v5238_v46 = vunpack.i.h.bf16 %v5236_v55  ;;  %v5193_v25 = vunpack.i.h.bf16 %v7722_v15 }
 0x2a4   : > { %v7825_v17 = vsel %vm8941_vm1, %v3507_v59, %v5232_v21  ;;  %vm8943_vm3 = vmmov %vm8942_vm13  ;;  %v5237_v21 = vunpack.i.l.bf16 %v5236_v55  ;;  %v5243_v59 = vunpack.i.h.bf16 %v5241_v28 }
 0x2a5   : > { %v3570_v14 = vpack.c.bf16 %v7822_v11, %v7825_v17  ;;  %4689 = vmatprep.mubr.msk.bf16.mxu1 %vm8943_vm3, %v1944_v41  ;;  %vm8944_vm15 = vmmov %vm8935_vm6  ;;  %v5183_v41 = vunpack.i.h.bf16 %v7718_v61  ;;  %v5251_v27 = vpop.permute.xlu1 %5250 }
 0x2a6   : > { %v1895_v62 = vsel %vm8944_vm15, %v8825_v52, %v5163_v57  ;;  %vm8946_vm1 = vmmov %vm8935_vm6  ;;  %vm8948_vm6 = vnez %v8947_v58  ;;  %v5253_v22 = vunpack.i.h.bf16 %v5251_v27 }
 0x2a7   : > { %v1894_v47 = vsel %vm8946_vm1, %v8945_v54, %v5162_v51  ;;  %v2021_v12 = vsel %vm8948_vm6, 0.0, %v8936_v2  ;;  %vm8949_vm12 = vmmov %vm8931_vm2  ;;  %v1927_v57 = vsel %vm8931_vm2, %v1895_v62, %v5173_v4  ;;  %v5182_v51 = vunpack.i.l.bf16 %v7718_v61  ;;  %v5246_v4 = vpop.permute.xlu0 %5245 }
 0x2a8   : > { %v1926_v35 = vsel %vm8949_vm12, %v1894_v47, %v5172_v39  ;;  %vm8950_vm10 = vmmov %vm8943_vm3  ;;  %v5192_v2 = vunpack.i.l.bf16 %v7722_v15  ;;  %v5252_v61 = vunpack.i.l.bf16 %v5251_v27 }
 0x2a9   : > { %4634 = vmatmul.mubr.msk.bf16.vlgmr.msra.gmra.mrb[32].mxu0 %vm8950_vm10, %v2466_v23  ;;  %vm8951_vm5 = vmmov %vm8946_vm1  ;;  %v1946_v32 = vpack.c.bf16 %v1927_v57, %v1926_v35 }
 0x2aa   : > { %v1897_v43 = vsel %vm8951_vm5, %v8831_v33, %v5168_v30  ;;  %vm8953_vm13 = vmmov %vm8946_vm1  ;;  %v5242_v30 = vunpack.i.l.bf16 %v5241_v28 }
 0x2ab   : > { %v1896_v39 = vsel %vm8953_vm13, %v8952_v40, %v5167_v5  ;;  %vm8954_vm3 = vmmov %vm8946_vm1  ;;  %v2405_v5 = vsel %vm8946_vm1, %v2021_v12, %v5237_v21  ;;  %vm8960_vm13 = vcmask 195584   ;;  %v8965_v21 = vld [vmem:[#allocation54_spill] sm:$0xff] }
 0x2ac   : > { %v1899_v23 = vsel %vm8954_vm3, %v8841_v49, %v5183_v41  ;;  %vm8955_vm15 = vmmov %vm8946_vm1  ;;  %4690 = vmatmul.mubr.msk.bf16.gmra.mrb[4].mxu1 %vm8960_vm13, %v1945_v60  ;;  %v5256_v41 = vpop.permute.xlu0 %5255 }
 0x2ad   : > { %v2406_v55 = vsel %vm8955_vm15, %v8793_v56, %v5238_v46  ;;  %vm8957_vm12 = vmmov %vm8946_vm1  ;;  %v5261_v46 = vpop.permute.xlu1 %5260 }
 0x2ae   : > { %v1898_v15 = vsel %vm8957_vm12, %v8956_v38, %v5182_v51  ;;  %vm8958_vm10 = vmmov %vm8931_vm2  ;;  %v2438_v28 = vsel %vm8931_vm2, %v2406_v55, %v5253_v22  ;;  %v3510_v57 = vsel %vm8957_vm12, %v8965_v21, %v5243_v59  ;;  %v8966_v51 = vld [vmem:[#allocation51_spill] sm:$0xff]  ;;  %v5263_v40 = vunpack.i.h.bf16 %v5261_v46 }
 0x2af   : > { %v1928_v62 = vsel %vm8958_vm10, %v1896_v39, %v5177_v50  ;;  %vm8959_vm5 = vmmov %vm8931_vm2  ;;  %v8967_v50 = vsel %vm8948_vm6, 0.0, %v8966_v51  ;;  %v5248_v39 = vunpack.i.h.bf16 %v5246_v4 }
 0x2b0   : > { %v2437_v54 = vsel %vm8959_vm5, %v2405_v5, %v5252_v61  ;;  %vm8961_vm3 = vmmov %vm8931_vm2  ;;  %v2023_v61 = vsel %vm7277_vm9, 0.0, %v8966_v51  ;;  %v5266_v55 = vpop.permute.xlu0 %5265 }
 0x2b1   : > { %v1929_v47 = vsel %vm8961_vm3, %v1897_v43, %v5178_v44  ;;  %vm8962_vm11 = vmmov %vm8931_vm2  ;;  %v2467_v35 = vpack.c.bf16 %v2438_v28, %v2437_v54  ;;  %v5262_v43 = vunpack.i.l.bf16 %v5261_v46  ;;  %v5247_v44 = vunpack.i.l.bf16 %v5246_v4  ;;  %v5271_v5 = vpop.permute.xlu1 %5270 }
 0x2b2   : > { %v1930_v56 = vsel %vm8962_vm11, %v1898_v15, %v5192_v2  ;;  %vm8963_vm15 = vmmov %vm8931_vm2  ;;  %v5258_v2 = vunpack.i.h.bf16 %v5256_v41  ;;  %v1947_v27 = vpack.c.bf16 %v1929_v47, %v1928_v62  ;;  %v5187_v4 = vunpack.i.l.bf16 %v7724_v29 }
 0x2b3   : > { %v1931_v12 = vsel %vm8963_vm15, %v1899_v23, %v5193_v25  ;;  %vm8964_vm1 = vmmov %vm8960_vm13  ;;  %v5257_v25 = vunpack.i.l.bf16 %v5256_v41  ;;  %v5268_v38 = vunpack.i.h.bf16 %v5266_v55  ;;  %v5267_v15 = vunpack.i.l.bf16 %v5266_v55 }
 0x2b4   : > { %4693 = vmatprep.mubr.msk.bf16.mxu1 %vm8964_vm1, %v1946_v32  ;;  %vm8968_vm10 = vmmov %vm8957_vm12  ;;  %v5188_v32 = vunpack.i.h.bf16 %v7724_v29  ;;  %v5273_v62 = vunpack.i.h.bf16 %v5271_v5  ;;  %v5272_v28 = vunpack.i.l.bf16 %v5271_v5  ;;  %v8976_v29 = vld [vmem:[#allocation92_spill] sm:$0xff] }
 0x2b5   : > { %v3509_v60 = vsel %vm8968_vm10, %v8967_v50, %v5242_v30  ;;  %vm8969_vm11 = vmmov %vm8964_vm1  ;;  %v1948_v30 = vpack.c.bf16 %v1931_v12, %v1930_v56  ;;  %v8977_v12 = vsel %vm7277_vm9, 0.0, %v8976_v29 }
 0x2b6   : > { %4637 = vmatprep.mubr.msk.bf16.mxu0 %vm8969_vm11, %v2467_v35  ;;  %v7888_v59 = vsel %vm8931_vm2, %v3509_v60, %v5262_v43  ;;  %vm8971_vm5 = vmmov %vm8931_vm2  ;;  %v8974_v35 = vld [vmem:[#allocation90_spill] sm:$0xff]  ;;  %v5281_v43 = vpop.permute.xlu1 %5280 }
 0x2b7   : > { %v7891_v58 = vsel %vm8971_vm5, %v3510_v57, %v5263_v40  ;;  %vm8972_vm6 = vmmov %vm8968_vm10  ;;  %v5276_v40 = vpop.permute.xlu0 %5275 }
 0x2b8   : > { %v3571_v23 = vpack.c.bf16 %v7891_v58, %v7888_v59  ;;  %v2408_v54 = vsel %vm8972_vm6, %v8965_v21, %v5248_v39  ;;  %vm8973_vm13 = vmmov %vm8972_vm6  ;;  %v5283_v39 = vunpack.i.h.bf16 %v5281_v43 }
 0x2b9   : > { %v2407_v47 = vsel %vm8973_vm13, %v2023_v61, %v5247_v44  ;;  %vm8975_vm3 = vmmov %vm8972_vm6  ;;  %v5282_v44 = vunpack.i.l.bf16 %v5281_v43  ;;  %v8998_v43 = vld [vmem:[#allocation67_spill] sm:$0xff] }
 0x2ba   : > { %v3512_v56 = vsel %vm8975_vm3, %v8974_v35, %v5258_v2  ;;  %vm8978_vm15 = vmmov %vm8975_vm3  ;;  %v5286_v5 = vpop.permute.xlu1 %5285 }
 0x2bb   : > { %v3511_v41 = vsel %vm8978_vm15, %v8977_v12, %v5257_v25  ;;  %vm8979_vm1 = vmmov %vm8931_vm2  ;;  %vm8983_vm2 = vcmask 195584   ;;  %v8986_v25 = vsel %vm8859_vm14, 0.0, %v7160_v18  ;;  %v5291_v55 = vpop.permute.xlu0 %5290 }
 0x2bc   : > { %v2439_v46 = vsel %vm8979_vm1, %v2407_v47, %v5267_v15  ;;  %vm8980_vm12 = vmmov %vm8979_vm1  ;;  %4694 = vmatmul.mubr.msk.bf16.gmra.mrb[8].mxu1 %vm8983_vm2, %v1947_v27  ;;  %v5277_v15 = vunpack.i.l.bf16 %v5276_v40 }
 0x2bd   : > { %v2440_v57 = vsel %vm8980_vm12, %v2408_v54, %v5268_v38  ;;  %vm8981_vm10 = vmmov %vm8979_vm1  ;;  %v5278_v38 = vunpack.i.h.bf16 %v5276_v40  ;;  %v8993_v54 = vld [vmem:[#allocation77_spill] sm:$0xff]  ;;  %v8997_v40 = vld [vmem:[#allocation82_spill] sm:$0xff] }
 0x2be   : > { %v7910_v51 = vsel %vm8981_vm10, %v3512_v56, %v5273_v62  ;;  %vm8982_vm11 = vmmov %vm8979_vm1  ;;  %v2468_v50 = vpack.c.bf16 %v2440_v57, %v2439_v46  ;;  %v5292_v62 = vunpack.i.l.bf16 %v5291_v55  ;;  %vm8994_vm10 = vnez %v8993_v54 }
 0x2bf   : > { %v7913_v21 = vsel %vm8982_vm11, %v3511_v41, %v5272_v28  ;;  %vm8984_vm5 = vmmov %vm8983_vm2  ;;  %v5296_v28 = vpop.permute.xlu1 %5295  ;;  %v2025_v47 = vsel %vm8994_vm10, 0.0, %v8976_v29  ;;  %v5288_v57 = vunpack.i.h.bf16 %v5286_v5 }
 0x2c0   : > { %v3572_v60 = vpack.c.bf16 %v7910_v51, %v7913_v21  ;;  %4697 = vmatprep.mubr.msk.bf16.mxu1 %vm8984_vm5, %v1948_v30  ;;  %vm8985_vm9 = vmmov %vm8975_vm3  ;;  %v5298_v56 = vunpack.i.h.bf16 %v5296_v28  ;;  %v5297_v12 = vunpack.i.l.bf16 %v5296_v28  ;;  %vm8999_vm5 = vnez %v8998_v43 }
 0x2c1   : > { %v1901_v2 = vsel %vm8985_vm9, %v7156_v20, %v5188_v32  ;;  %vm8987_vm6 = vmmov %vm8975_vm3  ;;  %v5293_v32 = vunpack.i.h.bf16 %v5291_v55  ;;  %v2027_v19 = vsel %vm8999_vm5, 0.0, %v8997_v40 }
 0x2c2   : > { %v1900_v22 = vsel %vm8987_vm6, %v8986_v25, %v5187_v4  ;;  %vm8988_vm13 = vmmov %vm8983_vm2  ;;  %v5301_v4 = vpop.permute.xlu0 %5300 }
 0x2c3   : > { %4638 = vmatmul.mubr.msk.bf16.gmra.mrb[36].mxu0 %vm8988_vm13, %v2468_v50  ;;  %vm8989_vm3 = vmmov %vm8979_vm1  ;;  %v5287_v50 = vunpack.i.l.bf16 %v5286_v5  ;;  %v9006_v5 = vsel %vm8994_vm10, 0.0, %v8997_v40 }
 0x2c4   : > { %v1932_v27 = vsel %vm8989_vm3, %v1900_v22, %v5282_v44  ;;  %vm8990_vm15 = vmmov %vm8979_vm1 }
 0x2c5   : > { %v1933_v61 = vsel %vm8990_vm15, %v1901_v2, %v5283_v39  ;;  %vm8991_vm1 = vmmov %vm8983_vm2  ;;  %v9002_v39 = vld [vmem:[#allocation80_spill] sm:$0xff] }
 0x2c6   : > { %v1949_v30 = vpack.c.bf16 %v1933_v61, %v1932_v27  ;;  %vm8992_vm12 = vmmov %vm8991_vm1  ;;  %v5311_v25 = vpop.permute.xlu0 %5310 }
 0x2c7   : > { %vm8995_vm11 = vmmov %vm8987_vm6  ;;  %v5313_v22 = vunpack.i.h.bf16 %v5311_v25  ;;  %v5312_v27 = vunpack.i.l.bf16 %v5311_v25  ;;  %v9024_v25 = vld [vmem:[#allocation78_spill] sm:$0xff] }
 0x2c8   : > { %4698 = vmatmul.mubr.msk.bf16.gmra.mrb[12].mxu1 %vm8991_vm1, %v1949_v30  ;;  %v2410_v41 = vsel %vm8995_vm11, %v8974_v35, %v5278_v38  ;;  %vm8996_vm2 = vmmov %vm8987_vm6  ;;  %v5306_v35 = vpop.permute.xlu1 %5305 }
 0x2c9   : > { %4705 = vmatprep.mubr.msk.bf16.mxu1 %vm8992_vm12, %v3569_v31  ;;  %v2409_v46 = vsel %vm8996_vm2, %v2025_v47, %v5277_v15  ;;  %vm9000_vm9 = vmmov %vm8989_vm3  ;;  %v5308_v61 = vunpack.i.h.bf16 %v5306_v35  ;;  %v5307_v30 = vunpack.i.l.bf16 %v5306_v35  ;;  %v5303_v15 = vunpack.i.h.bf16 %v5301_v4 }
 0x2ca   : > { %v2442_v13 = vsel %vm9000_vm9, %v2410_v41, %v5298_v56  ;;  %vm9001_vm6 = vmmov %vm8989_vm3 }
 0x2cb   : > { %v2441_v31 = vsel %vm9001_vm6, %v2409_v46, %v5297_v12  ;;  %vm9003_vm13 = vmmov %vm8996_vm2 }
 0x2cc   : > { %v2412_v29 = vsel %vm9003_vm13, %v9002_v39, %v5293_v32  ;;  %vm9004_vm3 = vmmov %vm8996_vm2  ;;  %v2469_v2 = vpack.c.bf16 %v2442_v13, %v2441_v31  ;;  %v5302_v32 = vunpack.i.l.bf16 %v5301_v4  ;;  %v5321_v4 = vpop.permute.xlu0 %5320  ;;  %v5316_v41 = vpop.permute.xlu1 %5315 }
 0x2cd   : > { %v2411_v44 = vsel %vm9004_vm3, %v2027_v19, %v5292_v62  ;;  %vm9005_vm15 = vmmov %vm8996_vm2  ;;  %v5318_v46 = vunpack.i.h.bf16 %v5316_v41  ;;  %v9016_v19 = vld [vmem:[#allocation94_spill] sm:$0xff]  ;;  %v5323_v31 = vunpack.i.h.bf16 %v5321_v4 }
 0x2ce   : > { %v3514_v55 = vsel %vm9005_vm15, %v9002_v39, %v5288_v57  ;;  %vm9007_vm1 = vmmov %vm8996_vm2  ;;  %4641 = vmatprep.mubr.msk.bf16.mxu0 %vm8992_vm12, %v2469_v2  ;;  %v5317_v57 = vunpack.i.l.bf16 %v5316_v41  ;;  %v9017_v11 = vsel %vm8999_vm5, 0.0, %v9016_v19  ;;  %v5322_v39 = vunpack.i.l.bf16 %v5321_v4 }
 0x2cf   : > { %v3513_v38 = vsel %vm9007_vm1, %v9006_v5, %v5287_v50  ;;  %vm9008_vm11 = vmmov %vm9001_vm6  ;;  %v9014_v50 = vld [vmem:[#allocation95_spill] sm:$0xff] }
 0x2d0   : > { %v2443_v62 = vsel %vm9008_vm11, %v2411_v44, %v5312_v27  ;;  %vm9009_vm2 = vmmov %vm9001_vm6  ;;  %v5326_v13 = vpop.permute.xlu1 %5325 }
 0x2d1   : > { %v2444_v28 = vsel %vm9009_vm2, %v2412_v29, %v5313_v22  ;;  %vm9010_vm9 = vmmov %vm9009_vm2  ;;  %v5328_v51 = vunpack.i.h.bf16 %v5326_v13  ;;  %v5327_v21 = vunpack.i.l.bf16 %v5326_v13 }
 0x2d2   : > { %v3545_v47 = vsel %vm9010_vm9, %v3513_v38, %v5307_v30  ;;  %vm9011_vm6 = vmmov %vm9009_vm2  ;;  %v2470_v54 = vpack.c.bf16 %v2444_v28, %v2443_v62  ;;  %vm9025_vm9 = vnez %v9024_v25 }
 0x2d3   : > { %v3546_v56 = vsel %vm9011_vm6, %v3514_v55, %v5308_v61  ;;  %vm9012_vm13 = vmmov %vm8992_vm12  ;;  %v2029_v35 = vsel %vm9025_vm9, 0.0, %v9016_v19 }
 0x2d4   : > { %4706 = vmatmul.mubr.msk.bf16.vlgmr.msra.gmra.mrb[16].mxu1 %vm9012_vm13, %v3570_v14  ;;  %v3573_v12 = vpack.c.bf16 %v3546_v56, %v3545_v47  ;;  %vm9013_vm10 = vmmov %vm8992_vm12  ;;  %v5336_v2 = vpop.permute.xlu1 %5335 }
 0x2d5   : > { %4709 = vmatprep.mubr.msk.bf16.mxu1 %vm9013_vm10, %v3571_v23  ;;  %vm9015_vm3 = vmmov %vm9007_vm1  ;;  %v5331_v23 = vpop.permute.xlu0 %5330  ;;  %v5338_v22 = vunpack.i.h.bf16 %v5336_v2  ;;  %v5337_v27 = vunpack.i.l.bf16 %v5336_v2 }
 0x2d6   : > { %v3516_v40 = vsel %vm9015_vm3, %v9014_v50, %v5303_v15  ;;  %vm9018_vm15 = vmmov %vm9007_vm1  ;;  %v5333_v43 = vunpack.i.h.bf16 %v5331_v23  ;;  %v5332_v29 = vunpack.i.l.bf16 %v5331_v23 }
 0x2d7   : > { %v3515_v17 = vsel %vm9018_vm15, %v9017_v11, %v5302_v32  ;;  %vm9019_vm1 = vmmov %vm9013_vm10 }
 0x2d8   : > { %4642 = vmatmul.mubr.msk.bf16.gmra.mrb[40].mxu0 %vm9019_vm1, %v2470_v54  ;;  %vm9020_vm12 = vmmov %vm9009_vm2  ;;  %v5346_v47 = vpop.permute.xlu1 %5345 }
 0x2d9   : > { %v3548_v14 = vsel %vm9020_vm12, %v3516_v40, %v5318_v46  ;;  %vm9021_vm11 = vmmov %vm9009_vm2  ;;  %v5341_v44 = vpop.permute.xlu0 %5340  ;;  %v5347_v4 = vunpack.i.l.bf16 %v5346_v47  ;;  %v9035_v46 = vsel %vm9025_vm9, 0.0, %v8871_v37 }
 0x2da   : > { %v3547_v59 = vsel %vm9021_vm11, %v3515_v17, %v5317_v57  ;;  %vm9022_vm2 = vmmov %vm9019_vm1  ;;  %v5342_v40 = vunpack.i.l.bf16 %v5341_v44 }
 0x2db   : > { %v3574_v58 = vpack.c.bf16 %v3548_v14, %v3547_v59  ;;  %vm9023_vm5 = vmmov %vm9019_vm1 }
 0x2dc   : > { %4710 = vmatmul.mubr.msk.bf16.gmra.mrb[20].mxu1 %vm9022_vm2, %v3572_v60  ;;  %vm9026_vm6 = vmmov %vm9015_vm3  ;;  %v9028_v60 = vld [vmem:[#allocation74_spill] sm:$0xff] }
 0x2dd   : > { %4713 = vmatprep.mubr.msk.bf16.mxu1 %vm9023_vm5, %v3573_v12  ;;  %v2414_v61 = vsel %vm9026_vm6, %v9014_v50, %v5323_v31  ;;  %vm9027_vm13 = vmmov %vm9015_vm3  ;;  %vm9029_vm10 = vnez %v9028_v60  ;;  %v5351_v28 = vpop.permute.xlu0 %5350  ;;  %v5348_v12 = vunpack.i.h.bf16 %v5346_v47  ;;  %v5343_v50 = vunpack.i.h.bf16 %v5341_v44 }
 0x2de   : > { %v2413_v30 = vsel %vm9027_vm13, %v2029_v35, %v5322_v39  ;;  %v2031_v55 = vsel %vm9029_vm10, 0.0, %v8871_v37  ;;  %vm9030_vm3 = vmmov %vm9021_vm11  ;;  %v5353_v56 = vunpack.i.h.bf16 %v5351_v28  ;;  %v5352_v54 = vunpack.i.l.bf16 %v5351_v28  ;;  %v5356_v37 = vpop.permute.xlu1 %5355 }
 0x2df   : > { %v2446_v5 = vsel %vm9030_vm3, %v2414_v61, %v5338_v22  ;;  %vm9031_vm15 = vmmov %vm9030_vm3  ;;  %v5358_v13 = vunpack.i.h.bf16 %v5356_v37  ;;  %v5357_v31 = vunpack.i.l.bf16 %v5356_v37 }
 0x2e0   : > { %v2445_v38 = vsel %vm9031_vm15, %v2413_v30, %v5337_v27  ;;  %vm9032_vm1 = vmmov %vm9026_vm6  ;;  %v9049_v30 = vsel %vm7081_vm4, 0.0, %v6989_v36  ;;  %v9052_v36 = vsel %vm7044_vm7, 0.0, %v7001_v16  ;;  %vm9058_vm7 = vnez %v8648_v48 }
 0x2e1   : > { %v2416_v15 = vsel %vm9032_vm1, %v8869_v34, %v5333_v43  ;;  %vm9033_vm12 = vmmov %vm9032_vm1  ;;  %v2471_v62 = vpack.c.bf16 %v2446_v5, %v2445_v38  ;;  %v5361_v23 = vpop.permute.xlu0 %5360  ;;  %v9042_v43 = vsel %vm9029_vm10, 0.0, %v7035_v8  ;;  %v9059_v16 = vsel %vm9058_vm7, 0.0, %v7021_v26 }
 0x2e2   : > { %v2415_v32 = vsel %vm9033_vm12, %v2031_v55, %v5332_v29  ;;  %vm9034_vm11 = vmmov %vm9032_vm1  ;;  %v5363_v44 = vunpack.i.h.bf16 %v5361_v23  ;;  %v5362_v2 = vunpack.i.l.bf16 %v5361_v23  ;;  %v5366_v27 = vpop.permute.xlu1 %5365 }
 0x2e3   : > { %v3518_v41 = vsel %vm9034_vm11, %v8869_v34, %v5328_v51  ;;  %vm9036_vm2 = vmmov %vm9032_vm1  ;;  %4645 = vmatprep.mubr.msk.bf16.mxu0 %vm9023_vm5, %v2471_v62  ;;  %v5367_v60 = vunpack.i.l.bf16 %v5366_v27 }
 0x2e4   : > { %v3517_v57 = vsel %vm9036_vm2, %v9035_v46, %v5327_v21  ;;  %vm9037_vm6 = vmmov %vm9030_vm3  ;;  %v5368_v21 = vunpack.i.h.bf16 %v5366_v27 }
 0x2e5   : > { %v2447_v19 = vsel %vm9037_vm6, %v2415_v32, %v5352_v54  ;;  %vm9038_vm13 = vmmov %vm9030_vm3  ;;  %v3549_v17 = vsel %vm9030_vm3, %v3517_v57, %v5347_v4  ;;  %v5371_v22 = vpop.permute.xlu0 %5370 }
 0x2e6   : > { %v2448_v11 = vsel %vm9038_vm13, %v2416_v15, %v5353_v56  ;;  %vm9039_vm15 = vmmov %vm9030_vm3  ;;  %v5372_v61 = vunpack.i.l.bf16 %v5371_v22  ;;  %v5376_v32 = vpop.permute.xlu1 %5375 }
 0x2e7   : > { %v3550_v14 = vsel %vm9039_vm15, %v3518_v41, %v5348_v12  ;;  %vm9040_vm1 = vmmov %vm9023_vm5  ;;  %v2472_v34 = vpack.c.bf16 %v2448_v11, %v2447_v19  ;;  %v5378_v62 = vunpack.i.h.bf16 %v5376_v32  ;;  %v5377_v28 = vunpack.i.l.bf16 %v5376_v32 }
 0x2e8   : > { %4714 = vmatmul.mubr.msk.bf16.gmra.mrb[24].mxu1 %vm9040_vm1, %v3574_v58  ;;  %v3575_v59 = vpack.c.bf16 %v3550_v14, %v3549_v17  ;;  %vm9041_vm9 = vmmov %vm9036_vm2 }
 0x2e9   : > { %v3520_v39 = vsel %vm9041_vm9, %v7029_v0, %v5343_v50  ;;  %vm9043_vm12 = vmmov %vm9036_vm2  ;;  %v5373_v0 = vunpack.i.h.bf16 %v5371_v22  ;;  %v5381_v15 = vpop.permute.xlu0 %5380 }
 0x2ea   : > { %v3519_v29 = vsel %vm9043_vm12, %v9042_v43, %v5342_v40  ;;  %vm9044_vm11 = vmmov %vm9040_vm1  ;;  %v5383_v47 = vunpack.i.h.bf16 %v5381_v15  ;;  %v5382_v56 = vunpack.i.l.bf16 %v5381_v15  ;;  %v5386_v46 = vpop.permute.xlu1 %5385 }
 0x2eb   : > { %4646 = vmatmul.mubr.msk.bf16.gmra.mrb[44].mxu0 %vm9044_vm11, %v2472_v34  ;;  %vm9045_vm2 = vmmov %vm9040_vm1  ;;  %v5388_v40 = vunpack.i.h.bf16 %v5386_v46  ;;  %v5387_v19 = vunpack.i.l.bf16 %v5386_v46 }
 0x2ec   : > { %4717 = vmatprep.mubr.msk.bf16.mxu1 %vm9045_vm2, %v3575_v59  ;;  %vm9046_vm5 = vmmov %vm9030_vm3 }
 0x2ed   : > { %v3552_v58 = vsel %vm9046_vm5, %v3520_v39, %v5358_v13  ;;  %vm9047_vm6 = vmmov %vm9030_vm3  ;;  %v5391_v41 = vpop.permute.xlu0 %5390 }
 0x2ee   : > { %v3551_v25 = vsel %vm9047_vm6, %v3519_v29, %v5357_v31  ;;  %vm9048_vm13 = vmmov %vm9041_vm9  ;;  %v5393_v57 = vunpack.i.h.bf16 %v5391_v41  ;;  %v5392_v50 = vunpack.i.l.bf16 %v5391_v41  ;;  %v5396_v59 = vpop.permute.xlu1 %5395  ;;  %v9092_v41 = vld [vmem:[#allocation22_spill] sm:$0xff] }
 0x2ef   : > { %v3576_v35 = vpack.c.bf16 %v3552_v58, %v3551_v25  ;;  %v3522_v8 = vsel %vm9048_vm13, %v6985_v24, %v5363_v44  ;;  %vm9050_vm10 = vmmov %vm9041_vm9  ;;  %v3524_v24 = vsel %vm9041_vm9, %v8816_v42, %v5368_v21  ;;  %v5398_v23 = vunpack.i.h.bf16 %v5396_v59 }
 0x2f0   : > { %v3521_v51 = vsel %vm9050_vm10, %v9049_v30, %v5362_v2  ;;  %vm9051_vm15 = vmmov %vm9030_vm3  ;;  %v5397_v37 = vunpack.i.l.bf16 %v5396_v59 }
 0x2f1   : > { %v3553_v55 = vsel %vm9030_vm3, %v3521_v51, %v5372_v61  ;;  %v3554_v5 = vsel %vm9051_vm15, %v3522_v8, %v5373_v0  ;;  %4718 = vmatmul.mubr.msk.bf16.gmra.mrb[28].mxu1 %vm9040_vm1, %v3576_v35  ;;  %vm9053_vm4 = vmmov %vm9041_vm9  ;;  %v5401_v34 = vpop.permute.xlu0 %5400 }
 0x2f2   : > { %v3577_v38 = vpack.c.bf16 %v3554_v5, %v3553_v55  ;;  %v3523_v63 = vsel %vm9053_vm4, %v9052_v36, %v5367_v60  ;;  %vm9054_vm12 = vmmov %vm9040_vm1  ;;  %v5403_v13 = vunpack.i.h.bf16 %v5401_v34  ;;  %v5402_v31 = vunpack.i.l.bf16 %v5401_v34  ;;  %v5406_v2 = vpop.permute.xlu1 %5405  ;;  %v9084_v36 = vld [vmem:[#allocation56_spill] sm:$0xff] }
 0x2f3   : > { %vm9055_vm11 = vmmov %vm9030_vm3  ;;  %v5408_v35 = vunpack.i.h.bf16 %v5406_v2  ;;  %v5407_v22 = vunpack.i.l.bf16 %v5406_v2 }
 0x2f4   : > { %4721 = vmatprep.mubr.msk.bf16.mxu1 %vm9054_vm12, %v3577_v38  ;;  %v3555_v54 = vsel %vm9055_vm11, %v3523_v63, %v5377_v28  ;;  %vm9056_vm2 = vmmov %vm9030_vm3 }
 0x2f5   : > { %v3556_v12 = vsel %vm9056_vm2, %v3524_v24, %v5378_v62  ;;  %vm9057_vm5 = vmmov %vm9053_vm4  ;;  %v5411_v44 = vpop.permute.xlu0 %5410 }
 0x2f6   : > { %v3578_v4 = vpack.c.bf16 %v3556_v12, %v3555_v54  ;;  %v3526_v45 = vsel %vm9057_vm5, %v8825_v52, %v5383_v47  ;;  %vm9060_vm6 = vmmov %vm9053_vm4  ;;  %v5413_v58 = vunpack.i.h.bf16 %v5411_v44  ;;  %v5412_v25 = vunpack.i.l.bf16 %v5411_v44  ;;  %v5421_v30 = vpop.permute.xlu1 %5420 }
 0x2f7   : > { %v3525_v42 = vsel %vm9060_vm6, %v9059_v16, %v5382_v56  ;;  %vm9061_vm13 = vmmov %vm9056_vm2  ;;  %v5423_v51 = vunpack.i.h.bf16 %v5421_v30  ;;  %v5422_v21 = vunpack.i.l.bf16 %v5421_v30  ;;  %v9095_v16 = vsel %vm8859_vm14, 0.0, %v9094_v9 }
 0x2f8   : > { %v3557_v11 = vsel %vm9061_vm13, %v3525_v42, %v5392_v50  ;;  %vm9062_vm10 = vmmov %vm9056_vm2 }
 0x2f9   : > { %v3558_v17 = vsel %vm9062_vm10, %v3526_v45, %v5393_v57  ;;  %vm9063_vm3 = vmmov %vm9040_vm1  ;;  %vm9065_vm1 = vnez %v8656_v1  ;;  %v5416_v8 = vpop.permute.xlu0 %5415 }
 0x2fa   : > { %4722 = vmatmul.mubr.msk.bf16.gmra.mrb[0].mxu1 %vm9063_vm3, %v3578_v4  ;;  %v3579_v14 = vpack.c.bf16 %v3558_v17, %v3557_v11  ;;  %vm9064_vm15 = vmmov %vm9053_vm4  ;;  %v9066_v26 = vsel %vm9065_vm1, 0.0, %v7093_v6  ;;  %v9072_v6 = vsel %vm7097_vm8, 0.0, %v7117_v7  ;;  %vm9078_vm8 = vnez %v8685_v3  ;;  %v5426_v62 = vpop.permute.xlu1 %5425  ;;  %v3929_v17 = vld [vmem:[#allocation11] sm:$0xf] }
 0x2fb   : > { %v3528_v48 = vsel %vm9064_vm15, %v8831_v33, %v5388_v40  ;;  %vm9067_vm9 = vmmov %vm9053_vm4  ;;  %v9079_v7 = vsel %vm9078_vm8, 0.0, %v7160_v18  ;;  %v5418_v60 = vunpack.i.h.bf16 %v5416_v8  ;;  %v5417_v55 = vunpack.i.l.bf16 %v5416_v8  ;;  %v9086_v18 = vld [vmem:[#allocation30_spill] sm:$0xff] }
 0x2fc   : > { %v3527_v52 = vsel %vm9067_vm9, %v9066_v26, %v5387_v19  ;;  %vm9068_vm4 = vmmov %vm9063_vm3  ;;  %v9087_v63 = vsel %vm8842_vm0, 0.0, %v9086_v18  ;;  %v5427_v56 = vunpack.i.l.bf16 %v5426_v62 }
 0x2fd   : > { %4725 = vmatprep.mubr.msk.bf16.mxu1 %vm9068_vm4, %v3579_v14  ;;  %vm9069_vm12 = vmmov %vm9056_vm2  ;;  %v5431_v32 = vpop.permute.xlu0 %5430 }
 0x2fe   : > { %v3559_v39 = vsel %vm9069_vm12, %v3527_v52, %v5397_v37  ;;  %vm9070_vm11 = vmmov %vm9056_vm2  ;;  %v5433_v28 = vunpack.i.h.bf16 %v5431_v32  ;;  %v5432_v24 = vunpack.i.l.bf16 %v5431_v32  ;;  %v5436_v57 = vpop.permute.xlu1 %5435 }
 0x2ff   : > { %v3560_v43 = vsel %vm9070_vm11, %v3528_v48, %v5398_v23  ;;  %vm9071_vm2 = vmmov %vm9057_vm5  ;;  %v5438_v50 = vunpack.i.h.bf16 %v5436_v57  ;;  %v5437_v45 = vunpack.i.l.bf16 %v5436_v57 }
 0x300   : > { %v3580_v29 = vpack.c.bf16 %v3560_v43, %v3559_v39  ;;  %v3530_v1 = vsel %vm9071_vm2, %v8841_v49, %v5403_v13  ;;  %vm9073_vm5 = vmmov %vm9071_vm2 }
 0x301   : > { %v3529_v33 = vsel %vm9073_vm5, %v9072_v6, %v5402_v31  ;;  %vm9074_vm7 = vmmov %vm9062_vm10  ;;  %v8104_v31 = vld [vmem:[#allocation10] ss:$0 sm:$0xff] }
 0x302   : > { %v3561_v27 = vsel %vm9074_vm7, %v3529_v33, %v5412_v25  ;;  %vm9075_vm6 = vmmov %vm9074_vm7 }
 0x303   : > { %v3562_v0 = vsel %vm9075_vm6, %v3530_v1, %v5413_v58  ;;  %vm9076_vm13 = vmmov %vm9063_vm3 }
 0x304   : > { %4726 = vmatmul.mubr.msk.bf16.gmra.mrb[4].mxu1 %vm9076_vm13, %v3580_v29  ;;  %v3581_v61 = vpack.c.bf16 %v3562_v0, %v3561_v27  ;;  %vm9077_vm10 = vmmov %vm9071_vm2 }
 0x305   : > { %v3532_v10 = vsel %vm9077_vm10, %v7156_v20, %v5408_v35  ;;  %vm9080_vm3 = vmmov %vm9071_vm2  ;;  %v5428_v20 = vunpack.i.h.bf16 %v5426_v62 }
 0x306   : > { %v3531_v49 = vsel %vm9080_vm3, %v9079_v7, %v5407_v22  ;;  %vm9081_vm15 = vmmov %vm9068_vm4 }
 0x307   : > { %4729 = vmatprep.mubr.msk.bf16.mxu1 %vm9081_vm15, %v3581_v61  ;;  %vm9082_vm1 = vmmov %vm9075_vm6 }
 0x308   : > { %v3563_v5 = vsel %vm9082_vm1, %v3531_v49, %v5422_v21  ;;  %vm9083_vm9 = vmmov %vm9082_vm1 }
 0x309   : > { %v3564_v38 = vsel %vm9083_vm9, %v3532_v10, %v5423_v51  ;;  %vm9085_vm4 = vmmov %vm9071_vm2 }
 0x30a   : > { %v3582_v15 = vpack.c.bf16 %v3564_v38, %v3563_v5  ;;  %v3534_v3 = vsel %vm9085_vm4, %v9084_v36, %v5418_v60  ;;  %vm9088_vm12 = vmmov %vm9071_vm2 }
 0x30b   : > { %v3533_v47 = vsel %vm9088_vm12, %v9087_v63, %v5417_v55  ;;  %vm9089_vm11 = vmmov %vm9082_vm1 }
 0x30c   : > { %v3565_v54 = vsel %vm9089_vm11, %v3533_v47, %v5432_v24  ;;  %vm9090_vm2 = vmmov %vm9082_vm1 }
 0x30d   : > { %v3566_v12 = vsel %vm9090_vm2, %v3534_v3, %v5433_v28  ;;  %vm9091_vm5 = vmmov %vm9076_vm13 }
 0x30e   : > { %4730 = vmatmul.mubr.msk.bf16.gmra.mrb[8].mxu1 %vm9091_vm5, %v3582_v15  ;;  %v3583_v4 = vpack.c.bf16 %v3566_v12, %v3565_v54  ;;  %vm9093_vm7 = vmmov %vm9080_vm3 }
 0x30f   : > { %v3536_v46 = vsel %vm9093_vm7, %v9092_v41, %v5428_v20  ;;  %vm9096_vm0 = vmmov %vm9080_vm3  ;;  %vm9101_vm3 = vcmask 1043456  }
 0x310   : > { %v3535_v42 = vsel %vm9096_vm0, %v9095_v16, %v5427_v56  ;;  %vm9097_vm6 = vmmov %vm9091_vm5  ;;  %4843 = vmatprep.subr.msk.bf16.mxu0 %vm9101_vm3, %v3929_v17 }
 0x311   : > { %4733 = vmatprep.mubr.msk.bf16.mxu1 %vm9097_vm6, %v3583_v4  ;;  %vm9098_vm13 = vmmov %vm9082_vm1 }
 0x312   : > { %v3567_v40 = vsel %vm9098_vm13, %v3535_v42, %v5437_v45  ;;  %vm9099_vm10 = vmmov %vm9082_vm1 }
 0x313   : > { %v3568_v19 = vsel %vm9099_vm10, %v3536_v46, %v5438_v50  ;;  %vm9100_vm8 = vmmov %vm9091_vm5 }
 0x314   : > { %v3584_v11 = vpack.c.bf16 %v3568_v19, %v3567_v40  ;;  %vm9102_vm15 = vmmov %vm9101_vm3 }
 0x315   : > { %v3986_v14 = vsel %vm9102_vm15, %v3929_v17, 0  ;;  %vm9103_vm14 = vmmov %vm9096_vm0 }
 0x316   : > { %4734 = vmatmul.mubr.msk.bf16.gmra.mrb[12].mxu1 %vm9100_vm8, %v3584_v11  ;;  %4738 = vmatpush3.bf16.msra.mxu0 %v3986_v14  ;;  %vm9104_vm1 = vmmov %vm9096_vm0 }
 0x317   : > { %vm9105_vm9 = vmmov %vm9096_vm0 }
 0x318   : > { %vm9106_vm4 = vmmov %vm9096_vm0 }
 0x319   : > { %vm9107_vm12 = vmmov %vm9096_vm0 }
 0x31a   : > { %vm9108_vm11 = vmmov %vm9096_vm0 }
 0x31b   : > { %vm9109_vm2 = vmmov %vm9096_vm0 }
 0x31c   : > { %vm9110_vm5 = vmmov %vm9096_vm0 }
 0x31d   : > { %vm9111_vm7 = vmmov %vm9096_vm0 }
 0x31e   : > { %vm9112_vm6 = vmmov %vm9096_vm0 }
 0x31f   : > { %vm9113_vm13 = vmmov %vm9096_vm0 }
 0x320   : > { %vm9114_vm10 = vmmov %vm9096_vm0 }
 0x321   : > { %vm9115_vm8 = vmmov %vm9096_vm0 }
 0x322   : > { %vm9116_vm3 = vmmov %vm9096_vm0 }
 0x323   : > { %vm9117_vm15 = vmmov %vm9096_vm0 }
 0x37c   : > { %v4635_v53 = vpop.f32.mrb[32].mxu0 }
 0x37d   : > { %v2581_v34 = vpop.f32.mrb[33].mxu0 }
 0x37e   : > { %v4636_v59 = vpop.f32.mrb[34].mxu0 }
 0x37f   : > { %v2584_v23 = vpop.f32.mrb[35].mxu0 }
 0x396   : > { %v4639_v37 = vpop.f32.mrb[36].mxu0 }
 0x397   : > { %v2597_v48 = vpop.f32.mrb[37].mxu0 }
 0x398   : > { %v4640_v26 = vpop.f32.mrb[38].mxu0 }
 0x399   : > { %v2600_v52 = vpop.f32.mrb[39].mxu0 }
 0x3a7   : > { %v4707_v13 = vpop.f32.mrb[16].mxu1 }
 0x3a8   : > { %v4775_v39 = vadd.f32 %v4707_v13, %v4635_v53  ;;  %v3683_v43 = vpop.f32.mrb[17].mxu1 }
 0x3a9   : > { %v4776_v29 = vadd.f32 %v3683_v43, %v2581_v34  ;;  %v4708_v44 = vpop.f32.mrb[18].mxu1 }
 0x3aa   : > { %v3851_v2 = vadd.f32 %v4775_v39, %v8104_v31  ;;  %v4777_v58 = vadd.f32 %v4708_v44, %v4636_v59  ;;  %v3686_v25 = vpop.f32.mrb[19].mxu1 }
 0x3ab   : > { %v4643_v1 = vpop.f32.mrb[40].mxu0  ;;  %v3849_v6 = vadd.f32 %v4776_v29, %v8104_v31  ;;  %v4778_v33 = vadd.f32 %v3686_v25, %v2584_v23 }
 0x3ac   : > { %v2613_v35 = vpop.f32.mrb[41].mxu0  ;;  %v3852_v22 = vadd.f32 %v4777_v58, %v8104_v31  ;;  %v3883_v8 = vmax.f32 %v3851_v2, 0.0 }
 0x3ad   : > { %v4644_v27 = vpop.f32.mrb[42].mxu0  ;;  %v3850_v0 = vadd.f32 %v4778_v33, %v8104_v31  ;;  %v3881_v51 = vmax.f32 %v3849_v6, 0.0 }
 0x3ae   : > { %v2616_v61 = vpop.f32.mrb[43].mxu0  ;;  %v3884_v30 = vmax.f32 %v3852_v22, 0.0 }
 0x3af   : > { %v3882_v21 = vmax.f32 %v3850_v0, 0.0  ;;  %v4711_v10 = vpop.f32.mrb[20].mxu1 }
 0x3b0   : > { %v3914_v7 = vpack.c.bf16 %v3884_v30, %v3883_v8  ;;  %v4779_v49 = vadd.f32 %v4711_v10, %v4639_v37  ;;  %v3699_v60 = vpop.f32.mrb[21].mxu1 }
 0x3b1   : > { %v3913_v55 = vpack.c.bf16 %v3882_v21, %v3881_v51  ;;  %v4780_v5 = vadd.f32 %v3699_v60, %v2597_v48  ;;  %v4712_v38 = vpop.f32.mrb[22].mxu1 }
 0x3b2   : > { %v3855_v15 = vadd.f32 %v4779_v49, %v8104_v31  ;;  %v4781_v32 = vadd.f32 %v4712_v38, %v4640_v26  ;;  %v3702_v62 = vpop.f32.mrb[23].mxu1 }
 0x3b3   : > { %v3853_v28 = vadd.f32 %v4780_v5, %v8104_v31  ;;  %v4782_v24 = vadd.f32 %v3702_v62, %v2600_v52  ;;  %4739 = vmatprep.mubr.msk.bf16.mxu0 %vm9103_vm14, %v3913_v55  ;;  %vm9118_vm14 = vcmask 130048  }
 0x3b4   : > { %v3856_v20 = vadd.f32 %v4781_v32, %v8104_v31  ;;  %4740 = vmatmul.mubr.msk.bf16.vlgmr.msra.gmra.mrb[48].mxu0 %vm9104_vm1, %v3914_v7  ;;  %v3887_v3 = vmax.f32 %v3855_v15, 0.0  ;;  %vm9119_vm1 = vmmov %vm9118_vm14 }
 0x3b5   : > { %v3854_v36 = vadd.f32 %v4782_v24, %v8104_v31  ;;  %v3885_v63 = vmax.f32 %v3853_v28, 0.0 }
 0x3b6   : > { %v3888_v18 = vmax.f32 %v3856_v20, 0.0 }
 0x3b7   : > { %v3886_v47 = vmax.f32 %v3854_v36, 0.0 }
 0x3b8   : > { %v3916_v54 = vpack.c.bf16 %v3888_v18, %v3887_v3 }
 0x3b9   : > { %v3915_v41 = vpack.c.bf16 %v3886_v47, %v3885_v63 }
 0x3bb   : > { %v4715_v56 = vpop.f32.mrb[24].mxu1  ;;  %4743 = vmatprep.mubr.msk.bf16.mxu0 %vm9105_vm9, %v3915_v41  ;;  %vm9120_vm9 = vmmov %vm9119_vm1 }
 0x3bc   : > { %v4783_v12 = vadd.f32 %v4715_v56, %v4643_v1  ;;  %v3715_v4 = vpop.f32.mrb[25].mxu1  ;;  %4744 = vmatmul.mubr.msk.bf16.gmra.mrb[52].mxu0 %vm9106_vm4, %v3916_v54  ;;  %vm9121_vm4 = vmmov %vm9119_vm1 }
 0x3bd   : > { %v4784_v46 = vadd.f32 %v3715_v4, %v2613_v35  ;;  %v4716_v57 = vpop.f32.mrb[26].mxu1 }
 0x3be   : > { %v3859_v50 = vadd.f32 %v4783_v12, %v8104_v31  ;;  %v4785_v45 = vadd.f32 %v4716_v57, %v4644_v27  ;;  %v3718_v9 = vpop.f32.mrb[27].mxu1  ;;  %v4647_v16 = vpop.f32.mrb[44].mxu0 }
 0x3bf   : > { %v3857_v42 = vadd.f32 %v4784_v46, %v8104_v31  ;;  %v4786_v40 = vadd.f32 %v3718_v9, %v2616_v61  ;;  %v2629_v19 = vpop.f32.mrb[45].mxu0 }
 0x3c0   : > { %v3860_v11 = vadd.f32 %v4785_v45, %v8104_v31  ;;  %v4648_v17 = vpop.f32.mrb[46].mxu0  ;;  %v3891_v34 = vmax.f32 %v3859_v50, 0.0 }
 0x3c1   : > { %v3858_v14 = vadd.f32 %v4786_v40, %v8104_v31  ;;  %v2632_v53 = vpop.f32.mrb[47].mxu0  ;;  %v3889_v23 = vmax.f32 %v3857_v42, 0.0 }
 0x3c2   : > { %v3892_v59 = vmax.f32 %v3860_v11, 0.0 }
 0x3c3   : > { %v3890_v37 = vmax.f32 %v3858_v14, 0.0 }
 0x3c4   : > { %v4719_v48 = vpop.f32.mrb[28].mxu1  ;;  %v3918_v26 = vpack.c.bf16 %v3892_v59, %v3891_v34 }
 0x3c5   : > { %v4787_v52 = vadd.f32 %v4719_v48, %v4647_v16  ;;  %v3731_v13 = vpop.f32.mrb[29].mxu1  ;;  %v3917_v39 = vpack.c.bf16 %v3890_v37, %v3889_v23 }
 0x3c6   : > { %v4788_v43 = vadd.f32 %v3731_v13, %v2629_v19  ;;  %v4720_v29 = vpop.f32.mrb[30].mxu1 }
 0x3c7   : > { %v3863_v44 = vadd.f32 %v4787_v52, %v8104_v31  ;;  %v4789_v2 = vadd.f32 %v4720_v29, %v4648_v17  ;;  %v3734_v58 = vpop.f32.mrb[31].mxu1  ;;  %4747 = vmatprep.mubr.msk.bf16.mxu0 %vm9107_vm12, %v3917_v39  ;;  %vm9122_vm12 = vmmov %vm9119_vm1 }
 0x3c8   : > { %v3861_v25 = vadd.f32 %v4788_v43, %v8104_v31  ;;  %v4790_v1 = vadd.f32 %v3734_v58, %v2632_v53  ;;  %4748 = vmatmul.mubr.msk.bf16.gmra.mrb[56].mxu0 %vm9108_vm11, %v3918_v26  ;;  %vm9123_vm11 = vmmov %vm9119_vm1 }
 0x3c9   : > { %v3864_v6 = vadd.f32 %v4789_v2, %v8104_v31  ;;  %v3895_v35 = vmax.f32 %v3863_v44, 0.0 }
 0x3ca   : > { %v3862_v33 = vadd.f32 %v4790_v1, %v8104_v31  ;;  %v3893_v27 = vmax.f32 %v3861_v25, 0.0 }
 0x3cb   : > { %v3896_v22 = vmax.f32 %v3864_v6, 0.0 }
 0x3cc   : > { %v3894_v0 = vmax.f32 %v3862_v33, 0.0  ;;  %v8154_v33 = vld [vmem:[#allocation13] ss:$0 sm:$0xff] }
 0x3cd   : > { %v4723_v61 = vpop.f32.mrb[0].mxu1  ;;  %v3920_v8 = vpack.c.bf16 %v3896_v22, %v3895_v35 }
 0x3ce   : > { %v3867_v30 = vadd.f32 %v4723_v61, %v8104_v31  ;;  %v3747_v51 = vpop.f32.mrb[1].mxu1  ;;  %v3919_v21 = vpack.c.bf16 %v3894_v0, %v3893_v27  ;;  %v5446_v61 = vld [vmem:[%s6073_s18 + $0x10] sm:$0xff] }
 0x3cf   : > { %v3865_v10 = vadd.f32 %v8104_v31, %v3747_v51  ;;  %v4724_v7 = vpop.f32.mrb[2].mxu1 }
 0x3d0   : > { %v3868_v49 = vadd.f32 %v4724_v7, %v8104_v31  ;;  %v3750_v60 = vpop.f32.mrb[3].mxu1  ;;  %4751 = vmatprep.mubr.msk.bf16.mxu0 %vm9109_vm2, %v3919_v21  ;;  %v3899_v5 = vmax.f32 %v3867_v30, 0.0  ;;  %v5447_v21 = vld [vmem:[%s6073_s18] sm:$0xff]  ;;  %vm9124_vm2 = vmmov %vm9119_vm1 }
 0x3d1   : > { %v3866_v55 = vadd.f32 %v8104_v31, %v3750_v60  ;;  %4752 = vmatmul.mubr.msk.bf16.gmra.mrb[60].mxu0 %vm9110_vm5, %v3920_v8  ;;  %v3897_v15 = vmax.f32 %v3865_v10, 0.0  ;;  %v5448_v60 = vld [vmem:[%s6073_s18 + $0x18] sm:$0xff]  ;;  %vm9125_vm5 = vmmov %vm9119_vm1 }
 0x3d2   : > { %v3900_v38 = vmax.f32 %v3868_v49, 0.0 }
 0x3d3   : > { %v3898_v32 = vmax.f32 %v3866_v55, 0.0 }
 0x3d4   : > { %v3922_v62 = vpack.c.bf16 %v3900_v38, %v3899_v5  ;;  %v5449_v38 = vld [vmem:[%s6073_s18 + $0x8] sm:$0xff] }
 0x3d5   : > { %v3921_v28 = vpack.c.bf16 %v3898_v32, %v3897_v15 }
 0x3d7   : > { %v4727_v24 = vpop.f32.mrb[4].mxu1  ;;  %4755 = vmatprep.mubr.msk.bf16.mxu0 %vm9111_vm7, %v3921_v28  ;;  %vm9126_vm7 = vmmov %vm9119_vm1 }
 0x3d8   : > { %v3871_v20 = vadd.f32 %v4727_v24, %v8104_v31  ;;  %v3763_v36 = vpop.f32.mrb[5].mxu1 }
 0x3d9   : > { %v3869_v3 = vadd.f32 %v8104_v31, %v3763_v36  ;;  %v4728_v18 = vpop.f32.mrb[6].mxu1  ;;  %4756 = vmatmul.mubr.msk.bf16.gmra.mrb[64].mxu0 %vm9096_vm0, %v3922_v62  ;;  %vm9127_vm0 = vmmov %vm9119_vm1 }
 0x3da   : > { %v3872_v63 = vadd.f32 %v4728_v18, %v8104_v31  ;;  %v3766_v47 = vpop.f32.mrb[7].mxu1  ;;  %v3903_v54 = vmax.f32 %v3871_v20, 0.0  ;;  %v5450_v18 = vld [vmem:[%s6073_s18 + $0x30] sm:$0xff] }
 0x3db   : > { %v3870_v56 = vadd.f32 %v8104_v31, %v3766_v47  ;;  %v3901_v4 = vmax.f32 %v3869_v3, 0.0 }
 0x3dc   : > { %v3904_v12 = vmax.f32 %v3872_v63, 0.0 }
 0x3dd   : > { %v3902_v41 = vmax.f32 %v3870_v56, 0.0 }
 0x3de   : > { %v3924_v46 = vpack.c.bf16 %v3904_v12, %v3903_v54  ;;  %v5451_v54 = vld [vmem:[%s6073_s18 + $0x20] sm:$0xff] }
 0x3df   : > { %v3923_v57 = vpack.c.bf16 %v3902_v41, %v3901_v4 }
 0x3e1   : > { %v4731_v50 = vpop.f32.mrb[8].mxu1  ;;  %4759 = vmatprep.mubr.msk.bf16.mxu0 %vm9112_vm6, %v3923_v57  ;;  %vm9128_vm6 = vmmov %vm9127_vm0 }
 0x3e2   : > { %v3875_v45 = vadd.f32 %v4731_v50, %v8104_v31  ;;  %v3779_v9 = vpop.f32.mrb[9].mxu1  ;;  %4760 = vmatmul.mubr.msk.bf16.gmra.mrb[68].mxu0 %vm9113_vm13, %v3924_v46  ;;  %v5452_v46 = vld [vmem:[%s6073_s18 + $0x38] sm:$0xff]  ;;  %vm9129_vm13 = vmmov %vm9127_vm0 }
 0x3e3   : > { %v3873_v16 = vadd.f32 %v8104_v31, %v3779_v9  ;;  %v4732_v42 = vpop.f32.mrb[10].mxu1 }
 0x3e4   : > { %v3876_v40 = vadd.f32 %v4732_v42, %v8104_v31  ;;  %v3782_v19 = vpop.f32.mrb[11].mxu1  ;;  %v3907_v17 = vmax.f32 %v3875_v45, 0.0  ;;  %v5453_v45 = vld [vmem:[%s6073_s18 + $0x28] sm:$0xff] }
 0x3e5   : > { %v3874_v11 = vadd.f32 %v8104_v31, %v3782_v19  ;;  %v3905_v53 = vmax.f32 %v3873_v16, 0.0 }
 0x3e6   : > { %v3908_v14 = vmax.f32 %v3876_v40, 0.0 }
 0x3e7   : > { %v3906_v34 = vmax.f32 %v3874_v11, 0.0 }
 0x3e8   : > { %v3926_v59 = vpack.c.bf16 %v3908_v14, %v3907_v17 }
 0x3e9   : > { %v3925_v23 = vpack.c.bf16 %v3906_v34, %v3905_v53  ;;  %v4735_v37 = vpop.f32.mrb[12].mxu1  ;;  %v5454_v53 = vld [vmem:[%s6073_s18 + $0x50] sm:$0xff] }
 0x3ea   : > { %v3879_v48 = vadd.f32 %v4735_v37, %v8104_v31  ;;  %v3795_v26 = vpop.f32.mrb[13].mxu1  ;;  %v5455_v37 = vld [vmem:[%s6073_s18 + $0x40] sm:$0xff] }
 0x3eb   : > { %v3877_v52 = vadd.f32 %v8104_v31, %v3795_v26  ;;  %v4736_v13 = vpop.f32.mrb[14].mxu1  ;;  %4763 = vmatprep.mubr.msk.bf16.mxu0 %vm9114_vm10, %v3925_v23  ;;  %vm9130_vm10 = vmmov %vm9127_vm0 }
 0x3ec   : > { %v3880_v39 = vadd.f32 %v4736_v13, %v8104_v31  ;;  %v3798_v43 = vpop.f32.mrb[15].mxu1  ;;  %v3911_v44 = vmax.f32 %v3879_v48, 0.0  ;;  %4764 = vmatmul.mubr.msk.bf16.gmra.mrb[72].mxu0 %vm9115_vm8, %v3926_v59  ;;  %v5456_v13 = vld [vmem:[%s6073_s18 + $0x58] sm:$0xff]  ;;  %vm9131_vm8 = vmmov %vm9127_vm0 }
 0x3ed   : > { %v3878_v29 = vadd.f32 %v8104_v31, %v3798_v43  ;;  %v3909_v58 = vmax.f32 %v3877_v52, 0.0 }
 0x3ee   : > { %v3912_v2 = vmax.f32 %v3880_v39, 0.0 }
 0x3ef   : > { %v3910_v25 = vmax.f32 %v3878_v29, 0.0  ;;  %v5457_v29 = vld [vmem:[%s6073_s18 + $0x48] sm:$0xff] }
 0x3f0   : > { %v3928_v1 = vpack.c.bf16 %v3912_v2, %v3911_v44 }
 0x3f1   : > { %v3927_v6 = vpack.c.bf16 %v3910_v25, %v3909_v58 }
 0x3f3   : > { %4767 = vmatprep.mubr.msk.bf16.mxu0 %vm9116_vm3, %v3927_v6  ;;  %vm9132_vm3 = vmmov %vm9127_vm0 }
 0x3f4   : > { %4768 = vmatmul.mubr.msk.bf16.gmra.mrb[76].mxu0 %vm9117_vm15, %v3928_v1  ;;  %vm9133_vm15 = vmmov %vm9127_vm0 }
 0x487   : > { %v4741_v35 = vpop.f32.mrb[48].mxu0 }
 0x488   : > { %v4031_v31 = vadd.f32 %v4741_v35, %v8154_v33  ;;  %v4022_v22 = vpop.f32.mrb[49].mxu0 }
 0x489   : > { %v4023_v27 = vadd.f32 %v8154_v33, %v4022_v22  ;;  %v4742_v0 = vpop.f32.mrb[50].mxu0  ;;  %v5458_v22 = vld [vmem:[%s6073_s18 + $0x70] sm:$0xff] }
 0x48a   : > { %v4151_v8 = vadd.f32 %v5446_v61, %v4031_v31  ;;  %v4034_v30 = vadd.f32 %v4742_v0, %v8154_v33  ;;  %v4025_v51 = vpop.f32.mrb[51].mxu0 }
 0x48b   : > { %v4149_v10 = vadd.f32 %v5447_v21, %v4023_v27  ;;  %v4026_v7 = vadd.f32 %v8154_v33, %v4025_v51 }
 0x48c   : > { %v4183_v49 = vmax.f32 %v4151_v8, 0.0  ;;  %v4152_v55 = vadd.f32 %v5448_v60, %v4034_v30  ;;  %v5459_v8 = vld [vmem:[%s6073_s18 + $0x60] sm:$0xff]  ;;  %v5461_v60 = vld [vmem:[%s6073_s18 + $0x68] sm:$0xff] }
 0x48d   : > { %v4181_v5 = vmax.f32 %v4149_v10, 0.0  ;;  %v4150_v15 = vadd.f32 %v5449_v38, %v4026_v7  ;;  %v5460_v10 = vld [vmem:[%s6073_s18 + $0x78] sm:$0xff] }
 0x48e   : > { %4215 = vst.msk [vmem:[%s8166_s17 + $0x10] sm:$0xff] %vm9118_vm14, %v4183_v49  ;;  %v4184_v32 = vmax.f32 %v4152_v55, 0.0  ;;  %vm9134_vm14 = vmmov %vm9127_vm0 }
 0x48f   : > { %4213 = vst.msk [vmem:[%s8166_s17] sm:$0xff] %vm9119_vm1, %v4181_v5  ;;  %v4182_v62 = vmax.f32 %v4150_v15, 0.0  ;;  %v4745_v28 = vpop.f32.mrb[52].mxu0  ;;  %vm9135_vm1 = vmmov %vm9127_vm0 }
 0x490   : > { %4216 = vst.msk [vmem:[%s8166_s17 + $0x18] sm:$0xff] %vm9120_vm9, %v4184_v32  ;;  %v4047_v24 = vadd.f32 %v4745_v28, %v8154_v33  ;;  %v4038_v20 = vpop.f32.mrb[53].mxu0  ;;  %vm9136_vm9 = vmmov %vm9127_vm0 }
 0x491   : > { %4214 = vst.msk [vmem:[%s8166_s17 + $0x8] sm:$0xff] %vm9121_vm4, %v4182_v62  ;;  %v4039_v36 = vadd.f32 %v8154_v33, %v4038_v20  ;;  %v4746_v3 = vpop.f32.mrb[54].mxu0  ;;  %v5462_v20 = vld [vmem:[%s6073_s18 + $0x90] sm:$0xff]  ;;  %vm9137_vm4 = vmmov %vm9127_vm0 }
 0x492   : > { %v4155_v63 = vadd.f32 %v5450_v18, %v4047_v24  ;;  %v4050_v47 = vadd.f32 %v4746_v3, %v8154_v33  ;;  %v4041_v56 = vpop.f32.mrb[55].mxu0 }
 0x493   : > { %v4153_v12 = vadd.f32 %v5451_v54, %v4039_v36  ;;  %v4042_v4 = vadd.f32 %v8154_v33, %v4041_v56 }
 0x494   : > { %v4187_v41 = vmax.f32 %v4155_v63, 0.0  ;;  %v4156_v57 = vadd.f32 %v5452_v46, %v4050_v47  ;;  %v5463_v63 = vld [vmem:[%s6073_s18 + $0x80] sm:$0xff]  ;;  %v5465_v46 = vld [vmem:[%s6073_s18 + $0x88] sm:$0xff] }
 0x495   : > { %v4185_v50 = vmax.f32 %v4153_v12, 0.0  ;;  %v4154_v9 = vadd.f32 %v5453_v45, %v4042_v4  ;;  %v5464_v12 = vld [vmem:[%s6073_s18 + $0x98] sm:$0xff] }
 0x496   : > { %4219 = vst.msk [vmem:[%s8166_s17 + $0x30] sm:$0xff] %vm9122_vm12, %v4187_v41  ;;  %v4188_v16 = vmax.f32 %v4156_v57, 0.0  ;;  %vm9138_vm12 = vmmov %vm9127_vm0 }
 0x497   : > { %4217 = vst.msk [vmem:[%s8166_s17 + $0x20] sm:$0xff] %vm9123_vm11, %v4185_v50  ;;  %v4186_v42 = vmax.f32 %v4154_v9, 0.0  ;;  %vm9139_vm11 = vmmov %vm9127_vm0 }
 0x498   : > { %4220 = vst.msk [vmem:[%s8166_s17 + $0x38] sm:$0xff] %vm9124_vm2, %v4188_v16  ;;  %vm9140_vm2 = vmmov %vm9127_vm0 }
 0x499   : > { %4218 = vst.msk [vmem:[%s8166_s17 + $0x28] sm:$0xff] %vm9125_vm5, %v4186_v42  ;;  %vm9141_vm5 = vmmov %vm9127_vm0 }
 0x49b   : > { %v4749_v40 = vpop.f32.mrb[56].mxu0 }
 0x49c   : > { %v4063_v19 = vadd.f32 %v4749_v40, %v8154_v33  ;;  %v4054_v11 = vpop.f32.mrb[57].mxu0 }
 0x49d   : > { %v4055_v17 = vadd.f32 %v8154_v33, %v4054_v11  ;;  %v4750_v14 = vpop.f32.mrb[58].mxu0  ;;  %v5466_v11 = vld [vmem:[%s6073_s18 + $0xb0] sm:$0xff] }
 0x49e   : > { %v4159_v34 = vadd.f32 %v5454_v53, %v4063_v19  ;;  %v4066_v59 = vadd.f32 %v4750_v14, %v8154_v33  ;;  %v4057_v23 = vpop.f32.mrb[59].mxu0 }
 0x49f   : > { %v4157_v48 = vadd.f32 %v5455_v37, %v4055_v17  ;;  %v4058_v26 = vadd.f32 %v8154_v33, %v4057_v23 }
 0x4a0   : > { %v4191_v52 = vmax.f32 %v4159_v34, 0.0  ;;  %v4160_v39 = vadd.f32 %v5456_v13, %v4066_v59  ;;  %v5467_v34 = vld [vmem:[%s6073_s18 + $0xa0] sm:$0xff]  ;;  %v5469_v13 = vld [vmem:[%s6073_s18 + $0xa8] sm:$0xff] }
 0x4a1   : > { %v4189_v43 = vmax.f32 %v4157_v48, 0.0  ;;  %v4158_v44 = vadd.f32 %v5457_v29, %v4058_v26  ;;  %v5468_v48 = vld [vmem:[%s6073_s18 + $0xb8] sm:$0xff] }
 0x4a2   : > { %4223 = vst.msk [vmem:[%s8166_s17 + $0x50] sm:$0xff] %vm9126_vm7, %v4191_v52  ;;  %v4192_v2 = vmax.f32 %v4160_v39, 0.0  ;;  %vm9142_vm7 = vmmov %vm9127_vm0 }
 0x4a3   : > { %4221 = vst.msk [vmem:[%s8166_s17 + $0x40] sm:$0xff] %vm9127_vm0, %v4189_v43  ;;  %v4190_v58 = vmax.f32 %v4158_v44, 0.0 }
 0x4a4   : > { %v4753_v25 = vpop.f32.mrb[60].mxu0  ;;  %4224 = vst.msk [vmem:[%s8166_s17 + $0x58] sm:$0xff] %vm9128_vm6, %v4192_v2  ;;  %vm9143_vm6 = vmmov %vm9127_vm0 }
 0x4a5   : > { %v4079_v1 = vadd.f32 %v4753_v25, %v8154_v33  ;;  %v4070_v6 = vpop.f32.mrb[61].mxu0  ;;  %4222 = vst.msk [vmem:[%s8166_s17 + $0x48] sm:$0xff] %vm9129_vm13, %v4190_v58  ;;  %vm9144_vm13 = vmmov %vm9127_vm0 }
 0x4a6   : > { %v4071_v35 = vadd.f32 %v8154_v33, %v4070_v6  ;;  %v4754_v31 = vpop.f32.mrb[62].mxu0  ;;  %v5470_v6 = vld [vmem:[%s6073_s18 + $0xd0] sm:$0xff] }
 0x4a7   : > { %v4163_v27 = vadd.f32 %v5458_v22, %v4079_v1  ;;  %v4082_v0 = vadd.f32 %v4754_v31, %v8154_v33  ;;  %v4073_v61 = vpop.f32.mrb[63].mxu0 }
 0x4a8   : > { %v4161_v30 = vadd.f32 %v5459_v8, %v4071_v35  ;;  %v4074_v51 = vadd.f32 %v8154_v33, %v4073_v61 }
 0x4a9   : > { %v4195_v21 = vmax.f32 %v4163_v27, 0.0  ;;  %v4164_v7 = vadd.f32 %v5460_v10, %v4082_v0  ;;  %v5471_v27 = vld [vmem:[%s6073_s18 + $0xc0] sm:$0xff]  ;;  %v5473_v10 = vld [vmem:[%s6073_s18 + $0xc8] sm:$0xff] }
 0x4aa   : > { %v4193_v49 = vmax.f32 %v4161_v30, 0.0  ;;  %v4162_v55 = vadd.f32 %v5461_v60, %v4074_v51  ;;  %v5472_v30 = vld [vmem:[%s6073_s18 + $0xd8] sm:$0xff] }
 0x4ab   : > { %4227 = vst.msk [vmem:[%s8166_s17 + $0x70] sm:$0xff] %vm9130_vm10, %v4195_v21  ;;  %v4196_v5 = vmax.f32 %v4164_v7, 0.0  ;;  %vm9145_vm10 = vmmov %vm9127_vm0 }
 0x4ac   : > { %4225 = vst.msk [vmem:[%s8166_s17 + $0x60] sm:$0xff] %vm9131_vm8, %v4193_v49  ;;  %v4194_v38 = vmax.f32 %v4162_v55, 0.0  ;;  %v4757_v15 = vpop.f32.mrb[64].mxu0  ;;  %vm9146_vm8 = vmmov %vm9127_vm0 }
 0x4ad   : > { %4228 = vst.msk [vmem:[%s8166_s17 + $0x78] sm:$0xff] %vm9132_vm3, %v4196_v5  ;;  %v4095_v32 = vadd.f32 %v4757_v15, %v8154_v33  ;;  %v4086_v62 = vpop.f32.mrb[65].mxu0  ;;  %vm9147_vm3 = vmmov %vm9127_vm0 }
 0x4ae   : > { %4226 = vst.msk [vmem:[%s8166_s17 + $0x68] sm:$0xff] %vm9133_vm15, %v4194_v38  ;;  %v4087_v28 = vadd.f32 %v8154_v33, %v4086_v62  ;;  %v4758_v24 = vpop.f32.mrb[66].mxu0  ;;  %v5474_v62 = vld [vmem:[%s6073_s18 + $0xf0] sm:$0xff]  ;;  %vm9148_vm15 = vmmov %vm9127_vm0 }
 0x4af   : > { %v4167_v36 = vadd.f32 %v5462_v20, %v4095_v32  ;;  %v4098_v3 = vadd.f32 %v4758_v24, %v8154_v33  ;;  %v4089_v18 = vpop.f32.mrb[67].mxu0 }
 0x4b0   : > { %v4165_v47 = vadd.f32 %v5463_v63, %v4087_v28  ;;  %v4090_v56 = vadd.f32 %v8154_v33, %v4089_v18 }
 0x4b1   : > { %v4199_v54 = vmax.f32 %v4167_v36, 0.0  ;;  %v4168_v4 = vadd.f32 %v5464_v12, %v4098_v3  ;;  %v5475_v36 = vld [vmem:[%s6073_s18 + $0xe0] sm:$0xff]  ;;  %v5477_v12 = vld [vmem:[%s6073_s18 + $0xe8] sm:$0xff] }
 0x4b2   : > { %v4197_v41 = vmax.f32 %v4165_v47, 0.0  ;;  %v4166_v57 = vadd.f32 %v5465_v46, %v4090_v56  ;;  %v5476_v47 = vld [vmem:[%s6073_s18 + $0xf8] sm:$0xff] }
 0x4b3   : > { %4231 = vst.msk [vmem:[%s8166_s17 + $0x90] sm:$0xff] %vm9134_vm14, %v4199_v54  ;;  %v4200_v50 = vmax.f32 %v4168_v4, 0.0 }
 0x4b4   : > { %4229 = vst.msk [vmem:[%s8166_s17 + $0x80] sm:$0xff] %vm9135_vm1, %v4197_v41  ;;  %v4198_v45 = vmax.f32 %v4166_v57, 0.0 }
 0x4b5   : > { %v4761_v9 = vpop.f32.mrb[68].mxu0  ;;  %4232 = vst.msk [vmem:[%s8166_s17 + $0x98] sm:$0xff] %vm9136_vm9, %v4200_v50 }
 0x4b6   : > { %v4111_v16 = vadd.f32 %v4761_v9, %v8154_v33  ;;  %v4102_v42 = vpop.f32.mrb[69].mxu0  ;;  %4230 = vst.msk [vmem:[%s8166_s17 + $0x88] sm:$0xff] %vm9137_vm4, %v4198_v45 }
 0x4b7   : > { %v4103_v40 = vadd.f32 %v8154_v33, %v4102_v42  ;;  %v4762_v19 = vpop.f32.mrb[70].mxu0 }
 0x4b8   : > { %v4171_v17 = vadd.f32 %v5466_v11, %v4111_v16  ;;  %v4114_v14 = vadd.f32 %v4762_v19, %v8154_v33  ;;  %v4105_v53 = vpop.f32.mrb[71].mxu0 }
 0x4b9   : > { %v4169_v59 = vadd.f32 %v5467_v34, %v4103_v40  ;;  %v4106_v23 = vadd.f32 %v8154_v33, %v4105_v53 }
 0x4ba   : > { %v4203_v37 = vmax.f32 %v4171_v17, 0.0  ;;  %v4172_v26 = vadd.f32 %v5468_v48, %v4114_v14 }
 0x4bb   : > { %v4201_v52 = vmax.f32 %v4169_v59, 0.0  ;;  %v4170_v39 = vadd.f32 %v5469_v13, %v4106_v23 }
 0x4bc   : > { %4235 = vst.msk [vmem:[%s8166_s17 + $0xb0] sm:$0xff] %vm9138_vm12, %v4203_v37  ;;  %v4204_v43 = vmax.f32 %v4172_v26, 0.0 }
 0x4bd   : > { %4233 = vst.msk [vmem:[%s8166_s17 + $0xa0] sm:$0xff] %vm9139_vm11, %v4201_v52  ;;  %v4202_v29 = vmax.f32 %v4170_v39, 0.0 }
 0x4be   : > { %4236 = vst.msk [vmem:[%s8166_s17 + $0xb8] sm:$0xff] %vm9140_vm2, %v4204_v43 }
 0x4bf   : > { %v4765_v44 = vpop.f32.mrb[72].mxu0  ;;  %4234 = vst.msk [vmem:[%s8166_s17 + $0xa8] sm:$0xff] %vm9141_vm5, %v4202_v29 }
 0x4c0   : > { %v4127_v2 = vadd.f32 %v4765_v44, %v8154_v33  ;;  %v4118_v58 = vpop.f32.mrb[73].mxu0 }
 0x4c1   : > { %v4119_v25 = vadd.f32 %v8154_v33, %v4118_v58  ;;  %v4766_v1 = vpop.f32.mrb[74].mxu0 }
 0x4c2   : > { %v4175_v35 = vadd.f32 %v5470_v6, %v4127_v2  ;;  %v4130_v31 = vadd.f32 %v4766_v1, %v8154_v33  ;;  %v4121_v22 = vpop.f32.mrb[75].mxu0 }
 0x4c3   : > { %v4173_v0 = vadd.f32 %v5471_v27, %v4119_v25  ;;  %v4122_v61 = vadd.f32 %v8154_v33, %v4121_v22 }
 0x4c4   : > { %v4207_v8 = vmax.f32 %v4175_v35, 0.0  ;;  %v4176_v51 = vadd.f32 %v5472_v30, %v4130_v31 }
 0x4c5   : > { %v4205_v21 = vmax.f32 %v4173_v0, 0.0  ;;  %v4174_v7 = vadd.f32 %v5473_v10, %v4122_v61 }
 0x4c6   : > { %4239 = vst.msk [vmem:[%s8166_s17 + $0xd0] sm:$0xff] %vm9142_vm7, %v4207_v8  ;;  %v4208_v49 = vmax.f32 %v4176_v51, 0.0 }
 0x4c7   : > { %4237 = vst.msk [vmem:[%s8166_s17 + $0xc0] sm:$0xff] %vm9127_vm0, %v4205_v21  ;;  %v4206_v60 = vmax.f32 %v4174_v7, 0.0  ;;  %v4769_v55 = vpop.f32.mrb[76].mxu0 }
 0x4c8   : > { %4240 = vst.msk [vmem:[%s8166_s17 + $0xd8] sm:$0xff] %vm9143_vm6, %v4208_v49  ;;  %v4143_v5 = vadd.f32 %v4769_v55, %v8154_v33  ;;  %v4134_v38 = vpop.f32.mrb[77].mxu0 }
 0x4c9   : > { %4238 = vst.msk [vmem:[%s8166_s17 + $0xc8] sm:$0xff] %vm9144_vm13, %v4206_v60  ;;  %v4135_v15 = vadd.f32 %v8154_v33, %v4134_v38  ;;  %v4770_v32 = vpop.f32.mrb[78].mxu0 }
 0x4ca   : > { %v4179_v28 = vadd.f32 %v5474_v62, %v4143_v5  ;;  %v4146_v24 = vadd.f32 %v4770_v32, %v8154_v33  ;;  %v4137_v20 = vpop.f32.mrb[79].mxu0 }
 0x4cb   : > { %v4177_v3 = vadd.f32 %v5475_v36, %v4135_v15  ;;  %v4138_v18 = vadd.f32 %v8154_v33, %v4137_v20 }
 0x4cc   : > { %v4211_v63 = vmax.f32 %v4179_v28, 0.0  ;;  %v4180_v56 = vadd.f32 %v5476_v47, %v4146_v24 }
 0x4cd   : > { %v4209_v54 = vmax.f32 %v4177_v3, 0.0  ;;  %v4178_v4 = vadd.f32 %v5477_v12, %v4138_v18 }
 0x4ce   : > { %4243 = vst.msk [vmem:[%s8166_s17 + $0xf0] sm:$0xff] %vm9145_vm10, %v4211_v63  ;;  %v4212_v41 = vmax.f32 %v4180_v56, 0.0 }
 0x4cf   : > { %4241 = vst.msk [vmem:[%s8166_s17 + $0xe0] sm:$0xff] %vm9146_vm8, %v4209_v54  ;;  %v4210_v33 = vmax.f32 %v4178_v4, 0.0 }
 0x4d0   : > { %4244 = vst.msk [vmem:[%s8166_s17 + $0xf8] sm:$0xff] %vm9147_vm3, %v4212_v41 }
 0x4d1   : > { %4242 = vst.msk [vmem:[%s8166_s17 + $0xe8] sm:$0xff] %vm9148_vm15, %v4210_v33 }
 0x4d2   : > { %5689 = shalt.err (!%p5686_p8)
}
 0x4d3   : > { %s5690_s18 = scalar_lea.hbm %s8287_s15, 4096  ;;  %s5694_s29 = scalar_lea.hbm %s8347_s7, 8192 }
 0x4d4   : > { %p5691_p4 = scmp.ne.s32.totalorder %s8287_s15, %s5690_s18  ;;  %p5695_p0 = scmp.lt.u32.totalorder %s8287_s15, %s8347_s7 }
 0x4d5   : > { %p5696_p5 = scmp.lt.u32.totalorder %s5694_s29, %s5690_s18  ;;  %p5698_p6 = scmp.lt.u32.totalorder %s5690_s18, %s8287_s15 }
 0x4d6   : > { %p5692_p10 = pnand %p5691_p4, %p9149_p9 }
 0x4d7   : > { %p5697_p7 = por %p5696_p5, %p5695_p0 }
 0x4d8   : > { %p5693_p11 = pneg %p5692_p10 }
 0x4d9   : > { %p5699_p12 = por %p5698_p6, %p5697_p7 }
 0x4db   : > { %p5700_p13 = pnand %p5699_p12, %p5693_p11 }
 0x4dd   : > { %5703 = shalt.err (!%p5700_p13)
}
 0x4de   : > { %s5771_s13 = smov 128  }
 0x4df   : > { %4870 = dma.vmem_to_hbm [thread:$0]  (%p9149_p9), %s8291_s19, 4096, %s8287_s15, %s4246_s30, %s5771_s13, %s5771_s13, %s5768_s8  }
 0x4e0 PF: > { %s4274_s28 = sand.u32 1, %s5742_s24   ;;  %p9150_p1 = scmp.ne.s32.totalorder %s8502_s12, 0 }
 0x4e1   : > { %p9151_p3 = scmp.ge.s32.totalorder %s5754_s27, 2  ;;  %s4275_s9 = scalar_lea.sflag [#allocation4], %s4274_s28 }
 0x4e3   : > { %p4896_p2 = pnand %p9151_p3, %p9150_p1 }
 0x4e5   : > { %5737 = dma.done.wait (!%p4896_p2), %s4275_s9, 4096  }
 0x4e6   : > { %5739 = vsyncadd (!%p4896_p2), %s4275_s9, 4294963200  ;;  %p23_p8 = scmp.ge.s32.totalorder %s5988_s11, 4   ;;  %s9152_s24 = smov %s5746_s25 }
 0x4e7   : > { %s9153_s25 = smov %s5750_s26  ;;  %s9154_s26 = smov %s5999_s10 }
 0x4e8   : > { %s9155_s27 = smov %s5988_s11  ;;  %25 = sbr.rel (!%p23_p8) target bundleno = 8 (0x8), region = 119 }
 0x4ef   :  { %4280 = vsyncpa [#allocation3], 1 }
 0x4f0   :  { %4282 = vsyncpa [#allocation3 + $0x1], 1 }
 0x4f1   :  { %4283 = vsyncpa [#allocation6], 1 }
 0x4f2   :  { %4284 = vsyncpa [#allocation9], 1 }
 0x4f3   :  { %4285 = vsyncpa [#allocation12], 1 }
 0x4f4   :  { %4286 = vsyncpa [#allocation4], 1 }
 0x4f5   :  { %4288 = vsyncpa [#allocation4 + $0x1], 1 }

</bundles_post_ra>
